<compile_context>
chip_gen: v5e
topology: v5e:2x2
jax: 0.10.0
libtpu: 0.0.40
codegen_flags: <defaults>
</compile_context>

<pallas_src>
import functools
import math

import jax
import jax.numpy as jnp
from jax import lax
from jax.experimental import pallas as pl
from jax.experimental.pallas import tpu as pltpu


# ----------------------------- packing helpers --------------------------------

def _pack_cols(named_mats):
    """Concatenate 2-D matrices (same row count) along columns -> (slab, slices)."""
    slices, cols, off = {}, [], 0
    for name, m in named_mats:
        slices[name] = slice(off, off + m.shape[1])
        cols.append(m)
        off += m.shape[1]
    return jnp.concatenate(cols, axis=1), slices


def _pack_row(named_vecs):
    """Concatenate vectors into one (1, total) f32 row -> (slab, slices)."""
    slices, parts, off = {}, [], 0
    for name, v in named_vecs:
        v = jnp.asarray(v, jnp.float32).reshape(-1)
        slices[name] = slice(off, off + v.shape[0])
        parts.append(v)
        off += v.shape[0]
    return jnp.concatenate(parts).reshape(1, -1), slices


# ----------------------------- in-kernel helpers -------------------------------

def _bf16(x):
    return x.astype(jnp.bfloat16)


def _layernorm(x, g, b, eps=1e-5):
    mu = jnp.mean(x, axis=-1, keepdims=True)
    xc = x - mu
    var = jnp.mean(xc * xc, axis=-1, keepdims=True)
    return xc * lax.rsqrt(var + eps) * g + b


def _softmax_lastdim(s):
    s = s - jnp.max(s, axis=-1, keepdims=True)
    p = jnp.exp(s)
    return p * pl.reciprocal(jnp.sum(p, axis=-1, keepdims=True), approx=True)


def _mha_fused(x, a_fn, u_fn, m_fn, b_attn, batch, seq, heads):
    """Multi-head self-attention with host-pre-composed per-head weights.

    x      : (batch*seq, D) f32, batch folded into rows.
    a_fn(h): (D, D) bf16  = Wq_h @ Wk_h^T / sqrt(dh)
    u_fn(h): (1, D) f32   = Wk_h @ bq_h / sqrt(dh)   (per-key score offset)
    m_fn(h): (D, D) bf16  = Wv_h @ Wo_h
    b_attn : (1, D) f32   = bo + sum_h bv_h @ Wo_h
    Mathematically identical to standard MHA (constant-per-query score terms
    are softmax-invariant).  All matmuls use the full 32-lane model dim.
    """
    n, d = x.shape
    xb = _bf16(x)
    x3 = x.reshape(batch, seq, d)
    x3b = _bf16(x3)
    out = None
    for h in range(heads):                                       # static unroll
        t = jnp.dot(xb, a_fn(h), preferred_element_type=jnp.float32)    # (n, d)
        c = jnp.sum(x3 * u_fn(h), axis=-1)                              # (b, s)
        s = jnp.einsum('bqd,bkd->bqk', _bf16(t.reshape(batch, seq, d)), x3b,
                       preferred_element_type=jnp.float32)
        s = s + c[:, None, :]                                    # per-key offset
        p = _softmax_lastdim(s)
        v = jnp.dot(xb, m_fn(h), preferred_element_type=jnp.float32)    # (n, d)
        o = jnp.einsum('bqk,bkd->bqd', _bf16(p),
                       _bf16(v.reshape(batch, seq, d)),
                       preferred_element_type=jnp.float32)              # (b,s,d)
        out = o if out is None else out + o
    return out.reshape(n, d) + b_attn


# ------------------------------ fused kernel -----------------------------------

def _forward_kernel(
        patches_ref, action_ref, pos_ref, query_ref,
        patch_w_ref, enc_a_ref, enc_u_ref, enc_m_ref, enc_w2_ref, enc_ff2_ref,
        act_w_ref, proj_w_ref,
        dec_a_ref, dec_u_ref, dec_m_ref, dec_w1_ref, dec_ff2_ref, dec_b_ref,
        pix_w_ref, bias_ref,
        out_ref,
        *, B, n_patch, seq, enc_heads, dec_heads, depth, latent_dim,
        ew, eb, dw, db):
    f32 = jnp.float32

    def gb(name):                       # global bias / LN slab slice -> (1, len)
        return bias_ref[:, eb[name]]

    # ------------------------------ encoder -----------------------------------
    x = jnp.dot(_bf16(patches_ref[...]), patch_w_ref[...],
                preferred_element_type=f32) + gb('patch_b')        # (B*N, De)
    x = x + pos_ref[...]
    sa = _mha_fused(x,
                    lambda h: enc_a_ref[h],
                    lambda h: enc_u_ref[h],
                    lambda h: enc_m_ref[h],
                    gb('attn_b'), B, n_patch, enc_heads)
    x = _layernorm(x + sa, gb('ln1_g'), gb('ln1_b'))
    ff = jnp.maximum(jnp.dot(_bf16(x), enc_w2_ref[:, ew['ff1_w']],
                             preferred_element_type=f32) + gb('ff1_b'), 0.0)
    ff = jnp.dot(_bf16(ff), enc_ff2_ref[...],
                 preferred_element_type=f32) + gb('ff2_b')
    x = _layernorm(x + ff, gb('ln2_g'), gb('ln2_b'))
    d_enc = x.shape[-1]
    pooled = jnp.mean(x.reshape(B, n_patch, d_enc), axis=1)        # (B, De)
    latent = jnp.dot(_bf16(pooled), enc_w2_ref[:, ew['head_w']],
                     preferred_element_type=f32) + gb('head_b')    # (B, L)

    # ------------- action embedding + decoder memory projection ---------------
    act = jnp.dot(_bf16(action_ref[...]), act_w_ref[...],
                  preferred_element_type=f32) + gb('act_b')        # (B, E)
    n_proj = proj_w_ref.shape[0]
    # concat([latent, act]) @ proj_w == latent @ proj_w[:L] + act @ proj_w[L:]
    mem = (jnp.dot(_bf16(latent), proj_w_ref[0:latent_dim, :],
                   preferred_element_type=f32)
           + jnp.dot(_bf16(act), proj_w_ref[latent_dim:n_proj, :],
                     preferred_element_type=f32)
           + gb('proj_b'))                                         # (B, Dd)

    # ------------------------- transformer decoder ----------------------------
    y = query_ref[...]                                             # (B*S, Dd)
    d_dec = y.shape[-1]
    for l in range(depth):                                         # static unroll
        def lb(name, _l=l):
            return dec_b_ref[_l, :, db[name]]                      # (1, len)

        sa = _mha_fused(y,
                        lambda h, _l=l: dec_a_ref[_l, h],
                        lambda h, _l=l: dec_u_ref[_l, h],
                        lambda h, _l=l: dec_m_ref[_l, h],
                        lb('attn_b'), B, seq, dec_heads)
        y = _layernorm(y + sa, lb('ln1_g'), lb('ln1_b'))

        # cross-attention with a single memory token: softmax over one key == 1,
        # so attn(y, mem, mem) == out_proj(v_proj(mem)) broadcast over queries.
        v = jnp.dot(_bf16(mem), dec_w1_ref[l, :, dw['ca_wv']],
                    preferred_element_type=f32) + lb('ca_bv')      # (B, Dd)
        ca = jnp.dot(_bf16(v), dec_w1_ref[l, :, dw['ca_wo']],
                     preferred_element_type=f32) + lb('ca_bo')     # (B, Dd)
        y3 = y.reshape(B, seq, d_dec) + ca[:, None, :]
        y = _layernorm(y3, lb('ln2_g'), lb('ln2_b')).reshape(B * seq, d_dec)

        ff = jnp.maximum(jnp.dot(_bf16(y), dec_w1_ref[l, :, dw['ff1_w']],
                                 preferred_element_type=f32) + lb('ff1_b'), 0.0)
        ff = jnp.dot(_bf16(ff), dec_ff2_ref[l],
                     preferred_element_type=f32) + lb('ff2_b')
        y = _layernorm(y + ff, lb('ln3_g'), lb('ln3_b'))

    # ------------------------------ pixel head ---------------------------------
    # pix_w / pix_b are zero-padded to 128 output lanes host-side so this final
    # HBM store is unmasked / lane-dense; the wrapper slices back to 48 dims.
    out_ref[...] = (jnp.dot(_bf16(y), pix_w_ref[...],
                            preferred_element_type=f32) + gb('pix_b'))


# ------------------------------ wrapper ----------------------------------------

def _full_spec(arr):
    nd = arr.ndim
    return pl.BlockSpec(arr.shape, lambda i, _nd=nd: (0,) * _nd)


def forward(packed, img, action, *, meta):
    B = img.shape[0]
    ps, C = meta['patch_size'], meta['input_channels']
    H, W = meta['image_size']
    hh, ww = H // ps, W // ps
    n_patch = hh * ww
    # b c (h p1) (w p2) -> (b h w) (p1 p2 c)   (host-side layout shuffle)
    patches = img.reshape(B, C, hh, ps, ww, ps).transpose(0, 2, 4, 3, 5, 1)
    patches = patches.reshape(B * n_patch, ps * ps * C).astype(jnp.float32)

    pos = jnp.tile(packed['pos_emb'], (B, 1))                      # (B*N, De)
    query = jnp.tile(packed['query_tokens'], (B, 1))               # (B*S, Dd)
    action2 = action.astype(jnp.float32)

    seq = meta['out_h'] * meta['out_w']
    out_pad = packed['pix_w'].shape[1]

    kernel = functools.partial(
        _forward_kernel,
        B=B, n_patch=n_patch, seq=seq,
        enc_heads=meta['enc_heads'], dec_heads=meta['decoder_heads'],
        depth=meta['decoder_depth'], latent_dim=meta['latent_dim'],
        ew=meta['enc_w_slices'], eb=meta['bias_slices'],
        dw=meta['dec_w_slices'], db=meta['dec_bias_slices'])

    operands = [patches, action2, pos, query,
                packed['patch_w'],
                packed['enc_A'], packed['enc_U'], packed['enc_M'],
                packed['enc_w2'], packed['enc_ff2'],
                packed['act_w'], packed['proj_w'],
                packed['dec_A'], packed['dec_U'], packed['dec_M'],
                packed['dec_w1'], packed['dec_ff2'], packed['dec_bias'],
                packed['pix_w'], packed['bias']]

    out = pl.pallas_call(
        kernel,
        out_shape=jax.ShapeDtypeStruct((B * seq, out_pad), jnp.float32),
        grid=(1,),
        in_specs=[_full_spec(a) for a in operands],
        out_specs=pl.BlockSpec((B * seq, out_pad), lambda i: (0, 0)),
        compiler_params=pltpu.CompilerParams(
            dimension_semantics=("arbitrary",),
            vmem_limit_bytes=32 * 1024 * 1024),
    )(*operands)

    # Rearrange 'b (h w) (p1 p2 c) -> b c (h p1) (w p2)'  (host-side layout)
    p_out, c_out = meta['decoder_patch_size'], meta['output_channels']
    oh, ow = meta['out_h'], meta['out_w']
    od = c_out * p_out * p_out
    pat = out[:, :od].reshape(B, oh, ow, p_out, p_out, c_out)
    return pat.transpose(0, 5, 1, 3, 2, 4).reshape(B, c_out, oh * p_out, ow * p_out)


# ------------------------------ host-side packing --------------------------------

def pack_params(params, cfg):
    """Pack module parameters into a few bf16/f32 slabs + static slice metadata."""
    f32, bf16 = jnp.float32, jnp.bfloat16
    De, Dd = cfg['enc_dim'], cfg['decoder_dim']
    He, Hd = cfg['enc_heads'], cfg['decoder_heads']
    L = cfg['latent_dim']
    out_patch_dim = cfg['output_channels'] * cfg['decoder_patch_size'] ** 2
    PIX_PAD = 128      # lane-dense pixel-head output width

    def compose_attention(qkv_w, qkv_b, o_w, o_b, d, heads):
        """Fold per-head q/k/v/out projections into full-width composed weights."""
        dh = d // heads
        scale = 1.0 / math.sqrt(dh)
        wq, wk, wv = qkv_w[:, 0:d], qkv_w[:, d:2 * d], qkv_w[:, 2 * d:3 * d]
        bq, bv = qkv_b[0, 0:d], qkv_b[0, 2 * d:3 * d]
        # bk only contributes a constant-per-query score term -> softmax-invariant.
        A, U, M = [], [], []
        b_fold = o_b[0]
        for h in range(heads):
            sl = slice(h * dh, (h + 1) * dh)
            A.append(wq[:, sl] @ wk[:, sl].T * scale)      # score bilinear form
            U.append(wk[:, sl] @ bq[sl] * scale)           # per-key score offset
            M.append(wv[:, sl] @ o_w[sl, :])               # value*out projection
            b_fold = b_fold + bv[sl] @ o_w[sl, :]
        return (jnp.stack(A).astype(bf16),                 # (H, D, D)
                jnp.stack(U)[:, None, :].astype(f32),      # (H, 1, D)
                jnp.stack(M).astype(bf16),                 # (H, D, D)
                b_fold)                                    # (D,)

    enc = params['enc_layer']
    eA, eU, eM, e_attn_b = compose_attention(enc['qkv_w'], enc['qkv_b'],
                                             enc['o_w'], enc['o_b'], De, He)
    enc_w2, enc_w_slices = _pack_cols([('ff1_w', enc['ff1_w']),
                                       ('head_w', params['head_w'])])

    pix_b_pad = jnp.zeros((PIX_PAD,), f32).at[:out_patch_dim].set(
        params['pix_b'][0])
    bias, bias_slices = _pack_row([
        ('patch_b', params['patch_b']), ('attn_b', e_attn_b),
        ('ln1_g', enc['ln1_g']), ('ln1_b', enc['ln1_b']),
        ('ff1_b', enc['ff1_b']), ('ff2_b', enc['ff2_b']),
        ('ln2_g', enc['ln2_g']), ('ln2_b', enc['ln2_b']),
        ('head_b', params['head_b']),
        ('act_b', params['act_b']), ('proj_b', params['proj_b']),
        ('pix_b', pix_b_pad)])

    dA, dU, dM, dW1, dFF2, dBias = [], [], [], [], [], []
    dec_w_slices = dec_bias_slices = None
    for lp in params['dec_layers']:
        A, U, M, attn_b = compose_attention(lp['sa_qkv_w'], lp['sa_qkv_b'],
                                            lp['sa_o_w'], lp['sa_o_b'], Dd, Hd)
        # ca_wq/ca_wk are mathematically inert for a length-1 memory sequence.
        w1, dec_w_slices = _pack_cols([('ca_wv', lp['ca_wv']),
                                       ('ca_wo', lp['ca_wo']),
                                       ('ff1_w', lp['ff1_w'])])
        b, dec_bias_slices = _pack_row([
            ('attn_b', attn_b),
            ('ln1_g', lp['ln1_g']), ('ln1_b', lp['ln1_b']),
            ('ca_bv', lp['ca_bv']), ('ca_bo', lp['ca_bo']),
            ('ln2_g', lp['ln2_g']), ('ln2_b', lp['ln2_b']),
            ('ff1_b', lp['ff1_b']), ('ff2_b', lp['ff2_b']),
            ('ln3_g', lp['ln3_g']), ('ln3_b', lp['ln3_b'])])
        dA.append(A); dU.append(U); dM.append(M)
        dW1.append(w1); dFF2.append(lp['ff2_w']); dBias.append(b)

    pix_w_pad = jnp.zeros((Dd, PIX_PAD), f32).at[:, :out_patch_dim].set(
        params['pix_w'])

    packed = {
        'pos_emb': params['pos_emb'].astype(f32),
        'query_tokens': params['query_tokens'][0].astype(f32),
        'patch_w': params['patch_w'].astype(bf16),
        'enc_A': eA, 'enc_U': eU, 'enc_M': eM,
        'enc_w2': enc_w2.astype(bf16),
        'enc_ff2': enc['ff2_w'].astype(bf16),
        'act_w': params['act_w'].astype(bf16),
        'proj_w': params['proj_w'].astype(bf16),
        'dec_A': jnp.stack(dA), 'dec_U': jnp.stack(dU), 'dec_M': jnp.stack(dM),
        'dec_w1': jnp.stack(dW1).astype(bf16),
        'dec_ff2': jnp.stack(dFF2).astype(bf16),
        'dec_bias': jnp.stack(dBias).astype(f32),
        'pix_w': pix_w_pad.astype(bf16),
        'bias': bias,
    }
    meta = dict(cfg)
    meta.update(enc_w_slices=enc_w_slices, bias_slices=bias_slices,
                dec_w_slices=dec_w_slices, dec_bias_slices=dec_bias_slices)
    return packed, meta


# ------------------------------ parameter init -----------------------------------

def init_params(key, cfg):
    ks = iter(jax.random.split(key, 128))
    nk = lambda: next(ks)
    w = lambda fi, fo: jax.random.normal(nk(), (fi, fo), jnp.float32) * 0.02
    b = lambda n: jax.random.normal(nk(), (1, n), jnp.float32) * 0.02
    ones = lambda n: jnp.ones((1, n), jnp.float32)
    zeros = lambda n: jnp.zeros((1, n), jnp.float32)

    De, Dd = cfg['enc_dim'], cfg['decoder_dim']
    patch_dim = cfg['patch_size'] ** 2 * cfg['input_channels']
    n_patches = ((cfg['image_size'][0] // cfg['patch_size'])
                 * (cfg['image_size'][1] // cfg['patch_size']))
    n_out_patches = cfg['out_h'] * cfg['out_w']
    out_patch_dim = cfg['output_channels'] * cfg['decoder_patch_size'] ** 2

    def enc_layer():
        return {'qkv_w': w(De, 3 * De), 'qkv_b': b(3 * De),
                'o_w': w(De, De), 'o_b': b(De),
                'ln1_g': ones(De), 'ln1_b': zeros(De),
                'ff1_w': w(De, cfg['enc_mlp_dim']), 'ff1_b': b(cfg['enc_mlp_dim']),
                'ff2_w': w(cfg['enc_mlp_dim'], De), 'ff2_b': b(De),
                'ln2_g': ones(De), 'ln2_b': zeros(De)}

    def dec_layer():
        m = cfg['decoder_mlp_dim']
        return {'sa_qkv_w': w(Dd, 3 * Dd), 'sa_qkv_b': b(3 * Dd),
                'sa_o_w': w(Dd, Dd), 'sa_o_b': b(Dd),
                'ln1_g': ones(Dd), 'ln1_b': zeros(Dd),
                # q/k cross-attn weights kept for fidelity; inert for memory len 1.
                'ca_wq': w(Dd, Dd), 'ca_bq': b(Dd),
                'ca_wk': w(Dd, Dd), 'ca_bk': b(Dd),
                'ca_wv': w(Dd, Dd), 'ca_bv': b(Dd),
                'ca_wo': w(Dd, Dd), 'ca_bo': b(Dd),
                'ln2_g': ones(Dd), 'ln2_b': zeros(Dd),
                'ff1_w': w(Dd, m), 'ff1_b': b(m),
                'ff2_w': w(m, Dd), 'ff2_b': b(Dd),
                'ln3_g': ones(Dd), 'ln3_b': zeros(Dd)}

    return {
        'patch_w': w(patch_dim, De), 'patch_b': b(De),
        'pos_emb': jax.random.normal(nk(), (n_patches, De), jnp.float32) * 0.02,
        'enc_layer': enc_layer(),
        'head_w': w(De, cfg['latent_dim']), 'head_b': b(cfg['latent_dim']),
        'act_w': w(cfg['action_dim'], cfg['action_emb_dim']),
        'act_b': b(cfg['action_emb_dim']),
        'proj_w': w(cfg['latent_dim'] + cfg['action_emb_dim'], Dd),
        'proj_b': b(Dd),
        'query_tokens': jax.random.normal(nk(), (1, n_out_patches, Dd),
                                          jnp.float32) * 0.02,
        'dec_layers': [dec_layer() for _ in range(cfg['decoder_depth'])],
        'pix_w': w(Dd, out_patch_dim), 'pix_b': b(out_patch_dim),
    }


# ----------------------------------- main -----------------------------------------

if __name__ == "__main__":
    cfg = dict(
        image_size=(16, 16), patch_size=4, input_channels=3,
        action_dim=4, action_emb_dim=8, latent_dim=32,
        decoder_dim=32, decoder_depth=2, decoder_heads=4, decoder_mlp_dim=64,
        output_channels=3, output_image_size=(16, 16), decoder_patch_size=4,
        enc_dim=32, enc_heads=4, enc_mlp_dim=64,
    )
    cfg['out_h'] = cfg['output_image_size'][0] // cfg['decoder_patch_size']
    cfg['out_w'] = cfg['output_image_size'][1] // cfg['decoder_patch_size']

    key = jax.random.PRNGKey(0)
    pkey, ikey, akey = jax.random.split(key, 3)
    params = init_params(pkey, cfg)
    packed, meta = pack_params(params, cfg)      # one-time host-side packing

    B = 2
    current_state_img = jax.random.normal(
        ikey, (B, cfg['input_channels'], *cfg['image_size']), jnp.float32)
    action = jax.random.normal(akey, (B, cfg['action_dim']), jnp.float32)  # continuous

    fwd = jax.jit(functools.partial(forward, meta=meta))
    out = jax.block_until_ready(fwd(packed, current_state_img, action))

    assert out.shape == (B, cfg['output_channels'], *cfg['output_image_size']), out.shape
    assert bool(jnp.all(jnp.isfinite(out)))
    print("KERNEL_OK")
</pallas_src>

<mosaic_0001>
module attributes {stable_mosaic.version = 11 : i64} {
  func.func @_forward_kernel(%arg0: i32, %arg1: memref<32x48xf32, #tpu.memory_space<vmem>>, %arg2: memref<2x4xf32, #tpu.memory_space<vmem>>, %arg3: memref<32x32xf32, #tpu.memory_space<vmem>>, %arg4: memref<32x32xf32, #tpu.memory_space<vmem>>, %arg5: memref<48x32xbf16, #tpu.memory_space<vmem>>, %arg6: memref<4x32x32xbf16, #tpu.memory_space<vmem>>, %arg7: memref<4x1x32xf32, #tpu.memory_space<vmem>>, %arg8: memref<4x32x32xbf16, #tpu.memory_space<vmem>>, %arg9: memref<32x96xbf16, #tpu.memory_space<vmem>>, %arg10: memref<64x32xbf16, #tpu.memory_space<vmem>>, %arg11: memref<4x8xbf16, #tpu.memory_space<vmem>>, %arg12: memref<40x32xbf16, #tpu.memory_space<vmem>>, %arg13: memref<2x4x32x32xbf16, #tpu.memory_space<vmem>>, %arg14: memref<2x4x1x32xf32, #tpu.memory_space<vmem>>, %arg15: memref<2x4x32x32xbf16, #tpu.memory_space<vmem>>, %arg16: memref<2x32x128xbf16, #tpu.memory_space<vmem>>, %arg17: memref<2x64x32xbf16, #tpu.memory_space<vmem>>, %arg18: memref<2x1x384xf32, #tpu.memory_space<vmem>>, %arg19: memref<32x128xbf16, #tpu.memory_space<vmem>>, %arg20: memref<1x488xf32, #tpu.memory_space<vmem>>, %arg21: memref<32x128xf32, #tpu.memory_space<vmem>>) attributes {dimension_semantics = [#tpu.dimension_semantics<arbitrary>], iteration_bounds = array<i64: 1>, scalar_prefetch = 0 : i64, scratch_operands = 0 : i64, tpu.core_type = #tpu.core_type<tc>, window_params = [{pipeline_mode = #tpu.pipeline_mode<synchronous>, transform_indices = @transform_0, window_bounds = array<i64: 32, 48>}, {pipeline_mode = #tpu.pipeline_mode<synchronous>, transform_indices = @transform_1, window_bounds = array<i64: 2, 4>}, {pipeline_mode = #tpu.pipeline_mode<synchronous>, transform_indices = @transform_2, window_bounds = array<i64: 32, 32>}, {pipeline_mode = #tpu.pipeline_mode<synchronous>, transform_indices = @transform_3, window_bounds = array<i64: 32, 32>}, {pipeline_mode = #tpu.pipeline_mode<synchronous>, transform_indices = @transform_4, window_bounds = array<i64: 48, 32>}, {pipeline_mode = #tpu.pipeline_mode<synchronous>, transform_indices = @transform_5, window_bounds = array<i64: 4, 32, 32>}, {pipeline_mode = #tpu.pipeline_mode<synchronous>, transform_indices = @transform_6, window_bounds = array<i64: 4, 1, 32>}, {pipeline_mode = #tpu.pipeline_mode<synchronous>, transform_indices = @transform_7, window_bounds = array<i64: 4, 32, 32>}, {pipeline_mode = #tpu.pipeline_mode<synchronous>, transform_indices = @transform_8, window_bounds = array<i64: 32, 96>}, {pipeline_mode = #tpu.pipeline_mode<synchronous>, transform_indices = @transform_9, window_bounds = array<i64: 64, 32>}, {pipeline_mode = #tpu.pipeline_mode<synchronous>, transform_indices = @transform_10, window_bounds = array<i64: 4, 8>}, {pipeline_mode = #tpu.pipeline_mode<synchronous>, transform_indices = @transform_11, window_bounds = array<i64: 40, 32>}, {pipeline_mode = #tpu.pipeline_mode<synchronous>, transform_indices = @transform_12, window_bounds = array<i64: 2, 4, 32, 32>}, {pipeline_mode = #tpu.pipeline_mode<synchronous>, transform_indices = @transform_13, window_bounds = array<i64: 2, 4, 1, 32>}, {pipeline_mode = #tpu.pipeline_mode<synchronous>, transform_indices = @transform_14, window_bounds = array<i64: 2, 4, 32, 32>}, {pipeline_mode = #tpu.pipeline_mode<synchronous>, transform_indices = @transform_15, window_bounds = array<i64: 2, 32, 128>}, {pipeline_mode = #tpu.pipeline_mode<synchronous>, transform_indices = @transform_16, window_bounds = array<i64: 2, 64, 32>}, {pipeline_mode = #tpu.pipeline_mode<synchronous>, transform_indices = @transform_17, window_bounds = array<i64: 2, 1, 384>}, {pipeline_mode = #tpu.pipeline_mode<synchronous>, transform_indices = @transform_18, window_bounds = array<i64: 32, 128>}, {pipeline_mode = #tpu.pipeline_mode<synchronous>, transform_indices = @transform_19, window_bounds = array<i64: 1, 488>}, {pipeline_mode = #tpu.pipeline_mode<synchronous>, transform_indices = @transform_20, window_bounds = array<i64: 32, 128>}]} {
    %c0 = arith.constant 0 : index
    %c0_0 = arith.constant 0 : index
    %0 = vector.load %arg1[%c0, %c0_0] : memref<32x48xf32, #tpu.memory_space<vmem>>, vector<32x48xf32>
    %1 = arith.truncf %0 : vector<32x48xf32> to vector<32x48xbf16>
    %c0_1 = arith.constant 0 : index
    %c0_2 = arith.constant 0 : index
    %2 = vector.load %arg5[%c0_1, %c0_2] : memref<48x32xbf16, #tpu.memory_space<vmem>>, vector<48x32xbf16>
    %cst = arith.constant dense<0.000000e+00> : vector<32x32xf32>
    %3 = tpu.matmul %1, %2, %cst {dimension_numbers = #tpu.dot_dimension_numbers<[1], [0], [0], [1], [0, 0, 1, 1], [], []>} : vector<32x48xbf16>, vector<48x32xbf16>, vector<32x32xf32> -> vector<32x32xf32>
    %c0_3 = arith.constant 0 : index
    %c0_4 = arith.constant 0 : index
    %4 = vector.load %arg20[%c0_3, %c0_4] : memref<1x488xf32, #tpu.memory_space<vmem>>, vector<1x32xf32>
    %5 = vector.broadcast %4 : vector<1x32xf32> to vector<32x32xf32>
    %6 = arith.addf %3, %5 : vector<32x32xf32>
    %c0_5 = arith.constant 0 : index
    %c0_6 = arith.constant 0 : index
    %7 = vector.load %arg3[%c0_5, %c0_6] : memref<32x32xf32, #tpu.memory_space<vmem>>, vector<32x32xf32>
    %8 = arith.addf %6, %7 : vector<32x32xf32>
    %c0_7 = arith.constant 0 : index
    %c32 = arith.constant 32 : index
    %9 = vector.load %arg20[%c0_7, %c32] : memref<1x488xf32, #tpu.memory_space<vmem>>, vector<1x32xf32>
    %10 = arith.truncf %8 : vector<32x32xf32> to vector<32x32xbf16>
    %11 = vector.shape_cast %8 : vector<32x32xf32> to vector<2x16x32xf32>
    %12 = arith.truncf %11 : vector<2x16x32xf32> to vector<2x16x32xbf16>
    %c0_8 = arith.constant 0 : index
    %c0_9 = arith.constant 0 : index
    %c0_10 = arith.constant 0 : index
    %13 = vector.load %arg6[%c0_8, %c0_9, %c0_10] : memref<4x32x32xbf16, #tpu.memory_space<vmem>>, vector<1x32x32xbf16>
    %14 = vector.shape_cast %13 : vector<1x32x32xbf16> to vector<32x32xbf16>
    %cst_11 = arith.constant dense<0.000000e+00> : vector<32x32xf32>
    %15 = tpu.matmul %10, %14, %cst_11 {dimension_numbers = #tpu.dot_dimension_numbers<[1], [0], [0], [1], [0, 0, 1, 1], [], []>} : vector<32x32xbf16>, vector<32x32xbf16>, vector<32x32xf32> -> vector<32x32xf32>
    %c0_12 = arith.constant 0 : index
    %c0_13 = arith.constant 0 : index
    %c0_14 = arith.constant 0 : index
    %16 = vector.load %arg7[%c0_12, %c0_13, %c0_14] : memref<4x1x32xf32, #tpu.memory_space<vmem>>, vector<1x1x32xf32>
    %17 = vector.shape_cast %16 : vector<1x1x32xf32> to vector<1x32xf32>
    %18 = vector.shape_cast %17 : vector<1x32xf32> to vector<1x1x32xf32>
    %19 = vector.broadcast %18 : vector<1x1x32xf32> to vector<2x16x32xf32>
    %20 = arith.mulf %11, %19 : vector<2x16x32xf32>
    %cst_15 = arith.constant dense<0.000000e+00> : vector<2x16xf32>
    %21 = vector.multi_reduction <add>, %20, %cst_15 [2] : vector<2x16x32xf32> to vector<2x16xf32>
    %22 = vector.shape_cast %15 : vector<32x32xf32> to vector<2x16x32xf32>
    %23 = arith.truncf %22 : vector<2x16x32xf32> to vector<2x16x32xbf16>
    "tpu.trace_start"() <{level = 10 : i32, message = "bqd,bkd->bqk"}> : () -> ()
    %cst_16 = arith.constant dense<0.000000e+00> : vector<2x16x16xf32>
    %24 = tpu.matmul %23, %12, %cst_16 {dimension_numbers = #tpu.dot_dimension_numbers<[2], [2], [1], [1], [0, 0, 0, 1, 1, 1], [0], [0]>} : vector<2x16x32xbf16>, vector<2x16x32xbf16>, vector<2x16x16xf32> -> vector<2x16x16xf32>
    "tpu.trace_stop"() : () -> ()
    %25 = vector.shape_cast %21 : vector<2x16xf32> to vector<2x1x16xf32>
    %26 = vector.broadcast %25 : vector<2x1x16xf32> to vector<2x16x16xf32>
    %27 = arith.addf %24, %26 : vector<2x16x16xf32>
    %cst_17 = arith.constant dense<0xFF800000> : vector<2x16xf32>
    %28 = vector.multi_reduction <maximumf>, %27, %cst_17 [2] : vector<2x16x16xf32> to vector<2x16xf32>
    %29 = vector.shape_cast %28 : vector<2x16xf32> to vector<2x16x1xf32>
    %30 = vector.broadcast %29 : vector<2x16x1xf32> to vector<2x16x16xf32>
    %31 = arith.subf %27, %30 : vector<2x16x16xf32>
    %32 = math.exp %31 : vector<2x16x16xf32>
    %cst_18 = arith.constant dense<0.000000e+00> : vector<2x16xf32>
    %33 = vector.multi_reduction <add>, %32, %cst_18 [2] : vector<2x16x16xf32> to vector<2x16xf32>
    %34 = vector.shape_cast %33 : vector<2x16xf32> to vector<2x16x1xf32>
    %35 = tpu.reciprocal %34 {approx = true} : vector<2x16x1xf32> -> vector<2x16x1xf32>
    %36 = vector.broadcast %35 : vector<2x16x1xf32> to vector<2x16x16xf32>
    %37 = arith.mulf %32, %36 : vector<2x16x16xf32>
    %c0_19 = arith.constant 0 : index
    %c0_20 = arith.constant 0 : index
    %c0_21 = arith.constant 0 : index
    %38 = vector.load %arg8[%c0_19, %c0_20, %c0_21] : memref<4x32x32xbf16, #tpu.memory_space<vmem>>, vector<1x32x32xbf16>
    %39 = vector.shape_cast %38 : vector<1x32x32xbf16> to vector<32x32xbf16>
    %cst_22 = arith.constant dense<0.000000e+00> : vector<32x32xf32>
    %40 = tpu.matmul %10, %39, %cst_22 {dimension_numbers = #tpu.dot_dimension_numbers<[1], [0], [0], [1], [0, 0, 1, 1], [], []>} : vector<32x32xbf16>, vector<32x32xbf16>, vector<32x32xf32> -> vector<32x32xf32>
    %41 = arith.truncf %37 : vector<2x16x16xf32> to vector<2x16x16xbf16>
    %42 = vector.shape_cast %40 : vector<32x32xf32> to vector<2x16x32xf32>
    %43 = arith.truncf %42 : vector<2x16x32xf32> to vector<2x16x32xbf16>
    "tpu.trace_start"() <{level = 10 : i32, message = "bqk,bkd->bqd"}> : () -> ()
    %cst_23 = arith.constant dense<0.000000e+00> : vector<2x16x32xf32>
    %44 = tpu.matmul %41, %43, %cst_23 {dimension_numbers = #tpu.dot_dimension_numbers<[2], [1], [1], [2], [0, 0, 0, 1, 1, 2], [0], [0]>} : vector<2x16x16xbf16>, vector<2x16x32xbf16>, vector<2x16x32xf32> -> vector<2x16x32xf32>
    "tpu.trace_stop"() : () -> ()
    %c1 = arith.constant 1 : index
    %c0_24 = arith.constant 0 : index
    %c0_25 = arith.constant 0 : index
    %45 = vector.load %arg6[%c1, %c0_24, %c0_25] : memref<4x32x32xbf16, #tpu.memory_space<vmem>>, vector<1x32x32xbf16>
    %46 = vector.shape_cast %45 : vector<1x32x32xbf16> to vector<32x32xbf16>
    %cst_26 = arith.constant dense<0.000000e+00> : vector<32x32xf32>
    %47 = tpu.matmul %10, %46, %cst_26 {dimension_numbers = #tpu.dot_dimension_numbers<[1], [0], [0], [1], [0, 0, 1, 1], [], []>} : vector<32x32xbf16>, vector<32x32xbf16>, vector<32x32xf32> -> vector<32x32xf32>
    %c1_27 = arith.constant 1 : index
    %c0_28 = arith.constant 0 : index
    %c0_29 = arith.constant 0 : index
    %48 = vector.load %arg7[%c1_27, %c0_28, %c0_29] : memref<4x1x32xf32, #tpu.memory_space<vmem>>, vector<1x1x32xf32>
    %49 = vector.shape_cast %48 : vector<1x1x32xf32> to vector<1x32xf32>
    %50 = vector.shape_cast %49 : vector<1x32xf32> to vector<1x1x32xf32>
    %51 = vector.broadcast %50 : vector<1x1x32xf32> to vector<2x16x32xf32>
    %52 = arith.mulf %11, %51 : vector<2x16x32xf32>
    %cst_30 = arith.constant dense<0.000000e+00> : vector<2x16xf32>
    %53 = vector.multi_reduction <add>, %52, %cst_30 [2] : vector<2x16x32xf32> to vector<2x16xf32>
    %54 = vector.shape_cast %47 : vector<32x32xf32> to vector<2x16x32xf32>
    %55 = arith.truncf %54 : vector<2x16x32xf32> to vector<2x16x32xbf16>
    "tpu.trace_start"() <{level = 10 : i32, message = "bqd,bkd->bqk"}> : () -> ()
    %cst_31 = arith.constant dense<0.000000e+00> : vector<2x16x16xf32>
    %56 = tpu.matmul %55, %12, %cst_31 {dimension_numbers = #tpu.dot_dimension_numbers<[2], [2], [1], [1], [0, 0, 0, 1, 1, 1], [0], [0]>} : vector<2x16x32xbf16>, vector<2x16x32xbf16>, vector<2x16x16xf32> -> vector<2x16x16xf32>
    "tpu.trace_stop"() : () -> ()
    %57 = vector.shape_cast %53 : vector<2x16xf32> to vector<2x1x16xf32>
    %58 = vector.broadcast %57 : vector<2x1x16xf32> to vector<2x16x16xf32>
    %59 = arith.addf %56, %58 : vector<2x16x16xf32>
    %cst_32 = arith.constant dense<0xFF800000> : vector<2x16xf32>
    %60 = vector.multi_reduction <maximumf>, %59, %cst_32 [2] : vector<2x16x16xf32> to vector<2x16xf32>
    %61 = vector.shape_cast %60 : vector<2x16xf32> to vector<2x16x1xf32>
    %62 = vector.broadcast %61 : vector<2x16x1xf32> to vector<2x16x16xf32>
    %63 = arith.subf %59, %62 : vector<2x16x16xf32>
    %64 = math.exp %63 : vector<2x16x16xf32>
    %cst_33 = arith.constant dense<0.000000e+00> : vector<2x16xf32>
    %65 = vector.multi_reduction <add>, %64, %cst_33 [2] : vector<2x16x16xf32> to vector<2x16xf32>
    %66 = vector.shape_cast %65 : vector<2x16xf32> to vector<2x16x1xf32>
    %67 = tpu.reciprocal %66 {approx = true} : vector<2x16x1xf32> -> vector<2x16x1xf32>
    %68 = vector.broadcast %67 : vector<2x16x1xf32> to vector<2x16x16xf32>
    %69 = arith.mulf %64, %68 : vector<2x16x16xf32>
    %c1_34 = arith.constant 1 : index
    %c0_35 = arith.constant 0 : index
    %c0_36 = arith.constant 0 : index
    %70 = vector.load %arg8[%c1_34, %c0_35, %c0_36] : memref<4x32x32xbf16, #tpu.memory_space<vmem>>, vector<1x32x32xbf16>
    %71 = vector.shape_cast %70 : vector<1x32x32xbf16> to vector<32x32xbf16>
    %cst_37 = arith.constant dense<0.000000e+00> : vector<32x32xf32>
    %72 = tpu.matmul %10, %71, %cst_37 {dimension_numbers = #tpu.dot_dimension_numbers<[1], [0], [0], [1], [0, 0, 1, 1], [], []>} : vector<32x32xbf16>, vector<32x32xbf16>, vector<32x32xf32> -> vector<32x32xf32>
    %73 = arith.truncf %69 : vector<2x16x16xf32> to vector<2x16x16xbf16>
    %74 = vector.shape_cast %72 : vector<32x32xf32> to vector<2x16x32xf32>
    %75 = arith.truncf %74 : vector<2x16x32xf32> to vector<2x16x32xbf16>
    "tpu.trace_start"() <{level = 10 : i32, message = "bqk,bkd->bqd"}> : () -> ()
    %cst_38 = arith.constant dense<0.000000e+00> : vector<2x16x32xf32>
    %76 = tpu.matmul %73, %75, %cst_38 {dimension_numbers = #tpu.dot_dimension_numbers<[2], [1], [1], [2], [0, 0, 0, 1, 1, 2], [0], [0]>} : vector<2x16x16xbf16>, vector<2x16x32xbf16>, vector<2x16x32xf32> -> vector<2x16x32xf32>
    "tpu.trace_stop"() : () -> ()
    %77 = arith.addf %44, %76 : vector<2x16x32xf32>
    %c2 = arith.constant 2 : index
    %c0_39 = arith.constant 0 : index
    %c0_40 = arith.constant 0 : index
    %78 = vector.load %arg6[%c2, %c0_39, %c0_40] : memref<4x32x32xbf16, #tpu.memory_space<vmem>>, vector<1x32x32xbf16>
    %79 = vector.shape_cast %78 : vector<1x32x32xbf16> to vector<32x32xbf16>
    %cst_41 = arith.constant dense<0.000000e+00> : vector<32x32xf32>
    %80 = tpu.matmul %10, %79, %cst_41 {dimension_numbers = #tpu.dot_dimension_numbers<[1], [0], [0], [1], [0, 0, 1, 1], [], []>} : vector<32x32xbf16>, vector<32x32xbf16>, vector<32x32xf32> -> vector<32x32xf32>
    %c2_42 = arith.constant 2 : index
    %c0_43 = arith.constant 0 : index
    %c0_44 = arith.constant 0 : index
    %81 = vector.load %arg7[%c2_42, %c0_43, %c0_44] : memref<4x1x32xf32, #tpu.memory_space<vmem>>, vector<1x1x32xf32>
    %82 = vector.shape_cast %81 : vector<1x1x32xf32> to vector<1x32xf32>
    %83 = vector.shape_cast %82 : vector<1x32xf32> to vector<1x1x32xf32>
    %84 = vector.broadcast %83 : vector<1x1x32xf32> to vector<2x16x32xf32>
    %85 = arith.mulf %11, %84 : vector<2x16x32xf32>
    %cst_45 = arith.constant dense<0.000000e+00> : vector<2x16xf32>
    %86 = vector.multi_reduction <add>, %85, %cst_45 [2] : vector<2x16x32xf32> to vector<2x16xf32>
    %87 = vector.shape_cast %80 : vector<32x32xf32> to vector<2x16x32xf32>
    %88 = arith.truncf %87 : vector<2x16x32xf32> to vector<2x16x32xbf16>
    "tpu.trace_start"() <{level = 10 : i32, message = "bqd,bkd->bqk"}> : () -> ()
    %cst_46 = arith.constant dense<0.000000e+00> : vector<2x16x16xf32>
    %89 = tpu.matmul %88, %12, %cst_46 {dimension_numbers = #tpu.dot_dimension_numbers<[2], [2], [1], [1], [0, 0, 0, 1, 1, 1], [0], [0]>} : vector<2x16x32xbf16>, vector<2x16x32xbf16>, vector<2x16x16xf32> -> vector<2x16x16xf32>
    "tpu.trace_stop"() : () -> ()
    %90 = vector.shape_cast %86 : vector<2x16xf32> to vector<2x1x16xf32>
    %91 = vector.broadcast %90 : vector<2x1x16xf32> to vector<2x16x16xf32>
    %92 = arith.addf %89, %91 : vector<2x16x16xf32>
    %cst_47 = arith.constant dense<0xFF800000> : vector<2x16xf32>
    %93 = vector.multi_reduction <maximumf>, %92, %cst_47 [2] : vector<2x16x16xf32> to vector<2x16xf32>
    %94 = vector.shape_cast %93 : vector<2x16xf32> to vector<2x16x1xf32>
    %95 = vector.broadcast %94 : vector<2x16x1xf32> to vector<2x16x16xf32>
    %96 = arith.subf %92, %95 : vector<2x16x16xf32>
    %97 = math.exp %96 : vector<2x16x16xf32>
    %cst_48 = arith.constant dense<0.000000e+00> : vector<2x16xf32>
    %98 = vector.multi_reduction <add>, %97, %cst_48 [2] : vector<2x16x16xf32> to vector<2x16xf32>
    %99 = vector.shape_cast %98 : vector<2x16xf32> to vector<2x16x1xf32>
    %100 = tpu.reciprocal %99 {approx = true} : vector<2x16x1xf32> -> vector<2x16x1xf32>
    %101 = vector.broadcast %100 : vector<2x16x1xf32> to vector<2x16x16xf32>
    %102 = arith.mulf %97, %101 : vector<2x16x16xf32>
    %c2_49 = arith.constant 2 : index
    %c0_50 = arith.constant 0 : index
    %c0_51 = arith.constant 0 : index
    %103 = vector.load %arg8[%c2_49, %c0_50, %c0_51] : memref<4x32x32xbf16, #tpu.memory_space<vmem>>, vector<1x32x32xbf16>
    %104 = vector.shape_cast %103 : vector<1x32x32xbf16> to vector<32x32xbf16>
    %cst_52 = arith.constant dense<0.000000e+00> : vector<32x32xf32>
    %105 = tpu.matmul %10, %104, %cst_52 {dimension_numbers = #tpu.dot_dimension_numbers<[1], [0], [0], [1], [0, 0, 1, 1], [], []>} : vector<32x32xbf16>, vector<32x32xbf16>, vector<32x32xf32> -> vector<32x32xf32>
    %106 = arith.truncf %102 : vector<2x16x16xf32> to vector<2x16x16xbf16>
    %107 = vector.shape_cast %105 : vector<32x32xf32> to vector<2x16x32xf32>
    %108 = arith.truncf %107 : vector<2x16x32xf32> to vector<2x16x32xbf16>
    "tpu.trace_start"() <{level = 10 : i32, message = "bqk,bkd->bqd"}> : () -> ()
    %cst_53 = arith.constant dense<0.000000e+00> : vector<2x16x32xf32>
    %109 = tpu.matmul %106, %108, %cst_53 {dimension_numbers = #tpu.dot_dimension_numbers<[2], [1], [1], [2], [0, 0, 0, 1, 1, 2], [0], [0]>} : vector<2x16x16xbf16>, vector<2x16x32xbf16>, vector<2x16x32xf32> -> vector<2x16x32xf32>
    "tpu.trace_stop"() : () -> ()
    %110 = arith.addf %77, %109 : vector<2x16x32xf32>
    %c3 = arith.constant 3 : index
    %c0_54 = arith.constant 0 : index
    %c0_55 = arith.constant 0 : index
    %111 = vector.load %arg6[%c3, %c0_54, %c0_55] : memref<4x32x32xbf16, #tpu.memory_space<vmem>>, vector<1x32x32xbf16>
    %112 = vector.shape_cast %111 : vector<1x32x32xbf16> to vector<32x32xbf16>
    %cst_56 = arith.constant dense<0.000000e+00> : vector<32x32xf32>
    %113 = tpu.matmul %10, %112, %cst_56 {dimension_numbers = #tpu.dot_dimension_numbers<[1], [0], [0], [1], [0, 0, 1, 1], [], []>} : vector<32x32xbf16>, vector<32x32xbf16>, vector<32x32xf32> -> vector<32x32xf32>
    %c3_57 = arith.constant 3 : index
    %c0_58 = arith.constant 0 : index
    %c0_59 = arith.constant 0 : index
    %114 = vector.load %arg7[%c3_57, %c0_58, %c0_59] : memref<4x1x32xf32, #tpu.memory_space<vmem>>, vector<1x1x32xf32>
    %115 = vector.shape_cast %114 : vector<1x1x32xf32> to vector<1x32xf32>
    %116 = vector.shape_cast %115 : vector<1x32xf32> to vector<1x1x32xf32>
    %117 = vector.broadcast %116 : vector<1x1x32xf32> to vector<2x16x32xf32>
    %118 = arith.mulf %11, %117 : vector<2x16x32xf32>
    %cst_60 = arith.constant dense<0.000000e+00> : vector<2x16xf32>
    %119 = vector.multi_reduction <add>, %118, %cst_60 [2] : vector<2x16x32xf32> to vector<2x16xf32>
    %120 = vector.shape_cast %113 : vector<32x32xf32> to vector<2x16x32xf32>
    %121 = arith.truncf %120 : vector<2x16x32xf32> to vector<2x16x32xbf16>
    "tpu.trace_start"() <{level = 10 : i32, message = "bqd,bkd->bqk"}> : () -> ()
    %cst_61 = arith.constant dense<0.000000e+00> : vector<2x16x16xf32>
    %122 = tpu.matmul %121, %12, %cst_61 {dimension_numbers = #tpu.dot_dimension_numbers<[2], [2], [1], [1], [0, 0, 0, 1, 1, 1], [0], [0]>} : vector<2x16x32xbf16>, vector<2x16x32xbf16>, vector<2x16x16xf32> -> vector<2x16x16xf32>
    "tpu.trace_stop"() : () -> ()
    %123 = vector.shape_cast %119 : vector<2x16xf32> to vector<2x1x16xf32>
    %124 = vector.broadcast %123 : vector<2x1x16xf32> to vector<2x16x16xf32>
    %125 = arith.addf %122, %124 : vector<2x16x16xf32>
    %cst_62 = arith.constant dense<0xFF800000> : vector<2x16xf32>
    %126 = vector.multi_reduction <maximumf>, %125, %cst_62 [2] : vector<2x16x16xf32> to vector<2x16xf32>
    %127 = vector.shape_cast %126 : vector<2x16xf32> to vector<2x16x1xf32>
    %128 = vector.broadcast %127 : vector<2x16x1xf32> to vector<2x16x16xf32>
    %129 = arith.subf %125, %128 : vector<2x16x16xf32>
    %130 = math.exp %129 : vector<2x16x16xf32>
    %cst_63 = arith.constant dense<0.000000e+00> : vector<2x16xf32>
    %131 = vector.multi_reduction <add>, %130, %cst_63 [2] : vector<2x16x16xf32> to vector<2x16xf32>
    %132 = vector.shape_cast %131 : vector<2x16xf32> to vector<2x16x1xf32>
    %133 = tpu.reciprocal %132 {approx = true} : vector<2x16x1xf32> -> vector<2x16x1xf32>
    %134 = vector.broadcast %133 : vector<2x16x1xf32> to vector<2x16x16xf32>
    %135 = arith.mulf %130, %134 : vector<2x16x16xf32>
    %c3_64 = arith.constant 3 : index
    %c0_65 = arith.constant 0 : index
    %c0_66 = arith.constant 0 : index
    %136 = vector.load %arg8[%c3_64, %c0_65, %c0_66] : memref<4x32x32xbf16, #tpu.memory_space<vmem>>, vector<1x32x32xbf16>
    %137 = vector.shape_cast %136 : vector<1x32x32xbf16> to vector<32x32xbf16>
    %cst_67 = arith.constant dense<0.000000e+00> : vector<32x32xf32>
    %138 = tpu.matmul %10, %137, %cst_67 {dimension_numbers = #tpu.dot_dimension_numbers<[1], [0], [0], [1], [0, 0, 1, 1], [], []>} : vector<32x32xbf16>, vector<32x32xbf16>, vector<32x32xf32> -> vector<32x32xf32>
    %139 = arith.truncf %135 : vector<2x16x16xf32> to vector<2x16x16xbf16>
    %140 = vector.shape_cast %138 : vector<32x32xf32> to vector<2x16x32xf32>
    %141 = arith.truncf %140 : vector<2x16x32xf32> to vector<2x16x32xbf16>
    "tpu.trace_start"() <{level = 10 : i32, message = "bqk,bkd->bqd"}> : () -> ()
    %cst_68 = arith.constant dense<0.000000e+00> : vector<2x16x32xf32>
    %142 = tpu.matmul %139, %141, %cst_68 {dimension_numbers = #tpu.dot_dimension_numbers<[2], [1], [1], [2], [0, 0, 0, 1, 1, 2], [0], [0]>} : vector<2x16x16xbf16>, vector<2x16x32xbf16>, vector<2x16x32xf32> -> vector<2x16x32xf32>
    "tpu.trace_stop"() : () -> ()
    %143 = arith.addf %110, %142 : vector<2x16x32xf32>
    %144 = vector.shape_cast %143 : vector<2x16x32xf32> to vector<32x32xf32>
    %145 = vector.broadcast %9 : vector<1x32xf32> to vector<32x32xf32>
    %146 = arith.addf %144, %145 : vector<32x32xf32>
    %147 = arith.addf %8, %146 : vector<32x32xf32>
    %c0_69 = arith.constant 0 : index
    %c64 = arith.constant 64 : index
    %148 = vector.load %arg20[%c0_69, %c64] : memref<1x488xf32, #tpu.memory_space<vmem>>, vector<1x32xf32>
    %c0_70 = arith.constant 0 : index
    %c96 = arith.constant 96 : index
    %149 = vector.load %arg20[%c0_70, %c96] : memref<1x488xf32, #tpu.memory_space<vmem>>, vector<1x32xf32>
    %cst_71 = arith.constant dense<0.000000e+00> : vector<32xf32>
    %150 = vector.multi_reduction <add>, %147, %cst_71 [1] : vector<32x32xf32> to vector<32xf32>
    %151 = vector.shape_cast %150 : vector<32xf32> to vector<32x1xf32>
    %cst_72 = arith.constant 3.200000e+01 : f32
    %152 = vector.broadcast %cst_72 : f32 to vector<32x1xf32>
    %153 = arith.divf %151, %152 : vector<32x1xf32>
    %154 = vector.broadcast %153 : vector<32x1xf32> to vector<32x32xf32>
    %155 = arith.subf %147, %154 : vector<32x32xf32>
    %156 = arith.mulf %155, %155 : vector<32x32xf32>
    %cst_73 = arith.constant dense<0.000000e+00> : vector<32xf32>
    %157 = vector.multi_reduction <add>, %156, %cst_73 [1] : vector<32x32xf32> to vector<32xf32>
    %158 = vector.shape_cast %157 : vector<32xf32> to vector<32x1xf32>
    %cst_74 = arith.constant 3.200000e+01 : f32
    %159 = vector.broadcast %cst_74 : f32 to vector<32x1xf32>
    %160 = arith.divf %158, %159 : vector<32x1xf32>
    %cst_75 = arith.constant 9.99999974E-6 : f32
    %161 = vector.broadcast %cst_75 : f32 to vector<32x1xf32>
    %162 = arith.addf %160, %161 : vector<32x1xf32>
    %163 = math.rsqrt %162 : vector<32x1xf32>
    %164 = vector.broadcast %163 : vector<32x1xf32> to vector<32x32xf32>
    %165 = arith.mulf %155, %164 : vector<32x32xf32>
    %166 = vector.broadcast %148 : vector<1x32xf32> to vector<32x32xf32>
    %167 = arith.mulf %165, %166 : vector<32x32xf32>
    %168 = vector.broadcast %149 : vector<1x32xf32> to vector<32x32xf32>
    %169 = arith.addf %167, %168 : vector<32x32xf32>
    %170 = arith.truncf %169 : vector<32x32xf32> to vector<32x32xbf16>
    %c0_76 = arith.constant 0 : index
    %c0_77 = arith.constant 0 : index
    %171 = vector.load %arg9[%c0_76, %c0_77] : memref<32x96xbf16, #tpu.memory_space<vmem>>, vector<32x64xbf16>
    %cst_78 = arith.constant dense<0.000000e+00> : vector<32x64xf32>
    %172 = tpu.matmul %170, %171, %cst_78 {dimension_numbers = #tpu.dot_dimension_numbers<[1], [0], [0], [1], [0, 0, 1, 1], [], []>} : vector<32x32xbf16>, vector<32x64xbf16>, vector<32x64xf32> -> vector<32x64xf32>
    %c0_79 = arith.constant 0 : index
    %c128 = arith.constant 128 : index
    %173 = vector.load %arg20[%c0_79, %c128] : memref<1x488xf32, #tpu.memory_space<vmem>>, vector<1x64xf32>
    %174 = vector.broadcast %173 : vector<1x64xf32> to vector<32x64xf32>
    %175 = arith.addf %172, %174 : vector<32x64xf32>
    %cst_80 = arith.constant 0.000000e+00 : f32
    %176 = vector.broadcast %cst_80 : f32 to vector<32x64xf32>
    %177 = arith.maximumf %175, %176 : vector<32x64xf32>
    %178 = arith.truncf %177 : vector<32x64xf32> to vector<32x64xbf16>
    %c0_81 = arith.constant 0 : index
    %c0_82 = arith.constant 0 : index
    %179 = vector.load %arg10[%c0_81, %c0_82] : memref<64x32xbf16, #tpu.memory_space<vmem>>, vector<64x32xbf16>
    %cst_83 = arith.constant dense<0.000000e+00> : vector<32x32xf32>
    %180 = tpu.matmul %178, %179, %cst_83 {dimension_numbers = #tpu.dot_dimension_numbers<[1], [0], [0], [1], [0, 0, 1, 1], [], []>} : vector<32x64xbf16>, vector<64x32xbf16>, vector<32x32xf32> -> vector<32x32xf32>
    %c0_84 = arith.constant 0 : index
    %c192 = arith.constant 192 : index
    %181 = vector.load %arg20[%c0_84, %c192] : memref<1x488xf32, #tpu.memory_space<vmem>>, vector<1x32xf32>
    %182 = vector.broadcast %181 : vector<1x32xf32> to vector<32x32xf32>
    %183 = arith.addf %180, %182 : vector<32x32xf32>
    %184 = arith.addf %169, %183 : vector<32x32xf32>
    %c0_85 = arith.constant 0 : index
    %c224 = arith.constant 224 : index
    %185 = vector.load %arg20[%c0_85, %c224] : memref<1x488xf32, #tpu.memory_space<vmem>>, vector<1x32xf32>
    %c0_86 = arith.constant 0 : index
    %c256 = arith.constant 256 : index
    %186 = vector.load %arg20[%c0_86, %c256] : memref<1x488xf32, #tpu.memory_space<vmem>>, vector<1x32xf32>
    %cst_87 = arith.constant dense<0.000000e+00> : vector<32xf32>
    %187 = vector.multi_reduction <add>, %184, %cst_87 [1] : vector<32x32xf32> to vector<32xf32>
    %188 = vector.shape_cast %187 : vector<32xf32> to vector<32x1xf32>
    %cst_88 = arith.constant 3.200000e+01 : f32
    %189 = vector.broadcast %cst_88 : f32 to vector<32x1xf32>
    %190 = arith.divf %188, %189 : vector<32x1xf32>
    %191 = vector.broadcast %190 : vector<32x1xf32> to vector<32x32xf32>
    %192 = arith.subf %184, %191 : vector<32x32xf32>
    %193 = arith.mulf %192, %192 : vector<32x32xf32>
    %cst_89 = arith.constant dense<0.000000e+00> : vector<32xf32>
    %194 = vector.multi_reduction <add>, %193, %cst_89 [1] : vector<32x32xf32> to vector<32xf32>
    %195 = vector.shape_cast %194 : vector<32xf32> to vector<32x1xf32>
    %cst_90 = arith.constant 3.200000e+01 : f32
    %196 = vector.broadcast %cst_90 : f32 to vector<32x1xf32>
    %197 = arith.divf %195, %196 : vector<32x1xf32>
    %cst_91 = arith.constant 9.99999974E-6 : f32
    %198 = vector.broadcast %cst_91 : f32 to vector<32x1xf32>
    %199 = arith.addf %197, %198 : vector<32x1xf32>
    %200 = math.rsqrt %199 : vector<32x1xf32>
    %201 = vector.broadcast %200 : vector<32x1xf32> to vector<32x32xf32>
    %202 = arith.mulf %192, %201 : vector<32x32xf32>
    %203 = vector.broadcast %185 : vector<1x32xf32> to vector<32x32xf32>
    %204 = arith.mulf %202, %203 : vector<32x32xf32>
    %205 = vector.broadcast %186 : vector<1x32xf32> to vector<32x32xf32>
    %206 = arith.addf %204, %205 : vector<32x32xf32>
    %207 = vector.shape_cast %206 : vector<32x32xf32> to vector<2x16x32xf32>
    %cst_92 = arith.constant dense<0.000000e+00> : vector<2x32xf32>
    %208 = vector.multi_reduction <add>, %207, %cst_92 [1] : vector<2x16x32xf32> to vector<2x32xf32>
    %cst_93 = arith.constant 1.600000e+01 : f32
    %209 = vector.broadcast %cst_93 : f32 to vector<2x32xf32>
    %210 = arith.divf %208, %209 : vector<2x32xf32>
    %211 = arith.truncf %210 : vector<2x32xf32> to vector<2x32xbf16>
    %c0_94 = arith.constant 0 : index
    %c64_95 = arith.constant 64 : index
    %212 = vector.load %arg9[%c0_94, %c64_95] : memref<32x96xbf16, #tpu.memory_space<vmem>>, vector<32x32xbf16>
    %cst_96 = arith.constant dense<0.000000e+00> : vector<2x32xf32>
    %213 = tpu.matmul %211, %212, %cst_96 {dimension_numbers = #tpu.dot_dimension_numbers<[1], [0], [0], [1], [0, 0, 1, 1], [], []>} : vector<2x32xbf16>, vector<32x32xbf16>, vector<2x32xf32> -> vector<2x32xf32>
    %c0_97 = arith.constant 0 : index
    %c288 = arith.constant 288 : index
    %214 = vector.load %arg20[%c0_97, %c288] : memref<1x488xf32, #tpu.memory_space<vmem>>, vector<1x32xf32>
    %215 = vector.broadcast %214 : vector<1x32xf32> to vector<2x32xf32>
    %216 = arith.addf %213, %215 : vector<2x32xf32>
    %c0_98 = arith.constant 0 : index
    %c0_99 = arith.constant 0 : index
    %217 = vector.load %arg2[%c0_98, %c0_99] : memref<2x4xf32, #tpu.memory_space<vmem>>, vector<2x4xf32>
    %218 = arith.truncf %217 : vector<2x4xf32> to vector<2x4xbf16>
    %c0_100 = arith.constant 0 : index
    %c0_101 = arith.constant 0 : index
    %219 = vector.load %arg11[%c0_100, %c0_101] : memref<4x8xbf16, #tpu.memory_space<vmem>>, vector<4x8xbf16>
    %cst_102 = arith.constant dense<0.000000e+00> : vector<2x8xf32>
    %220 = tpu.matmul %218, %219, %cst_102 {dimension_numbers = #tpu.dot_dimension_numbers<[1], [0], [0], [1], [0, 0, 1, 1], [], []>} : vector<2x4xbf16>, vector<4x8xbf16>, vector<2x8xf32> -> vector<2x8xf32>
    %c0_103 = arith.constant 0 : index
    %c320 = arith.constant 320 : index
    %221 = vector.load %arg20[%c0_103, %c320] : memref<1x488xf32, #tpu.memory_space<vmem>>, vector<1x8xf32>
    %222 = vector.broadcast %221 : vector<1x8xf32> to vector<2x8xf32>
    %223 = arith.addf %220, %222 : vector<2x8xf32>
    %224 = arith.truncf %216 : vector<2x32xf32> to vector<2x32xbf16>
    %c0_104 = arith.constant 0 : index
    %c0_105 = arith.constant 0 : index
    %225 = vector.load %arg12[%c0_104, %c0_105] : memref<40x32xbf16, #tpu.memory_space<vmem>>, vector<32x32xbf16>
    %cst_106 = arith.constant dense<0.000000e+00> : vector<2x32xf32>
    %226 = tpu.matmul %224, %225, %cst_106 {dimension_numbers = #tpu.dot_dimension_numbers<[1], [0], [0], [1], [0, 0, 1, 1], [], []>} : vector<2x32xbf16>, vector<32x32xbf16>, vector<2x32xf32> -> vector<2x32xf32>
    %227 = arith.truncf %223 : vector<2x8xf32> to vector<2x8xbf16>
    %c32_107 = arith.constant 32 : index
    %c0_108 = arith.constant 0 : index
    %228 = vector.load %arg12[%c32_107, %c0_108] : memref<40x32xbf16, #tpu.memory_space<vmem>>, vector<8x32xbf16>
    %cst_109 = arith.constant dense<0.000000e+00> : vector<2x32xf32>
    %229 = tpu.matmul %227, %228, %cst_109 {dimension_numbers = #tpu.dot_dimension_numbers<[1], [0], [0], [1], [0, 0, 1, 1], [], []>} : vector<2x8xbf16>, vector<8x32xbf16>, vector<2x32xf32> -> vector<2x32xf32>
    %230 = arith.addf %226, %229 : vector<2x32xf32>
    %c0_110 = arith.constant 0 : index
    %c328 = arith.constant 328 : index
    %231 = vector.load %arg20[%c0_110, %c328] : memref<1x488xf32, #tpu.memory_space<vmem>>, vector<1x32xf32>
    %232 = vector.broadcast %231 : vector<1x32xf32> to vector<2x32xf32>
    %233 = arith.addf %230, %232 : vector<2x32xf32>
    %c0_111 = arith.constant 0 : index
    %c0_112 = arith.constant 0 : index
    %234 = vector.load %arg4[%c0_111, %c0_112] : memref<32x32xf32, #tpu.memory_space<vmem>>, vector<32x32xf32>
    %c0_113 = arith.constant 0 : index
    %c0_114 = arith.constant 0 : index
    %c0_115 = arith.constant 0 : index
    %235 = vector.load %arg18[%c0_113, %c0_114, %c0_115] : memref<2x1x384xf32, #tpu.memory_space<vmem>>, vector<1x1x32xf32>
    %236 = vector.shape_cast %235 : vector<1x1x32xf32> to vector<1x32xf32>
    %237 = arith.truncf %234 : vector<32x32xf32> to vector<32x32xbf16>
    %238 = vector.shape_cast %234 : vector<32x32xf32> to vector<2x16x32xf32>
    %239 = arith.truncf %238 : vector<2x16x32xf32> to vector<2x16x32xbf16>
    %c0_116 = arith.constant 0 : index
    %c0_117 = arith.constant 0 : index
    %c0_118 = arith.constant 0 : index
    %c0_119 = arith.constant 0 : index
    %240 = vector.load %arg13[%c0_116, %c0_117, %c0_118, %c0_119] : memref<2x4x32x32xbf16, #tpu.memory_space<vmem>>, vector<1x1x32x32xbf16>
    %241 = vector.shape_cast %240 : vector<1x1x32x32xbf16> to vector<32x32xbf16>
    %cst_120 = arith.constant dense<0.000000e+00> : vector<32x32xf32>
    %242 = tpu.matmul %237, %241, %cst_120 {dimension_numbers = #tpu.dot_dimension_numbers<[1], [0], [0], [1], [0, 0, 1, 1], [], []>} : vector<32x32xbf16>, vector<32x32xbf16>, vector<32x32xf32> -> vector<32x32xf32>
    %c0_121 = arith.constant 0 : index
    %c0_122 = arith.constant 0 : index
    %c0_123 = arith.constant 0 : index
    %c0_124 = arith.constant 0 : index
    %243 = vector.load %arg14[%c0_121, %c0_122, %c0_123, %c0_124] : memref<2x4x1x32xf32, #tpu.memory_space<vmem>>, vector<1x1x1x32xf32>
    %244 = vector.shape_cast %243 : vector<1x1x1x32xf32> to vector<1x32xf32>
    %245 = vector.shape_cast %244 : vector<1x32xf32> to vector<1x1x32xf32>
    %246 = vector.broadcast %245 : vector<1x1x32xf32> to vector<2x16x32xf32>
    %247 = arith.mulf %238, %246 : vector<2x16x32xf32>
    %cst_125 = arith.constant dense<0.000000e+00> : vector<2x16xf32>
    %248 = vector.multi_reduction <add>, %247, %cst_125 [2] : vector<2x16x32xf32> to vector<2x16xf32>
    %249 = vector.shape_cast %242 : vector<32x32xf32> to vector<2x16x32xf32>
    %250 = arith.truncf %249 : vector<2x16x32xf32> to vector<2x16x32xbf16>
    "tpu.trace_start"() <{level = 10 : i32, message = "bqd,bkd->bqk"}> : () -> ()
    %cst_126 = arith.constant dense<0.000000e+00> : vector<2x16x16xf32>
    %251 = tpu.matmul %250, %239, %cst_126 {dimension_numbers = #tpu.dot_dimension_numbers<[2], [2], [1], [1], [0, 0, 0, 1, 1, 1], [0], [0]>} : vector<2x16x32xbf16>, vector<2x16x32xbf16>, vector<2x16x16xf32> -> vector<2x16x16xf32>
    "tpu.trace_stop"() : () -> ()
    %252 = vector.shape_cast %248 : vector<2x16xf32> to vector<2x1x16xf32>
    %253 = vector.broadcast %252 : vector<2x1x16xf32> to vector<2x16x16xf32>
    %254 = arith.addf %251, %253 : vector<2x16x16xf32>
    %cst_127 = arith.constant dense<0xFF800000> : vector<2x16xf32>
    %255 = vector.multi_reduction <maximumf>, %254, %cst_127 [2] : vector<2x16x16xf32> to vector<2x16xf32>
    %256 = vector.shape_cast %255 : vector<2x16xf32> to vector<2x16x1xf32>
    %257 = vector.broadcast %256 : vector<2x16x1xf32> to vector<2x16x16xf32>
    %258 = arith.subf %254, %257 : vector<2x16x16xf32>
    %259 = math.exp %258 : vector<2x16x16xf32>
    %cst_128 = arith.constant dense<0.000000e+00> : vector<2x16xf32>
    %260 = vector.multi_reduction <add>, %259, %cst_128 [2] : vector<2x16x16xf32> to vector<2x16xf32>
    %261 = vector.shape_cast %260 : vector<2x16xf32> to vector<2x16x1xf32>
    %262 = tpu.reciprocal %261 {approx = true} : vector<2x16x1xf32> -> vector<2x16x1xf32>
    %263 = vector.broadcast %262 : vector<2x16x1xf32> to vector<2x16x16xf32>
    %264 = arith.mulf %259, %263 : vector<2x16x16xf32>
    %c0_129 = arith.constant 0 : index
    %c0_130 = arith.constant 0 : index
    %c0_131 = arith.constant 0 : index
    %c0_132 = arith.constant 0 : index
    %265 = vector.load %arg15[%c0_129, %c0_130, %c0_131, %c0_132] : memref<2x4x32x32xbf16, #tpu.memory_space<vmem>>, vector<1x1x32x32xbf16>
    %266 = vector.shape_cast %265 : vector<1x1x32x32xbf16> to vector<32x32xbf16>
    %cst_133 = arith.constant dense<0.000000e+00> : vector<32x32xf32>
    %267 = tpu.matmul %237, %266, %cst_133 {dimension_numbers = #tpu.dot_dimension_numbers<[1], [0], [0], [1], [0, 0, 1, 1], [], []>} : vector<32x32xbf16>, vector<32x32xbf16>, vector<32x32xf32> -> vector<32x32xf32>
    %268 = arith.truncf %264 : vector<2x16x16xf32> to vector<2x16x16xbf16>
    %269 = vector.shape_cast %267 : vector<32x32xf32> to vector<2x16x32xf32>
    %270 = arith.truncf %269 : vector<2x16x32xf32> to vector<2x16x32xbf16>
    "tpu.trace_start"() <{level = 10 : i32, message = "bqk,bkd->bqd"}> : () -> ()
    %cst_134 = arith.constant dense<0.000000e+00> : vector<2x16x32xf32>
    %271 = tpu.matmul %268, %270, %cst_134 {dimension_numbers = #tpu.dot_dimension_numbers<[2], [1], [1], [2], [0, 0, 0, 1, 1, 2], [0], [0]>} : vector<2x16x16xbf16>, vector<2x16x32xbf16>, vector<2x16x32xf32> -> vector<2x16x32xf32>
    "tpu.trace_stop"() : () -> ()
    %c0_135 = arith.constant 0 : index
    %c1_136 = arith.constant 1 : index
    %c0_137 = arith.constant 0 : index
    %c0_138 = arith.constant 0 : index
    %272 = vector.load %arg13[%c0_135, %c1_136, %c0_137, %c0_138] : memref<2x4x32x32xbf16, #tpu.memory_space<vmem>>, vector<1x1x32x32xbf16>
    %273 = vector.shape_cast %272 : vector<1x1x32x32xbf16> to vector<32x32xbf16>
    %cst_139 = arith.constant dense<0.000000e+00> : vector<32x32xf32>
    %274 = tpu.matmul %237, %273, %cst_139 {dimension_numbers = #tpu.dot_dimension_numbers<[1], [0], [0], [1], [0, 0, 1, 1], [], []>} : vector<32x32xbf16>, vector<32x32xbf16>, vector<32x32xf32> -> vector<32x32xf32>
    %c0_140 = arith.constant 0 : index
    %c1_141 = arith.constant 1 : index
    %c0_142 = arith.constant 0 : index
    %c0_143 = arith.constant 0 : index
    %275 = vector.load %arg14[%c0_140, %c1_141, %c0_142, %c0_143] : memref<2x4x1x32xf32, #tpu.memory_space<vmem>>, vector<1x1x1x32xf32>
    %276 = vector.shape_cast %275 : vector<1x1x1x32xf32> to vector<1x32xf32>
    %277 = vector.shape_cast %276 : vector<1x32xf32> to vector<1x1x32xf32>
    %278 = vector.broadcast %277 : vector<1x1x32xf32> to vector<2x16x32xf32>
    %279 = arith.mulf %238, %278 : vector<2x16x32xf32>
    %cst_144 = arith.constant dense<0.000000e+00> : vector<2x16xf32>
    %280 = vector.multi_reduction <add>, %279, %cst_144 [2] : vector<2x16x32xf32> to vector<2x16xf32>
    %281 = vector.shape_cast %274 : vector<32x32xf32> to vector<2x16x32xf32>
    %282 = arith.truncf %281 : vector<2x16x32xf32> to vector<2x16x32xbf16>
    "tpu.trace_start"() <{level = 10 : i32, message = "bqd,bkd->bqk"}> : () -> ()
    %cst_145 = arith.constant dense<0.000000e+00> : vector<2x16x16xf32>
    %283 = tpu.matmul %282, %239, %cst_145 {dimension_numbers = #tpu.dot_dimension_numbers<[2], [2], [1], [1], [0, 0, 0, 1, 1, 1], [0], [0]>} : vector<2x16x32xbf16>, vector<2x16x32xbf16>, vector<2x16x16xf32> -> vector<2x16x16xf32>
    "tpu.trace_stop"() : () -> ()
    %284 = vector.shape_cast %280 : vector<2x16xf32> to vector<2x1x16xf32>
    %285 = vector.broadcast %284 : vector<2x1x16xf32> to vector<2x16x16xf32>
    %286 = arith.addf %283, %285 : vector<2x16x16xf32>
    %cst_146 = arith.constant dense<0xFF800000> : vector<2x16xf32>
    %287 = vector.multi_reduction <maximumf>, %286, %cst_146 [2] : vector<2x16x16xf32> to vector<2x16xf32>
    %288 = vector.shape_cast %287 : vector<2x16xf32> to vector<2x16x1xf32>
    %289 = vector.broadcast %288 : vector<2x16x1xf32> to vector<2x16x16xf32>
    %290 = arith.subf %286, %289 : vector<2x16x16xf32>
    %291 = math.exp %290 : vector<2x16x16xf32>
    %cst_147 = arith.constant dense<0.000000e+00> : vector<2x16xf32>
    %292 = vector.multi_reduction <add>, %291, %cst_147 [2] : vector<2x16x16xf32> to vector<2x16xf32>
    %293 = vector.shape_cast %292 : vector<2x16xf32> to vector<2x16x1xf32>
    %294 = tpu.reciprocal %293 {approx = true} : vector<2x16x1xf32> -> vector<2x16x1xf32>
    %295 = vector.broadcast %294 : vector<2x16x1xf32> to vector<2x16x16xf32>
    %296 = arith.mulf %291, %295 : vector<2x16x16xf32>
    %c0_148 = arith.constant 0 : index
    %c1_149 = arith.constant 1 : index
    %c0_150 = arith.constant 0 : index
    %c0_151 = arith.constant 0 : index
    %297 = vector.load %arg15[%c0_148, %c1_149, %c0_150, %c0_151] : memref<2x4x32x32xbf16, #tpu.memory_space<vmem>>, vector<1x1x32x32xbf16>
    %298 = vector.shape_cast %297 : vector<1x1x32x32xbf16> to vector<32x32xbf16>
    %cst_152 = arith.constant dense<0.000000e+00> : vector<32x32xf32>
    %299 = tpu.matmul %237, %298, %cst_152 {dimension_numbers = #tpu.dot_dimension_numbers<[1], [0], [0], [1], [0, 0, 1, 1], [], []>} : vector<32x32xbf16>, vector<32x32xbf16>, vector<32x32xf32> -> vector<32x32xf32>
    %300 = arith.truncf %296 : vector<2x16x16xf32> to vector<2x16x16xbf16>
    %301 = vector.shape_cast %299 : vector<32x32xf32> to vector<2x16x32xf32>
    %302 = arith.truncf %301 : vector<2x16x32xf32> to vector<2x16x32xbf16>
    "tpu.trace_start"() <{level = 10 : i32, message = "bqk,bkd->bqd"}> : () -> ()
    %cst_153 = arith.constant dense<0.000000e+00> : vector<2x16x32xf32>
    %303 = tpu.matmul %300, %302, %cst_153 {dimension_numbers = #tpu.dot_dimension_numbers<[2], [1], [1], [2], [0, 0, 0, 1, 1, 2], [0], [0]>} : vector<2x16x16xbf16>, vector<2x16x32xbf16>, vector<2x16x32xf32> -> vector<2x16x32xf32>
    "tpu.trace_stop"() : () -> ()
    %304 = arith.addf %271, %303 : vector<2x16x32xf32>
    %c0_154 = arith.constant 0 : index
    %c2_155 = arith.constant 2 : index
    %c0_156 = arith.constant 0 : index
    %c0_157 = arith.constant 0 : index
    %305 = vector.load %arg13[%c0_154, %c2_155, %c0_156, %c0_157] : memref<2x4x32x32xbf16, #tpu.memory_space<vmem>>, vector<1x1x32x32xbf16>
    %306 = vector.shape_cast %305 : vector<1x1x32x32xbf16> to vector<32x32xbf16>
    %cst_158 = arith.constant dense<0.000000e+00> : vector<32x32xf32>
    %307 = tpu.matmul %237, %306, %cst_158 {dimension_numbers = #tpu.dot_dimension_numbers<[1], [0], [0], [1], [0, 0, 1, 1], [], []>} : vector<32x32xbf16>, vector<32x32xbf16>, vector<32x32xf32> -> vector<32x32xf32>
    %c0_159 = arith.constant 0 : index
    %c2_160 = arith.constant 2 : index
    %c0_161 = arith.constant 0 : index
    %c0_162 = arith.constant 0 : index
    %308 = vector.load %arg14[%c0_159, %c2_160, %c0_161, %c0_162] : memref<2x4x1x32xf32, #tpu.memory_space<vmem>>, vector<1x1x1x32xf32>
    %309 = vector.shape_cast %308 : vector<1x1x1x32xf32> to vector<1x32xf32>
    %310 = vector.shape_cast %309 : vector<1x32xf32> to vector<1x1x32xf32>
    %311 = vector.broadcast %310 : vector<1x1x32xf32> to vector<2x16x32xf32>
    %312 = arith.mulf %238, %311 : vector<2x16x32xf32>
    %cst_163 = arith.constant dense<0.000000e+00> : vector<2x16xf32>
    %313 = vector.multi_reduction <add>, %312, %cst_163 [2] : vector<2x16x32xf32> to vector<2x16xf32>
    %314 = vector.shape_cast %307 : vector<32x32xf32> to vector<2x16x32xf32>
    %315 = arith.truncf %314 : vector<2x16x32xf32> to vector<2x16x32xbf16>
    "tpu.trace_start"() <{level = 10 : i32, message = "bqd,bkd->bqk"}> : () -> ()
    %cst_164 = arith.constant dense<0.000000e+00> : vector<2x16x16xf32>
    %316 = tpu.matmul %315, %239, %cst_164 {dimension_numbers = #tpu.dot_dimension_numbers<[2], [2], [1], [1], [0, 0, 0, 1, 1, 1], [0], [0]>} : vector<2x16x32xbf16>, vector<2x16x32xbf16>, vector<2x16x16xf32> -> vector<2x16x16xf32>
    "tpu.trace_stop"() : () -> ()
    %317 = vector.shape_cast %313 : vector<2x16xf32> to vector<2x1x16xf32>
    %318 = vector.broadcast %317 : vector<2x1x16xf32> to vector<2x16x16xf32>
    %319 = arith.addf %316, %318 : vector<2x16x16xf32>
    %cst_165 = arith.constant dense<0xFF800000> : vector<2x16xf32>
    %320 = vector.multi_reduction <maximumf>, %319, %cst_165 [2] : vector<2x16x16xf32> to vector<2x16xf32>
    %321 = vector.shape_cast %320 : vector<2x16xf32> to vector<2x16x1xf32>
    %322 = vector.broadcast %321 : vector<2x16x1xf32> to vector<2x16x16xf32>
    %323 = arith.subf %319, %322 : vector<2x16x16xf32>
    %324 = math.exp %323 : vector<2x16x16xf32>
    %cst_166 = arith.constant dense<0.000000e+00> : vector<2x16xf32>
    %325 = vector.multi_reduction <add>, %324, %cst_166 [2] : vector<2x16x16xf32> to vector<2x16xf32>
    %326 = vector.shape_cast %325 : vector<2x16xf32> to vector<2x16x1xf32>
    %327 = tpu.reciprocal %326 {approx = true} : vector<2x16x1xf32> -> vector<2x16x1xf32>
    %328 = vector.broadcast %327 : vector<2x16x1xf32> to vector<2x16x16xf32>
    %329 = arith.mulf %324, %328 : vector<2x16x16xf32>
    %c0_167 = arith.constant 0 : index
    %c2_168 = arith.constant 2 : index
    %c0_169 = arith.constant 0 : index
    %c0_170 = arith.constant 0 : index
    %330 = vector.load %arg15[%c0_167, %c2_168, %c0_169, %c0_170] : memref<2x4x32x32xbf16, #tpu.memory_space<vmem>>, vector<1x1x32x32xbf16>
    %331 = vector.shape_cast %330 : vector<1x1x32x32xbf16> to vector<32x32xbf16>
    %cst_171 = arith.constant dense<0.000000e+00> : vector<32x32xf32>
    %332 = tpu.matmul %237, %331, %cst_171 {dimension_numbers = #tpu.dot_dimension_numbers<[1], [0], [0], [1], [0, 0, 1, 1], [], []>} : vector<32x32xbf16>, vector<32x32xbf16>, vector<32x32xf32> -> vector<32x32xf32>
    %333 = arith.truncf %329 : vector<2x16x16xf32> to vector<2x16x16xbf16>
    %334 = vector.shape_cast %332 : vector<32x32xf32> to vector<2x16x32xf32>
    %335 = arith.truncf %334 : vector<2x16x32xf32> to vector<2x16x32xbf16>
    "tpu.trace_start"() <{level = 10 : i32, message = "bqk,bkd->bqd"}> : () -> ()
    %cst_172 = arith.constant dense<0.000000e+00> : vector<2x16x32xf32>
    %336 = tpu.matmul %333, %335, %cst_172 {dimension_numbers = #tpu.dot_dimension_numbers<[2], [1], [1], [2], [0, 0, 0, 1, 1, 2], [0], [0]>} : vector<2x16x16xbf16>, vector<2x16x32xbf16>, vector<2x16x32xf32> -> vector<2x16x32xf32>
    "tpu.trace_stop"() : () -> ()
    %337 = arith.addf %304, %336 : vector<2x16x32xf32>
    %c0_173 = arith.constant 0 : index
    %c3_174 = arith.constant 3 : index
    %c0_175 = arith.constant 0 : index
    %c0_176 = arith.constant 0 : index
    %338 = vector.load %arg13[%c0_173, %c3_174, %c0_175, %c0_176] : memref<2x4x32x32xbf16, #tpu.memory_space<vmem>>, vector<1x1x32x32xbf16>
    %339 = vector.shape_cast %338 : vector<1x1x32x32xbf16> to vector<32x32xbf16>
    %cst_177 = arith.constant dense<0.000000e+00> : vector<32x32xf32>
    %340 = tpu.matmul %237, %339, %cst_177 {dimension_numbers = #tpu.dot_dimension_numbers<[1], [0], [0], [1], [0, 0, 1, 1], [], []>} : vector<32x32xbf16>, vector<32x32xbf16>, vector<32x32xf32> -> vector<32x32xf32>
    %c0_178 = arith.constant 0 : index
    %c3_179 = arith.constant 3 : index
    %c0_180 = arith.constant 0 : index
    %c0_181 = arith.constant 0 : index
    %341 = vector.load %arg14[%c0_178, %c3_179, %c0_180, %c0_181] : memref<2x4x1x32xf32, #tpu.memory_space<vmem>>, vector<1x1x1x32xf32>
    %342 = vector.shape_cast %341 : vector<1x1x1x32xf32> to vector<1x32xf32>
    %343 = vector.shape_cast %342 : vector<1x32xf32> to vector<1x1x32xf32>
    %344 = vector.broadcast %343 : vector<1x1x32xf32> to vector<2x16x32xf32>
    %345 = arith.mulf %238, %344 : vector<2x16x32xf32>
    %cst_182 = arith.constant dense<0.000000e+00> : vector<2x16xf32>
    %346 = vector.multi_reduction <add>, %345, %cst_182 [2] : vector<2x16x32xf32> to vector<2x16xf32>
    %347 = vector.shape_cast %340 : vector<32x32xf32> to vector<2x16x32xf32>
    %348 = arith.truncf %347 : vector<2x16x32xf32> to vector<2x16x32xbf16>
    "tpu.trace_start"() <{level = 10 : i32, message = "bqd,bkd->bqk"}> : () -> ()
    %cst_183 = arith.constant dense<0.000000e+00> : vector<2x16x16xf32>
    %349 = tpu.matmul %348, %239, %cst_183 {dimension_numbers = #tpu.dot_dimension_numbers<[2], [2], [1], [1], [0, 0, 0, 1, 1, 1], [0], [0]>} : vector<2x16x32xbf16>, vector<2x16x32xbf16>, vector<2x16x16xf32> -> vector<2x16x16xf32>
    "tpu.trace_stop"() : () -> ()
    %350 = vector.shape_cast %346 : vector<2x16xf32> to vector<2x1x16xf32>
    %351 = vector.broadcast %350 : vector<2x1x16xf32> to vector<2x16x16xf32>
    %352 = arith.addf %349, %351 : vector<2x16x16xf32>
    %cst_184 = arith.constant dense<0xFF800000> : vector<2x16xf32>
    %353 = vector.multi_reduction <maximumf>, %352, %cst_184 [2] : vector<2x16x16xf32> to vector<2x16xf32>
    %354 = vector.shape_cast %353 : vector<2x16xf32> to vector<2x16x1xf32>
    %355 = vector.broadcast %354 : vector<2x16x1xf32> to vector<2x16x16xf32>
    %356 = arith.subf %352, %355 : vector<2x16x16xf32>
    %357 = math.exp %356 : vector<2x16x16xf32>
    %cst_185 = arith.constant dense<0.000000e+00> : vector<2x16xf32>
    %358 = vector.multi_reduction <add>, %357, %cst_185 [2] : vector<2x16x16xf32> to vector<2x16xf32>
    %359 = vector.shape_cast %358 : vector<2x16xf32> to vector<2x16x1xf32>
    %360 = tpu.reciprocal %359 {approx = true} : vector<2x16x1xf32> -> vector<2x16x1xf32>
    %361 = vector.broadcast %360 : vector<2x16x1xf32> to vector<2x16x16xf32>
    %362 = arith.mulf %357, %361 : vector<2x16x16xf32>
    %c0_186 = arith.constant 0 : index
    %c3_187 = arith.constant 3 : index
    %c0_188 = arith.constant 0 : index
    %c0_189 = arith.constant 0 : index
    %363 = vector.load %arg15[%c0_186, %c3_187, %c0_188, %c0_189] : memref<2x4x32x32xbf16, #tpu.memory_space<vmem>>, vector<1x1x32x32xbf16>
    %364 = vector.shape_cast %363 : vector<1x1x32x32xbf16> to vector<32x32xbf16>
    %cst_190 = arith.constant dense<0.000000e+00> : vector<32x32xf32>
    %365 = tpu.matmul %237, %364, %cst_190 {dimension_numbers = #tpu.dot_dimension_numbers<[1], [0], [0], [1], [0, 0, 1, 1], [], []>} : vector<32x32xbf16>, vector<32x32xbf16>, vector<32x32xf32> -> vector<32x32xf32>
    %366 = arith.truncf %362 : vector<2x16x16xf32> to vector<2x16x16xbf16>
    %367 = vector.shape_cast %365 : vector<32x32xf32> to vector<2x16x32xf32>
    %368 = arith.truncf %367 : vector<2x16x32xf32> to vector<2x16x32xbf16>
    "tpu.trace_start"() <{level = 10 : i32, message = "bqk,bkd->bqd"}> : () -> ()
    %cst_191 = arith.constant dense<0.000000e+00> : vector<2x16x32xf32>
    %369 = tpu.matmul %366, %368, %cst_191 {dimension_numbers = #tpu.dot_dimension_numbers<[2], [1], [1], [2], [0, 0, 0, 1, 1, 2], [0], [0]>} : vector<2x16x16xbf16>, vector<2x16x32xbf16>, vector<2x16x32xf32> -> vector<2x16x32xf32>
    "tpu.trace_stop"() : () -> ()
    %370 = arith.addf %337, %369 : vector<2x16x32xf32>
    %371 = vector.shape_cast %370 : vector<2x16x32xf32> to vector<32x32xf32>
    %372 = vector.broadcast %236 : vector<1x32xf32> to vector<32x32xf32>
    %373 = arith.addf %371, %372 : vector<32x32xf32>
    %374 = arith.addf %234, %373 : vector<32x32xf32>
    %c0_192 = arith.constant 0 : index
    %c0_193 = arith.constant 0 : index
    %c32_194 = arith.constant 32 : index
    %375 = vector.load %arg18[%c0_192, %c0_193, %c32_194] : memref<2x1x384xf32, #tpu.memory_space<vmem>>, vector<1x1x32xf32>
    %376 = vector.shape_cast %375 : vector<1x1x32xf32> to vector<1x32xf32>
    %c0_195 = arith.constant 0 : index
    %c0_196 = arith.constant 0 : index
    %c64_197 = arith.constant 64 : index
    %377 = vector.load %arg18[%c0_195, %c0_196, %c64_197] : memref<2x1x384xf32, #tpu.memory_space<vmem>>, vector<1x1x32xf32>
    %378 = vector.shape_cast %377 : vector<1x1x32xf32> to vector<1x32xf32>
    %cst_198 = arith.constant dense<0.000000e+00> : vector<32xf32>
    %379 = vector.multi_reduction <add>, %374, %cst_198 [1] : vector<32x32xf32> to vector<32xf32>
    %380 = vector.shape_cast %379 : vector<32xf32> to vector<32x1xf32>
    %cst_199 = arith.constant 3.200000e+01 : f32
    %381 = vector.broadcast %cst_199 : f32 to vector<32x1xf32>
    %382 = arith.divf %380, %381 : vector<32x1xf32>
    %383 = vector.broadcast %382 : vector<32x1xf32> to vector<32x32xf32>
    %384 = arith.subf %374, %383 : vector<32x32xf32>
    %385 = arith.mulf %384, %384 : vector<32x32xf32>
    %cst_200 = arith.constant dense<0.000000e+00> : vector<32xf32>
    %386 = vector.multi_reduction <add>, %385, %cst_200 [1] : vector<32x32xf32> to vector<32xf32>
    %387 = vector.shape_cast %386 : vector<32xf32> to vector<32x1xf32>
    %cst_201 = arith.constant 3.200000e+01 : f32
    %388 = vector.broadcast %cst_201 : f32 to vector<32x1xf32>
    %389 = arith.divf %387, %388 : vector<32x1xf32>
    %cst_202 = arith.constant 9.99999974E-6 : f32
    %390 = vector.broadcast %cst_202 : f32 to vector<32x1xf32>
    %391 = arith.addf %389, %390 : vector<32x1xf32>
    %392 = math.rsqrt %391 : vector<32x1xf32>
    %393 = vector.broadcast %392 : vector<32x1xf32> to vector<32x32xf32>
    %394 = arith.mulf %384, %393 : vector<32x32xf32>
    %395 = vector.broadcast %376 : vector<1x32xf32> to vector<32x32xf32>
    %396 = arith.mulf %394, %395 : vector<32x32xf32>
    %397 = vector.broadcast %378 : vector<1x32xf32> to vector<32x32xf32>
    %398 = arith.addf %396, %397 : vector<32x32xf32>
    %399 = arith.truncf %233 : vector<2x32xf32> to vector<2x32xbf16>
    %c0_203 = arith.constant 0 : index
    %c0_204 = arith.constant 0 : index
    %c0_205 = arith.constant 0 : index
    %400 = vector.load %arg16[%c0_203, %c0_204, %c0_205] : memref<2x32x128xbf16, #tpu.memory_space<vmem>>, vector<1x32x32xbf16>
    %401 = vector.shape_cast %400 : vector<1x32x32xbf16> to vector<32x32xbf16>
    %cst_206 = arith.constant dense<0.000000e+00> : vector<2x32xf32>
    %402 = tpu.matmul %399, %401, %cst_206 {dimension_numbers = #tpu.dot_dimension_numbers<[1], [0], [0], [1], [0, 0, 1, 1], [], []>} : vector<2x32xbf16>, vector<32x32xbf16>, vector<2x32xf32> -> vector<2x32xf32>
    %c0_207 = arith.constant 0 : index
    %c0_208 = arith.constant 0 : index
    %c96_209 = arith.constant 96 : index
    %403 = vector.load %arg18[%c0_207, %c0_208, %c96_209] : memref<2x1x384xf32, #tpu.memory_space<vmem>>, vector<1x1x32xf32>
    %404 = vector.shape_cast %403 : vector<1x1x32xf32> to vector<1x32xf32>
    %405 = vector.broadcast %404 : vector<1x32xf32> to vector<2x32xf32>
    %406 = arith.addf %402, %405 : vector<2x32xf32>
    %407 = arith.truncf %406 : vector<2x32xf32> to vector<2x32xbf16>
    %c0_210 = arith.constant 0 : index
    %c0_211 = arith.constant 0 : index
    %c32_212 = arith.constant 32 : index
    %408 = vector.load %arg16[%c0_210, %c0_211, %c32_212] : memref<2x32x128xbf16, #tpu.memory_space<vmem>>, vector<1x32x32xbf16>
    %409 = vector.shape_cast %408 : vector<1x32x32xbf16> to vector<32x32xbf16>
    %cst_213 = arith.constant dense<0.000000e+00> : vector<2x32xf32>
    %410 = tpu.matmul %407, %409, %cst_213 {dimension_numbers = #tpu.dot_dimension_numbers<[1], [0], [0], [1], [0, 0, 1, 1], [], []>} : vector<2x32xbf16>, vector<32x32xbf16>, vector<2x32xf32> -> vector<2x32xf32>
    %c0_214 = arith.constant 0 : index
    %c0_215 = arith.constant 0 : index
    %c128_216 = arith.constant 128 : index
    %411 = vector.load %arg18[%c0_214, %c0_215, %c128_216] : memref<2x1x384xf32, #tpu.memory_space<vmem>>, vector<1x1x32xf32>
    %412 = vector.shape_cast %411 : vector<1x1x32xf32> to vector<1x32xf32>
    %413 = vector.broadcast %412 : vector<1x32xf32> to vector<2x32xf32>
    %414 = arith.addf %410, %413 : vector<2x32xf32>
    %415 = vector.shape_cast %398 : vector<32x32xf32> to vector<2x16x32xf32>
    %416 = vector.shape_cast %414 : vector<2x32xf32> to vector<2x1x32xf32>
    %417 = vector.broadcast %416 : vector<2x1x32xf32> to vector<2x16x32xf32>
    %418 = arith.addf %415, %417 : vector<2x16x32xf32>
    %c0_217 = arith.constant 0 : index
    %c0_218 = arith.constant 0 : index
    %c160 = arith.constant 160 : index
    %419 = vector.load %arg18[%c0_217, %c0_218, %c160] : memref<2x1x384xf32, #tpu.memory_space<vmem>>, vector<1x1x32xf32>
    %420 = vector.shape_cast %419 : vector<1x1x32xf32> to vector<1x32xf32>
    %c0_219 = arith.constant 0 : index
    %c0_220 = arith.constant 0 : index
    %c192_221 = arith.constant 192 : index
    %421 = vector.load %arg18[%c0_219, %c0_220, %c192_221] : memref<2x1x384xf32, #tpu.memory_space<vmem>>, vector<1x1x32xf32>
    %422 = vector.shape_cast %421 : vector<1x1x32xf32> to vector<1x32xf32>
    %cst_222 = arith.constant dense<0.000000e+00> : vector<2x16xf32>
    %423 = vector.multi_reduction <add>, %418, %cst_222 [2] : vector<2x16x32xf32> to vector<2x16xf32>
    %424 = vector.shape_cast %423 : vector<2x16xf32> to vector<2x16x1xf32>
    %cst_223 = arith.constant 3.200000e+01 : f32
    %425 = vector.broadcast %cst_223 : f32 to vector<2x16x1xf32>
    %426 = arith.divf %424, %425 : vector<2x16x1xf32>
    %427 = vector.broadcast %426 : vector<2x16x1xf32> to vector<2x16x32xf32>
    %428 = arith.subf %418, %427 : vector<2x16x32xf32>
    %429 = arith.mulf %428, %428 : vector<2x16x32xf32>
    %cst_224 = arith.constant dense<0.000000e+00> : vector<2x16xf32>
    %430 = vector.multi_reduction <add>, %429, %cst_224 [2] : vector<2x16x32xf32> to vector<2x16xf32>
    %431 = vector.shape_cast %430 : vector<2x16xf32> to vector<2x16x1xf32>
    %cst_225 = arith.constant 3.200000e+01 : f32
    %432 = vector.broadcast %cst_225 : f32 to vector<2x16x1xf32>
    %433 = arith.divf %431, %432 : vector<2x16x1xf32>
    %cst_226 = arith.constant 9.99999974E-6 : f32
    %434 = vector.broadcast %cst_226 : f32 to vector<2x16x1xf32>
    %435 = arith.addf %433, %434 : vector<2x16x1xf32>
    %436 = math.rsqrt %435 : vector<2x16x1xf32>
    %437 = vector.broadcast %436 : vector<2x16x1xf32> to vector<2x16x32xf32>
    %438 = arith.mulf %428, %437 : vector<2x16x32xf32>
    %439 = vector.shape_cast %420 : vector<1x32xf32> to vector<1x1x32xf32>
    %440 = vector.broadcast %439 : vector<1x1x32xf32> to vector<2x16x32xf32>
    %441 = arith.mulf %438, %440 : vector<2x16x32xf32>
    %442 = vector.shape_cast %422 : vector<1x32xf32> to vector<1x1x32xf32>
    %443 = vector.broadcast %442 : vector<1x1x32xf32> to vector<2x16x32xf32>
    %444 = arith.addf %441, %443 : vector<2x16x32xf32>
    %445 = vector.shape_cast %444 : vector<2x16x32xf32> to vector<32x32xf32>
    %446 = arith.truncf %445 : vector<32x32xf32> to vector<32x32xbf16>
    %c0_227 = arith.constant 0 : index
    %c0_228 = arith.constant 0 : index
    %c64_229 = arith.constant 64 : index
    %447 = vector.load %arg16[%c0_227, %c0_228, %c64_229] : memref<2x32x128xbf16, #tpu.memory_space<vmem>>, vector<1x32x64xbf16>
    %448 = vector.shape_cast %447 : vector<1x32x64xbf16> to vector<32x64xbf16>
    %cst_230 = arith.constant dense<0.000000e+00> : vector<32x64xf32>
    %449 = tpu.matmul %446, %448, %cst_230 {dimension_numbers = #tpu.dot_dimension_numbers<[1], [0], [0], [1], [0, 0, 1, 1], [], []>} : vector<32x32xbf16>, vector<32x64xbf16>, vector<32x64xf32> -> vector<32x64xf32>
    %c0_231 = arith.constant 0 : index
    %c0_232 = arith.constant 0 : index
    %c224_233 = arith.constant 224 : index
    %450 = vector.load %arg18[%c0_231, %c0_232, %c224_233] : memref<2x1x384xf32, #tpu.memory_space<vmem>>, vector<1x1x64xf32>
    %451 = vector.shape_cast %450 : vector<1x1x64xf32> to vector<1x64xf32>
    %452 = vector.broadcast %451 : vector<1x64xf32> to vector<32x64xf32>
    %453 = arith.addf %449, %452 : vector<32x64xf32>
    %cst_234 = arith.constant 0.000000e+00 : f32
    %454 = vector.broadcast %cst_234 : f32 to vector<32x64xf32>
    %455 = arith.maximumf %453, %454 : vector<32x64xf32>
    %456 = arith.truncf %455 : vector<32x64xf32> to vector<32x64xbf16>
    %c0_235 = arith.constant 0 : index
    %c0_236 = arith.constant 0 : index
    %c0_237 = arith.constant 0 : index
    %457 = vector.load %arg17[%c0_235, %c0_236, %c0_237] : memref<2x64x32xbf16, #tpu.memory_space<vmem>>, vector<1x64x32xbf16>
    %458 = vector.shape_cast %457 : vector<1x64x32xbf16> to vector<64x32xbf16>
    %cst_238 = arith.constant dense<0.000000e+00> : vector<32x32xf32>
    %459 = tpu.matmul %456, %458, %cst_238 {dimension_numbers = #tpu.dot_dimension_numbers<[1], [0], [0], [1], [0, 0, 1, 1], [], []>} : vector<32x64xbf16>, vector<64x32xbf16>, vector<32x32xf32> -> vector<32x32xf32>
    %c0_239 = arith.constant 0 : index
    %c0_240 = arith.constant 0 : index
    %c288_241 = arith.constant 288 : index
    %460 = vector.load %arg18[%c0_239, %c0_240, %c288_241] : memref<2x1x384xf32, #tpu.memory_space<vmem>>, vector<1x1x32xf32>
    %461 = vector.shape_cast %460 : vector<1x1x32xf32> to vector<1x32xf32>
    %462 = vector.broadcast %461 : vector<1x32xf32> to vector<32x32xf32>
    %463 = arith.addf %459, %462 : vector<32x32xf32>
    %464 = arith.addf %445, %463 : vector<32x32xf32>
    %c0_242 = arith.constant 0 : index
    %c0_243 = arith.constant 0 : index
    %c320_244 = arith.constant 320 : index
    %465 = vector.load %arg18[%c0_242, %c0_243, %c320_244] : memref<2x1x384xf32, #tpu.memory_space<vmem>>, vector<1x1x32xf32>
    %466 = vector.shape_cast %465 : vector<1x1x32xf32> to vector<1x32xf32>
    %c0_245 = arith.constant 0 : index
    %c0_246 = arith.constant 0 : index
    %c352 = arith.constant 352 : index
    %467 = vector.load %arg18[%c0_245, %c0_246, %c352] : memref<2x1x384xf32, #tpu.memory_space<vmem>>, vector<1x1x32xf32>
    %468 = vector.shape_cast %467 : vector<1x1x32xf32> to vector<1x32xf32>
    %cst_247 = arith.constant dense<0.000000e+00> : vector<32xf32>
    %469 = vector.multi_reduction <add>, %464, %cst_247 [1] : vector<32x32xf32> to vector<32xf32>
    %470 = vector.shape_cast %469 : vector<32xf32> to vector<32x1xf32>
    %cst_248 = arith.constant 3.200000e+01 : f32
    %471 = vector.broadcast %cst_248 : f32 to vector<32x1xf32>
    %472 = arith.divf %470, %471 : vector<32x1xf32>
    %473 = vector.broadcast %472 : vector<32x1xf32> to vector<32x32xf32>
    %474 = arith.subf %464, %473 : vector<32x32xf32>
    %475 = arith.mulf %474, %474 : vector<32x32xf32>
    %cst_249 = arith.constant dense<0.000000e+00> : vector<32xf32>
    %476 = vector.multi_reduction <add>, %475, %cst_249 [1] : vector<32x32xf32> to vector<32xf32>
    %477 = vector.shape_cast %476 : vector<32xf32> to vector<32x1xf32>
    %cst_250 = arith.constant 3.200000e+01 : f32
    %478 = vector.broadcast %cst_250 : f32 to vector<32x1xf32>
    %479 = arith.divf %477, %478 : vector<32x1xf32>
    %cst_251 = arith.constant 9.99999974E-6 : f32
    %480 = vector.broadcast %cst_251 : f32 to vector<32x1xf32>
    %481 = arith.addf %479, %480 : vector<32x1xf32>
    %482 = math.rsqrt %481 : vector<32x1xf32>
    %483 = vector.broadcast %482 : vector<32x1xf32> to vector<32x32xf32>
    %484 = arith.mulf %474, %483 : vector<32x32xf32>
    %485 = vector.broadcast %466 : vector<1x32xf32> to vector<32x32xf32>
    %486 = arith.mulf %484, %485 : vector<32x32xf32>
    %487 = vector.broadcast %468 : vector<1x32xf32> to vector<32x32xf32>
    %488 = arith.addf %486, %487 : vector<32x32xf32>
    %c1_252 = arith.constant 1 : index
    %c0_253 = arith.constant 0 : index
    %c0_254 = arith.constant 0 : index
    %489 = vector.load %arg18[%c1_252, %c0_253, %c0_254] : memref<2x1x384xf32, #tpu.memory_space<vmem>>, vector<1x1x32xf32>
    %490 = vector.shape_cast %489 : vector<1x1x32xf32> to vector<1x32xf32>
    %491 = arith.truncf %488 : vector<32x32xf32> to vector<32x32xbf16>
    %492 = vector.shape_cast %488 : vector<32x32xf32> to vector<2x16x32xf32>
    %493 = arith.truncf %492 : vector<2x16x32xf32> to vector<2x16x32xbf16>
    %c1_255 = arith.constant 1 : index
    %c0_256 = arith.constant 0 : index
    %c0_257 = arith.constant 0 : index
    %c0_258 = arith.constant 0 : index
    %494 = vector.load %arg13[%c1_255, %c0_256, %c0_257, %c0_258] : memref<2x4x32x32xbf16, #tpu.memory_space<vmem>>, vector<1x1x32x32xbf16>
    %495 = vector.shape_cast %494 : vector<1x1x32x32xbf16> to vector<32x32xbf16>
    %cst_259 = arith.constant dense<0.000000e+00> : vector<32x32xf32>
    %496 = tpu.matmul %491, %495, %cst_259 {dimension_numbers = #tpu.dot_dimension_numbers<[1], [0], [0], [1], [0, 0, 1, 1], [], []>} : vector<32x32xbf16>, vector<32x32xbf16>, vector<32x32xf32> -> vector<32x32xf32>
    %c1_260 = arith.constant 1 : index
    %c0_261 = arith.constant 0 : index
    %c0_262 = arith.constant 0 : index
    %c0_263 = arith.constant 0 : index
    %497 = vector.load %arg14[%c1_260, %c0_261, %c0_262, %c0_263] : memref<2x4x1x32xf32, #tpu.memory_space<vmem>>, vector<1x1x1x32xf32>
    %498 = vector.shape_cast %497 : vector<1x1x1x32xf32> to vector<1x32xf32>
    %499 = vector.shape_cast %498 : vector<1x32xf32> to vector<1x1x32xf32>
    %500 = vector.broadcast %499 : vector<1x1x32xf32> to vector<2x16x32xf32>
    %501 = arith.mulf %492, %500 : vector<2x16x32xf32>
    %cst_264 = arith.constant dense<0.000000e+00> : vector<2x16xf32>
    %502 = vector.multi_reduction <add>, %501, %cst_264 [2] : vector<2x16x32xf32> to vector<2x16xf32>
    %503 = vector.shape_cast %496 : vector<32x32xf32> to vector<2x16x32xf32>
    %504 = arith.truncf %503 : vector<2x16x32xf32> to vector<2x16x32xbf16>
    "tpu.trace_start"() <{level = 10 : i32, message = "bqd,bkd->bqk"}> : () -> ()
    %cst_265 = arith.constant dense<0.000000e+00> : vector<2x16x16xf32>
    %505 = tpu.matmul %504, %493, %cst_265 {dimension_numbers = #tpu.dot_dimension_numbers<[2], [2], [1], [1], [0, 0, 0, 1, 1, 1], [0], [0]>} : vector<2x16x32xbf16>, vector<2x16x32xbf16>, vector<2x16x16xf32> -> vector<2x16x16xf32>
    "tpu.trace_stop"() : () -> ()
    %506 = vector.shape_cast %502 : vector<2x16xf32> to vector<2x1x16xf32>
    %507 = vector.broadcast %506 : vector<2x1x16xf32> to vector<2x16x16xf32>
    %508 = arith.addf %505, %507 : vector<2x16x16xf32>
    %cst_266 = arith.constant dense<0xFF800000> : vector<2x16xf32>
    %509 = vector.multi_reduction <maximumf>, %508, %cst_266 [2] : vector<2x16x16xf32> to vector<2x16xf32>
    %510 = vector.shape_cast %509 : vector<2x16xf32> to vector<2x16x1xf32>
    %511 = vector.broadcast %510 : vector<2x16x1xf32> to vector<2x16x16xf32>
    %512 = arith.subf %508, %511 : vector<2x16x16xf32>
    %513 = math.exp %512 : vector<2x16x16xf32>
    %cst_267 = arith.constant dense<0.000000e+00> : vector<2x16xf32>
    %514 = vector.multi_reduction <add>, %513, %cst_267 [2] : vector<2x16x16xf32> to vector<2x16xf32>
    %515 = vector.shape_cast %514 : vector<2x16xf32> to vector<2x16x1xf32>
    %516 = tpu.reciprocal %515 {approx = true} : vector<2x16x1xf32> -> vector<2x16x1xf32>
    %517 = vector.broadcast %516 : vector<2x16x1xf32> to vector<2x16x16xf32>
    %518 = arith.mulf %513, %517 : vector<2x16x16xf32>
    %c1_268 = arith.constant 1 : index
    %c0_269 = arith.constant 0 : index
    %c0_270 = arith.constant 0 : index
    %c0_271 = arith.constant 0 : index
    %519 = vector.load %arg15[%c1_268, %c0_269, %c0_270, %c0_271] : memref<2x4x32x32xbf16, #tpu.memory_space<vmem>>, vector<1x1x32x32xbf16>
    %520 = vector.shape_cast %519 : vector<1x1x32x32xbf16> to vector<32x32xbf16>
    %cst_272 = arith.constant dense<0.000000e+00> : vector<32x32xf32>
    %521 = tpu.matmul %491, %520, %cst_272 {dimension_numbers = #tpu.dot_dimension_numbers<[1], [0], [0], [1], [0, 0, 1, 1], [], []>} : vector<32x32xbf16>, vector<32x32xbf16>, vector<32x32xf32> -> vector<32x32xf32>
    %522 = arith.truncf %518 : vector<2x16x16xf32> to vector<2x16x16xbf16>
    %523 = vector.shape_cast %521 : vector<32x32xf32> to vector<2x16x32xf32>
    %524 = arith.truncf %523 : vector<2x16x32xf32> to vector<2x16x32xbf16>
    "tpu.trace_start"() <{level = 10 : i32, message = "bqk,bkd->bqd"}> : () -> ()
    %cst_273 = arith.constant dense<0.000000e+00> : vector<2x16x32xf32>
    %525 = tpu.matmul %522, %524, %cst_273 {dimension_numbers = #tpu.dot_dimension_numbers<[2], [1], [1], [2], [0, 0, 0, 1, 1, 2], [0], [0]>} : vector<2x16x16xbf16>, vector<2x16x32xbf16>, vector<2x16x32xf32> -> vector<2x16x32xf32>
    "tpu.trace_stop"() : () -> ()
    %c1_274 = arith.constant 1 : index
    %c1_275 = arith.constant 1 : index
    %c0_276 = arith.constant 0 : index
    %c0_277 = arith.constant 0 : index
    %526 = vector.load %arg13[%c1_274, %c1_275, %c0_276, %c0_277] : memref<2x4x32x32xbf16, #tpu.memory_space<vmem>>, vector<1x1x32x32xbf16>
    %527 = vector.shape_cast %526 : vector<1x1x32x32xbf16> to vector<32x32xbf16>
    %cst_278 = arith.constant dense<0.000000e+00> : vector<32x32xf32>
    %528 = tpu.matmul %491, %527, %cst_278 {dimension_numbers = #tpu.dot_dimension_numbers<[1], [0], [0], [1], [0, 0, 1, 1], [], []>} : vector<32x32xbf16>, vector<32x32xbf16>, vector<32x32xf32> -> vector<32x32xf32>
    %c1_279 = arith.constant 1 : index
    %c1_280 = arith.constant 1 : index
    %c0_281 = arith.constant 0 : index
    %c0_282 = arith.constant 0 : index
    %529 = vector.load %arg14[%c1_279, %c1_280, %c0_281, %c0_282] : memref<2x4x1x32xf32, #tpu.memory_space<vmem>>, vector<1x1x1x32xf32>
    %530 = vector.shape_cast %529 : vector<1x1x1x32xf32> to vector<1x32xf32>
    %531 = vector.shape_cast %530 : vector<1x32xf32> to vector<1x1x32xf32>
    %532 = vector.broadcast %531 : vector<1x1x32xf32> to vector<2x16x32xf32>
    %533 = arith.mulf %492, %532 : vector<2x16x32xf32>
    %cst_283 = arith.constant dense<0.000000e+00> : vector<2x16xf32>
    %534 = vector.multi_reduction <add>, %533, %cst_283 [2] : vector<2x16x32xf32> to vector<2x16xf32>
    %535 = vector.shape_cast %528 : vector<32x32xf32> to vector<2x16x32xf32>
    %536 = arith.truncf %535 : vector<2x16x32xf32> to vector<2x16x32xbf16>
    "tpu.trace_start"() <{level = 10 : i32, message = "bqd,bkd->bqk"}> : () -> ()
    %cst_284 = arith.constant dense<0.000000e+00> : vector<2x16x16xf32>
    %537 = tpu.matmul %536, %493, %cst_284 {dimension_numbers = #tpu.dot_dimension_numbers<[2], [2], [1], [1], [0, 0, 0, 1, 1, 1], [0], [0]>} : vector<2x16x32xbf16>, vector<2x16x32xbf16>, vector<2x16x16xf32> -> vector<2x16x16xf32>
    "tpu.trace_stop"() : () -> ()
    %538 = vector.shape_cast %534 : vector<2x16xf32> to vector<2x1x16xf32>
    %539 = vector.broadcast %538 : vector<2x1x16xf32> to vector<2x16x16xf32>
    %540 = arith.addf %537, %539 : vector<2x16x16xf32>
    %cst_285 = arith.constant dense<0xFF800000> : vector<2x16xf32>
    %541 = vector.multi_reduction <maximumf>, %540, %cst_285 [2] : vector<2x16x16xf32> to vector<2x16xf32>
    %542 = vector.shape_cast %541 : vector<2x16xf32> to vector<2x16x1xf32>
    %543 = vector.broadcast %542 : vector<2x16x1xf32> to vector<2x16x16xf32>
    %544 = arith.subf %540, %543 : vector<2x16x16xf32>
    %545 = math.exp %544 : vector<2x16x16xf32>
    %cst_286 = arith.constant dense<0.000000e+00> : vector<2x16xf32>
    %546 = vector.multi_reduction <add>, %545, %cst_286 [2] : vector<2x16x16xf32> to vector<2x16xf32>
    %547 = vector.shape_cast %546 : vector<2x16xf32> to vector<2x16x1xf32>
    %548 = tpu.reciprocal %547 {approx = true} : vector<2x16x1xf32> -> vector<2x16x1xf32>
    %549 = vector.broadcast %548 : vector<2x16x1xf32> to vector<2x16x16xf32>
    %550 = arith.mulf %545, %549 : vector<2x16x16xf32>
    %c1_287 = arith.constant 1 : index
    %c1_288 = arith.constant 1 : index
    %c0_289 = arith.constant 0 : index
    %c0_290 = arith.constant 0 : index
    %551 = vector.load %arg15[%c1_287, %c1_288, %c0_289, %c0_290] : memref<2x4x32x32xbf16, #tpu.memory_space<vmem>>, vector<1x1x32x32xbf16>
    %552 = vector.shape_cast %551 : vector<1x1x32x32xbf16> to vector<32x32xbf16>
    %cst_291 = arith.constant dense<0.000000e+00> : vector<32x32xf32>
    %553 = tpu.matmul %491, %552, %cst_291 {dimension_numbers = #tpu.dot_dimension_numbers<[1], [0], [0], [1], [0, 0, 1, 1], [], []>} : vector<32x32xbf16>, vector<32x32xbf16>, vector<32x32xf32> -> vector<32x32xf32>
    %554 = arith.truncf %550 : vector<2x16x16xf32> to vector<2x16x16xbf16>
    %555 = vector.shape_cast %553 : vector<32x32xf32> to vector<2x16x32xf32>
    %556 = arith.truncf %555 : vector<2x16x32xf32> to vector<2x16x32xbf16>
    "tpu.trace_start"() <{level = 10 : i32, message = "bqk,bkd->bqd"}> : () -> ()
    %cst_292 = arith.constant dense<0.000000e+00> : vector<2x16x32xf32>
    %557 = tpu.matmul %554, %556, %cst_292 {dimension_numbers = #tpu.dot_dimension_numbers<[2], [1], [1], [2], [0, 0, 0, 1, 1, 2], [0], [0]>} : vector<2x16x16xbf16>, vector<2x16x32xbf16>, vector<2x16x32xf32> -> vector<2x16x32xf32>
    "tpu.trace_stop"() : () -> ()
    %558 = arith.addf %525, %557 : vector<2x16x32xf32>
    %c1_293 = arith.constant 1 : index
    %c2_294 = arith.constant 2 : index
    %c0_295 = arith.constant 0 : index
    %c0_296 = arith.constant 0 : index
    %559 = vector.load %arg13[%c1_293, %c2_294, %c0_295, %c0_296] : memref<2x4x32x32xbf16, #tpu.memory_space<vmem>>, vector<1x1x32x32xbf16>
    %560 = vector.shape_cast %559 : vector<1x1x32x32xbf16> to vector<32x32xbf16>
    %cst_297 = arith.constant dense<0.000000e+00> : vector<32x32xf32>
    %561 = tpu.matmul %491, %560, %cst_297 {dimension_numbers = #tpu.dot_dimension_numbers<[1], [0], [0], [1], [0, 0, 1, 1], [], []>} : vector<32x32xbf16>, vector<32x32xbf16>, vector<32x32xf32> -> vector<32x32xf32>
    %c1_298 = arith.constant 1 : index
    %c2_299 = arith.constant 2 : index
    %c0_300 = arith.constant 0 : index
    %c0_301 = arith.constant 0 : index
    %562 = vector.load %arg14[%c1_298, %c2_299, %c0_300, %c0_301] : memref<2x4x1x32xf32, #tpu.memory_space<vmem>>, vector<1x1x1x32xf32>
    %563 = vector.shape_cast %562 : vector<1x1x1x32xf32> to vector<1x32xf32>
    %564 = vector.shape_cast %563 : vector<1x32xf32> to vector<1x1x32xf32>
    %565 = vector.broadcast %564 : vector<1x1x32xf32> to vector<2x16x32xf32>
    %566 = arith.mulf %492, %565 : vector<2x16x32xf32>
    %cst_302 = arith.constant dense<0.000000e+00> : vector<2x16xf32>
    %567 = vector.multi_reduction <add>, %566, %cst_302 [2] : vector<2x16x32xf32> to vector<2x16xf32>
    %568 = vector.shape_cast %561 : vector<32x32xf32> to vector<2x16x32xf32>
    %569 = arith.truncf %568 : vector<2x16x32xf32> to vector<2x16x32xbf16>
    "tpu.trace_start"() <{level = 10 : i32, message = "bqd,bkd->bqk"}> : () -> ()
    %cst_303 = arith.constant dense<0.000000e+00> : vector<2x16x16xf32>
    %570 = tpu.matmul %569, %493, %cst_303 {dimension_numbers = #tpu.dot_dimension_numbers<[2], [2], [1], [1], [0, 0, 0, 1, 1, 1], [0], [0]>} : vector<2x16x32xbf16>, vector<2x16x32xbf16>, vector<2x16x16xf32> -> vector<2x16x16xf32>
    "tpu.trace_stop"() : () -> ()
    %571 = vector.shape_cast %567 : vector<2x16xf32> to vector<2x1x16xf32>
    %572 = vector.broadcast %571 : vector<2x1x16xf32> to vector<2x16x16xf32>
    %573 = arith.addf %570, %572 : vector<2x16x16xf32>
    %cst_304 = arith.constant dense<0xFF800000> : vector<2x16xf32>
    %574 = vector.multi_reduction <maximumf>, %573, %cst_304 [2] : vector<2x16x16xf32> to vector<2x16xf32>
    %575 = vector.shape_cast %574 : vector<2x16xf32> to vector<2x16x1xf32>
    %576 = vector.broadcast %575 : vector<2x16x1xf32> to vector<2x16x16xf32>
    %577 = arith.subf %573, %576 : vector<2x16x16xf32>
    %578 = math.exp %577 : vector<2x16x16xf32>
    %cst_305 = arith.constant dense<0.000000e+00> : vector<2x16xf32>
    %579 = vector.multi_reduction <add>, %578, %cst_305 [2] : vector<2x16x16xf32> to vector<2x16xf32>
    %580 = vector.shape_cast %579 : vector<2x16xf32> to vector<2x16x1xf32>
    %581 = tpu.reciprocal %580 {approx = true} : vector<2x16x1xf32> -> vector<2x16x1xf32>
    %582 = vector.broadcast %581 : vector<2x16x1xf32> to vector<2x16x16xf32>
    %583 = arith.mulf %578, %582 : vector<2x16x16xf32>
    %c1_306 = arith.constant 1 : index
    %c2_307 = arith.constant 2 : index
    %c0_308 = arith.constant 0 : index
    %c0_309 = arith.constant 0 : index
    %584 = vector.load %arg15[%c1_306, %c2_307, %c0_308, %c0_309] : memref<2x4x32x32xbf16, #tpu.memory_space<vmem>>, vector<1x1x32x32xbf16>
    %585 = vector.shape_cast %584 : vector<1x1x32x32xbf16> to vector<32x32xbf16>
    %cst_310 = arith.constant dense<0.000000e+00> : vector<32x32xf32>
    %586 = tpu.matmul %491, %585, %cst_310 {dimension_numbers = #tpu.dot_dimension_numbers<[1], [0], [0], [1], [0, 0, 1, 1], [], []>} : vector<32x32xbf16>, vector<32x32xbf16>, vector<32x32xf32> -> vector<32x32xf32>
    %587 = arith.truncf %583 : vector<2x16x16xf32> to vector<2x16x16xbf16>
    %588 = vector.shape_cast %586 : vector<32x32xf32> to vector<2x16x32xf32>
    %589 = arith.truncf %588 : vector<2x16x32xf32> to vector<2x16x32xbf16>
    "tpu.trace_start"() <{level = 10 : i32, message = "bqk,bkd->bqd"}> : () -> ()
    %cst_311 = arith.constant dense<0.000000e+00> : vector<2x16x32xf32>
    %590 = tpu.matmul %587, %589, %cst_311 {dimension_numbers = #tpu.dot_dimension_numbers<[2], [1], [1], [2], [0, 0, 0, 1, 1, 2], [0], [0]>} : vector<2x16x16xbf16>, vector<2x16x32xbf16>, vector<2x16x32xf32> -> vector<2x16x32xf32>
    "tpu.trace_stop"() : () -> ()
    %591 = arith.addf %558, %590 : vector<2x16x32xf32>
    %c1_312 = arith.constant 1 : index
    %c3_313 = arith.constant 3 : index
    %c0_314 = arith.constant 0 : index
    %c0_315 = arith.constant 0 : index
    %592 = vector.load %arg13[%c1_312, %c3_313, %c0_314, %c0_315] : memref<2x4x32x32xbf16, #tpu.memory_space<vmem>>, vector<1x1x32x32xbf16>
    %593 = vector.shape_cast %592 : vector<1x1x32x32xbf16> to vector<32x32xbf16>
    %cst_316 = arith.constant dense<0.000000e+00> : vector<32x32xf32>
    %594 = tpu.matmul %491, %593, %cst_316 {dimension_numbers = #tpu.dot_dimension_numbers<[1], [0], [0], [1], [0, 0, 1, 1], [], []>} : vector<32x32xbf16>, vector<32x32xbf16>, vector<32x32xf32> -> vector<32x32xf32>
    %c1_317 = arith.constant 1 : index
    %c3_318 = arith.constant 3 : index
    %c0_319 = arith.constant 0 : index
    %c0_320 = arith.constant 0 : index
    %595 = vector.load %arg14[%c1_317, %c3_318, %c0_319, %c0_320] : memref<2x4x1x32xf32, #tpu.memory_space<vmem>>, vector<1x1x1x32xf32>
    %596 = vector.shape_cast %595 : vector<1x1x1x32xf32> to vector<1x32xf32>
    %597 = vector.shape_cast %596 : vector<1x32xf32> to vector<1x1x32xf32>
    %598 = vector.broadcast %597 : vector<1x1x32xf32> to vector<2x16x32xf32>
    %599 = arith.mulf %492, %598 : vector<2x16x32xf32>
    %cst_321 = arith.constant dense<0.000000e+00> : vector<2x16xf32>
    %600 = vector.multi_reduction <add>, %599, %cst_321 [2] : vector<2x16x32xf32> to vector<2x16xf32>
    %601 = vector.shape_cast %594 : vector<32x32xf32> to vector<2x16x32xf32>
    %602 = arith.truncf %601 : vector<2x16x32xf32> to vector<2x16x32xbf16>
    "tpu.trace_start"() <{level = 10 : i32, message = "bqd,bkd->bqk"}> : () -> ()
    %cst_322 = arith.constant dense<0.000000e+00> : vector<2x16x16xf32>
    %603 = tpu.matmul %602, %493, %cst_322 {dimension_numbers = #tpu.dot_dimension_numbers<[2], [2], [1], [1], [0, 0, 0, 1, 1, 1], [0], [0]>} : vector<2x16x32xbf16>, vector<2x16x32xbf16>, vector<2x16x16xf32> -> vector<2x16x16xf32>
    "tpu.trace_stop"() : () -> ()
    %604 = vector.shape_cast %600 : vector<2x16xf32> to vector<2x1x16xf32>
    %605 = vector.broadcast %604 : vector<2x1x16xf32> to vector<2x16x16xf32>
    %606 = arith.addf %603, %605 : vector<2x16x16xf32>
    %cst_323 = arith.constant dense<0xFF800000> : vector<2x16xf32>
    %607 = vector.multi_reduction <maximumf>, %606, %cst_323 [2] : vector<2x16x16xf32> to vector<2x16xf32>
    %608 = vector.shape_cast %607 : vector<2x16xf32> to vector<2x16x1xf32>
    %609 = vector.broadcast %608 : vector<2x16x1xf32> to vector<2x16x16xf32>
    %610 = arith.subf %606, %609 : vector<2x16x16xf32>
    %611 = math.exp %610 : vector<2x16x16xf32>
    %cst_324 = arith.constant dense<0.000000e+00> : vector<2x16xf32>
    %612 = vector.multi_reduction <add>, %611, %cst_324 [2] : vector<2x16x16xf32> to vector<2x16xf32>
    %613 = vector.shape_cast %612 : vector<2x16xf32> to vector<2x16x1xf32>
    %614 = tpu.reciprocal %613 {approx = true} : vector<2x16x1xf32> -> vector<2x16x1xf32>
    %615 = vector.broadcast %614 : vector<2x16x1xf32> to vector<2x16x16xf32>
    %616 = arith.mulf %611, %615 : vector<2x16x16xf32>
    %c1_325 = arith.constant 1 : index
    %c3_326 = arith.constant 3 : index
    %c0_327 = arith.constant 0 : index
    %c0_328 = arith.constant 0 : index
    %617 = vector.load %arg15[%c1_325, %c3_326, %c0_327, %c0_328] : memref<2x4x32x32xbf16, #tpu.memory_space<vmem>>, vector<1x1x32x32xbf16>
    %618 = vector.shape_cast %617 : vector<1x1x32x32xbf16> to vector<32x32xbf16>
    %cst_329 = arith.constant dense<0.000000e+00> : vector<32x32xf32>
    %619 = tpu.matmul %491, %618, %cst_329 {dimension_numbers = #tpu.dot_dimension_numbers<[1], [0], [0], [1], [0, 0, 1, 1], [], []>} : vector<32x32xbf16>, vector<32x32xbf16>, vector<32x32xf32> -> vector<32x32xf32>
    %620 = arith.truncf %616 : vector<2x16x16xf32> to vector<2x16x16xbf16>
    %621 = vector.shape_cast %619 : vector<32x32xf32> to vector<2x16x32xf32>
    %622 = arith.truncf %621 : vector<2x16x32xf32> to vector<2x16x32xbf16>
    "tpu.trace_start"() <{level = 10 : i32, message = "bqk,bkd->bqd"}> : () -> ()
    %cst_330 = arith.constant dense<0.000000e+00> : vector<2x16x32xf32>
    %623 = tpu.matmul %620, %622, %cst_330 {dimension_numbers = #tpu.dot_dimension_numbers<[2], [1], [1], [2], [0, 0, 0, 1, 1, 2], [0], [0]>} : vector<2x16x16xbf16>, vector<2x16x32xbf16>, vector<2x16x32xf32> -> vector<2x16x32xf32>
    "tpu.trace_stop"() : () -> ()
    %624 = arith.addf %591, %623 : vector<2x16x32xf32>
    %625 = vector.shape_cast %624 : vector<2x16x32xf32> to vector<32x32xf32>
    %626 = vector.broadcast %490 : vector<1x32xf32> to vector<32x32xf32>
    %627 = arith.addf %625, %626 : vector<32x32xf32>
    %628 = arith.addf %488, %627 : vector<32x32xf32>
    %c1_331 = arith.constant 1 : index
    %c0_332 = arith.constant 0 : index
    %c32_333 = arith.constant 32 : index
    %629 = vector.load %arg18[%c1_331, %c0_332, %c32_333] : memref<2x1x384xf32, #tpu.memory_space<vmem>>, vector<1x1x32xf32>
    %630 = vector.shape_cast %629 : vector<1x1x32xf32> to vector<1x32xf32>
    %c1_334 = arith.constant 1 : index
    %c0_335 = arith.constant 0 : index
    %c64_336 = arith.constant 64 : index
    %631 = vector.load %arg18[%c1_334, %c0_335, %c64_336] : memref<2x1x384xf32, #tpu.memory_space<vmem>>, vector<1x1x32xf32>
    %632 = vector.shape_cast %631 : vector<1x1x32xf32> to vector<1x32xf32>
    %cst_337 = arith.constant dense<0.000000e+00> : vector<32xf32>
    %633 = vector.multi_reduction <add>, %628, %cst_337 [1] : vector<32x32xf32> to vector<32xf32>
    %634 = vector.shape_cast %633 : vector<32xf32> to vector<32x1xf32>
    %cst_338 = arith.constant 3.200000e+01 : f32
    %635 = vector.broadcast %cst_338 : f32 to vector<32x1xf32>
    %636 = arith.divf %634, %635 : vector<32x1xf32>
    %637 = vector.broadcast %636 : vector<32x1xf32> to vector<32x32xf32>
    %638 = arith.subf %628, %637 : vector<32x32xf32>
    %639 = arith.mulf %638, %638 : vector<32x32xf32>
    %cst_339 = arith.constant dense<0.000000e+00> : vector<32xf32>
    %640 = vector.multi_reduction <add>, %639, %cst_339 [1] : vector<32x32xf32> to vector<32xf32>
    %641 = vector.shape_cast %640 : vector<32xf32> to vector<32x1xf32>
    %cst_340 = arith.constant 3.200000e+01 : f32
    %642 = vector.broadcast %cst_340 : f32 to vector<32x1xf32>
    %643 = arith.divf %641, %642 : vector<32x1xf32>
    %cst_341 = arith.constant 9.99999974E-6 : f32
    %644 = vector.broadcast %cst_341 : f32 to vector<32x1xf32>
    %645 = arith.addf %643, %644 : vector<32x1xf32>
    %646 = math.rsqrt %645 : vector<32x1xf32>
    %647 = vector.broadcast %646 : vector<32x1xf32> to vector<32x32xf32>
    %648 = arith.mulf %638, %647 : vector<32x32xf32>
    %649 = vector.broadcast %630 : vector<1x32xf32> to vector<32x32xf32>
    %650 = arith.mulf %648, %649 : vector<32x32xf32>
    %651 = vector.broadcast %632 : vector<1x32xf32> to vector<32x32xf32>
    %652 = arith.addf %650, %651 : vector<32x32xf32>
    %653 = arith.truncf %233 : vector<2x32xf32> to vector<2x32xbf16>
    %c1_342 = arith.constant 1 : index
    %c0_343 = arith.constant 0 : index
    %c0_344 = arith.constant 0 : index
    %654 = vector.load %arg16[%c1_342, %c0_343, %c0_344] : memref<2x32x128xbf16, #tpu.memory_space<vmem>>, vector<1x32x32xbf16>
    %655 = vector.shape_cast %654 : vector<1x32x32xbf16> to vector<32x32xbf16>
    %cst_345 = arith.constant dense<0.000000e+00> : vector<2x32xf32>
    %656 = tpu.matmul %653, %655, %cst_345 {dimension_numbers = #tpu.dot_dimension_numbers<[1], [0], [0], [1], [0, 0, 1, 1], [], []>} : vector<2x32xbf16>, vector<32x32xbf16>, vector<2x32xf32> -> vector<2x32xf32>
    %c1_346 = arith.constant 1 : index
    %c0_347 = arith.constant 0 : index
    %c96_348 = arith.constant 96 : index
    %657 = vector.load %arg18[%c1_346, %c0_347, %c96_348] : memref<2x1x384xf32, #tpu.memory_space<vmem>>, vector<1x1x32xf32>
    %658 = vector.shape_cast %657 : vector<1x1x32xf32> to vector<1x32xf32>
    %659 = vector.broadcast %658 : vector<1x32xf32> to vector<2x32xf32>
    %660 = arith.addf %656, %659 : vector<2x32xf32>
    %661 = arith.truncf %660 : vector<2x32xf32> to vector<2x32xbf16>
    %c1_349 = arith.constant 1 : index
    %c0_350 = arith.constant 0 : index
    %c32_351 = arith.constant 32 : index
    %662 = vector.load %arg16[%c1_349, %c0_350, %c32_351] : memref<2x32x128xbf16, #tpu.memory_space<vmem>>, vector<1x32x32xbf16>
    %663 = vector.shape_cast %662 : vector<1x32x32xbf16> to vector<32x32xbf16>
    %cst_352 = arith.constant dense<0.000000e+00> : vector<2x32xf32>
    %664 = tpu.matmul %661, %663, %cst_352 {dimension_numbers = #tpu.dot_dimension_numbers<[1], [0], [0], [1], [0, 0, 1, 1], [], []>} : vector<2x32xbf16>, vector<32x32xbf16>, vector<2x32xf32> -> vector<2x32xf32>
    %c1_353 = arith.constant 1 : index
    %c0_354 = arith.constant 0 : index
    %c128_355 = arith.constant 128 : index
    %665 = vector.load %arg18[%c1_353, %c0_354, %c128_355] : memref<2x1x384xf32, #tpu.memory_space<vmem>>, vector<1x1x32xf32>
    %666 = vector.shape_cast %665 : vector<1x1x32xf32> to vector<1x32xf32>
    %667 = vector.broadcast %666 : vector<1x32xf32> to vector<2x32xf32>
    %668 = arith.addf %664, %667 : vector<2x32xf32>
    %669 = vector.shape_cast %652 : vector<32x32xf32> to vector<2x16x32xf32>
    %670 = vector.shape_cast %668 : vector<2x32xf32> to vector<2x1x32xf32>
    %671 = vector.broadcast %670 : vector<2x1x32xf32> to vector<2x16x32xf32>
    %672 = arith.addf %669, %671 : vector<2x16x32xf32>
    %c1_356 = arith.constant 1 : index
    %c0_357 = arith.constant 0 : index
    %c160_358 = arith.constant 160 : index
    %673 = vector.load %arg18[%c1_356, %c0_357, %c160_358] : memref<2x1x384xf32, #tpu.memory_space<vmem>>, vector<1x1x32xf32>
    %674 = vector.shape_cast %673 : vector<1x1x32xf32> to vector<1x32xf32>
    %c1_359 = arith.constant 1 : index
    %c0_360 = arith.constant 0 : index
    %c192_361 = arith.constant 192 : index
    %675 = vector.load %arg18[%c1_359, %c0_360, %c192_361] : memref<2x1x384xf32, #tpu.memory_space<vmem>>, vector<1x1x32xf32>
    %676 = vector.shape_cast %675 : vector<1x1x32xf32> to vector<1x32xf32>
    %cst_362 = arith.constant dense<0.000000e+00> : vector<2x16xf32>
    %677 = vector.multi_reduction <add>, %672, %cst_362 [2] : vector<2x16x32xf32> to vector<2x16xf32>
    %678 = vector.shape_cast %677 : vector<2x16xf32> to vector<2x16x1xf32>
    %cst_363 = arith.constant 3.200000e+01 : f32
    %679 = vector.broadcast %cst_363 : f32 to vector<2x16x1xf32>
    %680 = arith.divf %678, %679 : vector<2x16x1xf32>
    %681 = vector.broadcast %680 : vector<2x16x1xf32> to vector<2x16x32xf32>
    %682 = arith.subf %672, %681 : vector<2x16x32xf32>
    %683 = arith.mulf %682, %682 : vector<2x16x32xf32>
    %cst_364 = arith.constant dense<0.000000e+00> : vector<2x16xf32>
    %684 = vector.multi_reduction <add>, %683, %cst_364 [2] : vector<2x16x32xf32> to vector<2x16xf32>
    %685 = vector.shape_cast %684 : vector<2x16xf32> to vector<2x16x1xf32>
    %cst_365 = arith.constant 3.200000e+01 : f32
    %686 = vector.broadcast %cst_365 : f32 to vector<2x16x1xf32>
    %687 = arith.divf %685, %686 : vector<2x16x1xf32>
    %cst_366 = arith.constant 9.99999974E-6 : f32
    %688 = vector.broadcast %cst_366 : f32 to vector<2x16x1xf32>
    %689 = arith.addf %687, %688 : vector<2x16x1xf32>
    %690 = math.rsqrt %689 : vector<2x16x1xf32>
    %691 = vector.broadcast %690 : vector<2x16x1xf32> to vector<2x16x32xf32>
    %692 = arith.mulf %682, %691 : vector<2x16x32xf32>
    %693 = vector.shape_cast %674 : vector<1x32xf32> to vector<1x1x32xf32>
    %694 = vector.broadcast %693 : vector<1x1x32xf32> to vector<2x16x32xf32>
    %695 = arith.mulf %692, %694 : vector<2x16x32xf32>
    %696 = vector.shape_cast %676 : vector<1x32xf32> to vector<1x1x32xf32>
    %697 = vector.broadcast %696 : vector<1x1x32xf32> to vector<2x16x32xf32>
    %698 = arith.addf %695, %697 : vector<2x16x32xf32>
    %699 = vector.shape_cast %698 : vector<2x16x32xf32> to vector<32x32xf32>
    %700 = arith.truncf %699 : vector<32x32xf32> to vector<32x32xbf16>
    %c1_367 = arith.constant 1 : index
    %c0_368 = arith.constant 0 : index
    %c64_369 = arith.constant 64 : index
    %701 = vector.load %arg16[%c1_367, %c0_368, %c64_369] : memref<2x32x128xbf16, #tpu.memory_space<vmem>>, vector<1x32x64xbf16>
    %702 = vector.shape_cast %701 : vector<1x32x64xbf16> to vector<32x64xbf16>
    %cst_370 = arith.constant dense<0.000000e+00> : vector<32x64xf32>
    %703 = tpu.matmul %700, %702, %cst_370 {dimension_numbers = #tpu.dot_dimension_numbers<[1], [0], [0], [1], [0, 0, 1, 1], [], []>} : vector<32x32xbf16>, vector<32x64xbf16>, vector<32x64xf32> -> vector<32x64xf32>
    %c1_371 = arith.constant 1 : index
    %c0_372 = arith.constant 0 : index
    %c224_373 = arith.constant 224 : index
    %704 = vector.load %arg18[%c1_371, %c0_372, %c224_373] : memref<2x1x384xf32, #tpu.memory_space<vmem>>, vector<1x1x64xf32>
    %705 = vector.shape_cast %704 : vector<1x1x64xf32> to vector<1x64xf32>
    %706 = vector.broadcast %705 : vector<1x64xf32> to vector<32x64xf32>
    %707 = arith.addf %703, %706 : vector<32x64xf32>
    %cst_374 = arith.constant 0.000000e+00 : f32
    %708 = vector.broadcast %cst_374 : f32 to vector<32x64xf32>
    %709 = arith.maximumf %707, %708 : vector<32x64xf32>
    %710 = arith.truncf %709 : vector<32x64xf32> to vector<32x64xbf16>
    %c1_375 = arith.constant 1 : index
    %c0_376 = arith.constant 0 : index
    %c0_377 = arith.constant 0 : index
    %711 = vector.load %arg17[%c1_375, %c0_376, %c0_377] : memref<2x64x32xbf16, #tpu.memory_space<vmem>>, vector<1x64x32xbf16>
    %712 = vector.shape_cast %711 : vector<1x64x32xbf16> to vector<64x32xbf16>
    %cst_378 = arith.constant dense<0.000000e+00> : vector<32x32xf32>
    %713 = tpu.matmul %710, %712, %cst_378 {dimension_numbers = #tpu.dot_dimension_numbers<[1], [0], [0], [1], [0, 0, 1, 1], [], []>} : vector<32x64xbf16>, vector<64x32xbf16>, vector<32x32xf32> -> vector<32x32xf32>
    %c1_379 = arith.constant 1 : index
    %c0_380 = arith.constant 0 : index
    %c288_381 = arith.constant 288 : index
    %714 = vector.load %arg18[%c1_379, %c0_380, %c288_381] : memref<2x1x384xf32, #tpu.memory_space<vmem>>, vector<1x1x32xf32>
    %715 = vector.shape_cast %714 : vector<1x1x32xf32> to vector<1x32xf32>
    %716 = vector.broadcast %715 : vector<1x32xf32> to vector<32x32xf32>
    %717 = arith.addf %713, %716 : vector<32x32xf32>
    %718 = arith.addf %699, %717 : vector<32x32xf32>
    %c1_382 = arith.constant 1 : index
    %c0_383 = arith.constant 0 : index
    %c320_384 = arith.constant 320 : index
    %719 = vector.load %arg18[%c1_382, %c0_383, %c320_384] : memref<2x1x384xf32, #tpu.memory_space<vmem>>, vector<1x1x32xf32>
    %720 = vector.shape_cast %719 : vector<1x1x32xf32> to vector<1x32xf32>
    %c1_385 = arith.constant 1 : index
    %c0_386 = arith.constant 0 : index
    %c352_387 = arith.constant 352 : index
    %721 = vector.load %arg18[%c1_385, %c0_386, %c352_387] : memref<2x1x384xf32, #tpu.memory_space<vmem>>, vector<1x1x32xf32>
    %722 = vector.shape_cast %721 : vector<1x1x32xf32> to vector<1x32xf32>
    %cst_388 = arith.constant dense<0.000000e+00> : vector<32xf32>
    %723 = vector.multi_reduction <add>, %718, %cst_388 [1] : vector<32x32xf32> to vector<32xf32>
    %724 = vector.shape_cast %723 : vector<32xf32> to vector<32x1xf32>
    %cst_389 = arith.constant 3.200000e+01 : f32
    %725 = vector.broadcast %cst_389 : f32 to vector<32x1xf32>
    %726 = arith.divf %724, %725 : vector<32x1xf32>
    %727 = vector.broadcast %726 : vector<32x1xf32> to vector<32x32xf32>
    %728 = arith.subf %718, %727 : vector<32x32xf32>
    %729 = arith.mulf %728, %728 : vector<32x32xf32>
    %cst_390 = arith.constant dense<0.000000e+00> : vector<32xf32>
    %730 = vector.multi_reduction <add>, %729, %cst_390 [1] : vector<32x32xf32> to vector<32xf32>
    %731 = vector.shape_cast %730 : vector<32xf32> to vector<32x1xf32>
    %cst_391 = arith.constant 3.200000e+01 : f32
    %732 = vector.broadcast %cst_391 : f32 to vector<32x1xf32>
    %733 = arith.divf %731, %732 : vector<32x1xf32>
    %cst_392 = arith.constant 9.99999974E-6 : f32
    %734 = vector.broadcast %cst_392 : f32 to vector<32x1xf32>
    %735 = arith.addf %733, %734 : vector<32x1xf32>
    %736 = math.rsqrt %735 : vector<32x1xf32>
    %737 = vector.broadcast %736 : vector<32x1xf32> to vector<32x32xf32>
    %738 = arith.mulf %728, %737 : vector<32x32xf32>
    %739 = vector.broadcast %720 : vector<1x32xf32> to vector<32x32xf32>
    %740 = arith.mulf %738, %739 : vector<32x32xf32>
    %741 = vector.broadcast %722 : vector<1x32xf32> to vector<32x32xf32>
    %742 = arith.addf %740, %741 : vector<32x32xf32>
    %743 = arith.truncf %742 : vector<32x32xf32> to vector<32x32xbf16>
    %c0_393 = arith.constant 0 : index
    %c0_394 = arith.constant 0 : index
    %744 = vector.load %arg19[%c0_393, %c0_394] : memref<32x128xbf16, #tpu.memory_space<vmem>>, vector<32x128xbf16>
    %cst_395 = arith.constant dense<0.000000e+00> : vector<32x128xf32>
    %745 = tpu.matmul %743, %744, %cst_395 {dimension_numbers = #tpu.dot_dimension_numbers<[1], [0], [0], [1], [0, 0, 1, 1], [], []>} : vector<32x32xbf16>, vector<32x128xbf16>, vector<32x128xf32> -> vector<32x128xf32>
    %c0_396 = arith.constant 0 : index
    %c360 = arith.constant 360 : index
    %746 = vector.load %arg20[%c0_396, %c360] : memref<1x488xf32, #tpu.memory_space<vmem>>, vector<1x128xf32>
    %747 = vector.broadcast %746 : vector<1x128xf32> to vector<32x128xf32>
    %748 = arith.addf %745, %747 : vector<32x128xf32>
    %c0_397 = arith.constant 0 : index
    %c0_398 = arith.constant 0 : index
    %749 = vector.load %arg21[%c0_397, %c0_398] : memref<32x128xf32, #tpu.memory_space<vmem>>, vector<32x128xf32>
    tpu.vector_store %arg21[%c0_397, %c0_398], %748 {strides = array<i32>} : memref<32x128xf32, #tpu.memory_space<vmem>>, vector<32x128xf32>,
    return
  }
  func.func @transform_0(%arg0: i32) -> (i32, i32) {
    %c0_i32 = arith.constant 0 : i32
    %c0_i32_0 = arith.constant 0 : i32
    %c0_i32_1 = arith.constant 0 : i32
    return %c0_i32, %c0_i32_0 : i32, i32
  }
  func.func @transform_1(%arg0: i32) -> (i32, i32) {
    %c0_i32 = arith.constant 0 : i32
    %c0_i32_0 = arith.constant 0 : i32
    %c0_i32_1 = arith.constant 0 : i32
    return %c0_i32, %c0_i32_0 : i32, i32
  }
  func.func @transform_2(%arg0: i32) -> (i32, i32) {
    %c0_i32 = arith.constant 0 : i32
    %c0_i32_0 = arith.constant 0 : i32
    %c0_i32_1 = arith.constant 0 : i32
    return %c0_i32, %c0_i32_0 : i32, i32
  }
  func.func @transform_3(%arg0: i32) -> (i32, i32) {
    %c0_i32 = arith.constant 0 : i32
    %c0_i32_0 = arith.constant 0 : i32
    %c0_i32_1 = arith.constant 0 : i32
    return %c0_i32, %c0_i32_0 : i32, i32
  }
  func.func @transform_4(%arg0: i32) -> (i32, i32) {
    %c0_i32 = arith.constant 0 : i32
    %c0_i32_0 = arith.constant 0 : i32
    %c0_i32_1 = arith.constant 0 : i32
    return %c0_i32, %c0_i32_0 : i32, i32
  }
  func.func @transform_5(%arg0: i32) -> (i32, i32, i32) {
    %c0_i32 = arith.constant 0 : i32
    %c0_i32_0 = arith.constant 0 : i32
    %c0_i32_1 = arith.constant 0 : i32
    %c0_i32_2 = arith.constant 0 : i32
    return %c0_i32, %c0_i32_0, %c0_i32_1 : i32, i32, i32
  }
  func.func @transform_6(%arg0: i32) -> (i32, i32, i32) {
    %c0_i32 = arith.constant 0 : i32
    %c0_i32_0 = arith.constant 0 : i32
    %c0_i32_1 = arith.constant 0 : i32
    %c0_i32_2 = arith.constant 0 : i32
    return %c0_i32, %c0_i32_0, %c0_i32_1 : i32, i32, i32
  }
  func.func @transform_7(%arg0: i32) -> (i32, i32, i32) {
    %c0_i32 = arith.constant 0 : i32
    %c0_i32_0 = arith.constant 0 : i32
    %c0_i32_1 = arith.constant 0 : i32
    %c0_i32_2 = arith.constant 0 : i32
    return %c0_i32, %c0_i32_0, %c0_i32_1 : i32, i32, i32
  }
  func.func @transform_8(%arg0: i32) -> (i32, i32) {
    %c0_i32 = arith.constant 0 : i32
    %c0_i32_0 = arith.constant 0 : i32
    %c0_i32_1 = arith.constant 0 : i32
    return %c0_i32, %c0_i32_0 : i32, i32
  }
  func.func @transform_9(%arg0: i32) -> (i32, i32) {
    %c0_i32 = arith.constant 0 : i32
    %c0_i32_0 = arith.constant 0 : i32
    %c0_i32_1 = arith.constant 0 : i32
    return %c0_i32, %c0_i32_0 : i32, i32
  }
  func.func @transform_10(%arg0: i32) -> (i32, i32) {
    %c0_i32 = arith.constant 0 : i32
    %c0_i32_0 = arith.constant 0 : i32
    %c0_i32_1 = arith.constant 0 : i32
    return %c0_i32, %c0_i32_0 : i32, i32
  }
  func.func @transform_11(%arg0: i32) -> (i32, i32) {
    %c0_i32 = arith.constant 0 : i32
    %c0_i32_0 = arith.constant 0 : i32
    %c0_i32_1 = arith.constant 0 : i32
    return %c0_i32, %c0_i32_0 : i32, i32
  }
  func.func @transform_12(%arg0: i32) -> (i32, i32, i32, i32) {
    %c0_i32 = arith.constant 0 : i32
    %c0_i32_0 = arith.constant 0 : i32
    %c0_i32_1 = arith.constant 0 : i32
    %c0_i32_2 = arith.constant 0 : i32
    %c0_i32_3 = arith.constant 0 : i32
    return %c0_i32, %c0_i32_0, %c0_i32_1, %c0_i32_2 : i32, i32, i32, i32
  }
  func.func @transform_13(%arg0: i32) -> (i32, i32, i32, i32) {
    %c0_i32 = arith.constant 0 : i32
    %c0_i32_0 = arith.constant 0 : i32
    %c0_i32_1 = arith.constant 0 : i32
    %c0_i32_2 = arith.constant 0 : i32
    %c0_i32_3 = arith.constant 0 : i32
    return %c0_i32, %c0_i32_0, %c0_i32_1, %c0_i32_2 : i32, i32, i32, i32
  }
  func.func @transform_14(%arg0: i32) -> (i32, i32, i32, i32) {
    %c0_i32 = arith.constant 0 : i32
    %c0_i32_0 = arith.constant 0 : i32
    %c0_i32_1 = arith.constant 0 : i32
    %c0_i32_2 = arith.constant 0 : i32
    %c0_i32_3 = arith.constant 0 : i32
    return %c0_i32, %c0_i32_0, %c0_i32_1, %c0_i32_2 : i32, i32, i32, i32
  }
  func.func @transform_15(%arg0: i32) -> (i32, i32, i32) {
    %c0_i32 = arith.constant 0 : i32
    %c0_i32_0 = arith.constant 0 : i32
    %c0_i32_1 = arith.constant 0 : i32
    %c0_i32_2 = arith.constant 0 : i32
    return %c0_i32, %c0_i32_0, %c0_i32_1 : i32, i32, i32
  }
  func.func @transform_16(%arg0: i32) -> (i32, i32, i32) {
    %c0_i32 = arith.constant 0 : i32
    %c0_i32_0 = arith.constant 0 : i32
    %c0_i32_1 = arith.constant 0 : i32
    %c0_i32_2 = arith.constant 0 : i32
    return %c0_i32, %c0_i32_0, %c0_i32_1 : i32, i32, i32
  }
  func.func @transform_17(%arg0: i32) -> (i32, i32, i32) {
    %c0_i32 = arith.constant 0 : i32
    %c0_i32_0 = arith.constant 0 : i32
    %c0_i32_1 = arith.constant 0 : i32
    %c0_i32_2 = arith.constant 0 : i32
    return %c0_i32, %c0_i32_0, %c0_i32_1 : i32, i32, i32
  }
  func.func @transform_18(%arg0: i32) -> (i32, i32) {
    %c0_i32 = arith.constant 0 : i32
    %c0_i32_0 = arith.constant 0 : i32
    %c0_i32_1 = arith.constant 0 : i32
    return %c0_i32, %c0_i32_0 : i32, i32
  }
  func.func @transform_19(%arg0: i32) -> (i32, i32) {
    %c0_i32 = arith.constant 0 : i32
    %c0_i32_0 = arith.constant 0 : i32
    %c0_i32_1 = arith.constant 0 : i32
    return %c0_i32, %c0_i32_0 : i32, i32
  }
  func.func @transform_20(%arg0: i32) -> (i32, i32) {
    %c0_i32 = arith.constant 0 : i32
    %c0_i32_0 = arith.constant 0 : i32
    %c0_i32_1 = arith.constant 0 : i32
    return %c0_i32, %c0_i32_0 : i32, i32
  }
}

</mosaic_0001>

<bundles_post_ra>
// kernel: forward.1
= control target key start
LH: loop header
LB: loop body
LE: loop exit
PB: predicated region body
PF: predicated region fallthrough
CT: control target
= control target key end

     0   :  { %vm100_vm0 = vcmask 392192   ;;  %vm156_vm1 = vcmask 261120   ;;  %vm223_vm2 = vcmask 130112   ;;  %vm301_vm3 = vcmask 130048   ;;  %s5997_s22 = smov 32   ;;  %s5999_s25 = smov 56   ;;  %s7749_s4 = inlined_call_operand.vmem [shape: bf16[48,32], index: 4, kind: input, shape index: {}]   ;;  %s7750_s19 = inlined_call_operand.vmem [shape: f32[1,488], index: 19, kind: input, shape index: {}]   ;;  %s7751_s0 = inlined_call_operand.vmem [shape: f32[32,48], index: 0, kind: input, shape index: {}]   ;;  %s7752_s6 = inlined_call_operand.vmem [shape: f32[4,1,32], index: 6, kind: input, shape index: {}]   ;;  %s7753_s5 = inlined_call_operand.vmem [shape: bf16[4,32,32], index: 5, kind: input, shape index: {}]   ;;  %s7754_s2 = inlined_call_operand.vmem [shape: f32[32,32], index: 2, kind: input, shape index: {}]   ;;  %s7755_s7 = inlined_call_operand.vmem [shape: bf16[4,32,32], index: 7, kind: input, shape index: {}]   ;;  %s7756_s8 = inlined_call_operand.vmem [shape: bf16[32,96], index: 8, kind: input, shape index: {}]   ;;  %s7757_s12 = inlined_call_operand.vmem [shape: bf16[2,4,32,32], index: 12, kind: input, shape index: {}]   ;;  %s7758_s9 = inlined_call_operand.vmem [shape: bf16[64,32], index: 9, kind: input, shape index: {}]   ;;  %s7759_s3 = inlined_call_operand.vmem [shape: f32[32,32], index: 3, kind: input, shape index: {}]   ;;  %s7760_s13 = inlined_call_operand.vmem [shape: f32[2,4,1,32], index: 13, kind: input, shape index: {}]   ;;  %s7761_s10 = inlined_call_operand.vmem [shape: bf16[4,8], index: 10, kind: input, shape index: {}]   ;;  %s7762_s1 = inlined_call_operand.vmem [shape: f32[2,4], index: 1, kind: input, shape index: {}]   ;;  %s7763_s11 = inlined_call_operand.vmem [shape: bf16[40,32], index: 11, kind: input, shape index: {}]   ;;  %s7764_s14 = inlined_call_operand.vmem [shape: bf16[2,4,32,32], index: 14, kind: input, shape index: {}]   ;;  %s7765_s17 = inlined_call_operand.vmem [shape: f32[2,1,384], index: 17, kind: input, shape index: {}]   ;;  %s7766_s15 = inlined_call_operand.vmem [shape: bf16[2,32,128], index: 15, kind: input, shape index: {}]   ;;  %s7767_s16 = inlined_call_operand.vmem [shape: bf16[2,64,32], index: 16, kind: input, shape index: {}]   ;;  %s7768_s18 = inlined_call_operand.vmem [shape: bf16[32,128], index: 18, kind: input, shape index: {}]   ;;  %s7769_s20 = inlined_call_operand.vmem [shape: f32[32,128], index: 20, kind: output, shape index: {}]  }
   0x1   :  { %7775 = sst [smem:[#allocation2_spill]] %s7749_s4  ;;  %v126_v14 = vld [vmem:[%s7754_s2] sm:$0xff]  ;;  %v127_v17 = vld [vmem:[%s7754_s2 + $0x8] sm:$0xff]  ;;  %v128_v26 = vld [vmem:[%s7754_s2 + $0x10] sm:$0xff]  ;;  %s5994_s4 = smov 96  }
   0x2   :  { %7776 = sst [smem:[#allocation3_spill]] %s7750_s19  ;;  %v129_v35 = vld [vmem:[%s7754_s2 + $0x18] sm:$0xff]  ;;  %v5626_v50 = vld [vmem:[%s7755_s7 + $0x8] sm:$0xff]  ;;  %v5625_v51 = vld [vmem:[%s7755_s7] sm:$0xff]  ;;  %s5996_s19 = smov 64  }
   0x3   :  { %7777 = sst [smem:[#allocation4_spill]] %s7751_s0 }
   0x4   :  { %7778 = sst [smem:[#allocation5_spill]] %s7752_s6 }
   0x5   :  { %7779 = sst [smem:[#allocation6_spill]] %s7753_s5 }
   0x6   :  { %s7780_s23 = sld [smem:[#allocation2_spill]] }
   0x7   :  { %s7781_s28 = sld [smem:[#allocation4_spill]] }
   0x8   :  { %s7782_s24 = sld [smem:[#allocation6_spill]] }
   0x9   :  { %s7783_s27 = sld [smem:[#allocation3_spill]] }
   0xc   :  { %v5622_v0 = vld [vmem:[%s7780_s23 + $0x10] sm:$0xff]  ;;  %v5621_v1 = vld [vmem:[%s7780_s23 + $0x8] sm:$0xff]  ;;  %v5620_v2 = vld [vmem:[%s7780_s23] sm:$0xff]  ;;  %s7784_s23 = sld [smem:[#allocation5_spill]] }
   0xd   :  { %112 = vmatpush.bf16.msra.mxu0 %v5622_v0  ;;  %v66_v3 = vld [vmem:[%s7781_s28] sm:$0xff]  ;;  %v67_v4 = vld [vmem:[%s7781_s28 + $0x8] sm:$0xff]  ;;  %v68_v6 = vld [vmem:[%s7781_s28 + $0x10] sm:$0xff] }
   0xe   :  { %v70_v5 = vpack.c.bf16 %v67_v4, %v66_v3  ;;  %v69_v7 = vld [vmem:[%s7781_s28 + $0x18] sm:$0xff]  ;;  %v5624_v9 = vld [vmem:[%s7782_s24 + $0x8] sm:$0xff]  ;;  %v5623_v10 = vld [vmem:[%s7782_s24] sm:$0xff] }
   0xf   :  { %v71_v8 = vpack.c.bf16 %v69_v7, %v68_v6  ;;  %169 = vmatpush.bf16.msra.mxu1 %v5624_v9  ;;  %5693 = vmatpush.bf16.msra.mxu2 %v5624_v9  ;;  %v5702_v11 = vld [vmem:[%s7783_s27] ss:$0 sm:$0xff]  ;;  %v5628_v53 = vld [vmem:[%s7782_s24 + $0x18] sm:$0xff]  ;;  %v5627_v60 = vld [vmem:[%s7782_s24 + $0x10] sm:$0xff] }
  0x10   :  { %v5630_v6 = vld [vmem:[%s7755_s7 + $0x18] sm:$0xff] }
  0x11   :  { %113 = vmatpush.bf16.msra.mxu0 %v5621_v1 }
  0x12   :  { %v6167_v31 = vld [vmem:[%s7784_s23 + $0x1] ss:$0 sm:$0xff]  ;;  %v6195_v45 = vld [vmem:[%s7784_s23] ss:$0 sm:$0xff] }
  0x13   :  { %170 = vmatpush.bf16.msra.mxu1 %v5623_v10  ;;  %5694 = vmatpush.bf16.msra.mxu2 %v5623_v10 }
  0x15   :  { %114 = vmatpush.bf16.msra.mxu0 %v5620_v2 }
  0x18   :  { %5113 = vmatmul.msk.bf16.vlgmr.msra.gmra.mxu0 %vm100_vm0, %v70_v5 }
  0x28   :  { %5114 = vmatmul.msk.bf16.gmra.mxu0 %vm100_vm0, %v71_v8  ;;  %v5629_v8 = vld [vmem:[%s7755_s7 + $0x10] sm:$0xff] }
  0x95   :  { %v116_v12 = vpop.f32.mrf.mxu0 }
  0x96   :  { %v117_v13 = vadd.f32 %v5702_v11, %v116_v12 }
  0x98   :  { %v6139_v15 = vadd.f32 %v126_v14, %v117_v13 }
  0x9a   :  { %v136_v20 = vpack.c.bf16 %v6139_v15, %v6139_v15  ;;  %v186_v48 = vmul.f32 %v6195_v45, %v6139_v15 }
  0x9c   :  { %v213_v23 = vunpack.c.l.b16 %v136_v20  ;;  %v190_v49 = vsel %vm156_vm1, %v186_v48, 0.0 }
  0x9d   :  { %v118_v16 = vpop.f32.mrf.mxu0 }
  0x9e   :  { %v119_v18 = vadd.f32 %v5702_v11, %v118_v16 }
  0xa0   :  { %v6144_v19 = vadd.f32 %v127_v17, %v119_v18 }
  0xa2   :  { %v6150_v21 = vpack.c.bf16 %v6144_v19, %v6139_v15  ;;  %v137_v22 = vpack.c.bf16 %v6144_v19, %v6144_v19 }
  0xa4   :  { %5123 = vmatmul.msk.bf16.vlgmr.msra.gmra.mxu1 %vm156_vm1, %v6150_v21  ;;  %v214_v24 = vunpack.c.l.b16 %v137_v22 }
  0xa5   :  { %v121_v25 = vpop.f32.mrf.mxu0 }
  0xa6   :  { %v122_v27 = vadd.f32 %v5702_v11, %v121_v25  ;;  %v215_v28 = vpack.c.b16 %v214_v24, %v213_v23 }
  0xa8   :  { %v6159_v29 = vadd.f32 %v128_v26, %v122_v27  ;;  %v6162_v30 = vsel %vm156_vm1, %v215_v28, 0 }
  0xa9   :  { %252 = vmatpush.bf16.xpose.msrb.mxu2 %v6162_v30  ;;  %477 = vmatpush.bf16.xpose.msrb.mxu1 %v6162_v30 }
  0xaa   :  { %v432_v32 = vmul.f32 %v6167_v31, %v6159_v29  ;;  %v138_v38 = vpack.c.bf16 %v6159_v29, %v6159_v29 }
  0xac   :  { %v440_v33 = vsel %vm156_vm1, %v432_v32, 0.0  ;;  %v266_v43 = vunpack.c.l.b16 %v138_v38 }
  0xad   :  { %v123_v34 = vpop.f32.mrf.mxu0  ;;  %441 = vadd.xlane.f32.xlu0 %v440_v33 }
  0xae   :  { %v124_v36 = vadd.f32 %v5702_v11, %v123_v34 }
  0xb0   :  { %v6177_v37 = vadd.f32 %v129_v35, %v124_v36 }
  0xb1   :  { %585 = vmatpush.bf16.msra.mxu1 %v5630_v6 }
  0xb2   :  { %v6183_v39 = vpack.c.bf16 %v6177_v37, %v6159_v29  ;;  %v433_v40 = vmul.f32 %v6167_v31, %v6177_v37  ;;  %v139_v41 = vpack.c.bf16 %v6177_v37, %v6177_v37 }
  0xb4   :  { %5124 = vmatmul.msk.bf16.vlgmr.msra.gmra.mxu2 %vm156_vm1, %v6183_v39  ;;  %v443_v42 = vsel %vm156_vm1, %v433_v40, 0.0  ;;  %v267_v44 = vunpack.c.l.b16 %v139_v41  ;;  %v218_v41 = vlaneseq }
  0xb5   :  { %444 = vadd.xlane.f32.xlu0 %v443_v42  ;;  %368 = vmatpush.bf16.msra.mxu2 %v5626_v50 }
  0xb6   :  { %v268_v46 = vpack.c.b16 %v267_v44, %v266_v43  ;;  %586 = vmatpush.bf16.msra.mxu1 %v5629_v8  ;;  %v6251_v42 = vand.u32 127, %v218_v41 }
  0xb8   :  { %v6198_v47 = vsel %vm156_vm1, %v268_v46, 0  ;;  %v6254_v43 = vadd.s32 4294967288, %v6251_v42 }
  0xb9   :  { %294 = vmatpush.bf16.xpose.msra.mxu3 %v6198_v47  ;;  %511 = vmatpush.bf16.xpose.msrb.mxu0 %v6198_v47 }
  0xba   :  { %369 = vmatpush.bf16.msra.mxu2 %v5625_v51 }
  0xbd   :  { %191 = vadd.xlane.f32.xlu0 %v190_v49 }
  0xc1   :  { %412 = vmatpush.bf16.msrb.mxu3 %v5628_v53 }
  0xc5   :  { %413 = vmatpush.bf16.msrb.mxu3 %v5627_v60 }
 0x120   :  { %v442_v38 = vpop.xlane.xlu0 %441 }
 0x121   :  { %v172_v52 = vpop.f32.mrf.mxu1  ;;  %v491_v50 = vperm.slane %v442_v38, %v6251_v42 }
 0x122   :  { %v202_v54 = vpack.c.bf16 %v172_v52, %v172_v52 }
 0x124   :  { %v208_v57 = vunpack.c.l.b16 %v202_v54 }
 0x128   :  { %v445_v46 = vpop.xlane.xlu0 %444 }
 0x129   :  { %v174_v55 = vpop.f32.mrf.mxu1  ;;  %v492_v49 = vperm.slane %v445_v46, %v6254_v43 }
 0x12a   :  { %v203_v56 = vpack.c.bf16 %v174_v55, %v174_v55 }
 0x12b   :  { %v493_v51 = vsel %vm223_vm2, %v492_v49, %v491_v50 }
 0x12c   :  { %v209_v58 = vunpack.c.l.b16 %v203_v56 }
 0x12e   :  { %v210_v59 = vpack.c.b16 %v209_v58, %v208_v57 }
 0x130   :  { %5125 = vmatmul.msk.bf16.vlgmr.msrb.gmra.mxu2 %vm156_vm1, %v210_v59  ;;  %v192_v41 = vpop.xlane.xlu0 %191 }
 0x137   :  { %v177_v61 = vpop.f32.mrf.mxu2 }
 0x138   :  { %v204_v62 = vpack.c.bf16 %v177_v61, %v177_v61 }
 0x13a   :  { %v261_v1 = vunpack.c.l.b16 %v204_v62 }
 0x13f   :  { %v179_v63 = vpop.f32.mrf.mxu2 }
 0x140   :  { %v205_v0 = vpack.c.bf16 %v179_v63, %v179_v63  ;;  %5135 = vmatmul.msk.bf16.vlgmr.msra.gmra.mxu2 %vm156_vm1, %v6150_v21 }
 0x142   :  { %v262_v2 = vunpack.c.l.b16 %v205_v0 }
 0x144   :  { %v263_v3 = vpack.c.b16 %v262_v2, %v261_v1 }
 0x146   :  { %5126 = vmatmul.msk.bf16.vlgmr.msra.gmra.mxu3 %vm156_vm1, %v263_v3 }
 0x150   :  { %5136 = vmatmul.msk.bf16.gmra.mxu2 %vm156_vm1, %v6183_v39 }
 0x156   :  { %5149 = vmatmul.msk.bf16.vlgmr.msrb.gmra.mxu3 %vm156_vm1, %v6150_v21 }
 0x166   :  { %5150 = vmatmul.msk.bf16.gmra.mxu3 %vm156_vm1, %v6183_v39 }
 0x1b3   :  { %v6227_v4 = vpop.f32.mrf.mxu2 }
 0x1bb   :  { %v6229_v5 = vpop.f32.mrf.mxu2 }
 0x1c3   :  { %v371_v7 = vpop.f32.mrf.mxu2 }
 0x1c4   :  { %v385_v10 = vpack.c.bf16 %v371_v7, %v371_v7 }
 0x1c6   :  { %v669_v13 = vunpack.c.l.b16 %v385_v10  ;;  %v187_v10 = vmul.f32 %v6195_v45, %v6144_v19 }
 0x1c9   :  { %v6237_v9 = vpop.f32.mrf.mxu3 }
 0x1cb   :  { %v373_v11 = vpop.f32.mrf.mxu2 }
 0x1cc   :  { %v386_v12 = vpack.c.bf16 %v373_v11, %v373_v11 }
 0x1ce   :  { %v670_v14 = vunpack.c.l.b16 %v386_v12  ;;  %v193_v12 = vsel %vm156_vm1, %v187_v10, 0.0 }
 0x1d0   :  { %v671_v16 = vpack.c.b16 %v670_v14, %v669_v13  ;;  %v430_v14 = vmul.f32 %v6167_v31, %v6139_v15 }
 0x1d1   :  { %v6239_v17 = vpop.f32.mrf.mxu3 }
 0x1d2   :  { %683 = vmatpush.bf16.msra.mxu0 %v671_v16 }
 0x1d3   :  { %v376_v48 = vpop.f32.mrf.mxu2 }
 0x1d4   :  { %v387_v59 = vpack.c.bf16 %v376_v48, %v376_v48  ;;  %v220_v48 = vperm.slane %v192_v41, %v6251_v42 }
 0x1d6   :  { %v697_v6 = vunpack.c.l.b16 %v387_v59  ;;  %v431_v59 = vmul.f32 %v6167_v31, %v6144_v19 }
 0x1d9   :  { %v415_v18 = vpop.f32.mrf.mxu3 }
 0x1da   :  { %v446_v20 = vpack.c.bf16 %v415_v18, %v415_v18 }
 0x1db   :  { %v378_v55 = vpop.f32.mrf.mxu2 }
 0x1dc   :  { %v452_v24 = vunpack.c.l.b16 %v446_v20  ;;  %v388_v57 = vpack.c.bf16 %v378_v55, %v378_v55 }
 0x1de   :  { %v698_v0 = vunpack.c.l.b16 %v388_v57 }
 0x1e0   :  { %v699_v8 = vpack.c.b16 %v698_v0, %v697_v6 }
 0x1e1   :  { %v417_v22 = vpop.f32.mrf.mxu3 }
 0x1e2   :  { %v447_v23 = vpack.c.bf16 %v417_v22, %v417_v22 }
 0x1e4   :  { %v453_v25 = vunpack.c.l.b16 %v447_v23  ;;  %v434_v23 = vsel %vm156_vm1, %v430_v14, 0.0 }
 0x1e6   :  { %v454_v26 = vpack.c.b16 %v453_v25, %v452_v24  ;;  %v189_v25 = vmul.f32 %v6195_v45, %v6177_v37 }
 0x1e8   :  { %5152 = vmatmul.msk.bf16.vlgmr.msrb.gmra.mxu1 %vm156_vm1, %v454_v26  ;;  %v199_v26 = vsel %vm156_vm1, %v189_v25, 0.0 }
 0x1e9   :  { %840 = vmatpush.bf16.xpose.msrb.mxu1 %v6198_v47  ;;  %v420_v27 = vpop.f32.mrf.mxu3 }
 0x1ea   :  { %v448_v28 = vpack.c.bf16 %v420_v27, %v420_v27 }
 0x1ec   :  { %v486_v34 = vunpack.c.l.b16 %v448_v28 }
 0x1f1   :  { %v422_v32 = vpop.f32.mrf.mxu3 }
 0x1f2   :  { %v449_v33 = vpack.c.bf16 %v422_v32, %v422_v32 }
 0x1f4   :  { %v487_v35 = vunpack.c.l.b16 %v449_v33 }
 0x1f6   :  { %v488_v36 = vpack.c.b16 %v487_v35, %v486_v34 }
 0x1f8   :  { %5153 = vmatmul.msk.bf16.vlgmr.msrb.gmra.mxu0 %vm156_vm1, %v488_v36  ;;  %5166 = vmatmul.msk.bf16.vlgmr.msra.gmra.mxu1 %vm156_vm1, %v6150_v21 }
 0x1f9   :  { %806 = vmatpush.bf16.xpose.msrb.mxu0 %v6162_v30 }
 0x208   :  { %5167 = vmatmul.msk.bf16.gmra.mxu1 %vm156_vm1, %v6183_v39 }
 0x265   :  { %v6249_v40 = vpop.f32.mrf.mxu1 }
 0x26d   :  { %v6256_v44 = vpop.f32.mrf.mxu1 }
 0x275   :  { %v513_v52 = vpop.f32.mrf.mxu0  ;;  %v588_v53 = vpop.f32.mrf.mxu1 }
 0x276   :  { %v514_v54 = vadd.f32 %v513_v52, %v493_v51  ;;  %v602_v58 = vpack.c.bf16 %v588_v53, %v588_v53 }
 0x278   :  { %v524_v56 = vsel %vm301_vm3, %v514_v54, -inf  ;;  %v613_v1 = vunpack.c.l.b16 %v602_v58 }
 0x279   :  { %525 = vmax.xlane.f32.xlu1 %v524_v56  ;;  %v188_v56 = vmul.f32 %v6195_v45, %v6159_v29  ;;  %v5631_v45 = vld [vmem:[%s7782_s24 + $0x20] sm:$0xff] }
 0x27b   :  { %v196_v58 = vsel %vm156_vm1, %v188_v56, 0.0 }
 0x27d   :  { %v515_v60 = vpop.f32.mrf.mxu0  ;;  %v590_v61 = vpop.f32.mrf.mxu1 }
 0x27e   :  { %v516_v62 = vadd.f32 %v515_v60, %v493_v51  ;;  %v603_v63 = vpack.c.bf16 %v590_v61, %v590_v61  ;;  %v5632_v60 = vld [vmem:[%s7782_s24 + $0x28] sm:$0xff] }
 0x280   :  { %v614_v2 = vunpack.c.l.b16 %v603_v63  ;;  %v527_v3 = vsel %vm301_vm3, %v516_v62, -inf }
 0x281   :  { %528 = vmax.xlane.f32.xlu1 %v527_v3 }
 0x282   :  { %v615_v7 = vpack.c.b16 %v614_v2, %v613_v1 }
 0x284   :  { %627 = vmatpush.bf16.msrb.mxu2 %v615_v7 }
 0x285   :  { %v593_v11 = vpop.f32.mrf.mxu1 }
 0x286   :  { %v604_v13 = vpack.c.bf16 %v593_v11, %v593_v11 }
 0x288   :  { %711 = vmatpush.bf16.msra.mxu2 %v699_v8  ;;  %v641_v20 = vunpack.c.l.b16 %v604_v13 }
 0x289   :  { %194 = vadd.xlane.f32.xlu1 %v193_v12 }
 0x28d   :  { %v595_v16 = vpop.f32.mrf.mxu1 }
 0x28e   :  { %v605_v18 = vpack.c.bf16 %v595_v16, %v595_v16 }
 0x290   :  { %v642_v22 = vunpack.c.l.b16 %v605_v18 }
 0x291   :  { %435 = vadd.xlane.f32.xlu1 %v434_v23 }
 0x292   :  { %v643_v24 = vpack.c.b16 %v642_v22, %v641_v20 }
 0x294   :  { %655 = vmatpush.bf16.msra.mxu3 %v643_v24 }
 0x298   :  { %741 = vmatpush.bf16.msrb.mxu3 %v5632_v60 }
 0x299   :  { %200 = vadd.xlane.f32.xlu1 %v199_v26 }
 0x29c   :  { %742 = vmatpush.bf16.msrb.mxu3 %v5631_v45 }
 0x2ec   :  { %v526_v27 = vpop.xlane.xlu1 %525 }
 0x2ed   :  { %v532_v28 = vsub.f32 %v514_v54, %v526_v27 }
 0x2ef   :  { %v538_v32 = vmul.f32 1.442695, %v532_v28  ;;  %v5636_v28 = vld [vmem:[%s7782_s24 + $0x38] sm:$0xff] }
 0x2f1   :  { %5726 = vpow2.f32 %v538_v32 }
 0x2f4   :  { %v529_v33 = vpop.xlane.xlu1 %528 }
 0x2f5   :  { %v533_v34 = vsub.f32 %v516_v62, %v529_v33 }
 0x2f7   :  { %v5727_v35 = vpop.eup %5726  ;;  %v540_v36 = vmul.f32 1.442695, %v533_v34 }
 0x2f8   :  { %v548_v38 = vsel %vm301_vm3, %v5727_v35, 0.0 }
 0x2f9   :  { %5728 = vpow2.f32 %v540_v36  ;;  %549 = vadd.xlane.f32.xlu2 %v548_v38 }
 0x2fc   :  { %v195_v46 = vpop.xlane.xlu1 %194 }
 0x2fd   :  { %v222_v49 = vperm.slane %v195_v46, %v6254_v43 }
 0x2ff   :  { %v5729_v50 = vpop.eup %5728  ;;  %v224_v51 = vsel %vm223_vm2, %v222_v49, %v220_v48 }
 0x300   :  { %v551_v52 = vsel %vm301_vm3, %v5729_v50, 0.0  ;;  %v257_v53 = vadd.f32 %v6229_v5, %v224_v51  ;;  %v255_v55 = vadd.f32 %v6227_v4, %v224_v51  ;;  %v437_v5 = vsel %vm156_vm1, %v431_v59, 0.0 }
 0x301   :  { %552 = vadd.xlane.f32.xlu2 %v551_v52 }
 0x302   :  { %v305_v54 = vsel %vm301_vm3, %v257_v53, -inf  ;;  %v302_v57 = vsel %vm301_vm3, %v255_v55, -inf }
 0x303   :  { %306 = vmax.xlane.f32.xlu0 %v305_v54 }
 0x304   :  { %v436_v61 = vpop.xlane.xlu1 %435 }
 0x305   :  { %v457_v32 = vperm.slane %v436_v61, %v6251_v42 }
 0x309   :  { %303 = vmax.xlane.f32.xlu2 %v302_v57 }
 0x30b   :  { %197 = vadd.xlane.f32.xlu0 %v196_v58 }
 0x30c   :  { %v201_v11 = vpop.xlane.xlu1 %200 }
 0x30d   :  { %v272_v23 = vperm.slane %v201_v11, %v6254_v43 }
 0x311   :  { %438 = vadd.xlane.f32.xlu2 %v437_v5 }
 0x36c   :  { %v550_v4 = vpop.xlane.xlu2 %549 }
 0x36d   :  { %5730 = vrcp.f32 %v550_v4 }
 0x373   :  { %v5731_v63 = vpop.eup %5730 }
 0x374   :  { %v553_v62 = vpop.xlane.xlu2 %552  ;;  %v560_v1 = vmul.f32 %v5731_v63, %v5727_v35  ;;  %v5635_v35 = vld [vmem:[%s7782_s24 + $0x30] sm:$0xff] }
 0x375   :  { %5732 = vrcp.f32 %v553_v62 }
 0x376   :  { %v307_v31 = vpop.xlane.xlu0 %306  ;;  %v600_v6 = vpack.c.bf16 %v560_v1, %v560_v1 }
 0x377   :  { %v315_v0 = vsub.f32 %v257_v53, %v307_v31 }
 0x378   :  { %v636_v18 = vunpack.c.l.b16 %v600_v6 }
 0x379   :  { %v320_v2 = vmul.f32 1.442695, %v315_v0 }
 0x37b   :  { %v5733_v3 = vpop.eup %5732  ;;  %5734 = vpow2.f32 %v320_v2 }
 0x37c   :  { %v561_v7 = vmul.f32 %v5733_v3, %v5729_v50  ;;  %v304_v8 = vpop.xlane.xlu2 %303 }
 0x37d   :  { %v314_v10 = vsub.f32 %v255_v55, %v304_v8 }
 0x37e   :  { %v601_v12 = vpack.c.bf16 %v561_v7, %v561_v7  ;;  %v198_v13 = vpop.xlane.xlu0 %197 }
 0x37f   :  { %v318_v14 = vmul.f32 1.442695, %v314_v10  ;;  %v271_v16 = vperm.slane %v198_v13, %v6251_v42  ;;  %v5705_v13 = vld [vmem:[%s7784_s23 + $0x2] ss:$0 sm:$0xff] }
 0x380   :  { %v637_v20 = vunpack.c.l.b16 %v601_v12 }
 0x381   :  { %v5735_v22 = vpop.eup %5734  ;;  %5736 = vpow2.f32 %v318_v14  ;;  %v273_v26 = vsel %vm223_vm2, %v272_v23, %v271_v16  ;;  %v760_v14 = vmul.f32 %v5705_v13, %v6144_v19 }
 0x382   :  { %v638_v24 = vpack.c.b16 %v637_v20, %v636_v18  ;;  %v329_v25 = vsel %vm301_vm3, %v5735_v22, 0.0  ;;  %v297_v34 = vadd.f32 %v6237_v9, %v273_v26  ;;  %v299_v50 = vadd.f32 %v6239_v17, %v273_v26 }
 0x383   :  { %330 = vadd.xlane.f32.xlu0 %v329_v25  ;;  %v766_v23 = vsel %vm156_vm1, %v760_v14, 0.0  ;;  %v759_v25 = vmul.f32 %v5705_v13, %v6139_v15 }
 0x384   :  { %5169 = vmatmul.msk.bf16.vlgmr.msra.gmra.mxu3 %vm301_vm3, %v638_v24  ;;  %v439_v27 = vpop.xlane.xlu2 %438  ;;  %v308_v48 = vsel %vm301_vm3, %v297_v34, -inf  ;;  %v311_v52 = vsel %vm301_vm3, %v299_v50, -inf }
 0x385   :  { %v458_v33 = vperm.slane %v439_v27, %v6254_v43  ;;  %1018 = vmatpush.bf16.msra.mxu3 %v5636_v28  ;;  %v761_v27 = vmul.f32 %v5705_v13, %v6159_v29  ;;  %v763_v28 = vsel %vm156_vm1, %v759_v25, 0.0 }
 0x387   :  { %v5737_v36 = vpop.eup %5736  ;;  %v459_v38 = vsel %vm223_vm2, %v458_v33, %v457_v32  ;;  %v769_v32 = vsel %vm156_vm1, %v761_v27, 0.0  ;;  %v762_v33 = vmul.f32 %v5705_v13, %v6177_v37 }
 0x388   :  { %v326_v41 = vsel %vm301_vm3, %v5737_v36, 0.0  ;;  %v480_v46 = vadd.f32 %v6249_v40, %v459_v38  ;;  %v482_v9 = vadd.f32 %v6256_v44, %v459_v38 }
 0x389   :  { %327 = vadd.xlane.f32.xlu2 %v326_v41  ;;  %1019 = vmatpush.bf16.msra.mxu3 %v5635_v35  ;;  %v772_v38 = vsel %vm156_vm1, %v762_v33, 0.0 }
 0x38a   :  { %v518_v49 = vsel %vm301_vm3, %v480_v46, -inf  ;;  %v521_v51 = vsel %vm301_vm3, %v482_v9, -inf }
 0x38b   :  { %309 = vmax.xlane.f32.xlu0 %v308_v48  ;;  %519 = vmax.xlane.f32.xlu1 %v518_v49 }
 0x391   :  { %522 = vmax.xlane.f32.xlu2 %v521_v51 }
 0x393   :  { %312 = vmax.xlane.f32.xlu1 %v311_v52 }
 0x394   :  { %5184 = vmatmul.msk.bf16.vlgmr.msrb.gmra.mxu3 %vm156_vm1, %v6150_v21 }
 0x3a4   :  { %5185 = vmatmul.msk.bf16.gmra.mxu3 %vm156_vm1, %v6183_v39 }
 0x3b4   :  { %5217 = vmatmul.msk.bf16.vlgmr.msra.gmra.mxu3 %vm156_vm1, %v6150_v21 }
 0x3c4   :  { %5218 = vmatmul.msk.bf16.gmra.mxu3 %vm156_vm1, %v6183_v39 }
 0x3f6   :  { %v331_v40 = vpop.xlane.xlu0 %330 }
 0x3f7   :  { %5738 = vrcp.f32 %v331_v40 }
 0x3fc   :  { %v328_v17 = vpop.xlane.xlu2 %327 }
 0x3fd   :  { %v5739_v44 = vpop.eup %5738  ;;  %5740 = vrcp.f32 %v328_v17 }
 0x3fe   :  { %v310_v53 = vpop.xlane.xlu0 %309  ;;  %v520_v54 = vpop.xlane.xlu1 %519  ;;  %v343_v57 = vmul.f32 %v5739_v44, %v5735_v22 }
 0x3ff   :  { %v316_v55 = vsub.f32 %v297_v34, %v310_v53  ;;  %v530_v56 = vsub.f32 %v480_v46, %v520_v54 }
 0x400   :  { %v382_v60 = vpack.c.bf16 %v343_v57, %v343_v57 }
 0x401   :  { %v322_v58 = vmul.f32 1.442695, %v316_v55  ;;  %v534_v59 = vmul.f32 1.442695, %v530_v56 }
 0x402   :  { %v665_v2 = vunpack.c.l.b16 %v382_v60 }
 0x403   :  { %v5741_v5 = vpop.eup %5740  ;;  %5742 = vpow2.f32 %v322_v58 }
 0x404   :  { %v342_v45 = vmul.f32 %v5741_v5, %v5737_v36  ;;  %5744 = vpow2.f32 %v534_v59  ;;  %v523_v4 = vpop.xlane.xlu2 %522 }
 0x405   :  { %v531_v61 = vsub.f32 %v482_v9, %v523_v4 }
 0x406   :  { %v381_v62 = vpack.c.bf16 %v342_v45, %v342_v45  ;;  %v313_v63 = vpop.xlane.xlu1 %312 }
 0x407   :  { %v536_v31 = vmul.f32 1.442695, %v531_v61  ;;  %v317_v0 = vsub.f32 %v299_v50, %v313_v63  ;;  %v6324_v1 = vpop.f32.mrf.mxu3 }
 0x408   :  { %v664_v3 = vunpack.c.l.b16 %v381_v62  ;;  %v5634_v62 = vld [vmem:[%s7755_s7 + $0x28] sm:$0xff] }
 0x409   :  { %v6326_v6 = vpop.eup %5742  ;;  %5746 = vpow2.f32 %v536_v31  ;;  %v324_v7 = vmul.f32 1.442695, %v317_v0 }
 0x40a   :  { %v5745_v8 = vpop.eup %5744  ;;  %v666_v10 = vpack.c.b16 %v665_v2, %v664_v3  ;;  %v332_v11 = vsel %vm301_vm3, %v6326_v6, 0.0  ;;  %v5633_v2 = vld [vmem:[%s7755_s7 + $0x20] sm:$0xff] }
 0x40b   :  { %5748 = vpow2.f32 %v324_v7  ;;  %333 = vadd.xlane.f32.xlu1 %v332_v11  ;;  %v542_v12 = vsel %vm301_vm3, %v5745_v8, 0.0 }
 0x40c   :  { %543 = vadd.xlane.f32.xlu2 %v542_v12  ;;  %5170 = vmatmul.msk.bf16.vlgmr.msra.gmra.mxu0 %vm301_vm3, %v666_v10 }
 0x40f   :  { %v5747_v16 = vpop.eup %5746  ;;  %v6336_v18 = vpop.f32.mrf.mxu3 }
 0x410   :  { %v545_v20 = vsel %vm301_vm3, %v5747_v16, 0.0 }
 0x411   :  { %v5749_v22 = vpop.eup %5748  ;;  %546 = vadd.xlane.f32.xlu0 %v545_v20 }
 0x412   :  { %v335_v24 = vsel %vm301_vm3, %v5749_v22, 0.0 }
 0x413   :  { %767 = vadd.xlane.f32.xlu1 %v766_v23 }
 0x414   :  { %336 = vadd.xlane.f32.xlu2 %v335_v24 }
 0x417   :  { %v744_v26 = vpop.f32.mrf.mxu3 }
 0x418   :  { %v775_v34 = vpack.c.bf16 %v744_v26, %v744_v26 }
 0x419   :  { %764 = vadd.xlane.f32.xlu0 %v763_v28  ;;  %v5637_v28 = vld [vmem:[%s7755_s7 + $0x30] sm:$0xff] }
 0x41a   :  { %v781_v41 = vunpack.c.l.b16 %v775_v34 }
 0x41c   :  { %770 = vadd.xlane.f32.xlu2 %v769_v32 }
 0x41f   :  { %v746_v35 = vpop.f32.mrf.mxu3 }
 0x420   :  { %v776_v36 = vpack.c.bf16 %v746_v35, %v746_v35 }
 0x421   :  { %773 = vadd.xlane.f32.xlu0 %v772_v38 }
 0x422   :  { %v782_v46 = vunpack.c.l.b16 %v776_v36 }
 0x424   :  { %v783_v48 = vpack.c.b16 %v782_v46, %v781_v41 }
 0x426   :  { %5187 = vmatmul.msk.bf16.vlgmr.msrb.gmra.mxu0 %vm156_vm1, %v783_v48 }
 0x427   :  { %v749_v49 = vpop.f32.mrf.mxu3 }
 0x428   :  { %v777_v9 = vpack.c.bf16 %v749_v49, %v749_v49 }
 0x42a   :  { %v815_v52 = vunpack.c.l.b16 %v777_v9 }
 0x42f   :  { %v751_v50 = vpop.f32.mrf.mxu3 }
 0x430   :  { %v778_v51 = vpack.c.bf16 %v751_v50, %v751_v50 }
 0x432   :  { %v816_v40 = vunpack.c.l.b16 %v778_v51 }
 0x434   :  { %v817_v17 = vpack.c.b16 %v816_v40, %v815_v52 }
 0x436   :  { %5188 = vmatmul.msk.bf16.vlgmr.msrb.gmra.mxu1 %vm156_vm1, %v817_v17 }
 0x47e   :  { %v334_v58 = vpop.xlane.xlu1 %333 }
 0x47f   :  { %v544_v44 = vpop.xlane.xlu2 %543 }
 0x480   :  { %5750 = vrcp.f32 %v544_v44 }
 0x484   :  { %v547_v53 = vpop.xlane.xlu0 %546 }
 0x485   :  { %5752 = vrcp.f32 %v547_v53 }
 0x486   :  { %v5751_v54 = vpop.eup %5750  ;;  %v768_v13 = vpop.xlane.xlu1 %767 }
 0x487   :  { %v558_v55 = vmul.f32 %v5751_v54, %v5745_v8  ;;  %v337_v56 = vpop.xlane.xlu2 %336  ;;  %v787_v23 = vperm.slane %v768_v13, %v6254_v43 }
 0x488   :  { %5754 = vrcp.f32 %v337_v56 }
 0x489   :  { %v598_v59 = vpack.c.bf16 %v558_v55, %v558_v55  ;;  %5756 = vrcp.f32 %v334_v58  ;;  %v6349_v61 = vpop.f32.mrf.mxu0 }
 0x48b   :  { %v5753_v57 = vpop.eup %5752  ;;  %v608_v45 = vunpack.c.l.b16 %v598_v59 }
 0x48c   :  { %v559_v5 = vmul.f32 %v5753_v57, %v5747_v16  ;;  %v765_v12 = vpop.xlane.xlu0 %764 }
 0x48d   :  { %v786_v16 = vperm.slane %v765_v12, %v6251_v42 }
 0x48e   :  { %v599_v60 = vpack.c.bf16 %v559_v5, %v559_v5  ;;  %v5755_v31 = vpop.eup %5754 }
 0x48f   :  { %v5757_v0 = vpop.eup %5756  ;;  %v345_v3 = vmul.f32 %v5755_v31, %v5749_v22  ;;  %v788_v25 = vsel %vm223_vm2, %v787_v23, %v786_v16  ;;  %v771_v35 = vpop.xlane.xlu2 %770 }
 0x490   :  { %v609_v4 = vunpack.c.l.b16 %v599_v60  ;;  %v344_v7 = vmul.f32 %v5757_v0, %v6326_v6  ;;  %v5638_v6 = vld [vmem:[%s7755_s7 + $0x38] sm:$0xff]  ;;  %v820_v41 = vperm.slane %v771_v35, %v6251_v42 }
 0x491   :  { %v384_v8 = vpack.c.bf16 %v345_v3, %v345_v3  ;;  %v6359_v10 = vpop.f32.mrf.mxu0 }
 0x492   :  { %v610_v63 = vpack.c.b16 %v609_v4, %v608_v45  ;;  %v383_v11 = vpack.c.bf16 %v344_v7, %v344_v7 }
 0x493   :  { %v693_v14 = vunpack.c.l.b16 %v384_v8 }
 0x494   :  { %5168 = vmatmul.msk.bf16.vlgmr.msrb.gmra.mxu2 %vm301_vm3, %v610_v63  ;;  %v692_v20 = vunpack.c.l.b16 %v383_v11  ;;  %v774_v33 = vpop.xlane.xlu0 %773 }
 0x495   :  { %914 = vmatpush.bf16.msrb.mxu2 %v5634_v62  ;;  %v821_v38 = vperm.slane %v774_v33, %v6254_v43  ;;  %v5706_v62 = vld [vmem:[%s7784_s23 + $0x3] ss:$0 sm:$0xff] }
 0x496   :  { %v694_v24 = vpack.c.b16 %v693_v14, %v692_v20  ;;  %v1036_v0 = vmul.f32 %v5706_v62, %v6139_v15  ;;  %v1037_v13 = vmul.f32 %v5706_v62, %v6144_v19  ;;  %v1039_v14 = vmul.f32 %v5706_v62, %v6177_v37 }
 0x497   :  { %v822_v46 = vsel %vm223_vm2, %v821_v38, %v820_v41 }
 0x498   :  { %v1040_v11 = vsel %vm156_vm1, %v1036_v0, 0.0 }
 0x499   :  { %915 = vmatpush.bf16.msrb.mxu2 %v5633_v2 }
 0x4a3   :  { %v808_v26 = vpop.f32.mrf.mxu0 }
 0x4a4   :  { %v809_v22 = vadd.f32 %v808_v26, %v788_v25  ;;  %5171 = vmatmul.msk.bf16.vlgmr.msra.gmra.mxu2 %vm301_vm3, %v694_v24  ;;  %v1043_v24 = vsel %vm156_vm1, %v1037_v13, 0.0  ;;  %v1049_v26 = vsel %vm156_vm1, %v1039_v14, 0.0 }
 0x4a5   :  { %1191 = vmatpush.bf16.msra.mxu2 %v5638_v6 }
 0x4a6   :  { %v847_v27 = vsel %vm301_vm3, %v809_v22, -inf }
 0x4a7   :  { %848 = vmax.xlane.f32.xlu1 %v847_v27 }
 0x4a9   :  { %1192 = vmatpush.bf16.msra.mxu2 %v5637_v28  ;;  %v1038_v28 = vmul.f32 %v5706_v62, %v6159_v29 }
 0x4ab   :  { %v810_v32 = vpop.f32.mrf.mxu0  ;;  %v1046_v33 = vsel %vm156_vm1, %v1038_v28, 0.0 }
 0x4ac   :  { %v811_v34 = vadd.f32 %v810_v32, %v788_v25 }
 0x4ae   :  { %v850_v36 = vsel %vm301_vm3, %v811_v34, -inf }
 0x4af   :  { %851 = vmax.xlane.f32.xlu2 %v850_v36 }
 0x4b3   :  { %v842_v48 = vpop.f32.mrf.mxu1 }
 0x4b4   :  { %v843_v49 = vadd.f32 %v842_v48, %v822_v46  ;;  %5201 = vmatmul.msk.bf16.vlgmr.msrb.gmra.mxu2 %vm156_vm1, %v6150_v21 }
 0x4b6   :  { %v853_v9 = vsel %vm301_vm3, %v843_v49, -inf }
 0x4b7   :  { %854 = vmax.xlane.f32.xlu0 %v853_v9 }
 0x4bb   :  { %v844_v50 = vpop.f32.mrf.mxu1 }
 0x4bc   :  { %v845_v51 = vadd.f32 %v844_v50, %v822_v46 }
 0x4be   :  { %v856_v52 = vsel %vm301_vm3, %v845_v51, -inf }
 0x4bf   :  { %857 = vmax.xlane.f32.xlu1 %v856_v52 }
 0x4c4   :  { %5202 = vmatmul.msk.bf16.gmra.mxu2 %vm156_vm1, %v6183_v39 }
 0x4d4   :  { %5234 = vmatmul.msk.bf16.vlgmr.msra.gmra.mxu2 %vm156_vm1, %v6150_v21 }
 0x4e4   :  { %5235 = vmatmul.msk.bf16.gmra.mxu2 %vm156_vm1, %v6183_v39 }
 0x517   :  { %v6386_v40 = vpop.f32.mrf.mxu2 }
 0x51a   :  { %v849_v17 = vpop.xlane.xlu1 %848 }
 0x51b   :  { %v859_v44 = vsub.f32 %v809_v22, %v849_v17 }
 0x51d   :  { %v863_v53 = vmul.f32 1.442695, %v859_v44  ;;  %v1021_v44 = vpop.f32.mrf.mxu3 }
 0x51e   :  { %v1052_v14 = vpack.c.bf16 %v1021_v44, %v1021_v44 }
 0x51f   :  { %5758 = vpow2.f32 %v863_v53  ;;  %v6388_v54 = vpop.f32.mrf.mxu2 }
 0x522   :  { %v852_v55 = vpop.xlane.xlu2 %851 }
 0x523   :  { %v860_v56 = vsub.f32 %v811_v34, %v852_v55 }
 0x525   :  { %v5759_v57 = vpop.eup %5758  ;;  %v865_v58 = vmul.f32 1.442695, %v860_v56  ;;  %v1023_v0 = vpop.f32.mrf.mxu3 }
 0x526   :  { %v871_v59 = vsel %vm301_vm3, %v5759_v57, 0.0 }
 0x527   :  { %5760 = vpow2.f32 %v865_v58  ;;  %872 = vadd.xlane.f32.xlu2 %v871_v59  ;;  %v6391_v21 = vpop.f32.mrf.mxu2 }
 0x52a   :  { %v855_v5 = vpop.xlane.xlu0 %854 }
 0x52b   :  { %v861_v39 = vsub.f32 %v843_v49, %v855_v5 }
 0x52d   :  { %v5761_v60 = vpop.eup %5760  ;;  %v867_v45 = vmul.f32 1.442695, %v861_v39 }
 0x52e   :  { %v874_v4 = vsel %vm301_vm3, %v5761_v60, 0.0 }
 0x52f   :  { %5762 = vpow2.f32 %v867_v45  ;;  %v6397_v63 = vpop.f32.mrf.mxu2  ;;  %875 = vadd.xlane.f32.xlu0 %v874_v4 }
 0x532   :  { %v858_v31 = vpop.xlane.xlu1 %857 }
 0x533   :  { %v862_v2 = vsub.f32 %v845_v51, %v858_v31 }
 0x535   :  { %v6400_v3 = vpop.eup %5762  ;;  %v869_v7 = vmul.f32 1.442695, %v862_v2 }
 0x536   :  { %v877_v8 = vsel %vm301_vm3, %v6400_v3, 0.0 }
 0x537   :  { %5764 = vpow2.f32 %v869_v7  ;;  %v917_v12 = vpop.f32.mrf.mxu2  ;;  %878 = vadd.xlane.f32.xlu1 %v877_v8  ;;  %1041 = vadd.xlane.f32.xlu0 %v1040_v11  ;;  %v1053_v11 = vpack.c.bf16 %v1023_v0, %v1023_v0 }
 0x538   :  { %v931_v20 = vpack.c.bf16 %v917_v12, %v917_v12 }
 0x53a   :  { %v942_v6 = vunpack.c.l.b16 %v931_v20 }
 0x53d   :  { %v6407_v16 = vpop.eup %5764 }
 0x53e   :  { %v880_v23 = vsel %vm301_vm3, %v6407_v16, 0.0 }
 0x53f   :  { %v919_v25 = vpop.f32.mrf.mxu2  ;;  %881 = vadd.xlane.f32.xlu2 %v880_v23  ;;  %1044 = vadd.xlane.f32.xlu1 %v1043_v24  ;;  %v1026_v24 = vpop.f32.mrf.mxu3 }
 0x540   :  { %v932_v22 = vpack.c.bf16 %v919_v25, %v919_v25  ;;  %1050 = vadd.xlane.f32.xlu0 %v1049_v26  ;;  %v1059_v26 = vunpack.c.l.b16 %v1053_v11 }
 0x542   :  { %v943_v27 = vunpack.c.l.b16 %v932_v22 }
 0x544   :  { %v944_v32 = vpack.c.b16 %v943_v27, %v942_v6  ;;  %v1058_v27 = vunpack.c.l.b16 %v1052_v14 }
 0x546   :  { %956 = vmatpush.bf16.msra.mxu0 %v944_v32 }
 0x547   :  { %v922_v34 = vpop.f32.mrf.mxu2  ;;  %1047 = vadd.xlane.f32.xlu2 %v1046_v33 }
 0x548   :  { %v933_v35 = vpack.c.bf16 %v922_v34, %v922_v34  ;;  %v1060_v34 = vpack.c.b16 %v1059_v26, %v1058_v27 }
 0x54a   :  { %1083 = vmatpush.bf16.xpose.msrb.mxu0 %v6162_v30  ;;  %v970_v41 = vunpack.c.l.b16 %v933_v35 }
 0x54f   :  { %v924_v36 = vpop.f32.mrf.mxu2 }
 0x550   :  { %v934_v38 = vpack.c.bf16 %v924_v36, %v924_v36 }
 0x552   :  { %v971_v46 = vunpack.c.l.b16 %v934_v38 }
 0x554   :  { %v972_v48 = vpack.c.b16 %v971_v46, %v970_v41 }
 0x556   :  { %984 = vmatpush.bf16.msra.mxu1 %v972_v48 }
 0x557   :  { %v1194_v49 = vpop.f32.mrf.mxu2 }
 0x558   :  { %v1208_v59 = vpack.c.bf16 %v1194_v49, %v1194_v49  ;;  %v686_v49 = vadd.f32 %v6349_v61, %v6386_v40 }
 0x55a   :  { %1117 = vmatpush.bf16.xpose.msrb.mxu1 %v6198_v47  ;;  %v1219_v62 = vunpack.c.l.b16 %v1208_v59 }
 0x55f   :  { %v1196_v50 = vpop.f32.mrf.mxu2 }
 0x560   :  { %v1209_v53 = vpack.c.bf16 %v1196_v50, %v1196_v50 }
 0x562   :  { %v1220_v45 = vunpack.c.l.b16 %v1209_v53  ;;  %v714_v53 = vadd.f32 %v6391_v21, %v6324_v1 }
 0x564   :  { %v1221_v2 = vpack.c.b16 %v1220_v45, %v1219_v62 }
 0x567   :  { %v1199_v5 = vpop.f32.mrf.mxu2 }
 0x568   :  { %v1210_v25 = vpack.c.bf16 %v1199_v5, %v1199_v5 }
 0x56a   :  { %v1247_v33 = vunpack.c.l.b16 %v1210_v25 }
 0x56f   :  { %v1201_v8 = vpop.f32.mrf.mxu2 }
 0x570   :  { %v1211_v13 = vpack.c.bf16 %v1201_v8, %v1201_v8 }
 0x572   :  { %v1248_v6 = vunpack.c.l.b16 %v1211_v13 }
 0x574   :  { %v1249_v36 = vpack.c.b16 %v1248_v6, %v1247_v33 }
 0x59a   :  { %v873_v9 = vpop.xlane.xlu2 %872 }
 0x59b   :  { %5766 = vrcp.f32 %v873_v9 }
 0x5a1   :  { %v5767_v52 = vpop.eup %5766 }
 0x5a2   :  { %v876_v51 = vpop.xlane.xlu0 %875  ;;  %v887_v17 = vmul.f32 %v5767_v52, %v5759_v57 }
 0x5a3   :  { %5768 = vrcp.f32 %v876_v51 }
 0x5a4   :  { %v927_v55 = vpack.c.bf16 %v887_v17, %v887_v17 }
 0x5a6   :  { %v937_v47 = vunpack.c.l.b16 %v927_v55 }
 0x5a9   :  { %v5769_v30 = vpop.eup %5768 }
 0x5aa   :  { %v888_v56 = vmul.f32 %v5769_v30, %v5761_v60  ;;  %v879_v58 = vpop.xlane.xlu1 %878  ;;  %v1042_v17 = vpop.xlane.xlu0 %1041 }
 0x5ab   :  { %5770 = vrcp.f32 %v879_v58  ;;  %v1063_v30 = vperm.slane %v1042_v17, %v6251_v42 }
 0x5ac   :  { %v928_v39 = vpack.c.bf16 %v888_v56, %v888_v56 }
 0x5ae   :  { %v938_v4 = vunpack.c.l.b16 %v928_v39 }
 0x5b0   :  { %v939_v31 = vpack.c.b16 %v938_v4, %v937_v47 }
 0x5b1   :  { %v5771_v7 = vpop.eup %5770 }
 0x5b2   :  { %5203 = vmatmul.msk.bf16.vlgmr.msra.gmra.mxu0 %vm301_vm3, %v939_v31  ;;  %v882_v57 = vpop.xlane.xlu2 %881  ;;  %v889_v60 = vmul.f32 %v5771_v7, %v6400_v3  ;;  %v1028_v3 = vpop.f32.mrf.mxu3 }
 0x5b3   :  { %1233 = vmatpush.bf16.msra.mxu0 %v1221_v2  ;;  %5772 = vrcp.f32 %v882_v57  ;;  %v1055_v38 = vpack.c.bf16 %v1028_v3, %v1028_v3  ;;  %v1045_v52 = vpop.xlane.xlu1 %1044  ;;  %v1051_v4 = vpop.xlane.xlu0 %1050 }
 0x5b4   :  { %v929_v20 = vpack.c.bf16 %v889_v60, %v889_v60  ;;  %v1064_v44 = vperm.slane %v1045_v52, %v6254_v43  ;;  %v1098_v21 = vperm.slane %v1051_v4, %v6254_v43 }
 0x5b5   :  { %v1093_v41 = vunpack.c.l.b16 %v1055_v38 }
 0x5b6   :  { %v965_v28 = vunpack.c.l.b16 %v929_v20  ;;  %v1065_v56 = vsel %vm223_vm2, %v1064_v44, %v1063_v30 }
 0x5b9   :  { %v5773_v12 = vpop.eup %5772 }
 0x5ba   :  { %v890_v23 = vmul.f32 %v5773_v12, %v6407_v16  ;;  %v1054_v16 = vpack.c.bf16 %v1026_v24, %v1026_v24  ;;  %v1048_v45 = vpop.xlane.xlu2 %1047 }
 0x5bb   :  { %v1097_v1 = vperm.slane %v1048_v45, %v6251_v42 }
 0x5bc   :  { %v930_v22 = vpack.c.bf16 %v890_v23, %v890_v23  ;;  %v1092_v46 = vunpack.c.l.b16 %v1054_v16  ;;  %v5986_v16 = vld [vmem:[%s7783_s27] ss:$0 sm:$0xff] }
 0x5bd   :  { %v1099_v31 = vsel %vm223_vm2, %v1098_v21, %v1097_v1 }
 0x5be   :  { %v966_v32 = vunpack.c.l.b16 %v930_v22  ;;  %v1094_v48 = vpack.c.b16 %v1093_v41, %v1092_v46 }
 0x5c0   :  { %v967_v35 = vpack.c.b16 %v966_v32, %v965_v28 }
 0x5c2   :  { %5204 = vmatmul.msk.bf16.vlgmr.msra.gmra.mxu1 %vm301_vm3, %v967_v35  ;;  %5220 = vmatmul.msk.bf16.vlgmr.msrb.gmra.mxu0 %vm156_vm1, %v1060_v34 }
 0x5c3   :  { %1261 = vmatpush.bf16.msra.mxu1 %v1249_v36 }
 0x5d2   :  { %5221 = vmatmul.msk.bf16.vlgmr.msrb.gmra.mxu1 %vm156_vm1, %v1094_v48 }
 0x62f   :  { %v958_v9 = vpop.f32.mrf.mxu0 }
 0x630   :  { %v6425_v50 = vadd.f32 %v958_v9, %v686_v49 }
 0x637   :  { %v6427_v51 = vpop.f32.mrf.mxu0 }
 0x63f   :  { %v986_v55 = vpop.f32.mrf.mxu1  ;;  %v1085_v58 = vpop.f32.mrf.mxu0 }
 0x640   :  { %v6434_v59 = vadd.f32 %v986_v55, %v714_v53  ;;  %v1086_v61 = vadd.f32 %v1085_v58, %v1065_v56 }
 0x642   :  { %v1124_v40 = vsel %vm301_vm3, %v1086_v61, -inf }
 0x643   :  { %1125 = vmax.xlane.f32.xlu1 %v1124_v40 }
 0x647   :  { %v6437_v5 = vpop.f32.mrf.mxu1  ;;  %v1087_v39 = vpop.f32.mrf.mxu0 }
 0x648   :  { %v1088_v47 = vadd.f32 %v1087_v39, %v1065_v56 }
 0x64a   :  { %v1127_v62 = vsel %vm301_vm3, %v1088_v47, -inf }
 0x64b   :  { %1128 = vmax.xlane.f32.xlu2 %v1127_v62 }
 0x64f   :  { %v1119_v0 = vpop.f32.mrf.mxu1 }
 0x650   :  { %v1120_v2 = vadd.f32 %v1119_v0, %v1099_v31 }
 0x652   :  { %v1130_v57 = vsel %vm301_vm3, %v1120_v2, -inf }
 0x653   :  { %1131 = vmax.xlane.f32.xlu0 %v1130_v57 }
 0x657   :  { %v1121_v7 = vpop.f32.mrf.mxu1 }
 0x658   :  { %v1122_v8 = vadd.f32 %v1121_v7, %v1099_v31  ;;  %v688_v7 = vadd.f32 %v6359_v10, %v6388_v54 }
 0x65a   :  { %v1133_v60 = vsel %vm301_vm3, %v1122_v8, -inf }
 0x65b   :  { %1134 = vmax.xlane.f32.xlu1 %v1133_v60  ;;  %v992_v60 = vadd.f32 %v6427_v51, %v688_v7 }
 0x6b6   :  { %v1126_v11 = vpop.xlane.xlu1 %1125 }
 0x6b7   :  { %v1136_v12 = vsub.f32 %v1086_v61, %v1126_v11 }
 0x6b9   :  { %v1140_v13 = vmul.f32 1.442695, %v1136_v12 }
 0x6bb   :  { %5774 = vpow2.f32 %v1140_v13 }
 0x6be   :  { %v1129_v14 = vpop.xlane.xlu2 %1128 }
 0x6bf   :  { %v1137_v20 = vsub.f32 %v1088_v47, %v1129_v14 }
 0x6c1   :  { %v5775_v23 = vpop.eup %5774  ;;  %v1142_v24 = vmul.f32 1.442695, %v1137_v20 }
 0x6c2   :  { %v1148_v25 = vsel %vm301_vm3, %v5775_v23, 0.0 }
 0x6c3   :  { %5776 = vpow2.f32 %v1142_v24  ;;  %1149 = vadd.xlane.f32.xlu2 %v1148_v25 }
 0x6c6   :  { %v1132_v26 = vpop.xlane.xlu0 %1131 }
 0x6c7   :  { %v1138_v22 = vsub.f32 %v1120_v2, %v1132_v26 }
 0x6c9   :  { %v5777_v6 = vpop.eup %5776  ;;  %v1144_v27 = vmul.f32 1.442695, %v1138_v22 }
 0x6ca   :  { %v1151_v28 = vsel %vm301_vm3, %v5777_v6, 0.0 }
 0x6cb   :  { %5778 = vpow2.f32 %v1144_v27  ;;  %1152 = vadd.xlane.f32.xlu0 %v1151_v28 }
 0x6ce   :  { %v1135_v32 = vpop.xlane.xlu1 %1134 }
 0x6cf   :  { %v1139_v33 = vsub.f32 %v1122_v8, %v1135_v32 }
 0x6d1   :  { %v5779_v34 = vpop.eup %5778  ;;  %v1146_v35 = vmul.f32 1.442695, %v1139_v33 }
 0x6d2   :  { %v1154_v36 = vsel %vm301_vm3, %v5779_v34, 0.0 }
 0x6d3   :  { %5780 = vpow2.f32 %v1146_v35  ;;  %1155 = vadd.xlane.f32.xlu1 %v1154_v36 }
 0x6d9   :  { %v5781_v3 = vpop.eup %5780 }
 0x6da   :  { %v1157_v38 = vsel %vm301_vm3, %v5781_v3, 0.0 }
 0x6db   :  { %1158 = vadd.xlane.f32.xlu2 %v1157_v38 }
 0x6df   :  { %1272 = vrot.lane.b32.xlu0 %v5986_v16, %s5994_s4 }
 0x736   :  { %v1150_v41 = vpop.xlane.xlu2 %1149 }
 0x737   :  { %5782 = vrcp.f32 %v1150_v41 }
 0x73d   :  { %v5783_v48 = vpop.eup %5782 }
 0x73e   :  { %v1153_v46 = vpop.xlane.xlu0 %1152  ;;  %v1164_v49 = vmul.f32 %v5783_v48, %v5775_v23 }
 0x73f   :  { %5784 = vrcp.f32 %v1153_v46 }
 0x740   :  { %v1204_v52 = vpack.c.bf16 %v1164_v49, %v1164_v49 }
 0x742   :  { %v1214_v53 = vunpack.c.l.b16 %v1204_v52 }
 0x745   :  { %v5785_v9 = vpop.eup %5784 }
 0x746   :  { %v1165_v17 = vmul.f32 %v5785_v9, %v5777_v6  ;;  %v1156_v44 = vpop.xlane.xlu1 %1155 }
 0x747   :  { %5786 = vrcp.f32 %v1156_v44 }
 0x748   :  { %v1205_v30 = vpack.c.bf16 %v1165_v17, %v1165_v17 }
 0x74a   :  { %v1215_v55 = vunpack.c.l.b16 %v1205_v30 }
 0x74c   :  { %v1216_v56 = vpack.c.b16 %v1215_v55, %v1214_v53 }
 0x74d   :  { %v5787_v61 = vpop.eup %5786 }
 0x74e   :  { %5236 = vmatmul.msk.bf16.vlgmr.msra.gmra.mxu0 %vm301_vm3, %v1216_v56  ;;  %v1159_v58 = vpop.xlane.xlu2 %1158  ;;  %v1166_v40 = vmul.f32 %v5787_v61, %v5779_v34 }
 0x74f   :  { %5788 = vrcp.f32 %v1159_v58  ;;  %v5707_v58 = vld [vmem:[%s7783_s27] ss:$0 sm:$0xff] }
 0x750   :  { %v1206_v45 = vpack.c.bf16 %v1166_v40, %v1166_v40 }
 0x751   :  { %v1273_v0 = vpop.permute.xlu0 %1272 }
 0x752   :  { %v1242_v62 = vunpack.c.l.b16 %v1206_v45 }
 0x755   :  { %v5789_v39 = vpop.eup %5788 }
 0x756   :  { %v1167_v47 = vmul.f32 %v5789_v39, %v5781_v3 }
 0x758   :  { %v1207_v4 = vpack.c.bf16 %v1167_v47, %v1167_v47 }
 0x75a   :  { %v1243_v1 = vunpack.c.l.b16 %v1207_v4 }
 0x75c   :  { %v1244_v21 = vpack.c.b16 %v1243_v1, %v1242_v62  ;;  %v6507_v62 = vld [vmem:[%s7756_s8 + $0x8] sm:$0xff]  ;;  %v6513_v1 = vld [vmem:[%s7756_s8] sm:$0xff] }
 0x75d   :  { %1429 = vmatpush.bf16.msrb.mxu3 %v6507_v62 }
 0x75e   :  { %5237 = vmatmul.msk.bf16.vlgmr.msra.gmra.mxu1 %vm301_vm3, %v1244_v21 }
 0x761   :  { %1430 = vmatpush.bf16.msrb.mxu3 %v6513_v1 }
 0x7cb   :  { %v1235_v31 = vpop.f32.mrf.mxu0 }
 0x7cc   :  { %v1268_v2 = vadd.f32 %v1235_v31, %v6425_v50 }
 0x7ce   :  { %v1275_v57 = vadd.f32 %v1273_v0, %v1268_v2 }
 0x7d0   :  { %v1279_v8 = vadd.f32 %v1275_v57, %v6139_v15  ;;  %v716_v15 = vadd.f32 %v6397_v63, %v6336_v18 }
 0x7d2   :  { %v1284_v11 = vsel %vm156_vm1, %v1279_v8, 0.0  ;;  %v994_v54 = vadd.f32 %v6437_v5, %v716_v15 }
 0x7d3   :  { %1285 = vadd.xlane.f32.xlu1 %v1284_v11  ;;  %v1237_v12 = vpop.f32.mrf.mxu0 }
 0x7d4   :  { %v1269_v13 = vadd.f32 %v1237_v12, %v992_v60 }
 0x7d6   :  { %v1276_v14 = vadd.f32 %v1273_v0, %v1269_v13 }
 0x7d8   :  { %v1280_v20 = vadd.f32 %v1276_v14, %v6144_v19 }
 0x7da   :  { %v1287_v23 = vsel %vm156_vm1, %v1280_v20, 0.0 }
 0x7db   :  { %1288 = vadd.xlane.f32.xlu2 %v1287_v23  ;;  %v1263_v50 = vpop.f32.mrf.mxu1 }
 0x7dc   :  { %v1270_v24 = vadd.f32 %v1263_v50, %v6434_v59  ;;  %v5995_v59 = vmov 32.0  }
 0x7dd   :  { %5790 = vrcp.f32 %v5995_v59 }
 0x7de   :  { %v1277_v25 = vadd.f32 %v1273_v0, %v1270_v24 }
 0x7e0   :  { %v1281_v10 = vadd.f32 %v1277_v25, %v6159_v29 }
 0x7e2   :  { %v1290_v51 = vsel %vm156_vm1, %v1281_v10, 0.0 }
 0x7e3   :  { %1291 = vadd.xlane.f32.xlu1 %v1290_v51  ;;  %v1265_v26 = vpop.f32.mrf.mxu1  ;;  %v5791_v28 = vpop.eup %5790 }
 0x7e4   :  { %v1271_v22 = vadd.f32 %v1265_v26, %v994_v54  ;;  %v1297_v32 = vmul.f32 32.0, %v5791_v28  ;;  %vm1301_vm4 = vweird.f32 %v5791_v28 }
 0x7e6   :  { %v1278_v19 = vadd.f32 %v1273_v0, %v1271_v22  ;;  %v1298_v18 = vsub.f32 1.0, %v1297_v32  ;;  %v5648_v22 = vld [vmem:[%s7757_s12 + $0x8] sm:$0xff] }
 0x7e7   :  { %1802 = vmatpush.bf16.msra.mxu3 %v5648_v22 }
 0x7e8   :  { %v1282_v6 = vadd.f32 %v1278_v19, %v6177_v37  ;;  %v1299_v63 = vmul.f32 %v5791_v28, %v1298_v18  ;;  %v6524_v19 = vld [vmem:[%s7783_s27 + $0x1] ss:$0 sm:$0xff] }
 0x7ea   :  { %v1293_v27 = vsel %vm156_vm1, %v1282_v6, 0.0  ;;  %v1300_v29 = vadd.f32 %v5791_v28, %v1299_v63 }
 0x7eb   :  { %1294 = vadd.xlane.f32.xlu2 %v1293_v27 }
 0x7ec   :  { %v6471_v5 = vsel %vm1301_vm4, %v5791_v28, %v1300_v29  ;;  %vm1483_vm4 = vcmask 523264  }
 0x846   :  { %v1286_v33 = vpop.xlane.xlu1 %1285 }
 0x847   :  { %v1303_v34 = vmul.f32 %v6471_v5, %v1286_v33 }
 0x849   :  { %v6474_v35 = vsub.f32 %v1279_v8, %v1303_v34 }
 0x84b   :  { %v1311_v37 = vmul.f32 %v6474_v35, %v6474_v35 }
 0x84d   :  { %v1315_v36 = vsel %vm156_vm1, %v1311_v37, 0.0 }
 0x84e   :  { %1316 = vadd.xlane.f32.xlu1 %v1315_v36  ;;  %v1289_v3 = vpop.xlane.xlu2 %1288 }
 0x84f   :  { %v1304_v38 = vmul.f32 %v6471_v5, %v1289_v3 }
 0x851   :  { %v6480_v16 = vsub.f32 %v1280_v20, %v1304_v38 }
 0x853   :  { %v1312_v41 = vmul.f32 %v6480_v16, %v6480_v16 }
 0x855   :  { %v1318_v46 = vsel %vm156_vm1, %v1312_v41, 0.0 }
 0x856   :  { %v1292_v48 = vpop.xlane.xlu1 %1291  ;;  %1319 = vadd.xlane.f32.xlu2 %v1318_v46 }
 0x857   :  { %v1305_v49 = vmul.f32 %v6471_v5, %v1292_v48 }
 0x859   :  { %v6486_v9 = vsub.f32 %v1281_v10, %v1305_v49 }
 0x85b   :  { %v1313_v52 = vmul.f32 %v6486_v9, %v6486_v9 }
 0x85d   :  { %v1321_v17 = vsel %vm156_vm1, %v1313_v52, 0.0 }
 0x85e   :  { %1322 = vadd.xlane.f32.xlu0 %v1321_v17  ;;  %v1295_v44 = vpop.xlane.xlu2 %1294 }
 0x85f   :  { %v1306_v30 = vmul.f32 %v6471_v5, %v1295_v44 }
 0x861   :  { %v6492_v53 = vsub.f32 %v1282_v6, %v1306_v30 }
 0x863   :  { %v1314_v55 = vmul.f32 %v6492_v53, %v6492_v53 }
 0x865   :  { %v1324_v56 = vsel %vm156_vm1, %v1314_v55, 0.0 }
 0x866   :  { %1325 = vadd.xlane.f32.xlu1 %v1324_v56 }
 0x86e   :  { %1381 = vrot.lane.b32.xlu2 %v5707_v58, %s5996_s19 }
 0x876   :  { %1480 = vrot.lane.b32.xlu2 %v6524_v19, %s5996_s19 }
 0x87f   :  { %1388 = vrot.lane.b32.xlu1 %v5707_v58, %s5997_s22 }
 0x8c1   :  { %v1317_v61 = vpop.xlane.xlu1 %1316 }
 0x8c2   :  { %v1327_v40 = vmul.f32 %v1317_v61, %v6471_v5 }
 0x8c4   :  { %v1331_v39 = vadd.f32 1e-05, %v1327_v40  ;;  %v5644_v40 = vld [vmem:[%s7758_s9 + $0x18] sm:$0xff] }
 0x8c5   :  { %1494 = vmatpush.bf16.msrb.mxu0 %v5644_v40 }
 0x8c6   :  { %5792 = vrsqrt.f32 %v1331_v39  ;;  %vm1341_vm7 = vweird.f32 %v1331_v39 }
 0x8c9   :  { %v1320_v45 = vpop.xlane.xlu2 %1319 }
 0x8ca   :  { %v1328_v47 = vmul.f32 %v1320_v45, %v6471_v5 }
 0x8cc   :  { %v1332_v4 = vadd.f32 1e-05, %v1328_v47  ;;  %v5793_v21 = vpop.eup %5792  ;;  %v5643_v47 = vld [vmem:[%s7758_s9 + $0x10] sm:$0xff] }
 0x8cd   :  { %v1336_v2 = vmul.f32 %v5793_v21, %v1331_v39  ;;  %vm1342_vm5 = vweird.f32 %v5793_v21  ;;  %v6560_v39 = vld [vmem:[%s7759_s3 + $0x8] sm:$0xff]  ;;  %1495 = vmatpush.bf16.msrb.mxu0 %v5643_v47 }
 0x8ce   :  { %5794 = vrsqrt.f32 %v1332_v4  ;;  %vm1343_vm8 = vmor %vm1341_vm7, %vm1342_vm5  ;;  %vm1351_vm9 = vweird.f32 %v1332_v4  ;;  %vm1686_vm5 = vcmask 1041408  }
 0x8cf   :  { %v1337_v8 = vmul.f32 %v5793_v21, %v1336_v2 }
 0x8d1   :  { %v1323_v31 = vpop.xlane.xlu0 %1322  ;;  %v1338_v14 = vmul.f32 0.5, %v1337_v8  ;;  %v1382_v34 = vpop.permute.xlu2 %1381 }
 0x8d2   :  { %v1329_v57 = vmul.f32 %v1323_v31, %v6471_v5 }
 0x8d3   :  { %v1339_v50 = vsub.f32 1.5, %v1338_v14 }
 0x8d4   :  { %v5795_v0 = vpop.eup %5794  ;;  %v1333_v60 = vadd.f32 1e-05, %v1329_v57 }
 0x8d5   :  { %v1346_v7 = vmul.f32 %v5795_v0, %v1332_v4  ;;  %v1340_v10 = vmul.f32 %v5793_v21, %v1339_v50  ;;  %vm1352_vm6 = vweird.f32 %v5795_v0  ;;  %v5642_v4 = vld [vmem:[%s7758_s9 + $0x8] sm:$0xff] }
 0x8d6   :  { %5796 = vrsqrt.f32 %v1333_v60  ;;  %vm1353_vm10 = vmor %vm1351_vm9, %vm1352_vm6  ;;  %vm1361_vm15 = vweird.f32 %v1333_v60  ;;  %1496 = vmatpush.bf16.msrb.mxu0 %v5642_v4  ;;  %vm1682_vm6 = vcmask 31744  }
 0x8d7   :  { %v1347_v11 = vmul.f32 %v5795_v0, %v1346_v7  ;;  %v1344_v27 = vsel %vm1343_vm8, %v5793_v21, %v1340_v10  ;;  %v5641_v21 = vld [vmem:[%s7758_s9] sm:$0xff] }
 0x8d8   :  { %v1375_v18 = vmul.f32 %v1344_v27, %v6474_v35 }
 0x8d9   :  { %v1326_v12 = vpop.xlane.xlu1 %1325  ;;  %v1348_v23 = vmul.f32 0.5, %v1347_v11 }
 0x8da   :  { %v1330_v13 = vmul.f32 %v1326_v12, %v6471_v5  ;;  %v1384_v37 = vmul.f32 %v1382_v34, %v1375_v18  ;;  %1497 = vmatpush.bf16.msrb.mxu0 %v5641_v21  ;;  %v5652_v18 = vld [vmem:[%s7757_s12 + $0x18] sm:$0xff] }
 0x8db   :  { %v1349_v24 = vsub.f32 1.5, %v1348_v23 }
 0x8dc   :  { %v1334_v20 = vadd.f32 1e-05, %v1330_v13  ;;  %v5797_v25 = vpop.eup %5796 }
 0x8dd   :  { %v1350_v54 = vmul.f32 %v5795_v0, %v1349_v24  ;;  %v1356_v51 = vmul.f32 %v5797_v25, %v1333_v60  ;;  %vm1362_vm14 = vweird.f32 %v5797_v25 }
 0x8de   :  { %5798 = vrsqrt.f32 %v1334_v20  ;;  %vm1371_vm12 = vweird.f32 %v1334_v20  ;;  %vm1363_vm0 = vmor %vm1361_vm15, %vm1362_vm14 }
 0x8df   :  { %v1354_v59 = vsel %vm1353_vm10, %v5795_v0, %v1350_v54  ;;  %v1357_v28 = vmul.f32 %v5797_v25, %v1356_v51 }
 0x8e0   :  { %v1376_v63 = vmul.f32 %v1354_v59, %v6480_v16 }
 0x8e1   :  { %v1358_v29 = vmul.f32 0.5, %v1357_v28 }
 0x8e2   :  { %v1385_v36 = vmul.f32 %v1382_v34, %v1376_v63  ;;  %v5651_v63 = vld [vmem:[%s7757_s12 + $0x10] sm:$0xff] }
 0x8e3   :  { %v1359_v3 = vsub.f32 1.5, %v1358_v29  ;;  %v1481_v29 = vpop.permute.xlu2 %1480 }
 0x8e4   :  { %v5799_v15 = vpop.eup %5798 }
 0x8e5   :  { %v1366_v26 = vmul.f32 %v5799_v15, %v1334_v20  ;;  %vm1372_vm11 = vweird.f32 %v5799_v15  ;;  %v1360_v49 = vmul.f32 %v5797_v25, %v1359_v3 }
 0x8e6   :  { %vm1373_vm13 = vmor %vm1371_vm12, %vm1372_vm11 }
 0x8e7   :  { %v1367_v6 = vmul.f32 %v5799_v15, %v1366_v26  ;;  %v1364_v17 = vsel %vm1363_vm0, %v5797_v25, %v1360_v49  ;;  %v1771_v25 = vpack.c.bf16 %v6560_v39, %v6560_v39 }
 0x8e8   :  { %v1377_v44 = vmul.f32 %v1364_v17, %v6486_v9  ;;  %v6555_v9 = vld [vmem:[%s7759_s3] sm:$0xff] }
 0x8e9   :  { %v1368_v32 = vmul.f32 0.5, %v1367_v6  ;;  %v6564_v45 = vpack.c.bf16 %v6560_v39, %v6555_v9  ;;  %v1770_v24 = vpack.c.bf16 %v6555_v9, %v6555_v9  ;;  %v1847_v10 = vunpack.c.l.b16 %v1771_v25 }
 0x8ea   :  { %v1386_v55 = vmul.f32 %v1382_v34, %v1377_v44 }
 0x8eb   :  { %v1369_v33 = vsub.f32 1.5, %v1368_v32 }
 0x8ed   :  { %v1370_v38 = vmul.f32 %v5799_v15, %v1369_v33  ;;  %v6603_v33 = vld [vmem:[%s7759_s3 + $0x10] sm:$0xff] }
 0x8ef   :  { %v1374_v16 = vsel %vm1373_vm13, %v5799_v15, %v1370_v38  ;;  %v1846_v15 = vunpack.c.l.b16 %v1770_v24 }
 0x8f0   :  { %v1378_v52 = vmul.f32 %v1374_v16, %v6492_v53  ;;  %v5647_v53 = vld [vmem:[%s7757_s12] sm:$0xff] }
 0x8f1   :  { %v1389_v41 = vpop.permute.xlu1 %1388  ;;  %1803 = vmatpush.bf16.msra.mxu3 %v5647_v53  ;;  %v1848_v54 = vpack.c.b16 %v1847_v10, %v1846_v15 }
 0x8f2   :  { %v6530_v46 = vadd.f32 %v1389_v41, %v1384_v37  ;;  %v6532_v48 = vadd.f32 %v1389_v41, %v1385_v36  ;;  %v1387_v30 = vmul.f32 %v1382_v34, %v1378_v52  ;;  %v6541_v58 = vadd.f32 %v1389_v41, %v1386_v55  ;;  %v6608_v34 = vld [vmem:[%s7759_s3 + $0x18] sm:$0xff] }
 0x8f3   :  { %v6588_v51 = vsel %vm156_vm1, %v1848_v54, 0  ;;  %v6612_v37 = vpack.c.bf16 %v6608_v34, %v6603_v33 }
 0x8f4   :  { %v1395_v35 = vpack.c.bf16 %v6532_v48, %v6530_v46  ;;  %v6539_v56 = vadd.f32 %v1389_v41, %v1387_v30  ;;  %1874 = vmatpush.bf16.xpose.msra.mxu0 %v6588_v51 }
 0x8f6   :  { %5246 = vmatmul.msk.bf16.vlgmr.msrb.gmra.mxu3 %vm156_vm1, %v1395_v35  ;;  %v1396_v61 = vpack.c.bf16 %v6539_v56, %v6541_v58 }
 0x906   :  { %5247 = vmatmul.msk.bf16.gmra.mxu3 %vm156_vm1, %v1396_v61 }
 0x916   :  { %5286 = vmatmul.msk.bf16.vlgmr.msra.gmra.mxu3 %vm156_vm1, %v6564_v45 }
 0x926   :  { %5287 = vmatmul.msk.bf16.gmra.mxu3 %vm156_vm1, %v6612_v37 }
 0x979   :  { %v1432_v31 = vpop.f32.mrf.mxu3 }
 0x97a   :  { %v1433_v0 = vadd.f32 %v6524_v19, %v1432_v31 }
 0x97c   :  { %v1442_v7 = vmax.f32 %v1433_v0, 0.0 }
 0x981   :  { %v1434_v2 = vpop.f32.mrf.mxu3 }
 0x982   :  { %v1435_v57 = vadd.f32 %v6524_v19, %v1434_v2 }
 0x984   :  { %v1443_v8 = vmax.f32 %v1435_v57, 0.0 }
 0x986   :  { %v1446_v60 = vpack.c.bf16 %v1443_v8, %v1442_v7  ;;  %v1772_v8 = vpack.c.bf16 %v6603_v33, %v6603_v33 }
 0x988   :  { %5264 = vmatmul.msk.bf16.vlgmr.msrb.gmra.mxu0 %vm1483_vm4, %v1446_v60  ;;  %v1773_v60 = vpack.c.bf16 %v6608_v34, %v6608_v34 }
 0x989   :  { %v1437_v11 = vpop.f32.mrf.mxu3  ;;  %2033 = vmatpush.bf16.msrb.mxu0 %v5652_v18 }
 0x98a   :  { %v1438_v12 = vadd.f32 %v6524_v19, %v1437_v11 }
 0x98c   :  { %v1444_v20 = vmax.f32 %v1438_v12, 0.0 }
 0x98d   :  { %2034 = vmatpush.bf16.msrb.mxu0 %v5651_v63 }
 0x991   :  { %v1439_v13 = vpop.f32.mrf.mxu3 }
 0x992   :  { %v1440_v14 = vadd.f32 %v6524_v19, %v1439_v13  ;;  %v1888_v13 = vunpack.c.l.b16 %v1772_v8 }
 0x994   :  { %v1445_v23 = vmax.f32 %v1440_v14, 0.0  ;;  %v1889_v14 = vunpack.c.l.b16 %v1773_v60 }
 0x996   :  { %v1447_v50 = vpack.c.bf16 %v1445_v23, %v1444_v20 }
 0x998   :  { %5265 = vmatmul.msk.bf16.gmra.mxu0 %vm1483_vm4, %v1447_v50  ;;  %v1890_v50 = vpack.c.b16 %v1889_v14, %v1888_v13 }
 0x999   :  { %v1805_v26 = vpop.f32.mrf.mxu3 }
 0x99a   :  { %v1835_v22 = vpack.c.bf16 %v1805_v26, %v1805_v26  ;;  %v6654_v25 = vsel %vm156_vm1, %v1890_v50, 0 }
 0x99b   :  { %2132 = vmatpush.bf16.xpose.msrb.mxu3 %v6654_v25 }
 0x99c   :  { %v1841_v27 = vunpack.c.l.b16 %v1835_v22 }
 0x9a1   :  { %v1807_v6 = vpop.f32.mrf.mxu3 }
 0x9a2   :  { %v1836_v59 = vpack.c.bf16 %v1807_v6, %v1807_v6 }
 0x9a4   :  { %v1842_v28 = vunpack.c.l.b16 %v1836_v59 }
 0x9a6   :  { %v1843_v32 = vpack.c.b16 %v1842_v28, %v1841_v27  ;;  %v1678_v28 = vld [vmem:[%s7761_s10] sm:$0x3] }
 0x9a8   :  { %5288 = vmatmul.msk.bf16.vlgmr.msra.gmra.mxu0 %vm156_vm1, %v1843_v32  ;;  %v1676_v32 = vld [vmem:[%s7762_s1] sm:$0x3] }
 0x9b8   :  { %5312 = vmatmul.msk.bf16.vlgmr.msrb.gmra.mxu0 %vm156_vm1, %v6564_v45 }
 0x9c8   :  { %5313 = vmatmul.msk.bf16.gmra.mxu0 %vm156_vm1, %v6612_v37 }
 0xa05   :  { %v1499_v36 = vpop.f32.mrf.mxu0 }
 0xa06   :  { %v1500_v3 = vadd.f32 %v1499_v36, %v1481_v29  ;;  %v1677_v36 = vpack.c.bf16 %v1676_v32, %v1676_v32 }
 0xa08   :  { %v1509_v38 = vadd.f32 %v1500_v3, %v6530_v46  ;;  %v6672_v3 = vld [vmem:[%s7760_s13 + $0x1] ss:$0 sm:$0xff] }
 0xa0a   :  { %v1514_v41 = vsel %vm156_vm1, %v1509_v38, 0.0 }
 0xa0b   :  { %1515 = vadd.xlane.f32.xlu2 %v1514_v41 }
 0xa0d   :  { %v1501_v35 = vpop.f32.mrf.mxu0 }
 0xa0e   :  { %v1502_v49 = vadd.f32 %v1501_v35, %v1481_v29  ;;  %v2053_v35 = vmul.f32 %v6672_v3, %v6603_v33 }
 0xa10   :  { %v1510_v16 = vadd.f32 %v1502_v49, %v6532_v48 }
 0xa12   :  { %v1517_v52 = vsel %vm156_vm1, %v1510_v16, 0.0 }
 0xa13   :  { %1518 = vadd.xlane.f32.xlu1 %v1517_v52 }
 0xa15   :  { %v1504_v17 = vpop.f32.mrf.mxu0 }
 0xa16   :  { %v1505_v44 = vadd.f32 %v1504_v17, %v1481_v29  ;;  %v6690_v17 = vld [vmem:[%s7783_s27 + $0x2] ss:$0 sm:$0xff] }
 0xa18   :  { %v1511_v30 = vadd.f32 %v1505_v44, %v6541_v58  ;;  %v2054_v44 = vmul.f32 %v6672_v3, %v6608_v34 }
 0xa1a   :  { %v1520_v55 = vsel %vm156_vm1, %v1511_v30, 0.0 }
 0xa1b   :  { %1521 = vadd.xlane.f32.xlu0 %v1520_v55 }
 0xa1d   :  { %v1506_v46 = vpop.f32.mrf.mxu0 }
 0xa1e   :  { %v1507_v61 = vadd.f32 %v1506_v46, %v1481_v29  ;;  %v1688_v29 = vsel %vm1686_vm5, %v1678_v28, 0 }
 0xa1f   :  { %1697 = vmatpush.bf16.msrb.mxu2 %v1688_v29 }
 0xa20   :  { %v1512_v40 = vadd.f32 %v1507_v61, %v6539_v56 }
 0xa22   :  { %v1523_v53 = vsel %vm156_vm1, %v1512_v40, 0.0  ;;  %5267 = vmatmul.msk.bf16.vlgmr.msrb.gmra.mxu2 %vm1682_vm6, %v1677_v36 }
 0xa23   :  { %1524 = vadd.xlane.f32.xlu0 %v1523_v53 }
 0xa25   :  { %v6628_v48 = vpop.f32.mrf.mxu0 }
 0xa2c   :  { %1602 = vrot.lane.b32.xlu1 %v6524_v19, %s5997_s22 }
 0xa2d   :  { %v6630_v47 = vpop.f32.mrf.mxu0 }
 0xa35   :  { %v6632_v4 = vpop.f32.mrf.mxu0 }
 0xa3d   :  { %v6639_v0 = vpop.f32.mrf.mxu0 }
 0xa45   :  { %v2041_v12 = vpop.f32.mrf.mxu0 }
 0xa46   :  { %v2069_v10 = vpack.c.bf16 %v2041_v12, %v2041_v12 }
 0xa48   :  { %v2107_v6 = vunpack.c.l.b16 %v2069_v10 }
 0xa4d   :  { %v2043_v26 = vpop.f32.mrf.mxu0 }
 0xa4e   :  { %v2070_v27 = vpack.c.bf16 %v2043_v26, %v2043_v26 }
 0xa50   :  { %v2108_v63 = vunpack.c.l.b16 %v2070_v27 }
 0xa52   :  { %v2109_v41 = vpack.c.b16 %v2108_v63, %v2107_v6 }
 0xa54   :  { %5316 = vmatmul.msk.bf16.vlgmr.msrb.gmra.mxu3 %vm156_vm1, %v2109_v41 }
 0xa7e   :  { %v1516_v58 = vpop.xlane.xlu2 %1515 }
 0xa7f   :  { %v1526_v21 = vmul.f32 %v1516_v58, %v6471_v5 }
 0xa81   :  { %v6635_v31 = vsub.f32 %v1509_v38, %v1526_v21 }
 0xa83   :  { %v1534_v56 = vmul.f32 %v6635_v31, %v6635_v31 }
 0xa85   :  { %v1538_v2 = vsel %vm156_vm1, %v1534_v56, 0.0 }
 0xa86   :  { %v1519_v57 = vpop.xlane.xlu1 %1518  ;;  %1539 = vadd.xlane.f32.xlu0 %v1538_v2 }
 0xa87   :  { %v1527_v19 = vmul.f32 %v1519_v57, %v6471_v5 }
 0xa89   :  { %v6643_v7 = vsub.f32 %v1510_v16, %v1527_v19  ;;  %v2061_v16 = vsel %vm156_vm1, %v2053_v35, 0.0 }
 0xa8a   :  { %2062 = vadd.xlane.f32.xlu1 %v2061_v16 }
 0xa8b   :  { %v1535_v11 = vmul.f32 %v6643_v7, %v6643_v7 }
 0xa8d   :  { %v1541_v20 = vsel %vm156_vm1, %v1535_v11, 0.0 }
 0xa8e   :  { %v1522_v23 = vpop.xlane.xlu0 %1521  ;;  %1542 = vadd.xlane.f32.xlu0 %v1541_v20 }
 0xa8f   :  { %v1528_v24 = vmul.f32 %v1522_v23, %v6471_v5 }
 0xa91   :  { %v6656_v15 = vsub.f32 %v1511_v30, %v1528_v24  ;;  %v2064_v30 = vsel %vm156_vm1, %v2054_v44, 0.0  ;;  %v5998_v44 = vmov 16.0  }
 0xa93   :  { %v1536_v54 = vmul.f32 %v6656_v15, %v6656_v15 }
 0xa95   :  { %v1544_v22 = vsel %vm156_vm1, %v1536_v54, 0.0 }
 0xa96   :  { %v1525_v59 = vpop.xlane.xlu0 %1524  ;;  %1545 = vadd.xlane.f32.xlu0 %v1544_v22 }
 0xa97   :  { %v1529_v18 = vmul.f32 %v1525_v59, %v6471_v5 }
 0xa99   :  { %v6674_v38 = vsub.f32 %v1512_v40, %v1529_v18 }
 0xa9b   :  { %v1537_v49 = vmul.f32 %v6674_v38, %v6674_v38 }
 0xa9d   :  { %v1547_v52 = vsel %vm156_vm1, %v1537_v49, 0.0 }
 0xa9e   :  { %1548 = vadd.xlane.f32.xlu2 %v1547_v52  ;;  %v1603_v54 = vpop.permute.xlu1 %1602 }
 0xaaa   :  { %1653 = vrot.lane.b32.xlu0 %v6507_v62, %s5996_s19 }
 0xab2   :  { %1679 = vrot.lane.b32.xlu0 %v6690_v17, %s5996_s19 }
 0xab6   :  { %1651 = vrot.lane.b32.xlu2 %v6513_v1, %s5996_s19 }
 0xadf   :  { %2065 = vadd.xlane.f32.xlu2 %v2064_v30 }
 0xaf7   :  { %1657 = vrot.lane.b32.xlu2 %v6690_v17, %s5994_s4 }
 0xaf9   :  { %v1540_v62 = vpop.xlane.xlu0 %1539 }
 0xafa   :  { %v1550_v1 = vmul.f32 %v1540_v62, %v6471_v5 }
 0xafc   :  { %v1554_v55 = vadd.f32 1e-05, %v1550_v1 }
 0xafe   :  { %5800 = vrsqrt.f32 %v1554_v55  ;;  %vm1564_vm8 = vweird.f32 %v1554_v55 }
 0xb01   :  { %v1543_v46 = vpop.xlane.xlu0 %1542 }
 0xb02   :  { %v1551_v61 = vmul.f32 %v1543_v46, %v6471_v5 }
 0xb04   :  { %v5801_v40 = vpop.eup %5800  ;;  %v1555_v53 = vadd.f32 1e-05, %v1551_v61 }
 0xb05   :  { %v1559_v58 = vmul.f32 %v5801_v40, %v1554_v55  ;;  %vm1565_vm7 = vweird.f32 %v5801_v40 }
 0xb06   :  { %5802 = vrsqrt.f32 %v1555_v53  ;;  %vm1566_vm9 = vmor %vm1564_vm8, %vm1565_vm7  ;;  %vm1574_vm11 = vweird.f32 %v1555_v53  ;;  %vm1714_vm7 = vcmask 1043456  }
 0xb07   :  { %v1560_v21 = vmul.f32 %v5801_v40, %v1559_v58 }
 0xb09   :  { %v1561_v56 = vmul.f32 0.5, %v1560_v21  ;;  %v1546_v2 = vpop.xlane.xlu0 %1545 }
 0xb0a   :  { %v1552_v57 = vmul.f32 %v1546_v2, %v6471_v5 }
 0xb0b   :  { %v1562_v19 = vsub.f32 1.5, %v1561_v56 }
 0xb0c   :  { %v5803_v8 = vpop.eup %5802  ;;  %v1556_v60 = vadd.f32 1e-05, %v1552_v57 }
 0xb0d   :  { %v1563_v11 = vmul.f32 %v5801_v40, %v1562_v19  ;;  %v1569_v12 = vmul.f32 %v5803_v8, %v1555_v53  ;;  %vm1575_vm10 = vweird.f32 %v5803_v8 }
 0xb0e   :  { %5804 = vrsqrt.f32 %v1556_v60  ;;  %vm1576_vm12 = vmor %vm1574_vm11, %vm1575_vm10  ;;  %vm1584_vm14 = vweird.f32 %v1556_v60  ;;  %vm1710_vm10 = vcmask 64512  }
 0xb0f   :  { %v1567_v13 = vsel %vm1566_vm9, %v5801_v40, %v1563_v11  ;;  %v1570_v14 = vmul.f32 %v5803_v8, %v1569_v12  ;;  %vm225_vm9 = vcmask 1041409  }
 0xb10   :  { %v1598_v50 = vmul.f32 %v1567_v13, %v6635_v31 }
 0xb11   :  { %v1571_v20 = vmul.f32 0.5, %v1570_v14  ;;  %v1549_v23 = vpop.xlane.xlu2 %1548 }
 0xb12   :  { %v1553_v24 = vmul.f32 %v1549_v23, %v6471_v5  ;;  %v1605_v59 = vmul.f32 %v1603_v54, %v1598_v50 }
 0xb13   :  { %v1572_v10 = vsub.f32 1.5, %v1571_v20 }
 0xb14   :  { %v5805_v26 = vpop.eup %5804  ;;  %v1557_v22 = vadd.f32 1e-05, %v1553_v24  ;;  %v1612_v31 = vadd.f32 %v6690_v17, %v1605_v59 }
 0xb15   :  { %v1573_v6 = vmul.f32 %v5803_v8, %v1572_v10  ;;  %v1579_v27 = vmul.f32 %v5805_v26, %v1556_v60  ;;  %vm1585_vm13 = vweird.f32 %v5805_v26 }
 0xb16   :  { %5806 = vrsqrt.f32 %v1557_v22  ;;  %vm1586_vm15 = vmor %vm1584_vm14, %vm1585_vm13  ;;  %v1616_v30 = vsel %vm156_vm1, %v1612_v31, 0.0  ;;  %vm1594_vm5 = vweird.f32 %v1557_v22 }
 0xb17   :  { %v1577_v28 = vsel %vm1576_vm12, %v5803_v8, %v1573_v6  ;;  %v1580_v32 = vmul.f32 %v5805_v26, %v1579_v27  ;;  %5808 = vrcp.f32 %v5998_v44  ;;  %v1699_v8 = vpop.f32.mrf.mxu2 }
 0xb18   :  { %v1599_v18 = vmul.f32 %v1577_v28, %v6643_v7 }
 0xb19   :  { %v1581_v63 = vmul.f32 0.5, %v1580_v32  ;;  %v1652_v46 = vpop.permute.xlu2 %1651 }
 0xb1a   :  { %v1606_v29 = vmul.f32 %v1603_v54, %v1599_v18 }
 0xb1b   :  { %v1582_v36 = vsub.f32 1.5, %v1581_v63 }
 0xb1c   :  { %v5807_v41 = vpop.eup %5806  ;;  %v1613_v35 = vadd.f32 %v6690_v17, %v1606_v29  ;;  %v1654_v49 = vpop.permute.xlu0 %1653 }
 0xb1d   :  { %v1583_v16 = vmul.f32 %v5805_v26, %v1582_v36  ;;  %v1589_v52 = vmul.f32 %v5807_v41, %v1557_v22  ;;  %1669 = vmatpush.bf16.msrb.mxu1 %v1654_v49  ;;  %v5809_v58 = vpop.eup %5808  ;;  %vm1595_vm0 = vweird.f32 %v5807_v41  ;;  %v1810_v29 = vpop.f32.mrf.mxu3 }
 0xb1e   :  { %v1617_v7 = vsel %vm156_vm1, %v1613_v35, 0.0  ;;  %vm1596_vm6 = vmor %vm1594_vm5, %vm1595_vm0  ;;  %v1635_v19 = vmul.f32 16.0, %v5809_v58  ;;  %vm1639_vm8 = vweird.f32 %v5809_v58 }
 0xb1f   :  { %v1587_v62 = vsel %vm1586_vm15, %v5805_v26, %v1583_v16  ;;  %v1618_v1 = vadd.f32 %v1617_v7, %v1616_v30  ;;  %v1590_v55 = vmul.f32 %v5807_v41, %v1589_v52  ;;  %v1701_v26 = vpop.f32.mrf.mxu2 }
 0xb20   :  { %v1600_v53 = vmul.f32 %v1587_v62, %v6656_v15  ;;  %v1636_v20 = vsub.f32 1.0, %v1635_v19 }
 0xb21   :  { %v1619_v61 = vrot.slane %v1618_v1, 4  ;;  %v1591_v40 = vmul.f32 0.5, %v1590_v55  ;;  %1670 = vmatpush.bf16.msrb.mxu1 %v1652_v46 }
 0xb22   :  { %v1607_v57 = vmul.f32 %v1603_v54, %v1600_v53  ;;  %v1637_v10 = vmul.f32 %v5809_v58, %v1636_v20  ;;  %v5654_v20 = vld [vmem:[%s7764_s14 + $0x18] sm:$0xff] }
 0xb23   :  { %v1592_v21 = vsub.f32 1.5, %v1591_v40  ;;  %v1620_v56 = vadd.f32 %v1619_v61, %v1618_v1  ;;  %v2063_v61 = vpop.xlane.xlu1 %2062 }
 0xb24   :  { %v1614_v13 = vadd.f32 %v6690_v17, %v1607_v57  ;;  %v1638_v59 = vadd.f32 %v5809_v58, %v1637_v10  ;;  %v1680_v55 = vpop.permute.xlu0 %1679  ;;  %v2112_v40 = vperm.slane %v2063_v61, %v6251_v42  ;;  %v2068_v10 = vpack.c.bf16 %v6639_v0, %v6639_v0 }
 0xb25   :  { %v1593_v2 = vmul.f32 %v5807_v41, %v1592_v21  ;;  %v1621_v12 = vrot.slane %v1620_v56, 2  ;;  %v1812_v52 = vpop.f32.mrf.mxu3  ;;  %v1700_v46 = vadd.f32 %v1699_v8, %v1680_v55 }
 0xb26   :  { %v1625_v50 = vsel %vm156_vm1, %v1614_v13, 0.0  ;;  %v1640_v18 = vsel %vm1639_vm8, %v5809_v58, %v1638_v59 }
 0xb27   :  { %v1597_v60 = vsel %vm1596_vm6, %v5807_v41, %v1593_v2  ;;  %v1622_v23 = vadd.f32 %v1621_v12, %v1620_v56  ;;  %v1708_v53 = vpack.c.bf16 %v1700_v46, %v1700_v46  ;;  %v1838_v12 = vpack.c.bf16 %v1812_v52, %v1812_v52 }
 0xb28   :  { %v1601_v11 = vmul.f32 %v1597_v60, %v6674_v38  ;;  %v1709_v38 = vld [vmem:[%s7763_s11 + $0x10] sm:$0xf] }
 0xb29   :  { %v1623_v6 = vrot.slane %v1622_v23, 1  ;;  %v1716_v28 = vsel %vm1714_vm7, %v1709_v38, 0 }
 0xb2a   :  { %v1608_v14 = vmul.f32 %v1603_v54, %v1601_v11  ;;  %1725 = vmatpush.bf16.msra.mxu1 %v1716_v28  ;;  %v1837_v11 = vpack.c.bf16 %v1810_v29, %v1810_v29 }
 0xb2c   :  { %v1615_v15 = vadd.f32 %v6690_v17, %v1608_v14  ;;  %v1624_v17 = vadd.f32 %v1623_v6, %v1622_v23  ;;  %v1883_v13 = vunpack.c.l.b16 %v1837_v11  ;;  %v1884_v14 = vunpack.c.l.b16 %v1838_v12  ;;  %v5646_v23 = vld [vmem:[%s7763_s11 + $0x8] sm:$0xff] }
 0xb2d   :  { %v2134_v1 = vpop.f32.mrf.mxu3  ;;  %1752 = vmatpush.bf16.msra.mxu2 %v5646_v23 }
 0xb2e   :  { %v1626_v24 = vsel %vm156_vm1, %v1615_v15, 0.0  ;;  %v1641_v36 = vmul.f32 %v1640_v18, %v1624_v17  ;;  %v1885_v15 = vpack.c.b16 %v1884_v14, %v1883_v13 }
 0xb2f   :  { %v1627_v22 = vadd.f32 %v1626_v24, %v1625_v50  ;;  %v5653_v50 = vld [vmem:[%s7764_s14 + $0x10] sm:$0xff]  ;;  %v2067_v24 = vpack.c.bf16 %v6632_v4, %v6632_v4  ;;  %v5645_v4 = vld [vmem:[%s7763_s11] sm:$0xff] }
 0xb30   :  { %v1643_v49 = vpack.c.bf16 %v1641_v36, %v1641_v36  ;;  %v6755_v36 = vld [vmem:[%s7760_s13] ss:$0 sm:$0xff] }
 0xb31   :  { %v1628_v27 = vrot.slane %v1627_v22, 4  ;;  %v2073_v26 = vunpack.c.l.b16 %v2067_v24  ;;  %1753 = vmatpush.bf16.msra.mxu2 %v5645_v4  ;;  %v1820_v52 = vmul.f32 %v6755_v36, %v6560_v39  ;;  %v5656_v24 = vld [vmem:[%s7757_s12 + $0x28] sm:$0xff] }
 0xb32   :  { %v1647_v44 = vunpack.c.l.b16 %v1643_v49 }
 0xb33   :  { %v1629_v54 = vadd.f32 %v1628_v27, %v1627_v22  ;;  %v2074_v22 = vunpack.c.l.b16 %v2068_v10 }
 0xb35   :  { %v1630_v32 = vrot.slane %v1629_v54, 2  ;;  %v2136_v56 = vpop.f32.mrf.mxu3  ;;  %v2075_v6 = vpack.c.b16 %v2074_v22, %v2073_v26  ;;  %v5649_v26 = vld [vmem:[%s7764_s14] sm:$0xff] }
 0xb36   :  { %v5655_v22 = vld [vmem:[%s7757_s12 + $0x20] sm:$0xff] }
 0xb37   :  { %v1631_v63 = vadd.f32 %v1630_v32, %v1629_v54 }
 0xb39   :  { %v1632_v31 = vrot.slane %v1631_v63, 1 }
 0xb3b   :  { %v1633_v41 = vadd.f32 %v1632_v31, %v1631_v63 }
 0xb3d   :  { %v1642_v35 = vmul.f32 %v1640_v18, %v1633_v41 }
 0xb3f   :  { %v1644_v16 = vpack.c.bf16 %v1642_v35, %v1642_v35 }
 0xb41   :  { %v1648_v30 = vunpack.c.l.b16 %v1644_v16 }
 0xb43   :  { %v1649_v7 = vsel %vm225_vm9, %v1648_v30, %v1647_v44  ;;  %v1819_v30 = vmul.f32 %v6755_v36, %v6555_v9 }
 0xb44   :  { %v1650_v62 = vpack.c.b16 %v1649_v7, %v1649_v7  ;;  %v1826_v7 = vsel %vm156_vm1, %v1820_v52, 0.0 }
 0xb46   :  { %5266 = vmatmul.msk.bf16.vlgmr.msrb.gmra.mxu1 %vm156_vm1, %v1650_v62  ;;  %v1823_v62 = vsel %vm156_vm1, %v1819_v30, 0.0 }
 0xb47   :  { %1916 = vmatpush.bf16.xpose.msrb.mxu1 %v6654_v25 }
 0xb52   :  { %v2066_v58 = vpop.xlane.xlu2 %2065 }
 0xb53   :  { %v2113_v21 = vperm.slane %v2066_v58, %v6254_v43 }
 0xb55   :  { %v2114_v2 = vsel %vm223_vm2, %v2113_v21, %v2112_v40 }
 0xb56   :  { %5268 = vmatmul.msk.bf16.vlgmr.msra.gmra.mxu1 %vm1710_vm10, %v1708_v53  ;;  %v2137_v57 = vadd.f32 %v2136_v56, %v2114_v2  ;;  %v2135_v19 = vadd.f32 %v2134_v1, %v2114_v2 }
 0xb57   :  { %2098 = vmatpush.bf16.xpose.msra.mxu1 %v6588_v51 }
 0xb58   :  { %v2148_v60 = vsel %vm301_vm3, %v2137_v57, -inf  ;;  %v2145_v8 = vsel %vm301_vm3, %v2135_v19, -inf }
 0xb59   :  { %2149 = vmax.xlane.f32.xlu1 %v2148_v60  ;;  %2146 = vmax.xlane.f32.xlu0 %v2145_v8  ;;  %v2051_v8 = vmul.f32 %v6672_v3, %v6555_v9 }
 0xb5a   :  { %v1658_v27 = vpop.permute.xlu2 %1657 }
 0xb5b   :  { %v2055_v11 = vsel %vm156_vm1, %v2051_v8, 0.0 }
 0xb5c   :  { %2056 = vadd.xlane.f32.xlu2 %v2055_v11 }
 0xb66   :  { %5289 = vmatmul.msk.bf16.vlgmr.msrb.gmra.mxu1 %vm156_vm1, %v1885_v15 }
 0xb67   :  { %2206 = vmatpush.bf16.msrb.mxu1 %v5654_v20 }
 0xb6b   :  { %2207 = vmatpush.bf16.msrb.mxu1 %v5653_v50  ;;  %v5650_v50 = vld [vmem:[%s7764_s14 + $0x8] sm:$0xff] }
 0xb6c   :  { %1989 = vmatpush.bf16.msrb.mxu2 %v5650_v50 }
 0xb70   :  { %1990 = vmatpush.bf16.msrb.mxu2 %v5649_v26 }
 0xb76   :  { %5315 = vmatmul.msk.bf16.vlgmr.msra.gmra.mxu1 %vm156_vm1, %v2075_v6 }
 0xb77   :  { %2461 = vmatpush.bf16.xpose.msra.mxu1 %v6654_v25 }
 0xb86   :  { %5329 = vmatmul.msk.bf16.vlgmr.msrb.gmra.mxu1 %vm156_vm1, %v6564_v45 }
 0xb96   :  { %5330 = vmatmul.msk.bf16.gmra.mxu1 %vm156_vm1, %v6612_v37 }
 0xbc3   :  { %v1672_v0 = vpop.f32.mrf.mxu1 }
 0xbc4   :  { %v1673_v59 = vadd.f32 %v1672_v0, %v1658_v27 }
 0xbc6   :  { %v1703_v38 = vpack.c.bf16 %v1673_v59, %v1673_v59 }
 0xbc8   :  { %5277 = vmatmul.msk.bf16.vlgmr.msra.gmra.mxu2 %vm156_vm1, %v1703_v38 }
 0xbcb   :  { %v1674_v54 = vpop.f32.mrf.mxu1 }
 0xbcc   :  { %v2150_v28 = vpop.xlane.xlu1 %2149  ;;  %v2147_v17 = vpop.xlane.xlu0 %2146 }
 0xbcd   :  { %v2154_v32 = vsub.f32 %v2137_v57, %v2150_v28  ;;  %v2153_v18 = vsub.f32 %v2135_v19, %v2147_v17 }
 0xbcf   :  { %v2161_v63 = vmul.f32 1.442695, %v2154_v32  ;;  %v2159_v29 = vmul.f32 1.442695, %v2153_v18 }
 0xbd1   :  { %5810 = vpow2.f32 %v2161_v63 }
 0xbd2   :  { %5812 = vpow2.f32 %v2159_v29 }
 0xbd3   :  { %v6750_v31 = vpop.f32.mrf.mxu1 }
 0xbd7   :  { %v5811_v41 = vpop.eup %5810 }
 0xbd8   :  { %v5813_v35 = vpop.eup %5812  ;;  %v2172_v49 = vsel %vm301_vm3, %v5811_v41, 0.0  ;;  %5298 = vmatmul.msk.bf16.vlgmr.msrb.gmra.mxu2 %vm156_vm1, %v6564_v45 }
 0xbd9   :  { %2173 = vadd.xlane.f32.xlu1 %v2172_v49  ;;  %v2169_v16 = vsel %vm301_vm3, %v5813_v35, 0.0 }
 0xbda   :  { %2170 = vadd.xlane.f32.xlu0 %v2169_v16 }
 0xbdb   :  { %v1729_v44 = vpop.f32.mrf.mxu1 }
 0xbe1   :  { %1827 = vadd.xlane.f32.xlu1 %v1826_v7  ;;  %v2052_v7 = vmul.f32 %v6672_v3, %v6560_v39 }
 0xbe2   :  { %1824 = vadd.xlane.f32.xlu0 %v1823_v62  ;;  %v1821_v62 = vmul.f32 %v6755_v36, %v6603_v33 }
 0xbe3   :  { %v6765_v1 = vpop.f32.mrf.mxu1 }
 0xbe8   :  { %5299 = vmatmul.msk.bf16.gmra.mxu2 %vm156_vm1, %v6612_v37 }
 0xbeb   :  { %v6767_v55 = vpop.f32.mrf.mxu1 }
 0xbf3   :  { %v6769_v46 = vpop.f32.mrf.mxu1 }
 0xbfb   :  { %v6771_v61 = vpop.f32.mrf.mxu1 }
 0xc03   :  { %v2209_v40 = vpop.f32.mrf.mxu1 }
 0xc04   :  { %v2223_v12 = vpack.c.bf16 %v2209_v40, %v2209_v40  ;;  %v2058_v40 = vsel %vm156_vm1, %v2052_v7, 0.0 }
 0xc06   :  { %v2234_v14 = vunpack.c.l.b16 %v2223_v12 }
 0xc0b   :  { %v2211_v53 = vpop.f32.mrf.mxu1 }
 0xc0c   :  { %v2224_v13 = vpack.c.bf16 %v2211_v53, %v2211_v53 }
 0xc0e   :  { %v2235_v20 = vunpack.c.l.b16 %v2224_v13 }
 0xc10   :  { %v2236_v6 = vpack.c.b16 %v2235_v20, %v2234_v14 }
 0xc12   :  { %2248 = vmatpush.bf16.msra.mxu2 %v2236_v6 }
 0xc13   :  { %v2214_v58 = vpop.f32.mrf.mxu1 }
 0xc14   :  { %v2225_v21 = vpack.c.bf16 %v2214_v58, %v2214_v58 }
 0xc16   :  { %v2262_v2 = vunpack.c.l.b16 %v2225_v21 }
 0xc1b   :  { %v2216_v56 = vpop.f32.mrf.mxu1 }
 0xc1c   :  { %v2226_v57 = vpack.c.bf16 %v2216_v56, %v2216_v56 }
 0xc1e   :  { %v2263_v19 = vunpack.c.l.b16 %v2226_v57 }
 0xc20   :  { %v2264_v60 = vpack.c.b16 %v2263_v19, %v2262_v2 }
 0xc22   :  { %2276 = vmatpush.bf16.msra.mxu3 %v2264_v60 }
 0xc26   :  { %2362 = vmatpush.bf16.msrb.mxu3 %v5656_v24 }
 0xc2a   :  { %2363 = vmatpush.bf16.msrb.mxu3 %v5655_v22 }
 0xc4b   :  { %v6776_v15 = vpop.f32.mrf.mxu2 }
 0xc4c   :  { %v2174_v23 = vpop.xlane.xlu1 %2173 }
 0xc4d   :  { %5814 = vrcp.f32 %v2174_v23  ;;  %v2171_v10 = vpop.xlane.xlu0 %2170 }
 0xc4e   :  { %5816 = vrcp.f32 %v2171_v10 }
 0xc53   :  { %v5815_v4 = vpop.eup %5814  ;;  %v1757_v27 = vpop.f32.mrf.mxu2 }
 0xc54   :  { %v5817_v0 = vpop.eup %5816  ;;  %v2182_v59 = vmul.f32 %v5815_v4, %v5811_v41  ;;  %v1828_v38 = vpop.xlane.xlu1 %1827 }
 0xc55   :  { %v2181_v54 = vmul.f32 %v5817_v0, %v5813_v35  ;;  %v1852_v28 = vperm.slane %v1828_v38, %v6254_v43  ;;  %v1825_v17 = vpop.xlane.xlu0 %1824 }
 0xc56   :  { %v2222_v32 = vpack.c.bf16 %v2182_v59, %v2182_v59  ;;  %v1851_v18 = vperm.slane %v1825_v17, %v6251_v42 }
 0xc57   :  { %v2221_v63 = vpack.c.bf16 %v2181_v54, %v2181_v54 }
 0xc58   :  { %v2258_v29 = vunpack.c.l.b16 %v2222_v32  ;;  %v1853_v49 = vsel %vm223_vm2, %v1852_v28, %v1851_v18 }
 0xc59   :  { %v2257_v16 = vunpack.c.l.b16 %v2221_v63  ;;  %v1879_v52 = vadd.f32 %v6630_v47, %v1853_v49  ;;  %v1877_v41 = vadd.f32 %v6628_v48, %v1853_v49  ;;  %v1829_v47 = vsel %vm156_vm1, %v1821_v62, 0.0 }
 0xc5a   :  { %v1822_v48 = vmul.f32 %v6755_v36, %v6608_v34  ;;  %v2057_v36 = vpop.xlane.xlu2 %2056 }
 0xc5b   :  { %v2259_v44 = vpack.c.b16 %v2258_v29, %v2257_v16  ;;  %v1926_v35 = vsel %vm301_vm3, %v1879_v52, -inf  ;;  %v1923_v30 = vsel %vm301_vm3, %v1877_v41, -inf  ;;  %v2078_v60 = vperm.slane %v2057_v36, %v6251_v42  ;;  %v1992_v8 = vpop.f32.mrf.mxu2 }
 0xc5c   :  { %1927 = vmax.xlane.f32.xlu1 %v1926_v35  ;;  %1924 = vmax.xlane.f32.xlu0 %v1923_v30  ;;  %v1832_v53 = vsel %vm156_vm1, %v1822_v48, 0.0  ;;  %v2006_v50 = vpack.c.bf16 %v1992_v8, %v1992_v8 }
 0xc5d   :  { %5332 = vmatmul.msk.bf16.vlgmr.msra.gmra.mxu3 %vm301_vm3, %v2259_v44 }
 0xc5e   :  { %v2290_v27 = vunpack.c.l.b16 %v2006_v50 }
 0xc63   :  { %v1994_v4 = vpop.f32.mrf.mxu2 }
 0xc64   :  { %2059 = vadd.xlane.f32.xlu0 %v2058_v40  ;;  %1830 = vadd.xlane.f32.xlu1 %v1829_v47  ;;  %v2007_v0 = vpack.c.bf16 %v1994_v4, %v1994_v4 }
 0xc66   :  { %v2291_v38 = vunpack.c.l.b16 %v2007_v0 }
 0xc68   :  { %v2292_v17 = vpack.c.b16 %v2291_v38, %v2290_v27 }
 0xc6a   :  { %2304 = vmatpush.bf16.msra.mxu0 %v2292_v17 }
 0xc6c   :  { %1833 = vadd.xlane.f32.xlu0 %v1832_v53 }
 0xc6d   :  { %5347 = vmatmul.msk.bf16.vlgmr.msrb.gmra.mxu3 %vm156_vm1, %v6564_v45 }
 0xc6e   :  { %2427 = vmatpush.bf16.xpose.msrb.mxu0 %v6588_v51 }
 0xc7d   :  { %5348 = vmatmul.msk.bf16.gmra.mxu3 %vm156_vm1, %v6612_v37 }
 0xccf   :  { %v1928_v39 = vpop.xlane.xlu1 %1927  ;;  %v1925_v3 = vpop.xlane.xlu0 %1924 }
 0xcd0   :  { %v1936_v58 = vsub.f32 %v1879_v52, %v1928_v39  ;;  %v1935_v21 = vsub.f32 %v1877_v41, %v1925_v3 }
 0xcd2   :  { %v1941_v56 = vmul.f32 1.442695, %v1936_v58  ;;  %v1939_v2 = vmul.f32 1.442695, %v1935_v21 }
 0xcd4   :  { %5818 = vpow2.f32 %v1941_v56 }
 0xcd5   :  { %5820 = vpow2.f32 %v1939_v2 }
 0xcd7   :  { %v2060_v57 = vpop.xlane.xlu0 %2059  ;;  %v1831_v23 = vpop.xlane.xlu1 %1830 }
 0xcd8   :  { %v2079_v19 = vperm.slane %v2060_v57, %v6254_v43  ;;  %v1893_v26 = vperm.slane %v1831_v23, %v6251_v42 }
 0xcda   :  { %v5819_v11 = vpop.eup %5818  ;;  %v2080_v20 = vsel %vm223_vm2, %v2079_v19, %v2078_v60 }
 0xcdb   :  { %v5821_v12 = vpop.eup %5820  ;;  %v1950_v13 = vsel %vm301_vm3, %v5819_v11, 0.0  ;;  %v2103_v10 = vadd.f32 %v6771_v61, %v2080_v20  ;;  %v2101_v6 = vadd.f32 %v6769_v46, %v2080_v20 }
 0xcdc   :  { %1951 = vadd.xlane.f32.xlu0 %v1950_v13  ;;  %v1947_v14 = vsel %vm301_vm3, %v5821_v12, 0.0 }
 0xcdd   :  { %1948 = vadd.xlane.f32.xlu1 %v1947_v14  ;;  %v2142_v59 = vsel %vm301_vm3, %v2103_v10, -inf  ;;  %v2139_v54 = vsel %vm301_vm3, %v2101_v6, -inf }
 0xcdf   :  { %v1834_v24 = vpop.xlane.xlu0 %1833 }
 0xce0   :  { %v1894_v22 = vperm.slane %v1834_v24, %v6254_v43  ;;  %v6832_v63 = vpop.f32.mrf.mxu3 }
 0xce2   :  { %v1895_v28 = vsel %vm223_vm2, %v1894_v22, %v1893_v26 }
 0xce3   :  { %v1921_v61 = vadd.f32 %v6767_v55, %v1895_v28  ;;  %v1919_v32 = vadd.f32 %v6765_v1, %v1895_v28 }
 0xce4   :  { %2143 = vmax.xlane.f32.xlu0 %v2142_v59 }
 0xce5   :  { %2140 = vmax.xlane.f32.xlu1 %v2139_v54  ;;  %v1932_v46 = vsel %vm301_vm3, %v1921_v61, -inf  ;;  %v1929_v18 = vsel %vm301_vm3, %v1919_v32, -inf }
 0xce8   :  { %v6834_v29 = vpop.f32.mrf.mxu3 }
 0xcec   :  { %1933 = vmax.xlane.f32.xlu0 %v1932_v46 }
 0xced   :  { %1930 = vmax.xlane.f32.xlu1 %v1929_v18  ;;  %v6855_v18 = vld [vmem:[%s7759_s3 + $0x8] sm:$0xff] }
 0xcf0   :  { %v2365_v49 = vpop.f32.mrf.mxu3 }
 0xcf1   :  { %v2396_v4 = vpack.c.bf16 %v2365_v49, %v2365_v49 }
 0xcf3   :  { %v2402_v38 = vunpack.c.l.b16 %v2396_v4 }
 0xcf8   :  { %v2367_v16 = vpop.f32.mrf.mxu3 }
 0xcf9   :  { %v2397_v27 = vpack.c.bf16 %v2367_v16, %v2367_v16 }
 0xcfb   :  { %v2403_v54 = vunpack.c.l.b16 %v2397_v27 }
 0xd00   :  { %v2370_v52 = vpop.f32.mrf.mxu3 }
 0xd01   :  { %v2398_v41 = vpack.c.bf16 %v2370_v52, %v2370_v52 }
 0xd03   :  { %v2436_v44 = vunpack.c.l.b16 %v2398_v41 }
 0xd08   :  { %v2372_v55 = vpop.f32.mrf.mxu3 }
 0xd09   :  { %v2399_v35 = vpack.c.bf16 %v2372_v55, %v2372_v55 }
 0xd0b   :  { %v2437_v1 = vunpack.c.l.b16 %v2399_v35 }
 0xd0d   :  { %v2438_v30 = vpack.c.b16 %v2437_v1, %v2436_v44 }
 0xd0f   :  { %5351 = vmatmul.msk.bf16.vlgmr.msra.gmra.mxu1 %vm156_vm1, %v2438_v30 }
 0xd4f   :  { %v1952_v7 = vpop.xlane.xlu0 %1951 }
 0xd50   :  { %v1949_v62 = vpop.xlane.xlu1 %1948  ;;  %5822 = vrcp.f32 %v1952_v7 }
 0xd51   :  { %5824 = vrcp.f32 %v1949_v62 }
 0xd56   :  { %v5823_v40 = vpop.eup %5822 }
 0xd57   :  { %v5825_v47 = vpop.eup %5824  ;;  %v1964_v48 = vmul.f32 %v5823_v40, %v5819_v11  ;;  %v2144_v53 = vpop.xlane.xlu0 %2143 }
 0xd58   :  { %v1963_v39 = vmul.f32 %v5825_v47, %v5821_v12  ;;  %v2152_v3 = vsub.f32 %v2103_v10, %v2144_v53  ;;  %v2141_v58 = vpop.xlane.xlu1 %2140  ;;  %v5712_v12 = vld [vmem:[%s7760_s13 + $0x2] ss:$0 sm:$0xff] }
 0xd59   :  { %v2003_v21 = vpack.c.bf16 %v1964_v48, %v1964_v48  ;;  %v2151_v56 = vsub.f32 %v2101_v6, %v2141_v58  ;;  %v2380_v6 = vmul.f32 %v5712_v12, %v6555_v9  ;;  %v2404_v9 = vpack.c.b16 %v2403_v54, %v2402_v38 }
 0xd5a   :  { %v2002_v2 = vpack.c.bf16 %v1963_v39, %v1963_v39  ;;  %v2157_v36 = vmul.f32 1.442695, %v2152_v3  ;;  %v2382_v46 = vmul.f32 %v5712_v12, %v6603_v33  ;;  %v2381_v49 = vmul.f32 %v6855_v18, %v5712_v12 }
 0xd5b   :  { %v2286_v57 = vunpack.c.l.b16 %v2003_v21  ;;  %v2155_v19 = vmul.f32 1.442695, %v2151_v56  ;;  %v2384_v0 = vsel %vm156_vm1, %v2380_v6, 0.0  ;;  %v5657_v6 = vld [vmem:[%s7764_s14 + $0x20] sm:$0xff] }
 0xd5c   :  { %v2285_v60 = vunpack.c.l.b16 %v2002_v2  ;;  %5826 = vpow2.f32 %v2157_v36  ;;  %v2390_v52 = vsel %vm156_vm1, %v2382_v46, 0.0  ;;  %v2387_v41 = vsel %vm156_vm1, %v2381_v49, 0.0 }
 0xd5d   :  { %5828 = vpow2.f32 %v2155_v19 }
 0xd5e   :  { %v2287_v8 = vpack.c.b16 %v2286_v57, %v2285_v60  ;;  %v5658_v60 = vld [vmem:[%s7764_s14 + $0x28] sm:$0xff] }
 0xd5f   :  { %v1934_v13 = vpop.xlane.xlu0 %1933 }
 0xd60   :  { %5333 = vmatmul.msk.bf16.vlgmr.msra.gmra.mxu0 %vm301_vm3, %v2287_v8  ;;  %v1938_v14 = vsub.f32 %v1921_v61, %v1934_v13  ;;  %v1931_v20 = vpop.xlane.xlu1 %1930 }
 0xd61   :  { %v1937_v11 = vsub.f32 %v1919_v32, %v1931_v20  ;;  %v2383_v32 = vmul.f32 %v5712_v12, %v6608_v34  ;;  %v1997_v34 = vpop.f32.mrf.mxu2 }
 0xd62   :  { %v5827_v23 = vpop.eup %5826  ;;  %v1945_v50 = vmul.f32 1.442695, %v1938_v14  ;;  %v2008_v33 = vpack.c.bf16 %v1997_v34, %v1997_v34 }
 0xd63   :  { %v5829_v24 = vpop.eup %5828  ;;  %v1943_v10 = vmul.f32 1.442695, %v1937_v11  ;;  %v2166_v26 = vsel %vm301_vm3, %v5827_v23, 0.0  ;;  %v2393_v16 = vsel %vm156_vm1, %v2383_v32, 0.0 }
 0xd64   :  { %5830 = vpow2.f32 %v1945_v50  ;;  %2167 = vadd.xlane.f32.xlu2 %v2166_v26  ;;  %v2163_v22 = vsel %vm301_vm3, %v5829_v24, 0.0  ;;  %v2318_v35 = vunpack.c.l.b16 %v2008_v33 }
 0xd65   :  { %5832 = vpow2.f32 %v1943_v10  ;;  %2164 = vadd.xlane.f32.xlu1 %v2163_v22  ;;  %v5660_v10 = vld [vmem:[%s7757_s12 + $0x38] sm:$0xff] }
 0xd66   :  { %2639 = vmatpush.bf16.msra.mxu3 %v5660_v10 }
 0xd69   :  { %v1999_v55 = vpop.f32.mrf.mxu2 }
 0xd6a   :  { %v6845_v59 = vpop.eup %5830  ;;  %v2009_v44 = vpack.c.bf16 %v1999_v55, %v1999_v55 }
 0xd6b   :  { %v5833_v28 = vpop.eup %5832  ;;  %v1956_v17 = vsel %vm301_vm3, %v6845_v59, 0.0 }
 0xd6c   :  { %2385 = vadd.xlane.f32.xlu2 %v2384_v0  ;;  %v1953_v61 = vsel %vm301_vm3, %v5833_v28, 0.0  ;;  %v2319_v1 = vunpack.c.l.b16 %v2009_v44 }
 0xd6d   :  { %1957 = vadd.xlane.f32.xlu1 %v1956_v17  ;;  %1954 = vadd.xlane.f32.xlu0 %v1953_v61 }
 0xd6e   :  { %v2320_v30 = vpack.c.b16 %v2319_v1, %v2318_v35  ;;  %v5659_v35 = vld [vmem:[%s7757_s12 + $0x30] sm:$0xff] }
 0xd6f   :  { %2640 = vmatpush.bf16.msra.mxu3 %v5659_v35 }
 0xd70   :  { %5350 = vmatmul.msk.bf16.vlgmr.msrb.gmra.mxu0 %vm156_vm1, %v2404_v9  ;;  %2332 = vmatpush.bf16.msrb.mxu2 %v2320_v30 }
 0xd72   :  { %5380 = vmatmul.msk.bf16.vlgmr.msra.gmra.mxu3 %vm156_vm1, %v6564_v45 }
 0xd74   :  { %2394 = vadd.xlane.f32.xlu2 %v2393_v16 }
 0xd75   :  { %2391 = vadd.xlane.f32.xlu1 %v2390_v52  ;;  %2388 = vadd.xlane.f32.xlu0 %v2387_v41 }
 0xd82   :  { %5381 = vmatmul.msk.bf16.gmra.mxu3 %vm156_vm1, %v6612_v37 }
 0xd8c   :  { %v2463_v11 = vpop.f32.mrf.mxu1 }
 0xd94   :  { %v2465_v49 = vpop.f32.mrf.mxu1 }
 0xdd7   :  { %v2168_v7 = vpop.xlane.xlu2 %2167 }
 0xdd8   :  { %5834 = vrcp.f32 %v2168_v7  ;;  %v2165_v62 = vpop.xlane.xlu1 %2164 }
 0xdd9   :  { %5836 = vrcp.f32 %v2165_v62 }
 0xddd   :  { %v6862_v40 = vpop.f32.mrf.mxu0 }
 0xdde   :  { %v5835_v47 = vpop.eup %5834 }
 0xddf   :  { %v5837_v48 = vpop.eup %5836  ;;  %v2180_v53 = vmul.f32 %v5835_v47, %v5827_v23  ;;  %v2386_v39 = vpop.xlane.xlu2 %2385 }
 0xde0   :  { %v2179_v3 = vmul.f32 %v5837_v48, %v5829_v24  ;;  %v1955_v58 = vpop.xlane.xlu0 %1954  ;;  %v1958_v21 = vpop.xlane.xlu1 %1957  ;;  %v2407_v14 = vperm.slane %v2386_v39, %v6251_v42 }
 0xde1   :  { %v2220_v56 = vpack.c.bf16 %v2180_v53, %v2180_v53  ;;  %5838 = vrcp.f32 %v1955_v58 }
 0xde2   :  { %v2219_v2 = vpack.c.bf16 %v2179_v3, %v2179_v3  ;;  %5840 = vrcp.f32 %v1958_v21 }
 0xde3   :  { %v2230_v36 = vunpack.c.l.b16 %v2220_v56 }
 0xde4   :  { %v2229_v57 = vunpack.c.l.b16 %v2219_v2 }
 0xde5   :  { %v6864_v19 = vpop.f32.mrf.mxu0 }
 0xde6   :  { %v2231_v8 = vpack.c.b16 %v2230_v36, %v2229_v57 }
 0xde7   :  { %v5839_v13 = vpop.eup %5838  ;;  %v2395_v20 = vpop.xlane.xlu2 %2394 }
 0xde8   :  { %v5841_v12 = vpop.eup %5840  ;;  %v2442_v23 = vperm.slane %v2395_v20, %v6254_v43  ;;  %5331 = vmatmul.msk.bf16.vlgmr.msra.gmra.mxu2 %vm301_vm3, %v2231_v8  ;;  %v2392_v50 = vpop.xlane.xlu1 %2391  ;;  %v1965_v4 = vmul.f32 %v5839_v13, %v5833_v28 }
 0xde9   :  { %v2389_v24 = vpop.xlane.xlu0 %2388  ;;  %v2441_v26 = vperm.slane %v2392_v50, %v6251_v42  ;;  %2535 = vmatpush.bf16.msra.mxu2 %v5658_v60  ;;  %v1966_v27 = vmul.f32 %v5841_v12, %v6845_v59 }
 0xdea   :  { %v2408_v22 = vperm.slane %v2389_v24, %v6254_v43  ;;  %v2004_v61 = vpack.c.bf16 %v1965_v4, %v1965_v4 }
 0xdeb   :  { %v2443_v0 = vsel %vm223_vm2, %v2442_v23, %v2441_v26  ;;  %v2005_v32 = vpack.c.bf16 %v1966_v27, %v1966_v27 }
 0xdec   :  { %v2409_v38 = vsel %vm223_vm2, %v2408_v22, %v2407_v14  ;;  %v2464_v54 = vadd.f32 %v2463_v11, %v2443_v0  ;;  %v2313_v28 = vunpack.c.l.b16 %v2004_v61  ;;  %v2466_v52 = vadd.f32 %v2465_v49, %v2443_v0 }
 0xded   :  { %v2429_v17 = vpop.f32.mrf.mxu0  ;;  %2536 = vmatpush.bf16.msra.mxu2 %v5657_v6  ;;  %v2314_v59 = vunpack.c.l.b16 %v2005_v32 }
 0xdee   :  { %v2430_v9 = vadd.f32 %v2429_v17, %v2409_v38  ;;  %v2474_v46 = vsel %vm301_vm3, %v2464_v54, -inf  ;;  %v2477_v55 = vsel %vm301_vm3, %v2466_v52, -inf }
 0xdef   :  { %2475 = vmax.xlane.f32.xlu2 %v2474_v46  ;;  %v2315_v34 = vpack.c.b16 %v2314_v59, %v2313_v28  ;;  %v5713_v46 = vld [vmem:[%s7760_s13 + $0x3] ss:$0 sm:$0xff] }
 0xdf0   :  { %v2468_v16 = vsel %vm301_vm3, %v2430_v9, -inf  ;;  %v2658_v35 = vmul.f32 %v6855_v18, %v5713_v46 }
 0xdf1   :  { %2469 = vmax.xlane.f32.xlu0 %v2468_v16  ;;  %v6925_v16 = vld [vmem:[%s7759_s3] sm:$0xff] }
 0xdf5   :  { %v2431_v41 = vpop.f32.mrf.mxu0  ;;  %v2642_v49 = vpop.f32.mrf.mxu3 }
 0xdf6   :  { %v2432_v33 = vadd.f32 %v2431_v41, %v2409_v38 }
 0xdf8   :  { %5334 = vmatmul.msk.bf16.vlgmr.msrb.gmra.mxu2 %vm301_vm3, %v2315_v34  ;;  %v2471_v44 = vsel %vm301_vm3, %v2432_v33, -inf }
 0xdf9   :  { %2472 = vmax.xlane.f32.xlu1 %v2471_v44  ;;  %2478 = vmax.xlane.f32.xlu0 %v2477_v55  ;;  %v6932_v55 = vld [vmem:[%s7759_s3 + $0x10] sm:$0xff] }
 0xdfa   :  { %v2659_v44 = vmul.f32 %v6932_v55, %v5713_v46 }
 0xe08   :  { %5364 = vmatmul.msk.bf16.vlgmr.msra.gmra.mxu2 %vm156_vm1, %v6564_v45 }
 0xe18   :  { %5365 = vmatmul.msk.bf16.gmra.mxu2 %vm156_vm1, %v6612_v37 }
 0xe62   :  { %v2476_v1 = vpop.xlane.xlu2 %2475 }
 0xe63   :  { %v2482_v30 = vsub.f32 %v2464_v54, %v2476_v1  ;;  %v6939_v1 = vld [vmem:[%s7759_s3 + $0x18] sm:$0xff] }
 0xe64   :  { %v2470_v7 = vpop.xlane.xlu0 %2469 }
 0xe65   :  { %v2488_v62 = vmul.f32 1.442695, %v2482_v30  ;;  %v2480_v47 = vsub.f32 %v2430_v9, %v2470_v7  ;;  %v2660_v30 = vmul.f32 %v6939_v1, %v5713_v46 }
 0xe67   :  { %5842 = vpow2.f32 %v2488_v62  ;;  %v2484_v48 = vmul.f32 1.442695, %v2480_v47  ;;  %v2667_v62 = vsel %vm156_vm1, %v2659_v44, 0.0  ;;  %v2664_v47 = vsel %vm156_vm1, %v2658_v35, 0.0 }
 0xe69   :  { %5844 = vpow2.f32 %v2484_v48  ;;  %v2670_v48 = vsel %vm156_vm1, %v2660_v30, 0.0 }
 0xe6b   :  { %v6899_v53 = vpop.f32.mrf.mxu2 }
 0xe6c   :  { %v2479_v39 = vpop.xlane.xlu0 %2478  ;;  %v2473_v3 = vpop.xlane.xlu1 %2472 }
 0xe6d   :  { %v6901_v58 = vpop.eup %5842  ;;  %v2483_v21 = vsub.f32 %v2466_v52, %v2479_v39  ;;  %v2481_v56 = vsub.f32 %v2432_v33, %v2473_v3 }
 0xe6e   :  { %v2498_v2 = vsel %vm301_vm3, %v6901_v58, 0.0 }
 0xe6f   :  { %v6905_v36 = vpop.eup %5844  ;;  %v2490_v57 = vmul.f32 1.442695, %v2483_v21  ;;  %v2486_v60 = vmul.f32 1.442695, %v2481_v56  ;;  %2499 = vadd.xlane.f32.xlu0 %v2498_v2 }
 0xe70   :  { %v2492_v8 = vsel %vm301_vm3, %v6905_v36, 0.0 }
 0xe71   :  { %5846 = vpow2.f32 %v2490_v57  ;;  %2493 = vadd.xlane.f32.xlu1 %v2492_v8 }
 0xe72   :  { %5848 = vpow2.f32 %v2486_v60 }
 0xe73   :  { %v6909_v13 = vpop.f32.mrf.mxu2 }
 0xe77   :  { %v5847_v14 = vpop.eup %5846  ;;  %2665 = vadd.xlane.f32.xlu0 %v2664_v47 }
 0xe78   :  { %v5849_v20 = vpop.eup %5848  ;;  %v2501_v11 = vsel %vm301_vm3, %v5847_v14, 0.0 }
 0xe79   :  { %2502 = vadd.xlane.f32.xlu1 %v2501_v11  ;;  %v2495_v12 = vsel %vm301_vm3, %v5849_v20, 0.0 }
 0xe7a   :  { %2496 = vadd.xlane.f32.xlu2 %v2495_v12 }
 0xe7b   :  { %v6913_v23 = vpop.f32.mrf.mxu2 }
 0xe81   :  { %2668 = vadd.xlane.f32.xlu1 %v2667_v62 }
 0xe83   :  { %v6915_v50 = vpop.f32.mrf.mxu2 }
 0xe8b   :  { %v2538_v24 = vpop.f32.mrf.mxu2 }
 0xe8c   :  { %v2552_v10 = vpack.c.bf16 %v2538_v24, %v2538_v24 }
 0xe8e   :  { %v2563_v22 = vunpack.c.l.b16 %v2552_v10 }
 0xe93   :  { %v2540_v26 = vpop.f32.mrf.mxu2 }
 0xe94   :  { %v2553_v6 = vpack.c.bf16 %v2540_v26, %v2540_v26 }
 0xe96   :  { %v2564_v4 = vunpack.c.l.b16 %v2553_v6 }
 0xe98   :  { %v2565_v27 = vpack.c.b16 %v2564_v4, %v2563_v22 }
 0xe9a   :  { %2577 = vmatpush.bf16.msra.mxu0 %v2565_v27 }
 0xe9b   :  { %v2543_v0 = vpop.f32.mrf.mxu2 }
 0xe9c   :  { %v2554_v38 = vpack.c.bf16 %v2543_v0, %v2543_v0 }
 0xe9e   :  { %2704 = vmatpush.bf16.xpose.msrb.mxu0 %v6588_v51  ;;  %v2591_v17 = vunpack.c.l.b16 %v2554_v38  ;;  %v2657_v51 = vmul.f32 %v6925_v16, %v5713_v46  ;;  %v2673_v38 = vpack.c.bf16 %v2642_v49, %v2642_v49 }
 0xea0   :  { %v2661_v28 = vsel %vm156_vm1, %v2657_v51, 0.0  ;;  %v2335_v51 = vadd.f32 %v6913_v23, %v6832_v63 }
 0xea1   :  { %2662 = vadd.xlane.f32.xlu2 %v2661_v28  ;;  %v2307_v28 = vadd.f32 %v6862_v40, %v6899_v53 }
 0xea3   :  { %v2545_v54 = vpop.f32.mrf.mxu2 }
 0xea4   :  { %v2555_v61 = vpack.c.bf16 %v2545_v54, %v2545_v54 }
 0xea6   :  { %v2592_v32 = vunpack.c.l.b16 %v2555_v61 }
 0xea8   :  { %v2593_v9 = vpack.c.b16 %v2592_v32, %v2591_v17 }
 0xea9   :  { %2671 = vadd.xlane.f32.xlu2 %v2670_v48 }
 0xeaa   :  { %2605 = vmatpush.bf16.msrb.mxu1 %v2593_v9 }
 0xeae   :  { %2738 = vmatpush.bf16.xpose.msra.mxu1 %v6654_v25  ;;  %v2644_v25 = vpop.f32.mrf.mxu3 }
 0xeaf   :  { %v2674_v54 = vpack.c.bf16 %v2644_v25, %v2644_v25 }
 0xeb1   :  { %v2680_v61 = vunpack.c.l.b16 %v2674_v54 }
 0xeb6   :  { %v2647_v56 = vpop.f32.mrf.mxu3 }
 0xeb7   :  { %v2675_v27 = vpack.c.bf16 %v2647_v56, %v2647_v56  ;;  %v5661_v56 = vld [vmem:[%s7764_s14 + $0x30] sm:$0xff] }
 0xee2   :  { %v2500_v59 = vpop.xlane.xlu0 %2499 }
 0xee3   :  { %5850 = vrcp.f32 %v2500_v59 }
 0xee4   :  { %v2494_v52 = vpop.xlane.xlu1 %2493 }
 0xee5   :  { %5852 = vrcp.f32 %v2494_v52 }
 0xee9   :  { %v5851_v34 = vpop.eup %5850 }
 0xeea   :  { %v2510_v39 = vmul.f32 %v5851_v34, %v6901_v58  ;;  %v2666_v44 = vpop.xlane.xlu0 %2665 }
 0xeeb   :  { %v5853_v7 = vpop.eup %5852  ;;  %v2685_v40 = vperm.slane %v2666_v44, %v6254_v43 }
 0xeec   :  { %v2503_v41 = vpop.xlane.xlu1 %2502  ;;  %v2508_v3 = vmul.f32 %v5853_v7, %v6905_v36  ;;  %v2550_v57 = vpack.c.bf16 %v2510_v39, %v2510_v39  ;;  %v2649_v36 = vpop.f32.mrf.mxu3  ;;  %v5662_v39 = vld [vmem:[%s7764_s14 + $0x38] sm:$0xff] }
 0xeed   :  { %v2497_v33 = vpop.xlane.xlu2 %2496  ;;  %5854 = vrcp.f32 %v2503_v41  ;;  %v2676_v0 = vpack.c.bf16 %v2649_v36, %v2649_v36  ;;  %2812 = vmatpush.bf16.msrb.mxu2 %v5662_v39 }
 0xeee   :  { %5856 = vrcp.f32 %v2497_v33  ;;  %v2548_v8 = vpack.c.bf16 %v2508_v3, %v2508_v3  ;;  %v2586_v10 = vunpack.c.l.b16 %v2550_v57 }
 0xeef   :  { %v2714_v17 = vunpack.c.l.b16 %v2676_v0 }
 0xef0   :  { %v2558_v22 = vunpack.c.l.b16 %v2548_v8 }
 0xef1   :  { %2813 = vmatpush.bf16.msrb.mxu2 %v5661_v56 }
 0xef3   :  { %v5855_v21 = vpop.eup %5854 }
 0xef4   :  { %v5857_v2 = vpop.eup %5856  ;;  %v2511_v60 = vmul.f32 %v5855_v21, %v5847_v14  ;;  %v2713_v14 = vunpack.c.l.b16 %v2675_v27  ;;  %v2669_v34 = vpop.xlane.xlu1 %2668  ;;  %5397 = vmatmul.msk.bf16.vlgmr.msrb.gmra.mxu2 %vm156_vm1, %v6564_v45  ;;  %v6995_v45 = vld [vmem:[%s7766_s15] sm:$0xff] }
 0xef5   :  { %v2509_v11 = vmul.f32 %v5857_v2, %v5849_v20  ;;  %v2679_v20 = vunpack.c.l.b16 %v2673_v38  ;;  %v2718_v63 = vperm.slane %v2669_v34, %v6251_v42 }
 0xef6   :  { %v2551_v12 = vpack.c.bf16 %v2511_v60, %v2511_v60  ;;  %v2715_v32 = vpack.c.b16 %v2714_v17, %v2713_v14 }
 0xef7   :  { %v2549_v24 = vpack.c.bf16 %v2509_v11, %v2509_v11  ;;  %v2681_v9 = vpack.c.b16 %v2680_v61, %v2679_v20 }
 0xef8   :  { %v2587_v26 = vunpack.c.l.b16 %v2551_v12 }
 0xef9   :  { %v2559_v6 = vunpack.c.l.b16 %v2549_v24 }
 0xefa   :  { %v2588_v4 = vpack.c.b16 %v2587_v26, %v2586_v10  ;;  %v5991_v10 = vld [vmem:[%s7783_s27 + $0x2] ss:$0 sm:$0xff]  ;;  %v6989_v26 = vld [vmem:[%s7766_s15 + $0x8] sm:$0xff] }
 0xefb   :  { %v2560_v58 = vpack.c.b16 %v2559_v6, %v2558_v22  ;;  %3038 = vmatpush.bf16.msrb.mxu3 %v6989_v26 }
 0xefc   :  { %5367 = vmatmul.msk.bf16.vlgmr.msrb.gmra.mxu1 %vm301_vm3, %v2588_v4 }
 0xefd   :  { %5366 = vmatmul.msk.bf16.vlgmr.msra.gmra.mxu0 %vm301_vm3, %v2560_v58 }
 0xeff   :  { %3039 = vmatpush.bf16.msrb.mxu3 %v6995_v45 }
 0xf04   :  { %5398 = vmatmul.msk.bf16.gmra.mxu2 %vm156_vm1, %v6612_v37 }
 0xf0c   :  { %5384 = vmatmul.msk.bf16.vlgmr.msra.gmra.mxu1 %vm156_vm1, %v2715_v32 }
 0xf0d   :  { %5383 = vmatmul.msk.bf16.vlgmr.msrb.gmra.mxu0 %vm156_vm1, %v2681_v9 }
 0xf14   :  { %v2663_v46 = vpop.xlane.xlu2 %2662 }
 0xf15   :  { %v2684_v23 = vperm.slane %v2663_v46, %v6251_v42 }
 0xf17   :  { %v2686_v7 = vsel %vm223_vm2, %v2685_v40, %v2684_v23 }
 0xf1c   :  { %v2672_v41 = vpop.xlane.xlu2 %2671 }
 0xf1d   :  { %v2719_v30 = vperm.slane %v2672_v41, %v6254_v43 }
 0xf1f   :  { %v2720_v53 = vsel %vm223_vm2, %v2719_v30, %v2718_v63 }
 0xf79   :  { %v2607_v59 = vpop.f32.mrf.mxu1 }
 0xf7a   :  { %v2579_v49 = vpop.f32.mrf.mxu0  ;;  %v6955_v52 = vadd.f32 %v2607_v59, %v2335_v51 }
 0xf7b   :  { %v6957_v25 = vadd.f32 %v2579_v49, %v2307_v28  ;;  %v2815_v28 = vpop.f32.mrf.mxu2  ;;  %v1756_v49 = vadd.f32 %v6776_v15, %v6750_v31  ;;  %v7015_v31 = vld [vmem:[%s7765_s17] ss:$0 sm:$0xff] }
 0xf7c   :  { %v2829_v34 = vpack.c.bf16 %v2815_v28, %v2815_v28 }
 0xf7e   :  { %v2840_v40 = vunpack.c.l.b16 %v2829_v34 }
 0xf81   :  { %v6959_v33 = vpop.f32.mrf.mxu1 }
 0xf82   :  { %v6961_v35 = vpop.f32.mrf.mxu0 }
 0xf83   :  { %v2817_v23 = vpop.f32.mrf.mxu2 }
 0xf89   :  { %v2740_v62 = vpop.f32.mrf.mxu1 }
 0xf8a   :  { %v2706_v47 = vpop.f32.mrf.mxu0  ;;  %v2741_v48 = vadd.f32 %v2740_v62, %v2720_v53 }
 0xf8b   :  { %v2707_v3 = vadd.f32 %v2706_v47, %v2686_v7  ;;  %v2820_v15 = vpop.f32.mrf.mxu2 }
 0xf8c   :  { %v2751_v21 = vsel %vm301_vm3, %v2741_v48, -inf  ;;  %v2831_v47 = vpack.c.bf16 %v2820_v15, %v2820_v15 }
 0xf8d   :  { %v2745_v2 = vsel %vm301_vm3, %v2707_v3, -inf  ;;  %2752 = vmax.xlane.f32.xlu2 %v2751_v21 }
 0xf8e   :  { %2746 = vmax.xlane.f32.xlu0 %v2745_v2 }
 0xf91   :  { %v2742_v57 = vpop.f32.mrf.mxu1 }
 0xf92   :  { %v2708_v60 = vpop.f32.mrf.mxu0  ;;  %v2743_v8 = vadd.f32 %v2742_v57, %v2720_v53  ;;  %v2830_v53 = vpack.c.bf16 %v2817_v23, %v2817_v23  ;;  %v2309_v23 = vadd.f32 %v6864_v19, %v6909_v13 }
 0xf93   :  { %v2709_v11 = vadd.f32 %v2708_v60, %v2686_v7 }
 0xf94   :  { %v2754_v12 = vsel %vm301_vm3, %v2743_v8, -inf  ;;  %v2841_v7 = vunpack.c.l.b16 %v2830_v53  ;;  %v2613_v53 = vadd.f32 %v6961_v35, %v2309_v23 }
 0xf95   :  { %v2748_v24 = vsel %vm301_vm3, %v2709_v11, -inf }
 0xf96   :  { %2749 = vmax.xlane.f32.xlu1 %v2748_v24  ;;  %2755 = vmax.xlane.f32.xlu0 %v2754_v12  ;;  %v2842_v62 = vpack.c.b16 %v2841_v7, %v2840_v40 }
 0xf98   :  { %2854 = vmatpush.bf16.msra.mxu0 %v2842_v62 }
 0xfaa   :  { %1759 = vrot.lane.b32.xlu0 %v5991_v10, %s5999_s25 }
 0xfb2   :  { %3050 = vrot.lane.b32.xlu0 %v6995_v45, %s5994_s4 }
0x1000   :  { %v2753_v22 = vpop.xlane.xlu2 %2752 }
0x1001   :  { %v2747_v37 = vpop.xlane.xlu0 %2746  ;;  %v2759_v58 = vsub.f32 %v2741_v48, %v2753_v22  ;;  %v2822_v48 = vpop.f32.mrf.mxu2 }
0x1002   :  { %v2757_v6 = vsub.f32 %v2707_v3, %v2747_v37  ;;  %v2832_v39 = vpack.c.bf16 %v2822_v48, %v2822_v48  ;;  %v2868_v3 = vunpack.c.l.b16 %v2831_v47 }
0x1003   :  { %v2765_v36 = vmul.f32 1.442695, %v2759_v58 }
0x1004   :  { %v2761_v4 = vmul.f32 1.442695, %v2757_v6  ;;  %v2869_v21 = vunpack.c.l.b16 %v2832_v39 }
0x1006   :  { %5858 = vpow2.f32 %v2761_v4  ;;  %v2870_v56 = vpack.c.b16 %v2869_v21, %v2868_v3 }
0x1007   :  { %5860 = vpow2.f32 %v2765_v36 }
0x1008   :  { %2882 = vmatpush.bf16.msrb.mxu1 %v2870_v56 }
0x1009   :  { %v2750_v27 = vpop.xlane.xlu1 %2749  ;;  %v2756_v0 = vpop.xlane.xlu0 %2755 }
0x100a   :  { %v2758_v38 = vsub.f32 %v2709_v11, %v2750_v27  ;;  %v2760_v17 = vsub.f32 %v2743_v8, %v2756_v0 }
0x100c   :  { %v5859_v54 = vpop.eup %5858  ;;  %v2763_v14 = vmul.f32 1.442695, %v2758_v38  ;;  %v2767_v61 = vmul.f32 1.442695, %v2760_v17 }
0x100d   :  { %v2769_v20 = vsel %vm301_vm3, %v5859_v54, 0.0  ;;  %v5861_v32 = vpop.eup %5860 }
0x100e   :  { %2770 = vadd.xlane.f32.xlu1 %v2769_v20  ;;  %5862 = vpow2.f32 %v2763_v14  ;;  %v2775_v46 = vsel %vm301_vm3, %v5861_v32, 0.0 }
0x100f   :  { %5864 = vpow2.f32 %v2767_v61 }
0x1014   :  { %v5863_v9 = vpop.eup %5862 }
0x1015   :  { %v2772_v51 = vsel %vm301_vm3, %v5863_v9, 0.0  ;;  %v5865_v59 = vpop.eup %5864 }
0x1016   :  { %2776 = vadd.xlane.f32.xlu1 %v2775_v46  ;;  %2773 = vadd.xlane.f32.xlu2 %v2772_v51  ;;  %v2778_v30 = vsel %vm301_vm3, %v5865_v59, 0.0 }
0x101c   :  { %v1760_v41 = vpop.permute.xlu0 %1759 }
0x101d   :  { %v1762_v44 = vadd.f32 %v1760_v41, %v1756_v49 }
0x101e   :  { %2779 = vadd.xlane.f32.xlu2 %v2778_v30 }
0x101f   :  { %v7006_v63 = vpack.c.bf16 %v1762_v44, %v1762_v44 }
0x1021   :  { %5409 = vmatmul.msk.bf16.vlgmr.msrb.gmra.mxu3 %vm156_vm1, %v7006_v63 }
0x1024   :  { %v3051_v51 = vpop.permute.xlu0 %3050 }
0x102f   :  { %3052 = vrot.lane.b32.xlu1 %v6989_v26, %s5994_s4 }
0x1036   :  { %3026 = vrot.lane.b32.xlu2 %v7015_v31, %s5997_s22 }
0x1081   :  { %v2771_v2 = vpop.xlane.xlu1 %2770 }
0x1082   :  { %5866 = vrcp.f32 %v2771_v2 }
0x1088   :  { %v5867_v8 = vpop.eup %5866 }
0x1089   :  { %v2774_v57 = vpop.xlane.xlu2 %2773  ;;  %v2777_v60 = vpop.xlane.xlu1 %2776  ;;  %v2785_v11 = vmul.f32 %v5867_v8, %v5859_v54 }
0x108a   :  { %5868 = vrcp.f32 %v2774_v57 }
0x108b   :  { %5870 = vrcp.f32 %v2777_v60  ;;  %v2825_v24 = vpack.c.bf16 %v2785_v11, %v2785_v11 }
0x108d   :  { %v2835_v4 = vunpack.c.l.b16 %v2825_v24 }
0x1090   :  { %v5869_v12 = vpop.eup %5868 }
0x1091   :  { %v2786_v10 = vmul.f32 %v5869_v12, %v5863_v9  ;;  %v2780_v37 = vpop.xlane.xlu2 %2779  ;;  %v5871_v22 = vpop.eup %5870 }
0x1092   :  { %5872 = vrcp.f32 %v2780_v37  ;;  %v2787_v36 = vmul.f32 %v5871_v22, %v5861_v32 }
0x1093   :  { %v2826_v6 = vpack.c.bf16 %v2786_v10, %v2786_v10 }
0x1094   :  { %v2827_v38 = vpack.c.bf16 %v2787_v36, %v2787_v36 }
0x1095   :  { %v2836_v58 = vunpack.c.l.b16 %v2826_v6 }
0x1096   :  { %v2863_v20 = vunpack.c.l.b16 %v2827_v38 }
0x1097   :  { %v2837_v27 = vpack.c.b16 %v2836_v58, %v2835_v4 }
0x1098   :  { %v5873_v0 = vpop.eup %5872 }
0x1099   :  { %v2788_v14 = vmul.f32 %v5873_v0, %v5865_v59  ;;  %5399 = vmatmul.msk.bf16.vlgmr.msra.gmra.mxu0 %vm301_vm3, %v2837_v27  ;;  %v3027_v9 = vpop.permute.xlu2 %3026  ;;  %v5715_v59 = vld [vmem:[%s7765_s17] ss:$0 sm:$0xff] }
0x109b   :  { %v2828_v17 = vpack.c.bf16 %v2788_v14, %v2788_v14 }
0x109d   :  { %v2864_v61 = vunpack.c.l.b16 %v2828_v17 }
0x109f   :  { %v2865_v54 = vpack.c.b16 %v2864_v61, %v2863_v20 }
0x10a1   :  { %v3053_v46 = vpop.permute.xlu1 %3052  ;;  %5400 = vmatmul.msk.bf16.vlgmr.msrb.gmra.mxu1 %vm301_vm3, %v2865_v54 }
0x10a2   :  { %3065 = vmatpush.bf16.msrb.mxu0 %v3053_v46 }
0x10a4   :  { %v3041_v28 = vpop.f32.mrf.mxu3 }
0x10a5   :  { %v3042_v49 = vadd.f32 %v3041_v28, %v3027_v9 }
0x10a6   :  { %3066 = vmatpush.bf16.msrb.mxu0 %v3051_v51 }
0x10a7   :  { %v3045_v32 = vpack.c.bf16 %v3042_v49, %v3042_v49 }
0x10a9   :  { %5410 = vmatmul.msk.bf16.vlgmr.msrb.gmra.mxu0 %vm156_vm1, %v3045_v32 }
0x10ac   :  { %v3043_v41 = vpop.f32.mrf.mxu3 }
0x1116   :  { %v2856_v34 = vpop.f32.mrf.mxu0 }
0x1117   :  { %v2889_v44 = vadd.f32 %v2856_v34, %v6957_v25  ;;  %v2337_v25 = vadd.f32 %v6915_v50, %v6834_v29 }
0x1119   :  { %v2896_v30 = vadd.f32 %v5715_v59, %v2889_v44  ;;  %v2615_v13 = vadd.f32 %v6959_v33, %v2337_v25 }
0x111b   :  { %v2900_v40 = vadd.f32 %v6925_v16, %v2896_v30 }
0x111d   :  { %v2905_v7 = vsel %vm156_vm1, %v2900_v40, 0.0 }
0x111e   :  { %2906 = vadd.xlane.f32.xlu0 %v2905_v7  ;;  %v2858_v62 = vpop.f32.mrf.mxu0  ;;  %v2884_v15 = vpop.f32.mrf.mxu1 }
0x111f   :  { %v2890_v47 = vadd.f32 %v2858_v62, %v2613_v53  ;;  %v2891_v48 = vadd.f32 %v2884_v15, %v6955_v52  ;;  %v7073_v62 = vld [vmem:[%s7765_s17 + $0x1] ss:$0 sm:$0xff] }
0x1121   :  { %v2897_v39 = vadd.f32 %v5715_v59, %v2890_v47  ;;  %v2898_v3 = vadd.f32 %v5715_v59, %v2891_v48 }
0x1123   :  { %v2901_v21 = vadd.f32 %v6855_v18, %v2897_v39  ;;  %v2902_v19 = vadd.f32 %v6932_v55, %v2898_v3 }
0x1125   :  { %v2908_v16 = vsel %vm156_vm1, %v2901_v21, 0.0  ;;  %v2911_v35 = vsel %vm156_vm1, %v2902_v19, 0.0 }
0x1126   :  { %2909 = vadd.xlane.f32.xlu1 %v2908_v16  ;;  %2912 = vadd.xlane.f32.xlu2 %v2911_v35  ;;  %v2886_v56 = vpop.f32.mrf.mxu1  ;;  %v7039_v2 = vpop.f32.mrf.mxu0 }
0x1127   :  { %v2892_v52 = vadd.f32 %v2886_v56, %v2615_v13  ;;  %v3069_v25 = vadd.f32 %v7073_v62, %v7039_v2 }
0x1129   :  { %v2899_v57 = vadd.f32 %v5715_v59, %v2892_v52 }
0x112b   :  { %v2903_v60 = vadd.f32 %v6939_v1, %v2899_v57 }
0x112d   :  { %v2914_v29 = vsel %vm156_vm1, %v2903_v60, 0.0 }
0x112e   :  { %2915 = vadd.xlane.f32.xlu0 %v2914_v29  ;;  %v3070_v18 = vpop.f32.mrf.mxu0 }
0x1191   :  { %v2907_v50 = vpop.xlane.xlu0 %2906 }
0x1192   :  { %v2917_v55 = vmul.f32 %v2907_v50, %v6471_v5  ;;  %v3073_v50 = vrot.slane %v3069_v25, 1 }
0x1194   :  { %v2921_v33 = vsub.f32 %v2900_v40, %v2917_v55 }
0x1196   :  { %v2925_v8 = vmul.f32 %v2921_v33, %v2921_v33 }
0x1198   :  { %v2929_v11 = vsel %vm156_vm1, %v2925_v8, 0.0 }
0x1199   :  { %2930 = vadd.xlane.f32.xlu1 %v2929_v11  ;;  %v2913_v12 = vpop.xlane.xlu2 %2912  ;;  %v2910_v24 = vpop.xlane.xlu1 %2909 }
0x119a   :  { %v2919_v10 = vmul.f32 %v2913_v12, %v6471_v5  ;;  %v2918_v37 = vmul.f32 %v2910_v24, %v6471_v5 }
0x119c   :  { %v7047_v22 = vsub.f32 %v2902_v19, %v2919_v10  ;;  %v7049_v1 = vsub.f32 %v2901_v21, %v2918_v37  ;;  %v3075_v10 = vperm.slane %v3073_v50, 0 }
0x119e   :  { %v2927_v6 = vmul.f32 %v7047_v22, %v7047_v22  ;;  %v2926_v4 = vmul.f32 %v7049_v1, %v7049_v1 }
0x11a0   :  { %v2935_v58 = vsel %vm156_vm1, %v2927_v6, 0.0  ;;  %v2932_v36 = vsel %vm156_vm1, %v2926_v4, 0.0 }
0x11a1   :  { %2936 = vadd.xlane.f32.xlu2 %v2935_v58  ;;  %v2916_v27 = vpop.xlane.xlu0 %2915  ;;  %2933 = vadd.xlane.f32.xlu0 %v2932_v36 }
0x11a2   :  { %v2920_v0 = vmul.f32 %v2916_v27, %v6471_v5 }
0x11a4   :  { %v7058_v38 = vsub.f32 %v2903_v60, %v2920_v0  ;;  %v3074_v60 = vperm.slane %v3069_v25, 0 }
0x11a6   :  { %v2928_v14 = vmul.f32 %v7058_v38, %v7058_v38 }
0x11a8   :  { %v2938_v17 = vsel %vm156_vm1, %v2928_v14, 0.0 }
0x11a9   :  { %2939 = vadd.xlane.f32.xlu1 %v2938_v17 }
0x11b5   :  { %2995 = vrot.lane.b32.xlu0 %v7015_v31, %s5994_s4 }
0x11b9   :  { %3002 = vrot.lane.b32.xlu2 %v7015_v31, %s5996_s19 }
0x120c   :  { %v2931_v20 = vpop.xlane.xlu1 %2930 }
0x120d   :  { %v2941_v61 = vmul.f32 %v2931_v20, %v6471_v5 }
0x120f   :  { %v2945_v54 = vadd.f32 1e-05, %v2941_v61 }
0x1211   :  { %5874 = vrsqrt.f32 %v2945_v54  ;;  %vm2955_vm12 = vweird.f32 %v2945_v54 }
0x1214   :  { %v2937_v46 = vpop.xlane.xlu2 %2936  ;;  %v2934_v9 = vpop.xlane.xlu0 %2933 }
0x1215   :  { %v2943_v51 = vmul.f32 %v2937_v46, %v6471_v5  ;;  %v2942_v28 = vmul.f32 %v2934_v9, %v6471_v5 }
0x1217   :  { %v5875_v49 = vpop.eup %5874  ;;  %v2947_v32 = vadd.f32 1e-05, %v2943_v51  ;;  %v2946_v41 = vadd.f32 1e-05, %v2942_v28 }
0x1218   :  { %v2950_v59 = vmul.f32 %v5875_v49, %v2945_v54  ;;  %vm2956_vm11 = vweird.f32 %v5875_v49 }
0x1219   :  { %5876 = vrsqrt.f32 %v2947_v32  ;;  %vm2957_vm13 = vmor %vm2955_vm12, %vm2956_vm11  ;;  %vm2975_vm0 = vweird.f32 %v2947_v32  ;;  %vm2965_vm6 = vweird.f32 %v2946_v41 }
0x121a   :  { %v2951_v34 = vmul.f32 %v5875_v49, %v2950_v59  ;;  %5878 = vrsqrt.f32 %v2946_v41 }
0x121c   :  { %v2952_v44 = vmul.f32 0.5, %v2951_v34  ;;  %v3003_v35 = vpop.permute.xlu2 %3002 }
0x121e   :  { %v2953_v31 = vsub.f32 1.5, %v2952_v44 }
0x121f   :  { %v5877_v30 = vpop.eup %5876 }
0x1220   :  { %v5879_v23 = vpop.eup %5878  ;;  %v2954_v40 = vmul.f32 %v5875_v49, %v2953_v31  ;;  %v2970_v53 = vmul.f32 %v5877_v30, %v2947_v32  ;;  %vm2976_vm14 = vweird.f32 %v5877_v30 }
0x1221   :  { %v2960_v7 = vmul.f32 %v5879_v23, %v2946_v41  ;;  %vm2966_vm15 = vweird.f32 %v5879_v23  ;;  %vm2977_vm5 = vmor %vm2975_vm0, %vm2976_vm14 }
0x1222   :  { %v2971_v15 = vmul.f32 %v5877_v30, %v2970_v53  ;;  %v2958_v48 = vsel %vm2957_vm13, %v5875_v49, %v2954_v40  ;;  %vm2967_vm7 = vmor %vm2965_vm6, %vm2966_vm15 }
0x1223   :  { %v2961_v47 = vmul.f32 %v5879_v23, %v2960_v7  ;;  %v2989_v19 = vmul.f32 %v2958_v48, %v2921_v33 }
0x1224   :  { %v2972_v39 = vmul.f32 0.5, %v2971_v15 }
0x1225   :  { %v2962_v3 = vmul.f32 0.5, %v2961_v47 }
0x1226   :  { %v2973_v21 = vsub.f32 1.5, %v2972_v39 }
0x1227   :  { %v2963_v13 = vsub.f32 1.5, %v2962_v3  ;;  %v2996_v16 = vpop.permute.xlu0 %2995 }
0x1228   :  { %v2974_v56 = vmul.f32 %v5877_v30, %v2973_v21  ;;  %v2998_v52 = vmul.f32 %v2996_v16, %v2989_v19 }
0x1229   :  { %v2964_v57 = vmul.f32 %v5879_v23, %v2963_v13 }
0x122a   :  { %v2978_v29 = vsel %vm2977_vm5, %v5877_v30, %v2974_v56  ;;  %v3005_v18 = vadd.f32 %v3003_v35, %v2998_v52 }
0x122b   :  { %v2968_v55 = vsel %vm2967_vm7, %v5879_v23, %v2964_v57  ;;  %v2991_v2 = vmul.f32 %v2978_v29, %v7047_v22  ;;  %v2940_v22 = vpop.xlane.xlu1 %2939 }
0x122c   :  { %v2990_v33 = vmul.f32 %v2968_v55, %v7049_v1  ;;  %v3078_v8 = vadd.f32 %v3074_v60, %v3005_v18  ;;  %v2944_v1 = vmul.f32 %v2940_v22, %v6471_v5 }
0x122d   :  { %v3000_v11 = vmul.f32 %v2996_v16, %v2991_v2 }
0x122e   :  { %v2999_v12 = vmul.f32 %v2996_v16, %v2990_v33  ;;  %v3082_v24 = vsel %vm156_vm1, %v3078_v8, 0.0  ;;  %v2948_v0 = vadd.f32 1e-05, %v2944_v1 }
0x122f   :  { %3083 = vadd.xlane.f32.xlu1 %v3082_v24  ;;  %v3007_v37 = vadd.f32 %v3003_v35, %v3000_v11 }
0x1230   :  { %v3006_v6 = vadd.f32 %v3003_v35, %v2999_v12  ;;  %5880 = vrsqrt.f32 %v2948_v0  ;;  %vm2985_vm9 = vweird.f32 %v2948_v0 }
0x1231   :  { %v3080_v4 = vadd.f32 %v3075_v10, %v3007_v37 }
0x1232   :  { %v3079_v58 = vadd.f32 %v3074_v60, %v3006_v6 }
0x1233   :  { %v3088_v36 = vsel %vm156_vm1, %v3080_v4, 0.0 }
0x1234   :  { %3089 = vadd.xlane.f32.xlu0 %v3088_v36  ;;  %v3085_v27 = vsel %vm156_vm1, %v3079_v58, 0.0 }
0x1236   :  { %v5881_v14 = vpop.eup %5880 }
0x1237   :  { %3086 = vadd.xlane.f32.xlu1 %v3085_v27  ;;  %v2980_v17 = vmul.f32 %v5881_v14, %v2948_v0  ;;  %vm2986_vm8 = vweird.f32 %v5881_v14 }
0x1238   :  { %vm2987_vm10 = vmor %vm2985_vm9, %vm2986_vm8 }
0x1239   :  { %v2981_v20 = vmul.f32 %v5881_v14, %v2980_v17 }
0x123b   :  { %v2982_v61 = vmul.f32 0.5, %v2981_v20 }
0x123d   :  { %v2983_v54 = vsub.f32 1.5, %v2982_v61 }
0x123f   :  { %v2984_v46 = vmul.f32 %v5881_v14, %v2983_v54 }
0x1241   :  { %v2988_v9 = vsel %vm2987_vm10, %v5881_v14, %v2984_v46  ;;  %v5668_v46 = vld [vmem:[%s7767_s16 + $0x18] sm:$0xff] }
0x1242   :  { %v2992_v51 = vmul.f32 %v2988_v9, %v7058_v38  ;;  %3281 = vmatpush.bf16.msra.mxu2 %v5668_v46 }
0x1244   :  { %v3001_v28 = vmul.f32 %v2996_v16, %v2992_v51 }
0x1246   :  { %v3008_v49 = vadd.f32 %v3003_v35, %v3001_v28 }
0x1248   :  { %3170 = vrot.lane.b32.xlu0 %v7073_v62, %s5994_s4  ;;  %v3081_v32 = vadd.f32 %v3075_v10, %v3008_v49 }
0x124a   :  { %v3091_v41 = vsel %vm156_vm1, %v3081_v32, 0.0 }
0x1250   :  { %3192 = vrot.lane.b32.xlu1 %v6989_v26, %s5996_s19 }
0x127a   :  { %3092 = vadd.xlane.f32.xlu1 %v3091_v41 }
0x12a2   :  { %v3084_v59 = vpop.xlane.xlu1 %3083 }
0x12a3   :  { %v3094_v26 = vmul.f32 %v3084_v59, %v6471_v5 }
0x12a5   :  { %v7090_v34 = vsub.f32 %v3078_v8, %v3094_v26 }
0x12a7   :  { %v3102_v44 = vmul.f32 %v7090_v34, %v7090_v34  ;;  %v3090_v30 = vpop.xlane.xlu0 %3089 }
0x12a8   :  { %v3096_v40 = vmul.f32 %v3090_v30, %v6471_v5 }
0x12a9   :  { %v3106_v31 = vsel %vm156_vm1, %v3102_v44, 0.0 }
0x12aa   :  { %3107 = vadd.xlane.f32.xlu2 %v3106_v31  ;;  %v3087_v23 = vpop.xlane.xlu1 %3086  ;;  %v7101_v15 = vsub.f32 %v3080_v4, %v3096_v40 }
0x12ab   :  { %v3095_v38 = vmul.f32 %v3087_v23, %v6471_v5 }
0x12ac   :  { %v3104_v48 = vmul.f32 %v7101_v15, %v7101_v15 }
0x12ad   :  { %v7097_v53 = vsub.f32 %v3079_v58, %v3095_v38 }
0x12ae   :  { %v3112_v39 = vsel %vm156_vm1, %v3104_v48, 0.0 }
0x12af   :  { %v3103_v7 = vmul.f32 %v7097_v53, %v7097_v53 }
0x12b1   :  { %v3109_v47 = vsel %vm156_vm1, %v3103_v7, 0.0 }
0x12b2   :  { %3110 = vadd.xlane.f32.xlu1 %v3109_v47 }
0x12ba   :  { %3113 = vadd.xlane.f32.xlu1 %v3112_v39  ;;  %v3171_v44 = vpop.permute.xlu0 %3170 }
0x12c2   :  { %v3193_v3 = vpop.permute.xlu1 %3192  ;;  %3177 = vrot.lane.b32.xlu2 %v7073_v62, %s5996_s19 }
0x12c3   :  { %3214 = vmatpush.bf16.msra.mxu1 %v3193_v3 }
0x12ed   :  { %v3093_v25 = vpop.xlane.xlu1 %3092 }
0x12ee   :  { %v3097_v21 = vmul.f32 %v3093_v25, %v6471_v5 }
0x12f0   :  { %v7110_v19 = vsub.f32 %v3081_v32, %v3097_v21  ;;  %v5667_v32 = vld [vmem:[%s7767_s16 + $0x10] sm:$0xff] }
0x12f1   :  { %3282 = vmatpush.bf16.msra.mxu2 %v5667_v32 }
0x12f2   :  { %v3105_v13 = vmul.f32 %v7110_v19, %v7110_v19 }
0x12f4   :  { %v3115_v16 = vsel %vm156_vm1, %v3105_v13, 0.0 }
0x12f5   :  { %3116 = vadd.xlane.f32.xlu1 %v3115_v16 }
0x130e   :  { %3190 = vrot.lane.b32.xlu1 %v6995_v45, %s5996_s19  ;;  %v3186_v45 = vld [vmem:[%s7765_s17 + $0x1] sm:$0x3] }
0x130f   :  { %v3188_v24 = vperm.slane %v3186_v45, 0  ;;  %v3189_v10 = vperm.slane %v3186_v45, 1 }
0x1311   :  { %3196 = vrot.lane.b32.xlu0 %v3188_v24, %s5997_s22 }
0x1316   :  { %3198 = vrot.lane.b32.xlu1 %v3189_v10, %s5997_s22 }
0x131d   :  { %v3108_v56 = vpop.xlane.xlu2 %3107 }
0x131e   :  { %v3118_v62 = vmul.f32 %v3108_v56, %v6471_v5 }
0x1320   :  { %v3122_v60 = vadd.f32 1e-05, %v3118_v62 }
0x1322   :  { %vm3132_vm15 = vweird.f32 %v3122_v60 }
0x1325   :  { %v3111_v35 = vpop.xlane.xlu1 %3110  ;;  %v3178_v40 = vpop.permute.xlu2 %3177 }
0x1326   :  { %v3119_v52 = vmul.f32 %v3111_v35, %v6471_v5 }
0x1328   :  { %v3123_v57 = vadd.f32 1e-05, %v3119_v52 }
0x132a   :  { %5882 = vrsqrt.f32 %v3123_v57  ;;  %vm3142_vm13 = vweird.f32 %v3123_v57 }
0x132b   :  { %5884 = vrsqrt.f32 %v3122_v60 }
0x132d   :  { %v3114_v18 = vpop.xlane.xlu1 %3113 }
0x132e   :  { %v3120_v2 = vmul.f32 %v3114_v18, %v6471_v5 }
0x1330   :  { %v5883_v29 = vpop.eup %5882  ;;  %v3124_v11 = vadd.f32 1e-05, %v3120_v2 }
0x1331   :  { %v5885_v50 = vpop.eup %5884  ;;  %v3137_v55 = vmul.f32 %v5883_v29, %v3123_v57  ;;  %vm3143_vm11 = vweird.f32 %v5883_v29  ;;  %v5666_v57 = vld [vmem:[%s7767_s16 + $0x8] sm:$0xff] }
0x1332   :  { %v3127_v33 = vmul.f32 %v5885_v50, %v3122_v60  ;;  %5886 = vrsqrt.f32 %v3124_v11  ;;  %vm3133_vm12 = vweird.f32 %v5885_v50  ;;  %vm3144_vm14 = vmor %vm3142_vm13, %vm3143_vm11  ;;  %vm3152_vm9 = vweird.f32 %v3124_v11  ;;  %3283 = vmatpush.bf16.msra.mxu2 %v5666_v57  ;;  %v5665_v60 = vld [vmem:[%s7767_s16] sm:$0xff] }
0x1333   :  { %v3138_v8 = vmul.f32 %v5883_v29, %v3137_v55  ;;  %vm3134_vm0 = vmor %vm3132_vm15, %vm3133_vm12 }
0x1334   :  { %v3128_v12 = vmul.f32 %v5885_v50, %v3127_v33 }
0x1335   :  { %v3139_v37 = vmul.f32 0.5, %v3138_v8 }
0x1336   :  { %v3129_v4 = vmul.f32 0.5, %v3128_v12  ;;  %3284 = vmatpush.bf16.msra.mxu2 %v5665_v60 }
0x1337   :  { %v3140_v36 = vsub.f32 1.5, %v3139_v37 }
0x1338   :  { %v3130_v22 = vsub.f32 1.5, %v3129_v4  ;;  %v5887_v1 = vpop.eup %5886 }
0x1339   :  { %v3141_v0 = vmul.f32 %v5883_v29, %v3140_v36  ;;  %v3147_v17 = vmul.f32 %v5887_v1, %v3124_v11  ;;  %vm3153_vm6 = vweird.f32 %v5887_v1 }
0x133a   :  { %v3131_v14 = vmul.f32 %v5885_v50, %v3130_v22  ;;  %vm3154_vm10 = vmor %vm3152_vm9, %vm3153_vm6 }
0x133b   :  { %v3145_v61 = vsel %vm3144_vm14, %v5883_v29, %v3141_v0  ;;  %v3148_v9 = vmul.f32 %v5887_v1, %v3147_v17 }
0x133c   :  { %v3135_v51 = vsel %vm3134_vm0, %v5885_v50, %v3131_v14  ;;  %v3167_v28 = vmul.f32 %v3145_v61, %v7097_v53 }
0x133d   :  { %v3166_v41 = vmul.f32 %v3135_v51, %v7090_v34  ;;  %v3149_v26 = vmul.f32 0.5, %v3148_v9 }
0x133e   :  { %v3174_v31 = vmul.f32 %v3171_v44, %v3167_v28 }
0x133f   :  { %v3173_v23 = vmul.f32 %v3171_v44, %v3166_v41  ;;  %v3150_v38 = vsub.f32 1.5, %v3149_v26 }
0x1340   :  { %v3181_v7 = vadd.f32 %v3178_v40, %v3174_v31 }
0x1341   :  { %v3180_v53 = vadd.f32 %v3178_v40, %v3173_v23  ;;  %v3151_v39 = vmul.f32 %v5887_v1, %v3150_v38 }
0x1343   :  { %v3184_v3 = vpack.c.bf16 %v3181_v7, %v3180_v53  ;;  %v3155_v25 = vsel %vm3154_vm10, %v5887_v1, %v3151_v39 }
0x1344   :  { %v3168_v13 = vmul.f32 %v3155_v25, %v7101_v15  ;;  %v7147_v15 = vld [vmem:[%s7765_s17 + $0x2] ss:$0 sm:$0xff] }
0x1345   :  { %3268 = vrot.lane.b32.xlu0 %v7147_v15, %s5994_s4 }
0x1346   :  { %v3175_v35 = vmul.f32 %v3171_v44, %v3168_v13 }
0x1348   :  { %v3182_v52 = vadd.f32 %v3178_v40, %v3175_v35 }
0x1368   :  { %v3117_v6 = vpop.xlane.xlu1 %3116 }
0x1369   :  { %v3121_v58 = vmul.f32 %v3117_v6, %v6471_v5 }
0x136b   :  { %v3125_v27 = vadd.f32 1e-05, %v3121_v58 }
0x136d   :  { %5888 = vrsqrt.f32 %v3125_v27  ;;  %vm3162_vm7 = vweird.f32 %v3125_v27 }
0x1373   :  { %v5889_v20 = vpop.eup %5888 }
0x1374   :  { %v3157_v54 = vmul.f32 %v5889_v20, %v3125_v27  ;;  %vm3163_vm5 = vweird.f32 %v5889_v20 }
0x1375   :  { %vm3164_vm8 = vmor %vm3162_vm7, %vm3163_vm5 }
0x1376   :  { %v3158_v49 = vmul.f32 %v5889_v20, %v3157_v54 }
0x1378   :  { %v3159_v59 = vmul.f32 0.5, %v3158_v49 }
0x137a   :  { %v3160_v30 = vsub.f32 1.5, %v3159_v59 }
0x137c   :  { %v3161_v47 = vmul.f32 %v5889_v20, %v3160_v30 }
0x137e   :  { %v3165_v34 = vsel %vm3164_vm8, %v5889_v20, %v3161_v47 }
0x137f   :  { %v3169_v21 = vmul.f32 %v3165_v34, %v7110_v19 }
0x1380   :  { %v3191_v48 = vpop.permute.xlu1 %3190 }
0x1381   :  { %3215 = vmatpush.bf16.msra.mxu1 %v3191_v48  ;;  %v3176_v16 = vmul.f32 %v3171_v44, %v3169_v21 }
0x1383   :  { %v3183_v56 = vadd.f32 %v3178_v40, %v3176_v16  ;;  %v3197_v29 = vpop.permute.xlu0 %3196 }
0x1384   :  { %5411 = vmatmul.msk.bf16.vlgmr.msra.gmra.mxu1 %vm156_vm1, %v3184_v3 }
0x1385   :  { %v3185_v62 = vpack.c.bf16 %v3183_v56, %v3182_v52 }
0x1388   :  { %v3199_v18 = vpop.permute.xlu1 %3198 }
0x1389   :  { %v3200_v50 = vsel %vm156_vm1, %v3197_v29, %v3199_v18  ;;  %v5671_v29 = vld [vmem:[%s7764_s14 + $0x40] sm:$0xff]  ;;  %v5673_v18 = vld [vmem:[%s7757_s12 + $0x50] sm:$0xff] }
0x1394   :  { %5412 = vmatmul.msk.bf16.gmra.mxu1 %vm156_vm1, %v3185_v62  ;;  %v5672_v62 = vld [vmem:[%s7764_s14 + $0x48] sm:$0xff] }
0x1395   :  { %3628 = vmatpush.bf16.msrb.mxu1 %v5672_v62 }
0x1399   :  { %3629 = vmatpush.bf16.msrb.mxu1 %v5671_v29 }
0x13b7   :  { %v3269_v36 = vpop.permute.xlu0 %3268 }
0x1401   :  { %v3217_v19 = vpop.f32.mrf.mxu1 }
0x1402   :  { %v3218_v55 = vadd.f32 %v3217_v19, %v3200_v50 }
0x1404   :  { %v3227_v8 = vmax.f32 %v3218_v55, 0.0 }
0x1409   :  { %v3219_v2 = vpop.f32.mrf.mxu1 }
0x140a   :  { %v3220_v33 = vadd.f32 %v3219_v2, %v3200_v50 }
0x140c   :  { %v3228_v11 = vmax.f32 %v3220_v33, 0.0 }
0x140e   :  { %v3231_v45 = vpack.c.bf16 %v3228_v11, %v3227_v8 }
0x1410   :  { %5429 = vmatmul.msk.bf16.vlgmr.msra.gmra.mxu2 %vm1483_vm4, %v3231_v45 }
0x1411   :  { %v3222_v12 = vpop.f32.mrf.mxu1 }
0x1412   :  { %v3223_v24 = vadd.f32 %v3222_v12, %v3200_v50 }
0x1414   :  { %v3229_v6 = vmax.f32 %v3223_v24, 0.0 }
0x1419   :  { %v3224_v10 = vpop.f32.mrf.mxu1 }
0x141a   :  { %v3225_v37 = vadd.f32 %v3224_v10, %v3200_v50 }
0x141c   :  { %v3230_v4 = vmax.f32 %v3225_v37, 0.0 }
0x141e   :  { %v3232_v58 = vpack.c.bf16 %v3230_v4, %v3229_v6 }
0x1420   :  { %5430 = vmatmul.msk.bf16.gmra.mxu2 %vm1483_vm4, %v3232_v58 }
0x1493   :  { %v3286_v27 = vpop.f32.mrf.mxu2 }
0x1494   :  { %v3287_v22 = vadd.f32 %v3286_v27, %v3269_v36 }
0x1496   :  { %v3296_v1 = vadd.f32 %v3287_v22, %v3180_v53 }
0x1498   :  { %v3300_v0 = vsel %vm156_vm1, %v3296_v1, 0.0 }
0x1499   :  { %3301 = vadd.xlane.f32.xlu2 %v3300_v0 }
0x149b   :  { %v3288_v14 = vpop.f32.mrf.mxu2 }
0x149c   :  { %v3289_v17 = vadd.f32 %v3288_v14, %v3269_v36 }
0x149e   :  { %v3297_v20 = vadd.f32 %v3289_v17, %v3181_v7 }
0x14a0   :  { %v3303_v61 = vsel %vm156_vm1, %v3297_v20, 0.0 }
0x14a1   :  { %3304 = vadd.xlane.f32.xlu1 %v3303_v61 }
0x14a3   :  { %v3291_v54 = vpop.f32.mrf.mxu2 }
0x14a4   :  { %v3292_v46 = vadd.f32 %v3291_v54, %v3269_v36 }
0x14a6   :  { %v3298_v9 = vadd.f32 %v3292_v46, %v3182_v52  ;;  %v5674_v52 = vld [vmem:[%s7757_s12 + $0x58] sm:$0xff] }
0x14a7   :  { %3672 = vmatpush.bf16.msrb.mxu2 %v5674_v52 }
0x14a8   :  { %v3306_v51 = vsel %vm156_vm1, %v3298_v9, 0.0 }
0x14a9   :  { %3307 = vadd.xlane.f32.xlu0 %v3306_v51 }
0x14ab   :  { %v3293_v28 = vpop.f32.mrf.mxu2  ;;  %3673 = vmatpush.bf16.msrb.mxu2 %v5673_v18 }
0x14ac   :  { %v3294_v49 = vadd.f32 %v3293_v28, %v3269_v36 }
0x14ae   :  { %v3299_v32 = vadd.f32 %v3294_v49, %v3183_v56  ;;  %v5670_v56 = vld [vmem:[%s7757_s12 + $0x48] sm:$0xff] }
0x14af   :  { %3439 = vmatpush.bf16.msra.mxu3 %v5670_v56 }
0x14b0   :  { %v3309_v41 = vsel %vm156_vm1, %v3299_v32, 0.0 }
0x14b1   :  { %3310 = vadd.xlane.f32.xlu2 %v3309_v41 }
0x150c   :  { %v3302_v59 = vpop.xlane.xlu2 %3301 }
0x150d   :  { %v3312_v26 = vmul.f32 %v3302_v59, %v6471_v5 }
0x150f   :  { %v7159_v44 = vsub.f32 %v3296_v1, %v3312_v26 }
0x1511   :  { %v3320_v31 = vmul.f32 %v7159_v44, %v7159_v44 }
0x1513   :  { %v3324_v30 = vsel %vm156_vm1, %v3320_v31, 0.0 }
0x1514   :  { %v3305_v23 = vpop.xlane.xlu1 %3304  ;;  %3325 = vadd.xlane.f32.xlu1 %v3324_v30 }
0x1515   :  { %v3313_v38 = vmul.f32 %v3305_v23, %v6471_v5 }
0x1517   :  { %v7165_v40 = vsub.f32 %v3297_v20, %v3313_v38 }
0x1519   :  { %v3321_v7 = vmul.f32 %v7165_v40, %v7165_v40 }
0x151b   :  { %v3327_v47 = vsel %vm156_vm1, %v3321_v7, 0.0 }
0x151c   :  { %v3308_v53 = vpop.xlane.xlu0 %3307  ;;  %3328 = vadd.xlane.f32.xlu0 %v3327_v47 }
0x151d   :  { %v3314_v48 = vmul.f32 %v3308_v53, %v6471_v5 }
0x151f   :  { %v7171_v39 = vsub.f32 %v3298_v9, %v3314_v48 }
0x1521   :  { %v3322_v3 = vmul.f32 %v7171_v39, %v7171_v39 }
0x1523   :  { %v3330_v34 = vsel %vm156_vm1, %v3322_v3, 0.0 }
0x1524   :  { %3331 = vadd.xlane.f32.xlu2 %v3330_v34  ;;  %v3311_v25 = vpop.xlane.xlu2 %3310 }
0x1525   :  { %v3315_v21 = vmul.f32 %v3311_v25, %v6471_v5 }
0x1527   :  { %v7177_v13 = vsub.f32 %v3299_v32, %v3315_v21 }
0x1529   :  { %v3323_v16 = vmul.f32 %v7177_v13, %v7177_v13 }
0x152b   :  { %v3333_v35 = vsel %vm156_vm1, %v3323_v16, 0.0 }
0x152c   :  { %3334 = vadd.xlane.f32.xlu1 %v3333_v35 }
0x1530   :  { %3388 = vrot.lane.b32.xlu0 %v7147_v15, %s5996_s19 }
0x153c   :  { %3395 = vrot.lane.b32.xlu2 %v7147_v15, %s5997_s22  ;;  %v5669_v15 = vld [vmem:[%s7757_s12 + $0x40] sm:$0xff] }
0x153d   :  { %3440 = vmatpush.bf16.msra.mxu3 %v5669_v15 }
0x1587   :  { %v3326_v57 = vpop.xlane.xlu1 %3325 }
0x1588   :  { %v3336_v60 = vmul.f32 %v3326_v57, %v6471_v5  ;;  %v7237_v57 = vld [vmem:[%s7760_s13 + $0x5] ss:$0 sm:$0xff] }
0x158a   :  { %v3340_v19 = vadd.f32 1e-05, %v3336_v60 }
0x158c   :  { %5890 = vrsqrt.f32 %v3340_v19  ;;  %vm3350_vm12 = vweird.f32 %v3340_v19 }
0x158f   :  { %v3329_v50 = vpop.xlane.xlu0 %3328 }
0x1590   :  { %v3337_v55 = vmul.f32 %v3329_v50, %v6471_v5 }
0x1592   :  { %v5891_v2 = vpop.eup %5890  ;;  %v3341_v33 = vadd.f32 1e-05, %v3337_v55 }
0x1593   :  { %v3345_v8 = vmul.f32 %v5891_v2, %v3340_v19  ;;  %vm3351_vm11 = vweird.f32 %v5891_v2 }
0x1594   :  { %5892 = vrsqrt.f32 %v3341_v33  ;;  %vm3352_vm13 = vmor %vm3350_vm12, %vm3351_vm11  ;;  %vm3360_vm15 = vweird.f32 %v3341_v33 }
0x1595   :  { %v3346_v11 = vmul.f32 %v5891_v2, %v3345_v8 }
0x1597   :  { %v3347_v45 = vmul.f32 0.5, %v3346_v11  ;;  %v3332_v12 = vpop.xlane.xlu2 %3331 }
0x1598   :  { %v3338_v24 = vmul.f32 %v3332_v12, %v6471_v5 }
0x1599   :  { %v3348_v10 = vsub.f32 1.5, %v3347_v45 }
0x159a   :  { %v5893_v37 = vpop.eup %5892  ;;  %v3342_v6 = vadd.f32 1e-05, %v3338_v24 }
0x159b   :  { %v3349_v4 = vmul.f32 %v5891_v2, %v3348_v10  ;;  %v3355_v58 = vmul.f32 %v5893_v37, %v3341_v33  ;;  %vm3361_vm14 = vweird.f32 %v5893_v37 }
0x159c   :  { %5894 = vrsqrt.f32 %v3342_v6  ;;  %vm3362_vm0 = vmor %vm3360_vm15, %vm3361_vm14  ;;  %vm3370_vm6 = vweird.f32 %v3342_v6 }
0x159d   :  { %v3356_v36 = vmul.f32 %v5893_v37, %v3355_v58  ;;  %v3353_v27 = vsel %vm3352_vm13, %v5891_v2, %v3349_v4 }
0x159e   :  { %v3384_v17 = vmul.f32 %v3353_v27, %v7159_v44 }
0x159f   :  { %v3357_v22 = vmul.f32 0.5, %v3356_v36  ;;  %v3335_v1 = vpop.xlane.xlu1 %3334  ;;  %v3396_v28 = vpop.permute.xlu2 %3395 }
0x15a0   :  { %v3339_v0 = vmul.f32 %v3335_v1, %v6471_v5 }
0x15a1   :  { %v3358_v14 = vsub.f32 1.5, %v3357_v22 }
0x15a2   :  { %v5895_v20 = vpop.eup %5894  ;;  %v3343_v61 = vadd.f32 1e-05, %v3339_v0  ;;  %v3389_v54 = vpop.permute.xlu0 %3388 }
0x15a3   :  { %v3359_v46 = vmul.f32 %v5893_v37, %v3358_v14  ;;  %v3365_v9 = vmul.f32 %v5895_v20, %v3342_v6  ;;  %v3391_v51 = vmul.f32 %v3389_v54, %v3384_v17  ;;  %vm3371_vm5 = vweird.f32 %v5895_v20  ;;  %v5675_v6 = vld [vmem:[%s7764_s14 + $0x50] sm:$0xff] }
0x15a4   :  { %5896 = vrsqrt.f32 %v3343_v61  ;;  %vm3372_vm7 = vmor %vm3370_vm6, %vm3371_vm5  ;;  %vm3380_vm9 = vweird.f32 %v3343_v61 }
0x15a5   :  { %v3366_v49 = vmul.f32 %v5895_v20, %v3365_v9  ;;  %v3363_v32 = vsel %vm3362_vm0, %v5893_v37, %v3359_v46  ;;  %v7210_v59 = vadd.f32 %v3396_v28, %v3391_v51  ;;  %v5676_v37 = vld [vmem:[%s7764_s14 + $0x58] sm:$0xff] }
0x15a6   :  { %v3385_v41 = vmul.f32 %v3363_v32, %v7165_v40 }
0x15a7   :  { %v3367_v26 = vmul.f32 0.5, %v3366_v49  ;;  %v3406_v38 = vpack.c.bf16 %v7210_v59, %v7210_v59 }
0x15a8   :  { %v3392_v31 = vmul.f32 %v3389_v54, %v3385_v41 }
0x15a9   :  { %v3368_v30 = vsub.f32 1.5, %v3367_v26  ;;  %v3484_v25 = vunpack.c.l.b16 %v3406_v38 }
0x15aa   :  { %v5897_v44 = vpop.eup %5896  ;;  %v7212_v23 = vadd.f32 %v3396_v28, %v3392_v31 }
0x15ab   :  { %v3369_v7 = vmul.f32 %v5895_v20, %v3368_v30  ;;  %v3375_v47 = vmul.f32 %v5897_v44, %v3343_v61  ;;  %vm3381_vm8 = vweird.f32 %v5897_v44 }
0x15ac   :  { %v7218_v53 = vpack.c.bf16 %v7212_v23, %v7210_v59  ;;  %v3407_v40 = vpack.c.bf16 %v7212_v23, %v7212_v23  ;;  %vm3382_vm10 = vmor %vm3380_vm9, %vm3381_vm8 }
0x15ad   :  { %v3376_v48 = vmul.f32 %v5897_v44, %v3375_v47  ;;  %v3373_v3 = vsel %vm3372_vm7, %v5895_v20, %v3369_v7 }
0x15ae   :  { %v3386_v34 = vmul.f32 %v3373_v3, %v7171_v39  ;;  %5444 = vmatmul.msk.bf16.vlgmr.msra.gmra.mxu3 %vm156_vm1, %v7218_v53  ;;  %5461 = vmatmul.msk.bf16.vlgmr.msrb.gmra.mxu1 %vm156_vm1, %v7218_v53  ;;  %v3485_v21 = vunpack.c.l.b16 %v3407_v40 }
0x15af   :  { %v3377_v16 = vmul.f32 0.5, %v3376_v48  ;;  %5475 = vmatmul.msk.bf16.vlgmr.msrb.gmra.mxu2 %vm156_vm1, %v7218_v53 }
0x15b0   :  { %v3393_v35 = vmul.f32 %v3389_v54, %v3386_v34  ;;  %v3486_v56 = vpack.c.b16 %v3485_v21, %v3484_v25 }
0x15b1   :  { %v3378_v52 = vsub.f32 1.5, %v3377_v16 }
0x15b2   :  { %v7229_v62 = vadd.f32 %v3396_v28, %v3393_v35  ;;  %v7232_v39 = vsel %vm156_vm1, %v3486_v56, 0 }
0x15b3   :  { %v3379_v60 = vmul.f32 %v5897_v44, %v3378_v52  ;;  %3512 = vmatpush.bf16.xpose.msra.mxu0 %v7232_v39  ;;  %3737 = vmatpush.bf16.xpose.msrb.mxu3 %v7232_v39 }
0x15b4   :  { %v3692_v19 = vmul.f32 %v7237_v57, %v7229_v62  ;;  %v3408_v2 = vpack.c.bf16 %v7229_v62, %v7229_v62 }
0x15b5   :  { %v3383_v15 = vsel %vm3382_vm10, %v5897_v44, %v3379_v60 }
0x15b6   :  { %v3387_v29 = vmul.f32 %v3383_v15, %v7177_v13  ;;  %v3700_v18 = vsel %vm156_vm1, %v3692_v19, 0.0  ;;  %v3526_v45 = vunpack.c.l.b16 %v3408_v2 }
0x15b7   :  { %3701 = vadd.xlane.f32.xlu1 %v3700_v18 }
0x15b8   :  { %v3394_v50 = vmul.f32 %v3389_v54, %v3387_v29 }
0x15ba   :  { %v7245_v55 = vadd.f32 %v3396_v28, %v3394_v50 }
0x15bb   :  { %3845 = vmatpush.bf16.msra.mxu3 %v5676_v37 }
0x15bc   :  { %v7251_v33 = vpack.c.bf16 %v7245_v55, %v7229_v62  ;;  %v3693_v8 = vmul.f32 %v7237_v57, %v7245_v55  ;;  %v3409_v11 = vpack.c.bf16 %v7245_v55, %v7245_v55 }
0x15be   :  { %5445 = vmatmul.msk.bf16.gmra.mxu3 %vm156_vm1, %v7251_v33  ;;  %5462 = vmatmul.msk.bf16.gmra.mxu1 %vm156_vm1, %v7251_v33  ;;  %v3703_v13 = vsel %vm156_vm1, %v3693_v8, 0.0  ;;  %v3527_v12 = vunpack.c.l.b16 %v3409_v11 }
0x15bf   :  { %5476 = vmatmul.msk.bf16.gmra.mxu2 %vm156_vm1, %v7251_v33  ;;  %3704 = vadd.xlane.f32.xlu1 %v3703_v13 }
0x15c0   :  { %v3528_v24 = vpack.c.b16 %v3527_v12, %v3526_v45  ;;  %3846 = vmatpush.bf16.msra.mxu3 %v5675_v6 }
0x15c2   :  { %v7265_v10 = vsel %vm156_vm1, %v3528_v24, 0 }
0x15c3   :  { %3554 = vmatpush.bf16.xpose.msrb.mxu0 %v7265_v10 }
0x162a   :  { %v3702_v15 = vpop.xlane.xlu1 %3701 }
0x162b   :  { %v3631_v4 = vpop.f32.mrf.mxu1  ;;  %v3751_v24 = vperm.slane %v3702_v15, %v6251_v42 }
0x162c   :  { %v3645_v36 = vpack.c.bf16 %v3631_v4, %v3631_v4 }
0x162e   :  { %v3929_v0 = vunpack.c.l.b16 %v3645_v36 }
0x1631   :  { %v3442_v58 = vpop.f32.mrf.mxu3 }
0x1632   :  { %v3675_v27 = vpop.f32.mrf.mxu2  ;;  %v3473_v17 = vpack.c.bf16 %v3442_v58, %v3442_v58  ;;  %v3705_v11 = vpop.xlane.xlu1 %3704 }
0x1633   :  { %v3633_v22 = vpop.f32.mrf.mxu1  ;;  %v3706_v61 = vpack.c.bf16 %v3675_v27, %v3675_v27  ;;  %v3752_v45 = vperm.slane %v3705_v11, %v6254_v43 }
0x1634   :  { %v3646_v1 = vpack.c.bf16 %v3633_v22, %v3633_v22  ;;  %v3479_v28 = vunpack.c.l.b16 %v3473_v17 }
0x1635   :  { %v3712_v32 = vunpack.c.l.b16 %v3706_v61  ;;  %v3753_v36 = vsel %vm223_vm2, %v3752_v45, %v3751_v24 }
0x1636   :  { %v3930_v14 = vunpack.c.l.b16 %v3646_v1 }
0x1638   :  { %v3931_v20 = vpack.c.b16 %v3930_v14, %v3929_v0 }
0x1639   :  { %v3444_v54 = vpop.f32.mrf.mxu3 }
0x163a   :  { %v3474_v46 = vpack.c.bf16 %v3444_v54, %v3444_v54  ;;  %v3677_v9 = vpop.f32.mrf.mxu2  ;;  %3943 = vmatpush.bf16.msra.mxu2 %v3931_v20 }
0x163b   :  { %v3707_v51 = vpack.c.bf16 %v3677_v9, %v3677_v9  ;;  %v3636_v18 = vpop.f32.mrf.mxu1 }
0x163c   :  { %v3480_v49 = vunpack.c.l.b16 %v3474_v46  ;;  %v3647_v6 = vpack.c.bf16 %v3636_v18, %v3636_v18 }
0x163d   :  { %v3713_v41 = vunpack.c.l.b16 %v3707_v51 }
0x163e   :  { %4066 = vmatpush.bf16.xpose.msrb.mxu2 %v7232_v39  ;;  %v3481_v26 = vpack.c.b16 %v3480_v49, %v3479_v28  ;;  %v3957_v17 = vunpack.c.l.b16 %v3647_v6 }
0x163f   :  { %v3714_v31 = vpack.c.b16 %v3713_v41, %v3712_v32 }
0x1640   :  { %5447 = vmatmul.msk.bf16.vlgmr.msra.gmra.mxu0 %vm156_vm1, %v3481_v26 }
0x1641   :  { %5478 = vmatmul.msk.bf16.vlgmr.msrb.gmra.mxu3 %vm156_vm1, %v3714_v31  ;;  %3771 = vmatpush.bf16.xpose.msra.mxu0 %v7265_v10  ;;  %v3447_v30 = vpop.f32.mrf.mxu3 }
0x1642   :  { %4100 = vmatpush.bf16.xpose.msrb.mxu3 %v7265_v10  ;;  %v3475_v44 = vpack.c.bf16 %v3447_v30, %v3447_v30  ;;  %v3680_v38 = vpop.f32.mrf.mxu2 }
0x1643   :  { %v3708_v21 = vpack.c.bf16 %v3680_v38, %v3680_v38  ;;  %v3638_v13 = vpop.f32.mrf.mxu1 }
0x1644   :  { %v3521_v40 = vunpack.c.l.b16 %v3475_v44  ;;  %v3648_v12 = vpack.c.bf16 %v3638_v13, %v3638_v13 }
0x1645   :  { %v3746_v35 = vunpack.c.l.b16 %v3708_v21 }
0x1646   :  { %v3958_v22 = vunpack.c.l.b16 %v3648_v12  ;;  %v5678_v12 = vld [vmem:[%s7757_s12 + $0x68] sm:$0xff] }
0x1648   :  { %v3959_v54 = vpack.c.b16 %v3958_v22, %v3957_v17 }
0x1649   :  { %v3449_v7 = vpop.f32.mrf.mxu3 }
0x164a   :  { %v3476_v47 = vpack.c.bf16 %v3449_v7, %v3449_v7  ;;  %v3682_v34 = vpop.f32.mrf.mxu2 }
0x164b   :  { %v3709_v25 = vpack.c.bf16 %v3682_v34, %v3682_v34 }
0x164c   :  { %v3522_v48 = vunpack.c.l.b16 %v3476_v47 }
0x164d   :  { %v3747_v16 = vunpack.c.l.b16 %v3709_v25  ;;  %v3691_v25 = vmul.f32 %v7237_v57, %v7212_v23 }
0x164e   :  { %v3523_v3 = vpack.c.b16 %v3522_v48, %v3521_v40 }
0x164f   :  { %v3748_v56 = vpack.c.b16 %v3747_v16, %v3746_v35  ;;  %v3697_v35 = vsel %vm156_vm1, %v3691_v25, 0.0 }
0x1650   :  { %5448 = vmatmul.msk.bf16.vlgmr.msrb.gmra.mxu0 %vm156_vm1, %v3523_v3 }
0x1651   :  { %5492 = vmatmul.msk.bf16.vlgmr.msra.gmra.mxu3 %vm156_vm1, %v7218_v53 }
0x1660   :  { %5479 = vmatmul.msk.bf16.vlgmr.msra.gmra.mxu0 %vm156_vm1, %v3748_v56  ;;  %v7310_v56 = vld [vmem:[%s7760_s13 + $0x4] ss:$0 sm:$0xff] }
0x1661   :  { %5493 = vmatmul.msk.bf16.gmra.mxu3 %vm156_vm1, %v7251_v33  ;;  %v3457_v15 = vmul.f32 %v7310_v56, %v7210_v59  ;;  %v3459_v18 = vmul.f32 %v7310_v56, %v7229_v62  ;;  %v3458_v13 = vmul.f32 %v7310_v56, %v7212_v23 }
0x1663   :  { %v3467_v11 = vsel %vm156_vm1, %v3459_v18, 0.0  ;;  %v3464_v45 = vsel %vm156_vm1, %v3458_v13, 0.0 }
0x16bd   :  { %v7285_v52 = vpop.f32.mrf.mxu0 }
0x16c4   :  { %v7287_v60 = vpop.f32.mrf.mxu3 }
0x16c5   :  { %v7289_v19 = vpop.f32.mrf.mxu0 }
0x16cc   :  { %v7291_v29 = vpop.f32.mrf.mxu3 }
0x16cd   :  { %v7293_v50 = vpop.f32.mrf.mxu0 }
0x16d4   :  { %v3848_v2 = vpop.f32.mrf.mxu3 }
0x16d5   :  { %v7295_v8 = vpop.f32.mrf.mxu0  ;;  %v3862_v37 = vpack.c.bf16 %v3848_v2, %v3848_v2  ;;  %v3461_v2 = vsel %vm156_vm1, %v3457_v15, 0.0 }
0x16d7   :  { %v3873_v0 = vunpack.c.l.b16 %v3862_v37  ;;  %v5677_v37 = vld [vmem:[%s7757_s12 + $0x60] sm:$0xff] }
0x16dc   :  { %v3850_v4 = vpop.f32.mrf.mxu3 }
0x16dd   :  { %v3863_v58 = vpack.c.bf16 %v3850_v4, %v3850_v4  ;;  %v3773_v27 = vpop.f32.mrf.mxu0 }
0x16de   :  { %v3774_v1 = vadd.f32 %v3773_v27, %v3753_v36 }
0x16df   :  { %v3874_v14 = vunpack.c.l.b16 %v3863_v58 }
0x16e0   :  { %v3784_v20 = vsel %vm301_vm3, %v3774_v1, -inf }
0x16e1   :  { %v3875_v61 = vpack.c.b16 %v3874_v14, %v3873_v0  ;;  %3785 = vmax.xlane.f32.xlu0 %v3784_v20 }
0x16e3   :  { %3887 = vmatpush.bf16.msrb.mxu0 %v3875_v61 }
0x16e4   :  { %v3853_v46 = vpop.f32.mrf.mxu3 }
0x16e5   :  { %v3775_v9 = vpop.f32.mrf.mxu0  ;;  %v3864_v49 = vpack.c.bf16 %v3853_v46, %v3853_v46 }
0x16e6   :  { %v3776_v51 = vadd.f32 %v3775_v9, %v3753_v36 }
0x16e7   :  { %3971 = vmatpush.bf16.msra.mxu0 %v3959_v54  ;;  %v3901_v26 = vunpack.c.l.b16 %v3864_v49  ;;  %v5682_v54 = vld [vmem:[%s7757_s12 + $0x78] sm:$0xff] }
0x16e8   :  { %v3787_v28 = vsel %vm301_vm3, %v3776_v51, -inf }
0x16e9   :  { %3788 = vmax.xlane.f32.xlu1 %v3787_v28 }
0x16ec   :  { %v3855_v32 = vpop.f32.mrf.mxu3 }
0x16ed   :  { %v3865_v41 = vpack.c.bf16 %v3855_v32, %v3855_v32 }
0x16ef   :  { %v3902_v31 = vunpack.c.l.b16 %v3865_v41 }
0x16f1   :  { %v3903_v30 = vpack.c.b16 %v3902_v31, %v3901_v26  ;;  %v3690_v31 = vmul.f32 %v7237_v57, %v7210_v59  ;;  %v7357_v57 = vld [vmem:[%s7766_s15 + $0x10] sm:$0xff] }
0x16f3   :  { %3915 = vmatpush.bf16.msra.mxu1 %v3903_v30  ;;  %v3694_v30 = vsel %vm156_vm1, %v3690_v31, 0.0 }
0x16f7   :  { %4001 = vmatpush.bf16.msrb.mxu1 %v5678_v12 }
0x16fb   :  { %4002 = vmatpush.bf16.msrb.mxu1 %v5677_v37 }
0x1754   :  { %v3786_v44 = vpop.xlane.xlu0 %3785 }
0x1755   :  { %v3792_v38 = vsub.f32 %v3774_v1, %v3786_v44 }
0x1757   :  { %v3798_v7 = vmul.f32 1.442695, %v3792_v38 }
0x1759   :  { %5898 = vpow2.f32 %v3798_v7 }
0x175c   :  { %v3789_v47 = vpop.xlane.xlu1 %3788 }
0x175d   :  { %v3793_v40 = vsub.f32 %v3776_v51, %v3789_v47  ;;  %v5681_v51 = vld [vmem:[%s7757_s12 + $0x70] sm:$0xff] }
0x175f   :  { %v5899_v48 = vpop.eup %5898  ;;  %v3800_v3 = vmul.f32 1.442695, %v3793_v40 }
0x1760   :  { %v3808_v34 = vsel %vm301_vm3, %v5899_v48, 0.0 }
0x1761   :  { %5900 = vpow2.f32 %v3800_v3  ;;  %3809 = vadd.xlane.f32.xlu2 %v3808_v34 }
0x1767   :  { %v5901_v21 = vpop.eup %5900 }
0x1768   :  { %v3811_v16 = vsel %vm301_vm3, %v5901_v21, 0.0 }
0x1769   :  { %3812 = vadd.xlane.f32.xlu1 %v3811_v16  ;;  %3698 = vadd.xlane.f32.xlu2 %v3697_v35 }
0x1771   :  { %3462 = vadd.xlane.f32.xlu1 %v3461_v2  ;;  %3468 = vadd.xlane.f32.xlu2 %v3467_v11 }
0x1779   :  { %3465 = vadd.xlane.f32.xlu1 %v3464_v45  ;;  %v3460_v45 = vmul.f32 %v7310_v56, %v7245_v55 }
0x177b   :  { %v3470_v37 = vsel %vm156_vm1, %v3460_v45, 0.0 }
0x17d4   :  { %v3810_v24 = vpop.xlane.xlu2 %3809 }
0x17d5   :  { %5902 = vrcp.f32 %v3810_v24 }
0x17db   :  { %v5903_v4 = vpop.eup %5902 }
0x17dc   :  { %v3813_v6 = vpop.xlane.xlu1 %3812  ;;  %v3820_v58 = vmul.f32 %v5903_v4, %v5899_v48  ;;  %v3699_v3 = vpop.xlane.xlu2 %3698 }
0x17dd   :  { %5904 = vrcp.f32 %v3813_v6  ;;  %v3718_v25 = vperm.slane %v3699_v3, %v6254_v43 }
0x17de   :  { %v3860_v27 = vpack.c.bf16 %v3820_v58, %v3820_v58 }
0x17e0   :  { %v3896_v14 = vunpack.c.l.b16 %v3860_v27 }
0x17e3   :  { %v5905_v36 = vpop.eup %5904 }
0x17e4   :  { %v3821_v22 = vmul.f32 %v5905_v36, %v5901_v21  ;;  %v3463_v1 = vpop.xlane.xlu1 %3462 }
0x17e5   :  { %v3489_v46 = vperm.slane %v3463_v1, %v6251_v42 }
0x17e6   :  { %v3861_v0 = vpack.c.bf16 %v3821_v22, %v3821_v22 }
0x17e8   :  { %v3897_v17 = vunpack.c.l.b16 %v3861_v0 }
0x17ea   :  { %v3898_v20 = vpack.c.b16 %v3897_v17, %v3896_v14 }
0x17ec   :  { %v3466_v61 = vpop.xlane.xlu1 %3465  ;;  %5495 = vmatmul.msk.bf16.vlgmr.msra.gmra.mxu1 %vm301_vm3, %v3898_v20 }
0x17ed   :  { %v3490_v9 = vperm.slane %v3466_v61, %v6254_v43  ;;  %4278 = vmatpush.bf16.msra.mxu1 %v5682_v54 }
0x17ef   :  { %v3491_v28 = vsel %vm223_vm2, %v3490_v9, %v3489_v46 }
0x17f0   :  { %v3515_v49 = vadd.f32 %v7285_v52, %v3491_v28  ;;  %v3517_v32 = vadd.f32 %v7289_v19, %v3491_v28  ;;  %v7351_v52 = vld [vmem:[%s7766_s15 + $0x18] sm:$0xff] }
0x17f1   :  { %4279 = vmatpush.bf16.msra.mxu1 %v5681_v51 }
0x17f2   :  { %v3561_v41 = vsel %vm301_vm3, %v3515_v49, -inf  ;;  %v3564_v26 = vsel %vm301_vm3, %v3517_v32, -inf }
0x17f3   :  { %3562 = vmax.xlane.f32.xlu1 %v3561_v41  ;;  %3565 = vmax.xlane.f32.xlu0 %v3564_v26 }
0x17fb   :  { %3695 = vadd.xlane.f32.xlu1 %v3694_v30 }
0x17fc   :  { %5510 = vmatmul.msk.bf16.vlgmr.msrb.gmra.mxu1 %vm156_vm1, %v7218_v53 }
0x17fd   :  { %4674 = vmatpush.bf16.msrb.mxu1 %v7351_v52 }
0x1801   :  { %4675 = vmatpush.bf16.msrb.mxu1 %v7357_v57 }
0x180c   :  { %5511 = vmatmul.msk.bf16.gmra.mxu1 %vm156_vm1, %v7251_v33 }
0x181c   :  { %5543 = vmatmul.msk.bf16.vlgmr.msra.gmra.mxu1 %vm156_vm1, %v7218_v53 }
0x182c   :  { %5544 = vmatmul.msk.bf16.gmra.mxu1 %vm156_vm1, %v7251_v33 }
0x183c   :  { %5577 = vmatmul.msk.bf16.vlgmr.msrb.gmra.mxu1 %vm156_vm1, %v7006_v63 }
0x1866   :  { %v3563_v19 = vpop.xlane.xlu1 %3562  ;;  %v3566_v44 = vpop.xlane.xlu0 %3565 }
0x1867   :  { %v3573_v38 = vsub.f32 %v3515_v49, %v3563_v19  ;;  %v3574_v7 = vsub.f32 %v3517_v32, %v3566_v44 }
0x1869   :  { %v3577_v47 = vmul.f32 1.442695, %v3573_v38  ;;  %v3579_v40 = vmul.f32 1.442695, %v3574_v7  ;;  %v7366_v48 = vpop.f32.mrf.mxu1 }
0x186b   :  { %5906 = vpow2.f32 %v3577_v47  ;;  %v3469_v47 = vpop.xlane.xlu2 %3468 }
0x186c   :  { %5908 = vpow2.f32 %v3579_v40 }
0x186e   :  { %v3696_v34 = vpop.xlane.xlu1 %3695 }
0x186f   :  { %v3717_v21 = vperm.slane %v3696_v34, %v6251_v42 }
0x1871   :  { %v5907_v16 = vpop.eup %5906  ;;  %v7370_v35 = vpop.f32.mrf.mxu1  ;;  %v3719_v63 = vsel %vm223_vm2, %v3718_v25, %v3717_v21 }
0x1872   :  { %v5909_v15 = vpop.eup %5908  ;;  %v3585_v18 = vsel %vm301_vm3, %v5907_v16, 0.0  ;;  %v3742_v2 = vadd.f32 %v7291_v29, %v3719_v63  ;;  %v3740_v12 = vadd.f32 %v7287_v60, %v3719_v63 }
0x1873   :  { %3586 = vadd.xlane.f32.xlu0 %v3585_v18  ;;  %v3588_v11 = vsel %vm301_vm3, %v5909_v15, 0.0 }
0x1874   :  { %3589 = vadd.xlane.f32.xlu1 %v3588_v11  ;;  %v3781_v13 = vsel %vm301_vm3, %v3742_v2, -inf  ;;  %v3778_v6 = vsel %vm301_vm3, %v3740_v12, -inf }
0x1875   :  { %3782 = vmax.xlane.f32.xlu2 %v3781_v13  ;;  %v3531_v13 = vperm.slane %v3469_v47, %v6251_v42 }
0x1879   :  { %v4004_v24 = vpop.f32.mrf.mxu1 }
0x187a   :  { %v4035_v29 = vpack.c.bf16 %v4004_v24, %v4004_v24 }
0x187b   :  { %3471 = vadd.xlane.f32.xlu0 %v3470_v37 }
0x187c   :  { %3779 = vmax.xlane.f32.xlu1 %v3778_v6  ;;  %v7382_v36 = vunpack.c.l.b16 %v4035_v29 }
0x1881   :  { %v4006_v4 = vpop.f32.mrf.mxu1 }
0x1882   :  { %v4036_v58 = vpack.c.bf16 %v4006_v4, %v4006_v4 }
0x1884   :  { %v7384_v27 = vunpack.c.l.b16 %v4036_v58 }
0x1886   :  { %v4043_v22 = vpack.c.b16 %v7384_v27, %v7382_v36 }
0x1889   :  { %v4009_v56 = vpop.f32.mrf.mxu1 }
0x188a   :  { %v4037_v1 = vpack.c.bf16 %v4009_v56, %v4009_v56 }
0x188c   :  { %v4075_v14 = vunpack.c.l.b16 %v4037_v1 }
0x1891   :  { %v4011_v60 = vpop.f32.mrf.mxu1 }
0x1892   :  { %v4038_v0 = vpack.c.bf16 %v4011_v60, %v4011_v60 }
0x1894   :  { %v4076_v17 = vunpack.c.l.b16 %v4038_v0 }
0x1896   :  { %v4077_v20 = vpack.c.b16 %v4076_v17, %v4075_v14 }
0x1898   :  { %5514 = vmatmul.msk.bf16.vlgmr.msrb.gmra.mxu3 %vm156_vm1, %v4077_v20 }
0x1899   :  { %v4281_v61 = vpop.f32.mrf.mxu1 }
0x189a   :  { %v4312_v54 = vpack.c.bf16 %v4281_v61, %v4281_v61 }
0x189c   :  { %v7389_v51 = vunpack.c.l.b16 %v4312_v54 }
0x18a1   :  { %v4283_v46 = vpop.f32.mrf.mxu1 }
0x18a2   :  { %v4313_v9 = vpack.c.bf16 %v4283_v46, %v4283_v46 }
0x18a4   :  { %v7391_v28 = vunpack.c.l.b16 %v4313_v9 }
0x18a6   :  { %v4320_v49 = vpack.c.b16 %v7391_v28, %v7389_v51 }
0x18a9   :  { %v4286_v32 = vpop.f32.mrf.mxu1 }
0x18aa   :  { %v4314_v41 = vpack.c.bf16 %v4286_v32, %v4286_v32 }
0x18ac   :  { %v7395_v30 = vunpack.c.l.b16 %v4314_v41 }
0x18b1   :  { %v4288_v26 = vpop.f32.mrf.mxu1 }
0x18b2   :  { %v4315_v31 = vpack.c.bf16 %v4288_v26, %v4288_v26 }
0x18b4   :  { %v7397_v19 = vunpack.c.l.b16 %v4315_v31 }
0x18b6   :  { %v4354_v44 = vpack.c.b16 %v7397_v19, %v7395_v30 }
0x18b9   :  { %v7401_v38 = vpop.f32.mrf.mxu1 }
0x18c1   :  { %v4679_v7 = vpop.f32.mrf.mxu1 }
0x18e6   :  { %v3587_v40 = vpop.xlane.xlu0 %3586 }
0x18e7   :  { %v3590_v3 = vpop.xlane.xlu1 %3589  ;;  %5910 = vrcp.f32 %v3587_v40 }
0x18e8   :  { %5912 = vrcp.f32 %v3590_v3  ;;  %v3783_v34 = vpop.xlane.xlu2 %3782 }
0x18e9   :  { %v3791_v25 = vsub.f32 %v3742_v2, %v3783_v34 }
0x18eb   :  { %v3796_v24 = vmul.f32 1.442695, %v3791_v25 }
0x18ed   :  { %v5911_v21 = vpop.eup %5910  ;;  %5914 = vpow2.f32 %v3796_v24 }
0x18ee   :  { %v5913_v63 = vpop.eup %5912  ;;  %v3601_v18 = vmul.f32 %v5911_v21, %v5907_v16  ;;  %v3472_v11 = vpop.xlane.xlu0 %3471 }
0x18ef   :  { %v3602_v45 = vmul.f32 %v5913_v63, %v5909_v15  ;;  %v3780_v37 = vpop.xlane.xlu1 %3779  ;;  %v3532_v6 = vperm.slane %v3472_v11, %v6254_v43 }
0x18f0   :  { %v3641_v29 = vpack.c.bf16 %v3601_v18, %v3601_v18  ;;  %v3790_v4 = vsub.f32 %v3740_v12, %v3780_v37 }
0x18f1   :  { %v3642_v58 = vpack.c.bf16 %v3602_v45, %v3602_v45  ;;  %v3533_v56 = vsel %vm223_vm2, %v3532_v6, %v3531_v13 }
0x18f2   :  { %v3924_v1 = vunpack.c.l.b16 %v3641_v29  ;;  %v3794_v60 = vmul.f32 1.442695, %v3790_v4  ;;  %v3559_v2 = vadd.f32 %v7295_v8, %v3533_v56  ;;  %v3557_v0 = vadd.f32 %v7293_v50, %v3533_v56  ;;  %v5720_v50 = vld [vmem:[%s7760_s13 + $0x6] ss:$0 sm:$0xff] }
0x18f3   :  { %v3925_v16 = vunpack.c.l.b16 %v3642_v58  ;;  %v5915_v12 = vpop.eup %5914  ;;  %v4019_v54 = vmul.f32 %v5720_v50, %v7210_v59  ;;  %v4022_v9 = vmul.f32 %v5720_v50, %v7245_v55  ;;  %v4021_v13 = vmul.f32 %v5720_v50, %v7229_v62 }
0x18f4   :  { %5916 = vpow2.f32 %v3794_v60  ;;  %v3570_v15 = vsel %vm301_vm3, %v3559_v2, -inf  ;;  %v3567_v14 = vsel %vm301_vm3, %v3557_v0, -inf  ;;  %v3805_v8 = vsel %vm301_vm3, %v5915_v12, 0.0 }
0x18f5   :  { %v3926_v17 = vpack.c.b16 %v3925_v16, %v3924_v1  ;;  %3571 = vmax.xlane.f32.xlu1 %v3570_v15  ;;  %3568 = vmax.xlane.f32.xlu0 %v3567_v14  ;;  %v4023_v46 = vsel %vm156_vm1, %v4019_v54, 0.0  ;;  %v4032_v32 = vsel %vm156_vm1, %v4022_v9, 0.0  ;;  %v4020_v24 = vmul.f32 %v5720_v50, %v7212_v23  ;;  %v5679_v16 = vld [vmem:[%s7764_s14 + $0x60] sm:$0xff] }
0x18f6   :  { %v4029_v4 = vsel %vm156_vm1, %v4021_v13, 0.0 }
0x18f7   :  { %5496 = vmatmul.msk.bf16.vlgmr.msra.gmra.mxu2 %vm301_vm3, %v3926_v17  ;;  %v4026_v58 = vsel %vm156_vm1, %v4020_v24, 0.0 }
0x18fa   :  { %v5917_v20 = vpop.eup %5916 }
0x18fb   :  { %v3802_v61 = vsel %vm301_vm3, %v5917_v20, 0.0 }
0x18fc   :  { %3803 = vadd.xlane.f32.xlu2 %v3802_v61 }
0x18fd   :  { %3806 = vadd.xlane.f32.xlu0 %v3805_v8 }
0x1905   :  { %4024 = vadd.xlane.f32.xlu0 %v4023_v46 }
0x1907   :  { %5513 = vmatmul.msk.bf16.vlgmr.msrb.gmra.mxu2 %vm156_vm1, %v4043_v22 }
0x190d   :  { %4033 = vadd.xlane.f32.xlu0 %v4032_v32 }
0x191b   :  { %v4102_v8 = vpop.f32.mrf.mxu3 }
0x1923   :  { %v4104_v24 = vpop.f32.mrf.mxu3 }
0x1968   :  { %v3572_v41 = vpop.xlane.xlu1 %3571  ;;  %v3569_v26 = vpop.xlane.xlu0 %3568 }
0x1969   :  { %v3576_v31 = vsub.f32 %v3559_v2, %v3572_v41  ;;  %v3575_v7 = vsub.f32 %v3557_v0, %v3569_v26  ;;  %v5680_v2 = vld [vmem:[%s7764_s14 + $0x68] sm:$0xff] }
0x196b   :  { %v3583_v47 = vmul.f32 1.442695, %v3576_v31  ;;  %v3581_v40 = vmul.f32 1.442695, %v3575_v7 }
0x196d   :  { %5918 = vpow2.f32 %v3583_v47 }
0x196e   :  { %5920 = vpow2.f32 %v3581_v40 }
0x196f   :  { %v3804_v3 = vpop.xlane.xlu2 %3803 }
0x1970   :  { %5922 = vrcp.f32 %v3804_v3  ;;  %v3807_v34 = vpop.xlane.xlu0 %3806 }
0x1971   :  { %5924 = vrcp.f32 %v3807_v34 }
0x1973   :  { %v5919_v36 = vpop.eup %5918 }
0x1974   :  { %v5921_v27 = vpop.eup %5920  ;;  %v3594_v22 = vsel %vm301_vm3, %v5919_v36, 0.0 }
0x1975   :  { %3595 = vadd.xlane.f32.xlu2 %v3594_v22  ;;  %v3591_v25 = vsel %vm301_vm3, %v5921_v27, 0.0 }
0x1976   :  { %v5923_v21 = vpop.eup %5922  ;;  %3592 = vadd.xlane.f32.xlu1 %v3591_v25 }
0x1977   :  { %v5925_v63 = vpop.eup %5924  ;;  %v3818_v18 = vmul.f32 %v5923_v21, %v5917_v20 }
0x1978   :  { %v3819_v11 = vmul.f32 %v5925_v63, %v5915_v12  ;;  %v4025_v0 = vpop.xlane.xlu0 %4024 }
0x1979   :  { %v3858_v45 = vpack.c.bf16 %v3818_v18, %v3818_v18  ;;  %v4046_v26 = vperm.slane %v4025_v0, %v6251_v42 }
0x197a   :  { %v3859_v37 = vpack.c.bf16 %v3819_v11, %v3819_v11  ;;  %v7431_v1 = vpop.f32.mrf.mxu2 }
0x197b   :  { %v3868_v6 = vunpack.c.l.b16 %v3858_v45  ;;  %v5684_v45 = vld [vmem:[%s7764_s14 + $0x78] sm:$0xff] }
0x197c   :  { %v3869_v29 = vunpack.c.l.b16 %v3859_v37 }
0x197d   :  { %4030 = vadd.xlane.f32.xlu2 %v4029_v4 }
0x197e   :  { %v3870_v56 = vpack.c.b16 %v3869_v29, %v3868_v6  ;;  %4027 = vadd.xlane.f32.xlu1 %v4026_v58  ;;  %v5683_v6 = vld [vmem:[%s7764_s14 + $0x70] sm:$0xff] }
0x1980   :  { %5494 = vmatmul.msk.bf16.vlgmr.msrb.gmra.mxu0 %vm301_vm3, %v3870_v56  ;;  %v4034_v12 = vpop.xlane.xlu0 %4033 }
0x1981   :  { %4174 = vmatpush.bf16.msrb.mxu0 %v5680_v2  ;;  %v4081_v46 = vperm.slane %v4034_v12, %v6254_v43 }
0x1982   :  { %v7433_v60 = vpop.f32.mrf.mxu2 }
0x1985   :  { %4175 = vmatpush.bf16.msrb.mxu0 %v5679_v16 }
0x198a   :  { %v4068_v17 = vpop.f32.mrf.mxu2 }
0x1992   :  { %v4070_v3 = vpop.f32.mrf.mxu2 }
0x19e8   :  { %v3596_v15 = vpop.xlane.xlu2 %3595 }
0x19e9   :  { %5926 = vrcp.f32 %v3596_v15  ;;  %v3593_v14 = vpop.xlane.xlu1 %3592 }
0x19ea   :  { %5928 = vrcp.f32 %v3593_v14 }
0x19ef   :  { %v5927_v20 = vpop.eup %5926 }
0x19f0   :  { %v5929_v61 = vpop.eup %5928  ;;  %v3604_v50 = vmul.f32 %v5927_v20, %v5919_v36  ;;  %v4031_v54 = vpop.xlane.xlu2 %4030 }
0x19f1   :  { %v3603_v9 = vmul.f32 %v5929_v61, %v5921_v27  ;;  %v4080_v32 = vperm.slane %v4031_v54, %v6251_v42  ;;  %v4028_v41 = vpop.xlane.xlu1 %4027 }
0x19f2   :  { %v3644_v31 = vpack.c.bf16 %v3604_v50, %v3604_v50  ;;  %v4047_v7 = vperm.slane %v4028_v41, %v6254_v43  ;;  %v5721_v41 = vld [vmem:[%s7760_s13 + $0x7] ss:$0 sm:$0xff] }
0x19f3   :  { %v3643_v47 = vpack.c.bf16 %v3603_v9, %v3603_v9  ;;  %v4082_v40 = vsel %vm223_vm2, %v4081_v46, %v4080_v32 }
0x19f4   :  { %v3953_v34 = vunpack.c.l.b16 %v3644_v31  ;;  %v4048_v22 = vsel %vm223_vm2, %v4047_v7, %v4046_v26  ;;  %v4103_v36 = vadd.f32 %v4102_v8, %v4082_v40  ;;  %v4105_v37 = vadd.f32 %v4104_v24, %v4082_v40 }
0x19f5   :  { %v3952_v25 = vunpack.c.l.b16 %v3643_v47  ;;  %v4071_v21 = vadd.f32 %v4070_v3, %v4048_v22  ;;  %v4069_v63 = vadd.f32 %v4068_v17, %v4048_v22  ;;  %v4297_v31 = vmul.f32 %v5721_v41, %v7212_v23 }
0x19f6   :  { %v4113_v27 = vsel %vm301_vm3, %v4103_v36, -inf  ;;  %v4116_v29 = vsel %vm301_vm3, %v4105_v37, -inf  ;;  %v4296_v7 = vmul.f32 %v5721_v41, %v7210_v59 }
0x19f7   :  { %v3954_v18 = vpack.c.b16 %v3953_v34, %v3952_v25  ;;  %v4110_v11 = vsel %vm301_vm3, %v4071_v21, -inf  ;;  %v4107_v13 = vsel %vm301_vm3, %v4069_v63, -inf  ;;  %4114 = vmax.xlane.f32.xlu0 %v4113_v27  ;;  %v4303_v3 = vsel %vm156_vm1, %v4297_v31, 0.0 }
0x19f8   :  { %4111 = vmax.xlane.f32.xlu2 %v4110_v11  ;;  %4108 = vmax.xlane.f32.xlu1 %v4107_v13  ;;  %v4300_v22 = vsel %vm156_vm1, %v4296_v7, 0.0  ;;  %v4298_v25 = vmul.f32 %v5721_v41, %v7229_v62 }
0x19f9   :  { %5497 = vmatmul.msk.bf16.vlgmr.msra.gmra.mxu0 %vm301_vm3, %v3954_v18 }
0x19fa   :  { %4451 = vmatpush.bf16.msra.mxu0 %v5684_v45  ;;  %v4306_v27 = vsel %vm156_vm1, %v4298_v25, 0.0 }
0x19fd   :  { %v7466_v4 = vpop.f32.mrf.mxu0 }
0x19fe   :  { %4452 = vmatpush.bf16.msra.mxu0 %v5683_v6 }
0x1a00   :  { %4117 = vmax.xlane.f32.xlu1 %v4116_v29 }
0x1a05   :  { %v7468_v17 = vpop.f32.mrf.mxu0 }
0x1a09   :  { %5527 = vmatmul.msk.bf16.vlgmr.msrb.gmra.mxu0 %vm156_vm1, %v7218_v53 }
0x1a19   :  { %5528 = vmatmul.msk.bf16.gmra.mxu0 %vm156_vm1, %v7251_v33 }
0x1a29   :  { %5560 = vmatmul.msk.bf16.vlgmr.msra.gmra.mxu0 %vm156_vm1, %v7218_v53 }
0x1a39   :  { %5561 = vmatmul.msk.bf16.gmra.mxu0 %vm156_vm1, %v7251_v33 }
0x1a6a   :  { %v4115_v58 = vpop.xlane.xlu0 %4114 }
0x1a6b   :  { %v4112_v56 = vpop.xlane.xlu2 %4111  ;;  %v4109_v2 = vpop.xlane.xlu1 %4108  ;;  %v4121_v0 = vsub.f32 %v4103_v36, %v4115_v58  ;;  %v4299_v36 = vmul.f32 %v5721_v41, %v7245_v55 }
0x1a6c   :  { %v4120_v16 = vsub.f32 %v4071_v21, %v4112_v56  ;;  %v4119_v15 = vsub.f32 %v4069_v63, %v4109_v2 }
0x1a6d   :  { %v4127_v14 = vmul.f32 1.442695, %v4121_v0  ;;  %v4309_v63 = vsel %vm156_vm1, %v4299_v36, 0.0 }
0x1a6e   :  { %v4125_v12 = vmul.f32 1.442695, %v4120_v16  ;;  %v4123_v20 = vmul.f32 1.442695, %v4119_v15 }
0x1a6f   :  { %5930 = vpow2.f32 %v4127_v14 }
0x1a70   :  { %5932 = vpow2.f32 %v4125_v12 }
0x1a71   :  { %5934 = vpow2.f32 %v4123_v20 }
0x1a73   :  { %v4118_v53 = vpop.xlane.xlu1 %4117 }
0x1a74   :  { %v4122_v61 = vsub.f32 %v4105_v37, %v4118_v53 }
0x1a75   :  { %v7470_v8 = vpop.eup %5930 }
0x1a76   :  { %v5933_v33 = vpop.eup %5932  ;;  %v4129_v50 = vmul.f32 1.442695, %v4122_v61  ;;  %v7472_v54 = vpop.f32.mrf.mxu0  ;;  %v4137_v46 = vsel %vm301_vm3, %v7470_v8, 0.0 }
0x1a77   :  { %v5935_v9 = vpop.eup %5934  ;;  %v4134_v32 = vsel %vm301_vm3, %v5933_v33, 0.0  ;;  %4138 = vadd.xlane.f32.xlu1 %v4137_v46 }
0x1a78   :  { %5936 = vpow2.f32 %v4129_v50  ;;  %v4131_v26 = vsel %vm301_vm3, %v5935_v9, 0.0  ;;  %4135 = vadd.xlane.f32.xlu0 %v4134_v32 }
0x1a79   :  { %4132 = vadd.xlane.f32.xlu2 %v4131_v26 }
0x1a7e   :  { %v7483_v47 = vpop.eup %5936  ;;  %v7485_v40 = vpop.f32.mrf.mxu0 }
0x1a7f   :  { %v4140_v34 = vsel %vm301_vm3, %v7483_v47, 0.0  ;;  %4304 = vadd.xlane.f32.xlu1 %v4303_v3 }
0x1a80   :  { %4301 = vadd.xlane.f32.xlu0 %v4300_v22 }
0x1a81   :  { %4141 = vadd.xlane.f32.xlu2 %v4140_v34 }
0x1a86   :  { %v4177_v21 = vpop.f32.mrf.mxu0 }
0x1a87   :  { %v4191_v18 = vpack.c.bf16 %v4177_v21, %v4177_v21 }
0x1a88   :  { %4310 = vadd.xlane.f32.xlu0 %v4309_v63 }
0x1a89   :  { %4307 = vadd.xlane.f32.xlu2 %v4306_v27  ;;  %v4202_v45 = vunpack.c.l.b16 %v4191_v18 }
0x1a8e   :  { %v4179_v11 = vpop.f32.mrf.mxu0 }
0x1a8f   :  { %v4192_v13 = vpack.c.bf16 %v4179_v11, %v4179_v11 }
0x1a91   :  { %v4203_v24 = vunpack.c.l.b16 %v4192_v13 }
0x1a93   :  { %v4204_v37 = vpack.c.b16 %v4203_v24, %v4202_v45 }
0x1a95   :  { %4216 = vmatpush.bf16.msra.mxu2 %v4204_v37 }
0x1a96   :  { %v4182_v6 = vpop.f32.mrf.mxu0 }
0x1a97   :  { %v4193_v29 = vpack.c.bf16 %v4182_v6, %v4182_v6 }
0x1a99   :  { %4343 = vmatpush.bf16.xpose.msrb.mxu2 %v7232_v39  ;;  %v4230_v2 = vunpack.c.l.b16 %v4193_v29 }
0x1a9e   :  { %v4184_v58 = vpop.f32.mrf.mxu0 }
0x1a9f   :  { %v4194_v56 = vpack.c.bf16 %v4184_v58, %v4184_v58 }
0x1aa1   :  { %v4231_v0 = vunpack.c.l.b16 %v4194_v56 }
0x1aa3   :  { %v4232_v16 = vpack.c.b16 %v4231_v0, %v4230_v2 }
0x1aa5   :  { %4244 = vmatpush.bf16.msra.mxu3 %v4232_v16  ;;  %v3974_v16 = vadd.f32 %v7472_v54, %v7366_v48 }
0x1aa6   :  { %v4454_v15 = vpop.f32.mrf.mxu0 }
0x1aa7   :  { %v4468_v7 = vpack.c.bf16 %v4454_v15, %v4454_v15 }
0x1aa9   :  { %4377 = vmatpush.bf16.xpose.msrb.mxu3 %v7265_v10  ;;  %v4479_v63 = vunpack.c.l.b16 %v4468_v7 }
0x1aae   :  { %v4456_v14 = vpop.f32.mrf.mxu0 }
0x1aaf   :  { %v4469_v46 = vpack.c.bf16 %v4456_v14, %v4456_v14 }
0x1ab1   :  { %v4480_v34 = vunpack.c.l.b16 %v4469_v46 }
0x1ab3   :  { %v4481_v11 = vpack.c.b16 %v4480_v34, %v4479_v63 }
0x1ab6   :  { %v4459_v61 = vpop.f32.mrf.mxu0 }
0x1abe   :  { %v4461_v36 = vpop.f32.mrf.mxu0 }
0x1abf   :  { %v4471_v13 = vpack.c.bf16 %v4461_v36, %v4461_v36 }
0x1ac1   :  { %v4508_v37 = vunpack.c.l.b16 %v4471_v13 }
0x1aea   :  { %v4139_v53 = vpop.xlane.xlu1 %4138 }
0x1aeb   :  { %v4136_v12 = vpop.xlane.xlu0 %4135 }
0x1aec   :  { %v4133_v20 = vpop.xlane.xlu2 %4132  ;;  %5938 = vrcp.f32 %v4136_v12 }
0x1aed   :  { %5940 = vrcp.f32 %v4133_v20 }
0x1aee   :  { %5942 = vrcp.f32 %v4139_v53 }
0x1af2   :  { %v5939_v50 = vpop.eup %5938  ;;  %v4305_v28 = vpop.xlane.xlu1 %4304 }
0x1af3   :  { %v5941_v39 = vpop.eup %5940  ;;  %v4148_v32 = vmul.f32 %v5939_v50, %v5933_v33  ;;  %v4302_v15 = vpop.xlane.xlu0 %4301  ;;  %v4324_v30 = vperm.slane %v4305_v28, %v6254_v43 }
0x1af4   :  { %v4147_v41 = vmul.f32 %v5941_v39, %v5935_v9  ;;  %v4142_v26 = vpop.xlane.xlu2 %4141  ;;  %v5943_v31 = vpop.eup %5942  ;;  %v4470_v9 = vpack.c.bf16 %v4459_v61, %v4459_v61  ;;  %v4323_v19 = vperm.slane %v4302_v15, %v6251_v42 }
0x1af5   :  { %v4188_v3 = vpack.c.bf16 %v4148_v32, %v4148_v32  ;;  %5944 = vrcp.f32 %v4142_v26  ;;  %v4149_v21 = vmul.f32 %v5943_v31, %v7470_v8  ;;  %v3946_v8 = vadd.f32 %v7431_v1, %v7466_v4 }
0x1af6   :  { %v4187_v10 = vpack.c.bf16 %v4147_v41, %v4147_v41  ;;  %v4507_v58 = vunpack.c.l.b16 %v4470_v9  ;;  %v4325_v4 = vsel %vm223_vm2, %v4324_v30, %v4323_v19 }
0x1af7   :  { %v4198_v22 = vunpack.c.l.b16 %v4188_v3  ;;  %v4189_v45 = vpack.c.bf16 %v4149_v21, %v4149_v21 }
0x1af8   :  { %v4197_v25 = vunpack.c.l.b16 %v4187_v10  ;;  %v4509_v2 = vpack.c.b16 %v4508_v37, %v4507_v58 }
0x1af9   :  { %v4225_v6 = vunpack.c.l.b16 %v4189_v45 }
0x1afa   :  { %v4199_v27 = vpack.c.b16 %v4198_v22, %v4197_v25 }
0x1afb   :  { %v5945_v18 = vpop.eup %5944  ;;  %v4311_v48 = vpop.xlane.xlu0 %4310 }
0x1afc   :  { %v4150_v33 = vmul.f32 %v5945_v18, %v7483_v47  ;;  %5529 = vmatmul.msk.bf16.vlgmr.msra.gmra.mxu2 %vm301_vm3, %v4199_v27  ;;  %v4308_v20 = vpop.xlane.xlu2 %4307  ;;  %v4358_v39 = vperm.slane %v4311_v48, %v6254_v43 }
0x1afd   :  { %4493 = vmatpush.bf16.msra.mxu2 %v4481_v11  ;;  %v4357_v50 = vperm.slane %v4308_v20, %v6251_v42 }
0x1afe   :  { %v4190_v24 = vpack.c.bf16 %v4150_v33, %v4150_v33 }
0x1aff   :  { %v4359_v32 = vsel %vm223_vm2, %v4358_v39, %v4357_v50 }
0x1b00   :  { %v4226_v29 = vunpack.c.l.b16 %v4190_v24 }
0x1b02   :  { %v4227_v56 = vpack.c.b16 %v4226_v29, %v4225_v6 }
0x1b04   :  { %5530 = vmatmul.msk.bf16.vlgmr.msra.gmra.mxu3 %vm301_vm3, %v4227_v56  ;;  %v7542_v56 = vld [vmem:[%s7765_s17 + $0x3] ss:$0 sm:$0xff] }
0x1b05   :  { %4521 = vmatpush.bf16.msra.mxu3 %v4509_v2 }
0x1b0c   :  { %5546 = vmatmul.msk.bf16.vlgmr.msrb.gmra.mxu2 %vm156_vm1, %v4320_v49 }
0x1b14   :  { %5547 = vmatmul.msk.bf16.vlgmr.msrb.gmra.mxu3 %vm156_vm1, %v4354_v44  ;;  %v3976_v44 = vadd.f32 %v7485_v40, %v7370_v35 }
0x1b7f   :  { %v4218_v47 = vpop.f32.mrf.mxu2 }
0x1b80   :  { %v7511_v0 = vadd.f32 %v4218_v47, %v3946_v8 }
0x1b87   :  { %v7515_v14 = vpop.f32.mrf.mxu2  ;;  %v4246_v51 = vpop.f32.mrf.mxu3 }
0x1b88   :  { %v7517_v49 = vadd.f32 %v4246_v51, %v3974_v16 }
0x1b8f   :  { %v4248_v1 = vpop.f32.mrf.mxu3  ;;  %v4345_v12 = vpop.f32.mrf.mxu2 }
0x1b90   :  { %v7524_v54 = vadd.f32 %v4248_v1, %v3976_v44  ;;  %v4346_v53 = vadd.f32 %v4345_v12, %v4325_v4 }
0x1b92   :  { %v4384_v61 = vsel %vm301_vm3, %v4346_v53, -inf }
0x1b93   :  { %4385 = vmax.xlane.f32.xlu1 %v4384_v61 }
0x1b97   :  { %v4347_v46 = vpop.f32.mrf.mxu2  ;;  %v4379_v35 = vpop.f32.mrf.mxu3 }
0x1b98   :  { %v4348_v40 = vadd.f32 %v4347_v46, %v4325_v4  ;;  %v4380_v41 = vadd.f32 %v4379_v35, %v4359_v32 }
0x1b9a   :  { %v4387_v26 = vsel %vm301_vm3, %v4348_v40, -inf  ;;  %v4390_v31 = vsel %vm301_vm3, %v4380_v41, -inf }
0x1b9b   :  { %4388 = vmax.xlane.f32.xlu2 %v4387_v26  ;;  %4391 = vmax.xlane.f32.xlu0 %v4390_v31  ;;  %v5723_v31 = vld [vmem:[%s7765_s17 + $0x3] ss:$0 sm:$0xff] }
0x1b9f   :  { %v4381_v7 = vpop.f32.mrf.mxu3 }
0x1ba0   :  { %v4382_v3 = vadd.f32 %v4381_v7, %v4359_v32 }
0x1ba2   :  { %v4393_v10 = vsel %vm301_vm3, %v4382_v3, -inf }
0x1ba3   :  { %4394 = vmax.xlane.f32.xlu1 %v4393_v10 }
0x1c06   :  { %v4386_v42 = vpop.xlane.xlu1 %4385 }
0x1c07   :  { %v4396_v43 = vsub.f32 %v4346_v53, %v4386_v42  ;;  %v3948_v42 = vadd.f32 %v7433_v60, %v7468_v17 }
0x1c09   :  { %v4400_v34 = vmul.f32 1.442695, %v4396_v43 }
0x1c0b   :  { %5946 = vpow2.f32 %v4400_v34  ;;  %v4252_v34 = vadd.f32 %v7515_v14, %v3948_v42 }
0x1c0e   :  { %v4389_v22 = vpop.xlane.xlu2 %4388  ;;  %v4392_v36 = vpop.xlane.xlu0 %4391 }
0x1c0f   :  { %v4397_v25 = vsub.f32 %v4348_v40, %v4389_v22  ;;  %v4398_v21 = vsub.f32 %v4380_v41, %v4392_v36 }
0x1c11   :  { %v5947_v63 = vpop.eup %5946  ;;  %v4402_v27 = vmul.f32 1.442695, %v4397_v25  ;;  %v4404_v18 = vmul.f32 1.442695, %v4398_v21 }
0x1c12   :  { %v4408_v11 = vsel %vm301_vm3, %v5947_v63, 0.0 }
0x1c13   :  { %5948 = vpow2.f32 %v4402_v27  ;;  %4409 = vadd.xlane.f32.xlu2 %v4408_v11 }
0x1c14   :  { %5950 = vpow2.f32 %v4404_v18 }
0x1c16   :  { %v4395_v13 = vpop.xlane.xlu1 %4394 }
0x1c17   :  { %v4399_v45 = vsub.f32 %v4382_v3, %v4395_v13 }
0x1c19   :  { %v5949_v33 = vpop.eup %5948  ;;  %v4406_v9 = vmul.f32 1.442695, %v4399_v45 }
0x1c1a   :  { %v5951_v24 = vpop.eup %5950  ;;  %v4411_v37 = vsel %vm301_vm3, %v5949_v33, 0.0 }
0x1c1b   :  { %5952 = vpow2.f32 %v4406_v9  ;;  %4412 = vadd.xlane.f32.xlu0 %v4411_v37  ;;  %v4414_v6 = vsel %vm301_vm3, %v5951_v24, 0.0 }
0x1c1c   :  { %4415 = vadd.xlane.f32.xlu1 %v4414_v6 }
0x1c21   :  { %v5953_v29 = vpop.eup %5952 }
0x1c22   :  { %v4417_v58 = vsel %vm301_vm3, %v5953_v29, 0.0 }
0x1c23   :  { %4418 = vadd.xlane.f32.xlu2 %v4417_v58 }
0x1c2f   :  { %4688 = vrot.lane.b32.xlu0 %v7351_v52, %s5994_s4 }
0x1c35   :  { %4665 = vrot.lane.b32.xlu1 %v7542_v56, %s5997_s22 }
0x1c3b   :  { %4686 = vrot.lane.b32.xlu2 %v7357_v57, %s5994_s4 }
0x1c86   :  { %v4410_v2 = vpop.xlane.xlu2 %4409 }
0x1c87   :  { %5954 = vrcp.f32 %v4410_v2 }
0x1c8d   :  { %v5955_v47 = vpop.eup %5954 }
0x1c8e   :  { %v4413_v8 = vpop.xlane.xlu0 %4412  ;;  %v4424_v15 = vmul.f32 %v5955_v47, %v5947_v63 }
0x1c8f   :  { %v4416_v16 = vpop.xlane.xlu1 %4415  ;;  %5956 = vrcp.f32 %v4413_v8 }
0x1c90   :  { %5958 = vrcp.f32 %v4416_v16  ;;  %v4464_v51 = vpack.c.bf16 %v4424_v15, %v4424_v15 }
0x1c92   :  { %v4474_v1 = vunpack.c.l.b16 %v4464_v51 }
0x1c95   :  { %v5957_v52 = vpop.eup %5956 }
0x1c96   :  { %v4425_v28 = vmul.f32 %v5957_v52, %v5949_v33  ;;  %v4419_v30 = vpop.xlane.xlu2 %4418  ;;  %v5959_v19 = vpop.eup %5958 }
0x1c97   :  { %5960 = vrcp.f32 %v4419_v30  ;;  %v4426_v4 = vmul.f32 %v5959_v19, %v5951_v24 }
0x1c98   :  { %v4465_v44 = vpack.c.bf16 %v4425_v28, %v4425_v28 }
0x1c99   :  { %v4466_v48 = vpack.c.bf16 %v4426_v4, %v4426_v4 }
0x1c9a   :  { %v4475_v12 = vunpack.c.l.b16 %v4465_v44 }
0x1c9b   :  { %v4502_v39 = vunpack.c.l.b16 %v4466_v48 }
0x1c9c   :  { %v4476_v20 = vpack.c.b16 %v4475_v12, %v4474_v1 }
0x1c9d   :  { %v5961_v57 = vpop.eup %5960 }
0x1c9e   :  { %v4427_v53 = vmul.f32 %v5961_v57, %v5953_v29  ;;  %5562 = vmatmul.msk.bf16.vlgmr.msra.gmra.mxu2 %vm301_vm3, %v4476_v20  ;;  %v4687_v32 = vpop.permute.xlu2 %4686 }
0x1ca0   :  { %v4467_v61 = vpack.c.bf16 %v4427_v53, %v4427_v53 }
0x1ca1   :  { %v4689_v50 = vpop.permute.xlu0 %4688 }
0x1ca2   :  { %v4503_v46 = vunpack.c.l.b16 %v4467_v61  ;;  %4701 = vmatpush.bf16.msrb.mxu2 %v4689_v50 }
0x1ca4   :  { %v4504_v35 = vpack.c.b16 %v4503_v46, %v4502_v39 }
0x1ca6   :  { %5563 = vmatmul.msk.bf16.vlgmr.msra.gmra.mxu3 %vm301_vm3, %v4504_v35  ;;  %4702 = vmatpush.bf16.msrb.mxu2 %v4687_v32 }
0x1ca7   :  { %v4666_v40 = vpop.permute.xlu1 %4665 }
0x1ca8   :  { %v4678_v41 = vadd.f32 %v7401_v38, %v4666_v40 }
0x1caa   :  { %v4681_v26 = vpack.c.bf16 %v4678_v41, %v4678_v41  ;;  %v7601_v41 = vld [vmem:[%s7765_s17 + $0x4] ss:$0 sm:$0xff] }
0x1cae   :  { %5579 = vmatmul.msk.bf16.vlgmr.msrb.gmra.mxu2 %vm156_vm1, %v4681_v26 }
0x1d21   :  { %v4495_v7 = vpop.f32.mrf.mxu2 }
0x1d22   :  { %v4528_v3 = vadd.f32 %v4495_v7, %v7511_v0 }
0x1d24   :  { %v4535_v10 = vadd.f32 %v5723_v31, %v4528_v3 }
0x1d26   :  { %v4539_v43 = vadd.f32 %v4535_v10, %v7210_v59 }
0x1d28   :  { %v4544_v38 = vsel %vm156_vm1, %v4539_v43, 0.0 }
0x1d29   :  { %v4523_v22 = vpop.f32.mrf.mxu3  ;;  %4545 = vadd.xlane.f32.xlu0 %v4544_v38  ;;  %v4497_v36 = vpop.f32.mrf.mxu2 }
0x1d2a   :  { %v4530_v25 = vadd.f32 %v4523_v22, %v7517_v49  ;;  %v4529_v21 = vadd.f32 %v4497_v36, %v4252_v34 }
0x1d2c   :  { %v4537_v63 = vadd.f32 %v5723_v31, %v4530_v25  ;;  %v4536_v27 = vadd.f32 %v5723_v31, %v4529_v21 }
0x1d2e   :  { %v4541_v0 = vadd.f32 %v4537_v63, %v7229_v62  ;;  %v4540_v18 = vadd.f32 %v4536_v27, %v7212_v23 }
0x1d30   :  { %v4550_v60 = vsel %vm156_vm1, %v4541_v0, 0.0  ;;  %v4547_v59 = vsel %vm156_vm1, %v4540_v18, 0.0 }
0x1d31   :  { %4551 = vadd.xlane.f32.xlu2 %v4550_v60  ;;  %v4525_v17 = vpop.f32.mrf.mxu3  ;;  %4548 = vadd.xlane.f32.xlu1 %v4547_v59  ;;  %v7566_v14 = vpop.f32.mrf.mxu2 }
0x1d32   :  { %v4531_v11 = vadd.f32 %v4525_v17, %v7524_v54  ;;  %v4705_v38 = vadd.f32 %v7601_v41, %v7566_v14 }
0x1d34   :  { %v4538_v13 = vadd.f32 %v5723_v31, %v4531_v11 }
0x1d36   :  { %v4542_v49 = vadd.f32 %v4538_v13, %v7245_v55 }
0x1d38   :  { %v4553_v45 = vsel %vm156_vm1, %v4542_v49, 0.0 }
0x1d39   :  { %4554 = vadd.xlane.f32.xlu0 %v4553_v45  ;;  %v4706_v62 = vpop.f32.mrf.mxu2 }
0x1d9c   :  { %v4546_v33 = vpop.xlane.xlu0 %4545 }
0x1d9d   :  { %v4556_v23 = vmul.f32 %v4546_v33, %v6471_v5 }
0x1d9f   :  { %v4560_v9 = vsub.f32 %v4539_v43, %v4556_v23 }
0x1da1   :  { %v4564_v24 = vmul.f32 %v4560_v9, %v4560_v9 }
0x1da3   :  { %v4568_v37 = vsel %vm156_vm1, %v4564_v24, 0.0 }
0x1da4   :  { %v4552_v6 = vpop.xlane.xlu2 %4551  ;;  %v4549_v29 = vpop.xlane.xlu1 %4548  ;;  %4569 = vadd.xlane.f32.xlu1 %v4568_v37 }
0x1da5   :  { %v4558_v58 = vmul.f32 %v4552_v6, %v6471_v5  ;;  %v4557_v54 = vmul.f32 %v4549_v29, %v6471_v5 }
0x1da7   :  { %v7575_v2 = vsub.f32 %v4541_v0, %v4558_v58  ;;  %v7577_v55 = vsub.f32 %v4540_v18, %v4557_v54  ;;  %v4710_v0 = vperm.slane %v4705_v38, 0 }
0x1da9   :  { %v4566_v8 = vmul.f32 %v7575_v2, %v7575_v2  ;;  %v4565_v47 = vmul.f32 %v7577_v55, %v7577_v55 }
0x1dab   :  { %v4574_v16 = vsel %vm156_vm1, %v4566_v8, 0.0  ;;  %v4571_v15 = vsel %vm156_vm1, %v4565_v47, 0.0 }
0x1dac   :  { %4575 = vadd.xlane.f32.xlu0 %v4574_v16  ;;  %4572 = vadd.xlane.f32.xlu2 %v4571_v15  ;;  %v4555_v52 = vpop.xlane.xlu0 %4554  ;;  %v5992_v16 = vld [vmem:[%s7766_s15 + $0x18] sm:$0xff] }
0x1dad   :  { %v4559_v51 = vmul.f32 %v4555_v52, %v6471_v5 }
0x1daf   :  { %v7586_v28 = vsub.f32 %v4542_v49, %v4559_v51  ;;  %v4709_v49 = vrot.slane %v4705_v38, 1 }
0x1db1   :  { %v4567_v30 = vmul.f32 %v7586_v28, %v7586_v28  ;;  %v4711_v24 = vperm.slane %v4709_v49, 0 }
0x1db3   :  { %v4577_v19 = vsel %vm156_vm1, %v4567_v30, 0.0 }
0x1db4   :  { %4578 = vadd.xlane.f32.xlu1 %v4577_v19 }
0x1dc0   :  { %4641 = vrot.lane.b32.xlu0 %v7542_v56, %s5996_s19 }
0x1dc4   :  { %4634 = vrot.lane.b32.xlu2 %v7542_v56, %s5994_s4 }
0x1e17   :  { %v4570_v44 = vpop.xlane.xlu1 %4569 }
0x1e18   :  { %v4580_v1 = vmul.f32 %v4570_v44, %v6471_v5 }
0x1e1a   :  { %v4584_v4 = vadd.f32 1e-05, %v4580_v1 }
0x1e1c   :  { %5962 = vrsqrt.f32 %v4584_v4  ;;  %vm4594_vm3 = vweird.f32 %v4584_v4 }
0x1e1f   :  { %v4573_v12 = vpop.xlane.xlu2 %4572  ;;  %v4576_v20 = vpop.xlane.xlu0 %4575 }
0x1e20   :  { %v4581_v57 = vmul.f32 %v4573_v12, %v6471_v5  ;;  %v4582_v48 = vmul.f32 %v4576_v20, %v6471_v5 }
0x1e22   :  { %v5963_v53 = vpop.eup %5962  ;;  %v4585_v61 = vadd.f32 1e-05, %v4581_v57  ;;  %v4586_v50 = vadd.f32 1e-05, %v4582_v48 }
0x1e23   :  { %v4589_v39 = vmul.f32 %v5963_v53, %v4584_v4  ;;  %vm4595_vm2 = vweird.f32 %v5963_v53 }
0x1e24   :  { %5964 = vrsqrt.f32 %v4585_v61  ;;  %vm4596_vm11 = vmor %vm4594_vm3, %vm4595_vm2  ;;  %vm4604_vm14 = vweird.f32 %v4585_v61  ;;  %vm4614_vm0 = vweird.f32 %v4586_v50 }
0x1e25   :  { %v4590_v46 = vmul.f32 %v5963_v53, %v4589_v39  ;;  %5966 = vrsqrt.f32 %v4586_v50 }
0x1e27   :  { %v4591_v32 = vmul.f32 0.5, %v4590_v46  ;;  %v4635_v10 = vpop.permute.xlu2 %4634 }
0x1e29   :  { %v4592_v56 = vsub.f32 1.5, %v4591_v32 }
0x1e2a   :  { %v5965_v35 = vpop.eup %5964 }
0x1e2b   :  { %v5967_v40 = vpop.eup %5966  ;;  %v4593_v26 = vmul.f32 %v5963_v53, %v4592_v56  ;;  %v4599_v31 = vmul.f32 %v5965_v35, %v4585_v61  ;;  %vm4605_vm12 = vweird.f32 %v5965_v35 }
0x1e2c   :  { %v4609_v7 = vmul.f32 %v5967_v40, %v4586_v50  ;;  %vm4615_vm13 = vweird.f32 %v5967_v40  ;;  %vm4606_vm15 = vmor %vm4604_vm14, %vm4605_vm12 }
0x1e2d   :  { %v4600_v3 = vmul.f32 %v5965_v35, %v4599_v31  ;;  %v4597_v42 = vsel %vm4596_vm11, %v5963_v53, %v4593_v26  ;;  %vm4616_vm5 = vmor %vm4614_vm0, %vm4615_vm13 }
0x1e2e   :  { %v4610_v43 = vmul.f32 %v5967_v40, %v4609_v7  ;;  %v4628_v34 = vmul.f32 %v4597_v42, %v4560_v9 }
0x1e2f   :  { %v4601_v22 = vmul.f32 0.5, %v4600_v3 }
0x1e30   :  { %v4611_v36 = vmul.f32 0.5, %v4610_v43  ;;  %v4637_v25 = vmul.f32 %v4635_v10, %v4628_v34 }
0x1e31   :  { %v4602_v21 = vsub.f32 1.5, %v4601_v22 }
0x1e32   :  { %v4612_v63 = vsub.f32 1.5, %v4611_v36  ;;  %v4642_v27 = vpop.permute.xlu0 %4641  ;;  %v5993_v36 = vld [vmem:[%s7766_s15 + $0x10] sm:$0xff] }
0x1e33   :  { %v4603_v18 = vmul.f32 %v5965_v35, %v4602_v21  ;;  %v4644_v60 = vadd.f32 %v4642_v27, %v4637_v25 }
0x1e34   :  { %v4613_v59 = vmul.f32 %v5967_v40, %v4612_v63 }
0x1e35   :  { %v4607_v17 = vsel %vm4606_vm15, %v5965_v35, %v4603_v18  ;;  %v4714_v11 = vadd.f32 %v4710_v0, %v4644_v60 }
0x1e36   :  { %v4629_v14 = vmul.f32 %v4607_v17, %v7577_v55  ;;  %v4617_v13 = vsel %vm4616_vm5, %v5967_v40, %v4613_v59  ;;  %v4579_v55 = vpop.xlane.xlu1 %4578 }
0x1e37   :  { %v4630_v45 = vmul.f32 %v4617_v13, %v7575_v2  ;;  %v4718_v62 = vsel %vm156_vm1, %v4714_v11, 0.0  ;;  %v4583_v8 = vmul.f32 %v4579_v55, %v6471_v5 }
0x1e38   :  { %v4638_v33 = vmul.f32 %v4635_v10, %v4629_v14  ;;  %4719 = vadd.xlane.f32.xlu1 %v4718_v62 }
0x1e39   :  { %v4639_v23 = vmul.f32 %v4635_v10, %v4630_v45  ;;  %v4587_v2 = vadd.f32 1e-05, %v4583_v8  ;;  %v5580_v45 = vld [vmem:[%s7765_s17 + $0x4] sm:$0x3] }
0x1e3a   :  { %v4645_v9 = vadd.f32 %v4642_v27, %v4638_v33  ;;  %v4824_v33 = vperm.slane %v5580_v45, 0 }
0x1e3b   :  { %v4646_v37 = vadd.f32 %v4642_v27, %v4639_v23  ;;  %5968 = vrsqrt.f32 %v4587_v2  ;;  %vm4624_vm7 = vweird.f32 %v4587_v2  ;;  %v4825_v23 = vperm.slane %v5580_v45, 1 }
0x1e3c   :  { %v4715_v6 = vadd.f32 %v4710_v0, %v4645_v9 }
0x1e3d   :  { %v4716_v29 = vadd.f32 %v4711_v24, %v4646_v37 }
0x1e3e   :  { %v4721_v58 = vsel %vm156_vm1, %v4715_v6, 0.0 }
0x1e3f   :  { %v4724_v54 = vsel %vm156_vm1, %v4716_v29, 0.0 }
0x1e40   :  { %4725 = vadd.xlane.f32.xlu0 %v4724_v54  ;;  %4722 = vadd.xlane.f32.xlu1 %v4721_v58 }
0x1e41   :  { %v5969_v47 = vpop.eup %5968 }
0x1e42   :  { %v4619_v15 = vmul.f32 %v5969_v47, %v4587_v2  ;;  %vm4625_vm6 = vweird.f32 %v5969_v47 }
0x1e43   :  { %vm4626_vm8 = vmor %vm4624_vm7, %vm4625_vm6 }
0x1e44   :  { %v4620_v52 = vmul.f32 %v5969_v47, %v4619_v15 }
0x1e46   :  { %v4621_v51 = vmul.f32 0.5, %v4620_v52 }
0x1e48   :  { %v4622_v30 = vsub.f32 1.5, %v4621_v51  ;;  %v5690_v51 = vld [vmem:[%s7767_s16 + $0x38] sm:$0xff] }
0x1e49   :  { %4918 = vmatpush.bf16.msrb.mxu0 %v5690_v51 }
0x1e4a   :  { %v4623_v19 = vmul.f32 %v5969_v47, %v4622_v30 }
0x1e4c   :  { %v4627_v44 = vsel %vm4626_vm8, %v5969_v47, %v4623_v19 }
0x1e4d   :  { %v4631_v1 = vmul.f32 %v4627_v44, %v7586_v28 }
0x1e4f   :  { %v4640_v4 = vmul.f32 %v4635_v10, %v4631_v1 }
0x1e51   :  { %v4647_v12 = vadd.f32 %v4642_v27, %v4640_v4  ;;  %v5689_v4 = vld [vmem:[%s7767_s16 + $0x30] sm:$0xff] }
0x1e52   :  { %4919 = vmatpush.bf16.msrb.mxu0 %v5689_v4 }
0x1e53   :  { %v4717_v20 = vadd.f32 %v4711_v24, %v4647_v12 }
0x1e54   :  { %4806 = vrot.lane.b32.xlu0 %v7601_v41, %s5994_s4 }
0x1e55   :  { %v4727_v57 = vsel %vm156_vm1, %v4717_v20, 0.0 }
0x1e59   :  { %4828 = vrot.lane.b32.xlu1 %v5992_v16, %s5996_s19 }
0x1e5c   :  { %4832 = vrot.lane.b32.xlu0 %v4824_v33, %s5997_s22 }
0x1e83   :  { %4728 = vadd.xlane.f32.xlu1 %v4727_v57 }
0x1eab   :  { %v4720_v48 = vpop.xlane.xlu1 %4719 }
0x1eac   :  { %v4730_v53 = vmul.f32 %v4720_v48, %v6471_v5 }
0x1eae   :  { %v7620_v61 = vsub.f32 %v4714_v11, %v4730_v53 }
0x1eb0   :  { %v4738_v50 = vmul.f32 %v7620_v61, %v7620_v61 }
0x1eb2   :  { %v4742_v39 = vsel %vm156_vm1, %v4738_v50, 0.0 }
0x1eb3   :  { %v4726_v46 = vpop.xlane.xlu0 %4725  ;;  %4743 = vadd.xlane.f32.xlu2 %v4742_v39  ;;  %v4723_v32 = vpop.xlane.xlu1 %4722 }
0x1eb4   :  { %v4731_v28 = vmul.f32 %v4723_v32, %v6471_v5  ;;  %v4732_v56 = vmul.f32 %v4726_v46, %v6471_v5 }
0x1eb6   :  { %v7627_v35 = vsub.f32 %v4715_v6, %v4731_v28  ;;  %v7631_v26 = vsub.f32 %v4716_v29, %v4732_v56 }
0x1eb8   :  { %v4739_v40 = vmul.f32 %v7627_v35, %v7627_v35  ;;  %v4740_v7 = vmul.f32 %v7631_v26, %v7631_v26 }
0x1eba   :  { %v4745_v31 = vsel %vm156_vm1, %v4739_v40, 0.0  ;;  %v4748_v3 = vsel %vm156_vm1, %v4740_v7, 0.0 }
0x1ebb   :  { %4746 = vadd.xlane.f32.xlu1 %v4745_v31 }
0x1ec3   :  { %4749 = vadd.xlane.f32.xlu1 %v4748_v3 }
0x1ec6   :  { %v4807_v48 = vpop.permute.xlu0 %4806 }
0x1ecb   :  { %v4829_v10 = vpop.permute.xlu1 %4828  ;;  %4813 = vrot.lane.b32.xlu2 %v7601_v41, %s5996_s19 }
0x1ecc   :  { %4850 = vmatpush.bf16.msrb.mxu3 %v4829_v10 }
0x1ef6   :  { %v4729_v42 = vpop.xlane.xlu1 %4728 }
0x1ef7   :  { %v4733_v43 = vmul.f32 %v4729_v42, %v6471_v5 }
0x1ef9   :  { %v7640_v34 = vsub.f32 %v4717_v20, %v4733_v43 }
0x1efb   :  { %v4741_v38 = vmul.f32 %v7640_v34, %v7640_v34 }
0x1efd   :  { %v4751_v22 = vsel %vm156_vm1, %v4741_v38, 0.0 }
0x1efe   :  { %4752 = vadd.xlane.f32.xlu1 %v4751_v22 }
0x1f17   :  { %4826 = vrot.lane.b32.xlu1 %v5993_v36, %s5996_s19 }
0x1f1f   :  { %4834 = vrot.lane.b32.xlu1 %v4825_v23, %s5997_s22 }
0x1f26   :  { %v4744_v41 = vpop.xlane.xlu2 %4743 }
0x1f27   :  { %v4754_v63 = vmul.f32 %v4744_v41, %v6471_v5  ;;  %v5688_v41 = vld [vmem:[%s7767_s16 + $0x28] sm:$0xff] }
0x1f28   :  { %4920 = vmatpush.bf16.msrb.mxu0 %v5688_v41 }
0x1f29   :  { %v4758_v0 = vadd.f32 1e-05, %v4754_v63  ;;  %v4833_v63 = vpop.permute.xlu0 %4832 }
0x1f2b   :  { %vm4768_vm11 = vweird.f32 %v4758_v0 }
0x1f2e   :  { %v4747_v25 = vpop.xlane.xlu1 %4746  ;;  %v4814_v32 = vpop.permute.xlu2 %4813 }
0x1f2f   :  { %v4755_v21 = vmul.f32 %v4747_v25, %v6471_v5 }
0x1f31   :  { %v4759_v27 = vadd.f32 1e-05, %v4755_v21  ;;  %v5687_v21 = vld [vmem:[%s7767_s16 + $0x20] sm:$0xff] }
0x1f32   :  { %4921 = vmatpush.bf16.msrb.mxu0 %v5687_v21 }
0x1f33   :  { %5970 = vrsqrt.f32 %v4759_v27  ;;  %vm4778_vm2 = vweird.f32 %v4759_v27 }
0x1f34   :  { %5972 = vrsqrt.f32 %v4758_v0 }
0x1f36   :  { %v4750_v60 = vpop.xlane.xlu1 %4749 }
0x1f37   :  { %v4756_v11 = vmul.f32 %v4750_v60, %v6471_v5 }
0x1f39   :  { %v5971_v18 = vpop.eup %5970  ;;  %v4760_v49 = vadd.f32 1e-05, %v4756_v11 }
0x1f3a   :  { %v5973_v59 = vpop.eup %5972  ;;  %v4773_v17 = vmul.f32 %v5971_v18, %v4759_v27  ;;  %vm4779_vm9 = vweird.f32 %v5971_v18 }
0x1f3b   :  { %v4763_v14 = vmul.f32 %v5973_v59, %v4758_v0  ;;  %5974 = vrsqrt.f32 %v4760_v49  ;;  %vm4769_vm10 = vweird.f32 %v5973_v59  ;;  %vm4780_vm3 = vmor %vm4778_vm2, %vm4779_vm9  ;;  %vm4788_vm5 = vweird.f32 %v4760_v49 }
0x1f3c   :  { %v4774_v13 = vmul.f32 %v5971_v18, %v4773_v17  ;;  %vm4770_vm12 = vmor %vm4768_vm11, %vm4769_vm10 }
0x1f3d   :  { %v4764_v62 = vmul.f32 %v5973_v59, %v4763_v14 }
0x1f3e   :  { %v4775_v9 = vmul.f32 0.5, %v4774_v13 }
0x1f3f   :  { %v4765_v37 = vmul.f32 0.5, %v4764_v62 }
0x1f40   :  { %v4776_v29 = vsub.f32 1.5, %v4775_v9 }
0x1f41   :  { %v4766_v54 = vsub.f32 1.5, %v4765_v37  ;;  %v5975_v55 = vpop.eup %5974 }
0x1f42   :  { %v4777_v8 = vmul.f32 %v5971_v18, %v4776_v29  ;;  %v4783_v47 = vmul.f32 %v5975_v55, %v4760_v49  ;;  %vm4789_vm14 = vweird.f32 %v5975_v55 }
0x1f43   :  { %v4767_v2 = vmul.f32 %v5973_v59, %v4766_v54  ;;  %vm4790_vm6 = vmor %vm4788_vm5, %vm4789_vm14 }
0x1f44   :  { %v4781_v15 = vsel %vm4780_vm3, %v5971_v18, %v4777_v8  ;;  %v4784_v30 = vmul.f32 %v5975_v55, %v4783_v47 }
0x1f45   :  { %v4771_v19 = vsel %vm4770_vm12, %v5973_v59, %v4767_v2  ;;  %v4803_v44 = vmul.f32 %v4781_v15, %v7627_v35 }
0x1f46   :  { %v4802_v12 = vmul.f32 %v4771_v19, %v7620_v61  ;;  %v4785_v57 = vmul.f32 0.5, %v4784_v30 }
0x1f47   :  { %v4810_v53 = vmul.f32 %v4807_v48, %v4803_v44 }
0x1f48   :  { %v4809_v39 = vmul.f32 %v4807_v48, %v4802_v12  ;;  %v4786_v46 = vsub.f32 1.5, %v4785_v57 }
0x1f49   :  { %v4817_v28 = vadd.f32 %v4814_v32, %v4810_v53 }
0x1f4a   :  { %v4816_v35 = vadd.f32 %v4814_v32, %v4809_v39  ;;  %v4787_v31 = vmul.f32 %v5975_v55, %v4786_v46 }
0x1f4c   :  { %v4820_v7 = vpack.c.bf16 %v4817_v28, %v4816_v35  ;;  %v4791_v3 = vsel %vm4790_vm6, %v5975_v55, %v4787_v31 }
0x1f4d   :  { %v4804_v42 = vmul.f32 %v4791_v3, %v7631_v26  ;;  %v7679_v26 = vld [vmem:[%s7765_s17 + $0x5] ss:$0 sm:$0xff] }
0x1f4e   :  { %4905 = vrot.lane.b32.xlu2 %v7679_v26, %s5994_s4 }
0x1f4f   :  { %v4811_v38 = vmul.f32 %v4807_v48, %v4804_v42 }
0x1f51   :  { %v4818_v36 = vadd.f32 %v4814_v32, %v4811_v38 }
0x1f71   :  { %v4753_v24 = vpop.xlane.xlu1 %4752 }
0x1f72   :  { %v4757_v6 = vmul.f32 %v4753_v24, %v6471_v5 }
0x1f74   :  { %v4761_v58 = vadd.f32 1e-05, %v4757_v6 }
0x1f76   :  { %5976 = vrsqrt.f32 %v4761_v58  ;;  %vm4798_vm15 = vweird.f32 %v4761_v58 }
0x1f7c   :  { %v5977_v16 = vpop.eup %5976 }
0x1f7d   :  { %v4793_v52 = vmul.f32 %v5977_v16, %v4761_v58  ;;  %vm4799_vm13 = vweird.f32 %v5977_v16 }
0x1f7e   :  { %vm4800_vm0 = vmor %vm4798_vm15, %vm4799_vm13 }
0x1f7f   :  { %v4794_v1 = vmul.f32 %v5977_v16, %v4793_v52 }
0x1f81   :  { %v4795_v20 = vmul.f32 0.5, %v4794_v1 }
0x1f83   :  { %v4796_v50 = vsub.f32 1.5, %v4795_v20 }
0x1f85   :  { %v4797_v56 = vmul.f32 %v5977_v16, %v4796_v50 }
0x1f87   :  { %v4801_v61 = vsel %vm4800_vm0, %v5977_v16, %v4797_v56  ;;  %vm5065_vm0 = vcmask 195584  }
0x1f88   :  { %v4805_v10 = vmul.f32 %v4801_v61, %v7640_v34 }
0x1f89   :  { %v4827_v40 = vpop.permute.xlu1 %4826 }
0x1f8a   :  { %4851 = vmatpush.bf16.msrb.mxu3 %v4827_v40  ;;  %v4812_v43 = vmul.f32 %v4807_v48, %v4805_v10 }
0x1f8c   :  { %v4819_v22 = vadd.f32 %v4814_v32, %v4812_v43  ;;  %v5692_v43 = vld [vmem:[%s7768_s18 + $0x8] sm:$0xff] }
0x1f8d   :  { %5581 = vmatmul.msk.bf16.vlgmr.msrb.gmra.mxu3 %vm156_vm1, %v4820_v7  ;;  %5080 = vmatpush.bf16.msra.mxu1 %v5692_v43 }
0x1f8e   :  { %v4821_v25 = vpack.c.bf16 %v4819_v22, %v4818_v36 }
0x1f91   :  { %v4835_v27 = vpop.permute.xlu1 %4834 }
0x1f92   :  { %v4836_v0 = vsel %vm156_vm1, %v4833_v63, %v4835_v27 }
0x1f9d   :  { %5582 = vmatmul.msk.bf16.gmra.mxu3 %vm156_vm1, %v4821_v25 }
0x1fa8   :  { %v4906_v24 = vpop.permute.xlu2 %4905 }
0x2010   :  { %v4853_v34 = vpop.f32.mrf.mxu3 }
0x2011   :  { %v4854_v18 = vadd.f32 %v4853_v34, %v4836_v0 }
0x2013   :  { %v4863_v17 = vmax.f32 %v4854_v18, 0.0  ;;  %v5045_v18 = vld [vmem:[%s7783_s27 + $0x2] sm:$0x3] }
0x2018   :  { %v4855_v60 = vpop.f32.mrf.mxu3 }
0x2019   :  { %v4856_v59 = vadd.f32 %v4855_v60, %v4836_v0 }
0x201b   :  { %v4864_v11 = vmax.f32 %v4856_v59, 0.0  ;;  %v5048_v59 = vperm.slane %v5045_v18, 1 }
0x201d   :  { %v4867_v14 = vpack.c.bf16 %v4864_v11, %v4863_v17  ;;  %v5047_v17 = vperm.slane %v5045_v18, 0 }
0x201f   :  { %5608 = vmatmul.msk.bf16.vlgmr.msrb.gmra.mxu0 %vm1483_vm4, %v4867_v14 }
0x2020   :  { %v4858_v13 = vpop.f32.mrf.mxu3 }
0x2021   :  { %v4859_v49 = vadd.f32 %v4858_v13, %v4836_v0 }
0x2023   :  { %v4865_v33 = vmax.f32 %v4859_v49, 0.0 }
0x2028   :  { %v4860_v45 = vpop.f32.mrf.mxu3 }
0x2029   :  { %v4861_v62 = vadd.f32 %v4860_v45, %v4836_v0 }
0x202b   :  { %v4866_v23 = vmax.f32 %v4861_v62, 0.0 }
0x202d   :  { %v4868_v9 = vpack.c.bf16 %v4866_v23, %v4865_v33 }
0x202f   :  { %5609 = vmatmul.msk.bf16.gmra.mxu0 %vm1483_vm4, %v4868_v9 }
0x209c   :  { %v4923_v37 = vpop.f32.mrf.mxu0 }
0x209d   :  { %v4924_v6 = vadd.f32 %v4923_v37, %v4906_v24 }
0x209f   :  { %v4933_v29 = vadd.f32 %v4924_v6, %v4816_v35 }
0x20a1   :  { %v4937_v58 = vsel %vm156_vm1, %v4933_v29, 0.0 }
0x20a2   :  { %4938 = vadd.xlane.f32.xlu0 %v4937_v58 }
0x20a4   :  { %v4925_v54 = vpop.f32.mrf.mxu0 }
0x20a5   :  { %v4926_v55 = vadd.f32 %v4925_v54, %v4906_v24 }
0x20a7   :  { %v4934_v8 = vadd.f32 %v4926_v55, %v4817_v28 }
0x20a9   :  { %v4940_v2 = vsel %vm156_vm1, %v4934_v8, 0.0 }
0x20aa   :  { %4941 = vadd.xlane.f32.xlu1 %v4940_v2 }
0x20ac   :  { %v4928_v47 = vpop.f32.mrf.mxu0 }
0x20ad   :  { %v4929_v16 = vadd.f32 %v4928_v47, %v4906_v24 }
0x20af   :  { %v4935_v15 = vadd.f32 %v4929_v16, %v4818_v36  ;;  %v5691_v36 = vld [vmem:[%s7768_s18] sm:$0xff]  ;;  %s6000_s18 = smov 24  }
0x20b0   :  { %5081 = vmatpush.bf16.msra.mxu1 %v5691_v36 }
0x20b1   :  { %v4943_v52 = vsel %vm156_vm1, %v4935_v15, 0.0 }
0x20b2   :  { %4944 = vadd.xlane.f32.xlu2 %v4943_v52 }
0x20b4   :  { %v4930_v51 = vpop.f32.mrf.mxu0 }
0x20b5   :  { %v4931_v30 = vadd.f32 %v4930_v51, %v4906_v24 }
0x20b7   :  { %v4936_v19 = vadd.f32 %v4931_v30, %v4819_v22 }
0x20b9   :  { %v4946_v44 = vsel %vm156_vm1, %v4936_v19, 0.0 }
0x20ba   :  { %4947 = vadd.xlane.f32.xlu0 %v4946_v44 }
0x2115   :  { %v4939_v1 = vpop.xlane.xlu0 %4938 }
0x2116   :  { %v4949_v4 = vmul.f32 %v4939_v1, %v6471_v5 }
0x2118   :  { %v7691_v12 = vsub.f32 %v4933_v29, %v4949_v4 }
0x211a   :  { %v4957_v20 = vmul.f32 %v7691_v12, %v7691_v12 }
0x211c   :  { %v4961_v57 = vsel %vm156_vm1, %v4957_v20, 0.0 }
0x211d   :  { %v4942_v48 = vpop.xlane.xlu1 %4941  ;;  %4962 = vadd.xlane.f32.xlu1 %v4961_v57 }
0x211e   :  { %v4950_v53 = vmul.f32 %v4942_v48, %v6471_v5 }
0x2120   :  { %v7697_v50 = vsub.f32 %v4934_v8, %v4950_v53 }
0x2122   :  { %v4958_v39 = vmul.f32 %v7697_v50, %v7697_v50 }
0x2124   :  { %v4964_v46 = vsel %vm156_vm1, %v4958_v39, 0.0 }
0x2125   :  { %v4945_v32 = vpop.xlane.xlu2 %4944  ;;  %4965 = vadd.xlane.f32.xlu2 %v4964_v46 }
0x2126   :  { %v4951_v28 = vmul.f32 %v4945_v32, %v6471_v5 }
0x2128   :  { %v7703_v56 = vsub.f32 %v4935_v15, %v4951_v28 }
0x212a   :  { %v4959_v35 = vmul.f32 %v7703_v56, %v7703_v56 }
0x212c   :  { %v4967_v40 = vsel %vm156_vm1, %v4959_v35, 0.0 }
0x212d   :  { %4968 = vadd.xlane.f32.xlu0 %v4967_v40  ;;  %v4948_v31 = vpop.xlane.xlu0 %4947 }
0x212e   :  { %v4952_v7 = vmul.f32 %v4948_v31, %v6471_v5 }
0x2130   :  { %v7709_v61 = vsub.f32 %v4936_v19, %v4952_v7 }
0x2132   :  { %v4960_v3 = vmul.f32 %v7709_v61, %v7709_v61 }
0x2134   :  { %v4970_v10 = vsel %vm156_vm1, %v4960_v3, 0.0 }
0x2135   :  { %4971 = vadd.xlane.f32.xlu1 %v4970_v10 }
0x213d   :  { %5025 = vrot.lane.b32.xlu2 %v7679_v26, %s5996_s19 }
0x2141   :  { %5032 = vrot.lane.b32.xlu0 %v7679_v26, %s5997_s22 }
0x2149   :  { %5063 = vrot.lane.b32.xlu0 %v5048_v59, %s6000_s18 }
0x214e   :  { %5061 = vrot.lane.b32.xlu1 %v5047_v17, %s6000_s18 }
0x2190   :  { %v4963_v42 = vpop.xlane.xlu1 %4962 }
0x2191   :  { %v4973_v38 = vmul.f32 %v4963_v42, %v6471_v5 }
0x2193   :  { %v4977_v22 = vadd.f32 1e-05, %v4973_v38 }
0x2195   :  { %5978 = vrsqrt.f32 %v4977_v22  ;;  %vm4987_vm7 = vweird.f32 %v4977_v22 }
0x2198   :  { %v4966_v25 = vpop.xlane.xlu2 %4965 }
0x2199   :  { %v4974_v41 = vmul.f32 %v4966_v25, %v6471_v5 }
0x219b   :  { %v5979_v21 = vpop.eup %5978  ;;  %v4978_v26 = vadd.f32 1e-05, %v4974_v41 }
0x219c   :  { %v4982_v34 = vmul.f32 %v5979_v21, %v4977_v22  ;;  %vm4988_vm4 = vweird.f32 %v5979_v21 }
0x219d   :  { %5980 = vrsqrt.f32 %v4978_v26  ;;  %vm4989_vm8 = vmor %vm4987_vm7, %vm4988_vm4  ;;  %vm4997_vm10 = vweird.f32 %v4978_v26 }
0x219e   :  { %v4983_v63 = vmul.f32 %v5979_v21, %v4982_v34 }
0x21a0   :  { %v4984_v27 = vmul.f32 0.5, %v4983_v63  ;;  %v4969_v0 = vpop.xlane.xlu0 %4968  ;;  %v5026_v16 = vpop.permute.xlu2 %5025 }
0x21a1   :  { %v4975_v60 = vmul.f32 %v4969_v0, %v6471_v5 }
0x21a2   :  { %v4985_v14 = vsub.f32 1.5, %v4984_v27 }
0x21a3   :  { %v5981_v11 = vpop.eup %5980  ;;  %v4979_v13 = vadd.f32 1e-05, %v4975_v60 }
0x21a4   :  { %v4992_v49 = vmul.f32 %v5981_v11, %v4978_v26  ;;  %v4986_v62 = vmul.f32 %v5979_v21, %v4985_v14  ;;  %vm4998_vm9 = vweird.f32 %v5981_v11 }
0x21a5   :  { %5982 = vrsqrt.f32 %v4979_v13  ;;  %vm4999_vm2 = vmor %vm4997_vm10, %vm4998_vm9  ;;  %vm5007_vm11 = vweird.f32 %v4979_v13 }
0x21a6   :  { %v4993_v45 = vmul.f32 %v5981_v11, %v4992_v49  ;;  %v4990_v6 = vsel %vm4989_vm8, %v5979_v21, %v4986_v62 }
0x21a7   :  { %v5021_v2 = vmul.f32 %v4990_v6, %v7691_v12 }
0x21a8   :  { %v4994_v33 = vmul.f32 0.5, %v4993_v45  ;;  %v4972_v23 = vpop.xlane.xlu1 %4971 }
0x21a9   :  { %v4976_v9 = vmul.f32 %v4972_v23, %v6471_v5  ;;  %v5028_v51 = vmul.f32 %v5026_v16, %v5021_v2 }
0x21aa   :  { %v4995_v24 = vsub.f32 1.5, %v4994_v33 }
0x21ab   :  { %v5983_v37 = vpop.eup %5982  ;;  %v4980_v29 = vadd.f32 1e-05, %v4976_v9 }
0x21ac   :  { %v4996_v58 = vmul.f32 %v5981_v11, %v4995_v24  ;;  %v5002_v54 = vmul.f32 %v5983_v37, %v4979_v13  ;;  %vm5008_vm3 = vweird.f32 %v5983_v37 }
0x21ad   :  { %5984 = vrsqrt.f32 %v4980_v29  ;;  %vm5009_vm12 = vmor %vm5007_vm11, %vm5008_vm3  ;;  %vm5017_vm14 = vweird.f32 %v4980_v29 }
0x21ae   :  { %v5003_v55 = vmul.f32 %v5983_v37, %v5002_v54  ;;  %v5000_v8 = vsel %vm4999_vm2, %v5981_v11, %v4996_v58 }
0x21af   :  { %v5022_v47 = vmul.f32 %v5000_v8, %v7697_v50 }
0x21b0   :  { %v5004_v15 = vmul.f32 0.5, %v5003_v55 }
0x21b1   :  { %v5029_v5 = vmul.f32 %v5026_v16, %v5022_v47 }
0x21b2   :  { %v5005_v52 = vsub.f32 1.5, %v5004_v15 }
0x21b3   :  { %v5985_v30 = vpop.eup %5984  ;;  %v5033_v19 = vpop.permute.xlu0 %5032 }
0x21b4   :  { %v5006_v44 = vmul.f32 %v5983_v37, %v5005_v52  ;;  %v5012_v1 = vmul.f32 %v5985_v30, %v4980_v29  ;;  %v5035_v4 = vadd.f32 %v5033_v19, %v5028_v51  ;;  %v5036_v20 = vadd.f32 %v5033_v19, %v5029_v5 }
0x21b5   :  { %vm5018_vm13 = vweird.f32 %v5985_v30 }
0x21b6   :  { %v5013_v57 = vmul.f32 %v5985_v30, %v5012_v1  ;;  %v5039_v48 = vpack.c.bf16 %v5036_v20, %v5035_v4  ;;  %v5010_v53 = vsel %vm5009_vm12, %v5983_v37, %v5006_v44  ;;  %vm5019_vm15 = vmor %vm5017_vm14, %vm5018_vm13 }
0x21b7   :  { %v5023_v39 = vmul.f32 %v5010_v53, %v7703_v56 }
0x21b8   :  { %v5014_v12 = vmul.f32 0.5, %v5013_v57  ;;  %5618 = vmatmul.msk.bf16.vlgmr.msra.gmra.mxu1 %vm156_vm1, %v5039_v48 }
0x21b9   :  { %v5030_v28 = vmul.f32 %v5026_v16, %v5023_v39 }
0x21ba   :  { %v5015_v50 = vsub.f32 1.5, %v5014_v12 }
0x21bb   :  { %v5037_v31 = vadd.f32 %v5033_v19, %v5030_v28  ;;  %v5064_v42 = vpop.permute.xlu0 %5063 }
0x21bc   :  { %v5016_v46 = vmul.f32 %v5985_v30, %v5015_v50 }
0x21be   :  { %v5020_v32 = vsel %vm5019_vm15, %v5985_v30, %v5016_v46 }
0x21bf   :  { %v5024_v35 = vmul.f32 %v5020_v32, %v7709_v61 }
0x21c0   :  { %v5062_v10 = vpop.permute.xlu1 %5061 }
0x21c1   :  { %v5031_v40 = vmul.f32 %v5026_v16, %v5024_v35  ;;  %v5066_v43 = vsel %vm5065_vm0, %v5062_v10, %v5064_v42 }
0x21c3   :  { %v5038_v7 = vadd.f32 %v5033_v19, %v5031_v40 }
0x21c5   :  { %v5040_v3 = vpack.c.bf16 %v5038_v7, %v5037_v31 }
0x21c8   :  { %5619 = vmatmul.msk.bf16.gmra.mxu1 %vm156_vm1, %v5040_v3 }
0x2235   :  { %v5083_v38 = vpop.f32.mrf.mxu1 }
0x2236   :  { %v5084_v22 = vadd.f32 %v5083_v38, %v5066_v43 }
0x2238   :  { %5093 = vst [vmem:[%s7769_s20] sm:$0xff] %v5084_v22 }
0x223d   :  { %v5085_v56 = vpop.f32.mrf.mxu1 }
0x223e   :  { %v5086_v36 = vadd.f32 %v5085_v56, %v5066_v43 }
0x2240   :  { %5094 = vst [vmem:[%s7769_s20 + $0x8] sm:$0xff] %v5086_v36 }
0x2245   :  { %v5088_v61 = vpop.f32.mrf.mxu1 }
0x2246   :  { %v5089_v25 = vadd.f32 %v5088_v61, %v5066_v43 }
0x2248   :  { %5095 = vst [vmem:[%s7769_s20 + $0x10] sm:$0xff] %v5089_v25 }
0x224d   :  { %v5090_v41 = vpop.f32.mrf.mxu1 }
0x224e   :  { %v5091_v21 = vadd.f32 %v5090_v41, %v5066_v43 }
0x2250   :  { %5096 = vst [vmem:[%s7769_s20 + $0x18] sm:$0xff] %v5091_v21 }

</bundles_post_ra>
